<compile_context>
chip_gen: v6e
topology: v6e:2x2x1
jax: 0.10.0
libtpu: 0.0.40
codegen_flags: <defaults>
</compile_context>

<pallas_src>
import functools

import jax
import jax.numpy as jnp
from jax.experimental import pallas as pl
from jax.experimental.pallas import tpu as pltpu


# ----------------------------------------------------------------------------------
# Fused kernel: q/v/key projections + pos-MLP + attn-MLP + softmax + aggregation
#               + linear_end + residual, all inside one grid step.
# ----------------------------------------------------------------------------------
def _attn_kernel(x_ref, g_ref,
                 wq_ref, bq_ref, wv_ref, bv_ref, wk_ref, bk_ref,
                 pw1_ref, pb1_ref, pw2_ref, pb2_ref,
                 aw1_ref, ab1_ref, aw2_ref, ab2_ref,
                 we_ref, be_ref, o_ref):
    f32 = jnp.float32
    bf16 = jnp.bfloat16

    x_ct = x_ref[0]                         # (Cin, T) f32: residual + q/v source
    g = g_ref[0]                            # (T, K, Cg) bf16: [x_j | pos_i - pos_j | 0]
    T, K, Cg = g.shape
    D = wq_ref.shape[1]

    # q / v projections from the centre features (linear_start folded into the weights).
    xt = x_ct.T.astype(bf16)                                                    # (T, Cin)
    q = jnp.dot(xt, wq_ref[...], preferred_element_type=f32) + bq_ref[...]      # (T, D)
    v = jnp.dot(xt, wv_ref[...], preferred_element_type=f32) + bv_ref[...]      # (T, D)

    # key projection of the *gathered raw features*: zero weight rows for the pos/pad
    # channels make this identical to gathering the projected key.
    g2 = g.reshape(T * K, Cg)
    kg = jnp.dot(g2, wk_ref[...], preferred_element_type=f32) + bk_ref[...]     # (T*K, D)

    # pos_mlp: Conv2d(3->H) [BN folded] -> ReLU -> Conv2d(H->D); the first layer only
    # sees the pos_rel channels (zero weight rows for the feature/pad channels).
    h = jnp.dot(g2, pw1_ref[...], preferred_element_type=f32) + pb1_ref[...]    # (T*K, H)
    h = jnp.maximum(h, 0.0).astype(bf16)
    pe = jnp.dot(h, pw2_ref[...], preferred_element_type=f32) + pb2_ref[...]    # (T*K, D)
    pe = pe.reshape(T, K, D)

    # attn_mlp on (query_i - key_ij + pos_embedding_ij); BN folded into w1/b1.
    a_in = (q[:, None, :] - kg.reshape(T, K, D) + pe).reshape(T * K, D).astype(bf16)
    a = jnp.dot(a_in, aw1_ref[...], preferred_element_type=f32) + ab1_ref[...]  # (T*K, A)
    a = jnp.maximum(a, 0.0).astype(bf16)
    attn = jnp.dot(a, aw2_ref[...], preferred_element_type=f32) + ab2_ref[...]  # (T*K, D)
    attn = attn.reshape(T, K, D)

    # softmax over the neighbour axis (== torch.softmax(attention, dim=-1)), f32 math.
    attn = jnp.exp(attn - jnp.max(attn, axis=1, keepdims=True))
    attn = attn * pl.reciprocal(jnp.sum(attn, axis=1, keepdims=True), approx=True)

    # value_ij = value_i + pos_embedding_ij ; aggregate over neighbours.
    agg = jnp.sum(attn * (v[:, None, :] + pe), axis=1)                          # (T, D)

    # linear_end + residual, emitted in (Cin, T) layout -> lane-dense store over points.
    y = jnp.dot(agg.astype(bf16), we_ref[...], preferred_element_type=f32) + be_ref[...]
    o_ref[0] = (y.T + x_ct).astype(o_ref.dtype)


def attention_block(x, g, wts, tile_n, vmem_limit_bytes):
    B, Cin, N = x.shape
    K, Cg = g.shape[2], g.shape[3]
    D = wts["wq"].shape[1]
    H = wts["pos_w1"].shape[1]
    A = wts["attn_w1"].shape[1]
    grid = (B, N // tile_n)

    def const(shape):
        return pl.BlockSpec(shape, lambda bi, ti: (0,) * len(shape))

    in_specs = [
        pl.BlockSpec((1, Cin, tile_n), lambda bi, ti: (bi, 0, ti)),      # x tile (residual)
        pl.BlockSpec((1, tile_n, K, Cg), lambda bi, ti: (bi, ti, 0, 0)), # packed gather
        const((Cin, D)), const((1, D)),     # wq', bq'
        const((Cin, D)), const((1, D)),     # wv', bv'
        const((Cg, D)), const((1, D)),      # wk' (packed rows), bk'
        const((Cg, H)), const((1, H)),      # pos w1' (packed rows, BN folded), b1'
        const((H, D)), const((1, D)),       # pos w2, b2
        const((D, A)), const((1, A)),       # attn w1' (BN folded), b1'
        const((A, D)), const((1, D)),       # attn w2, b2
        const((D, Cin)), const((1, Cin)),   # w_end, b_end
    ]
    return pl.pallas_call(
        _attn_kernel,
        out_shape=jax.ShapeDtypeStruct((B, Cin, N), x.dtype),
        grid_spec=pltpu.PrefetchScalarGridSpec(
            num_scalar_prefetch=0,
            grid=grid,
            in_specs=in_specs,
            out_specs=pl.BlockSpec((1, Cin, tile_n), lambda bi, ti: (bi, 0, ti)),
        ),
        compiler_params=pltpu.CompilerParams(
            dimension_semantics=("parallel", "parallel"),
            vmem_limit_bytes=vmem_limit_bytes),
    )(x, g,
      wts["wq"], wts["bq"], wts["wv"], wts["bv"], wts["wk"], wts["bk"],
      wts["pos_w1"], wts["pos_b1"], wts["pos_w2"], wts["pos_b2"],
      wts["attn_w1"], wts["attn_b1"], wts["attn_w2"], wts["attn_b2"],
      wts["w_end"], wts["b_end"])


# ----------------------------------------------------------------------------------
# k-NN + grouping (plain JAX glue).
# ----------------------------------------------------------------------------------
def square_distance(src, dst):
    dist = -2.0 * jnp.matmul(src, jnp.swapaxes(dst, 1, 2))
    dist = dist + jnp.sum(src ** 2, axis=-1)[:, :, None]
    dist = dist + jnp.sum(dst ** 2, axis=-1)[:, None, :]
    return dist


def query_knn(nsample, xyz, new_xyz):
    # TODO(synk): top-k selection stays in XLA (no clean Pallas sort); tie ordering may
    # differ from torch.argsort for coincident points.
    sqr = square_distance(new_xyz, xyz)
    _, idx = jax.lax.top_k(-sqr, nsample)
    return idx.astype(jnp.int32)


def group(feat_last, idx):
    # feat_last: (B, N, C), idx: (B, N, K) -> (B, N, K, C)
    # TODO(synk): the neighbour gather stays in XLA — a general data-dependent gather
    # from VMEM has no reliable Pallas/Mosaic lowering at these shapes.
    return jax.vmap(lambda f, i: f[i])(feat_last, idx)


def packed_channels(in_channel):
    cg = in_channel + 3
    return cg + (cg % 2)          # keep the packed width even (one ~free zero channel)


# ----------------------------------------------------------------------------------
# Generation-aware VMEM budgeting + tile selection.
# ----------------------------------------------------------------------------------
def tpu_vmem_capacity_bytes():
    try:
        return int(pltpu.get_tpu_info().vmem_capacity_bytes)
    except Exception:
        return 64 << 20           # conservative fallback (v7x physical per-core VMEM)


def choose_vmem_limit_bytes(physical_bytes):
    if physical_bytes >= (96 << 20):   # v5e / v6e: 128 MiB physical -> raise the scope
        return 72 << 20
    return 44 << 20                    # v7x: 64 MiB physical -> cap below physical


def choose_tile_n(batch, n_points, n_knn, cg, in_ch, dim, pos_hidden, attn_hidden,
                  vmem_limit_bytes):
    def rup(a, m):
        return -(-a // m) * m

    def tile_bytes(rows, cols, itemsize):
        sub = 16 if itemsize == 2 else 8        # bf16 packs 16 sublanes per vreg
        return rup(rows, sub) * rup(cols, 128) * itemsize

    def vmem_needed(t):
        # double-buffered pipeline blocks (the packed gather dominates)
        blocks = 2 * (t * tile_bytes(n_knn, cg, 2)       # packed gather (bf16)
                      + tile_bytes(in_ch, t, 4)          # x tile (f32)
                      + tile_bytes(in_ch, t, 4))         # output tile (f32)
        # live f32 intermediates inside one grid step, counted with lane padding.
        rows = t * n_knn
        inter = (tile_bytes(rows, attn_hidden, 4)        # attn-MLP hidden
                 + 5 * tile_bytes(rows, dim, 4)          # kg, pe, qk_rel/a_in, attn, val
                 + tile_bytes(rows, pos_hidden, 4))      # h
        return int(1.3 * (blocks + inter)) + (2 << 20)   # headroom + weights/scratch

    legal = sorted(set([t for t in range(128, n_points, 128) if n_points % t == 0]
                       + [n_points]))
    fitting = [t for t in legal if vmem_needed(t) <= vmem_limit_bytes]
    t = max(fitting) if fitting else legal[0]

    # v7x megacore: make sure the grid has >= 2 programs so both TensorCores get work.
    while batch * (n_points // t) < 2:
        smaller = [s for s in legal if s < t]
        if not smaller:
            break
        t = max(smaller)
    return t


# ----------------------------------------------------------------------------------
# Full forward.
# ----------------------------------------------------------------------------------
def transformer_forward(params, x, pos, *, n_knn, tile_n, vmem_limit_bytes):
    """x: (B, in_channel, n), pos: (B, 3, n)  (PyTorch layout) -> (B, in_channel, n)."""
    eps = 1e-5
    f32, bf16 = jnp.float32, jnp.bfloat16
    B, Cin, N = x.shape
    cg = packed_channels(Cin)

    x_l = jnp.transpose(x, (0, 2, 1))                     # (B, n, Cin)
    pos_l = jnp.transpose(pos, (0, 2, 1))                 # (B, n, 3)

    # ---- kNN + ONE packed gather of raw features + relative positions (bf16) --------
    idx = query_knn(n_knn, pos_l, pos_l)                  # (B, n, K)
    xg = group(x_l, idx)                                  # (B, n, K, Cin)
    pos_rel = pos_l[:, :, None, :] - group(pos_l, idx)    # (B, n, K, 3), f32
    g = jnp.concatenate([xg, pos_rel], axis=-1)           # (B, n, K, Cin+3)
    if cg != Cin + 3:
        g = jnp.pad(g, ((0, 0), (0, 0), (0, 0), (0, cg - (Cin + 3))))
    g = g.astype(bf16)                                    # (B, n, K, cg)

    # ---- wrapper-side (free) weight folding: linear_start + eval-mode BatchNorm ------
    ws, bs = params["w_start"], params["b_start"]
    wq = (ws @ params["w_query"]).astype(bf16)
    bq = bs @ params["w_query"] + params["b_query"]
    wv = (ws @ params["w_value"]).astype(bf16)
    bv = bs @ params["w_value"] + params["b_value"]
    wk_x = ws @ params["w_key"]                           # (Cin, D)
    bk = bs @ params["w_key"] + params["b_key"]
    D = wk_x.shape[1]
    wk = jnp.zeros((cg, D), f32).at[:Cin, :].set(wk_x).astype(bf16)

    # TODO(synk): BatchNorm reproduced in eval mode only (running stats folded into the
    # preceding conv weights); training-mode batch statistics are not implemented.
    psc = params["pos_gamma1"] / jnp.sqrt(params["pos_var1"] + eps)
    psh = params["pos_beta1"] - params["pos_mean1"] * psc
    pw1_rel = params["pos_w1"] * psc                      # (3, H), BN folded
    H = pw1_rel.shape[1]
    pw1 = jnp.zeros((cg, H), f32).at[Cin:Cin + 3, :].set(pw1_rel).astype(bf16)
    pb1 = params["pos_b1"] * psc + psh

    asc = params["attn_gamma1"] / jnp.sqrt(params["attn_var1"] + eps)
    ash = params["attn_beta1"] - params["attn_mean1"] * asc
    aw1 = (params["attn_w1"] * asc).astype(bf16)
    ab1 = params["attn_b1"] * asc + ash

    wts = dict(
        wq=wq, bq=bq, wv=wv, bv=bv, wk=wk, bk=bk,
        pos_w1=pw1, pos_b1=pb1,
        pos_w2=params["pos_w2"].astype(bf16), pos_b2=params["pos_b2"],
        attn_w1=aw1, attn_b1=ab1,
        attn_w2=params["attn_w2"].astype(bf16), attn_b2=params["attn_b2"],
        w_end=params["w_end"].astype(bf16), b_end=params["b_end"],
    )
    return attention_block(x, g, wts, tile_n, vmem_limit_bytes)   # (B, in_channel, n)


# ----------------------------------------------------------------------------------
# Pure-JAX f32 reference (unfused) for correctness checking.
# ----------------------------------------------------------------------------------
def reference_forward(params, x, pos, *, n_knn):
    x_l = jnp.transpose(x, (0, 2, 1))
    pos_l = jnp.transpose(pos, (0, 2, 1))
    identity = x_l
    eps = 1e-5
    feat = x_l @ params["w_start"] + params["b_start"]
    idx = query_knn(n_knn, pos_l, pos_l)
    key = feat @ params["w_key"] + params["b_key"]
    query = feat @ params["w_query"] + params["b_query"]
    value = feat @ params["w_value"] + params["b_value"]
    key_g = group(key, idx)
    pos_rel = pos_l[:, :, None, :] - group(pos_l, idx)
    ps = params["pos_gamma1"] / jnp.sqrt(params["pos_var1"] + eps)
    psh = params["pos_beta1"] - params["pos_mean1"] * ps
    h = pos_rel @ params["pos_w1"] + params["pos_b1"]
    h = jnp.maximum(h * ps + psh, 0.0)
    pe = h @ params["pos_w2"] + params["pos_b2"]
    asc = params["attn_gamma1"] / jnp.sqrt(params["attn_var1"] + eps)
    ash = params["attn_beta1"] - params["attn_mean1"] * asc
    a = (query[:, :, None, :] - key_g + pe) @ params["attn_w1"] + params["attn_b1"]
    a = jnp.maximum(a * asc + ash, 0.0)
    attn = a @ params["attn_w2"] + params["attn_b2"]
    attn = jax.nn.softmax(attn, axis=2)
    val = value[:, :, None, :] + pe
    agg = jnp.sum(attn * val, axis=2)
    y = agg @ params["w_end"] + params["b_end"]
    return jnp.transpose(y + identity, (0, 2, 1))


# ----------------------------------------------------------------------------------
# Deterministic parameter init.
# ----------------------------------------------------------------------------------
def init_params(key, in_channel, dim, pos_hidden, attn_hidden):
    ks = jax.random.split(key, 22)

    def nrm(k, shape, scale=0.1):
        return scale * jax.random.normal(k, shape, dtype=jnp.float32)

    return {
        "w_start": nrm(ks[0], (in_channel, dim)),
        "b_start": nrm(ks[1], (1, dim), 0.02),
        "w_key": nrm(ks[2], (dim, dim)),
        "b_key": nrm(ks[3], (1, dim), 0.02),
        "w_query": nrm(ks[4], (dim, dim)),
        "b_query": nrm(ks[5], (1, dim), 0.02),
        "w_value": nrm(ks[6], (dim, dim)),
        "b_value": nrm(ks[7], (1, dim), 0.02),
        "pos_w1": nrm(ks[8], (3, pos_hidden)),
        "pos_b1": nrm(ks[9], (1, pos_hidden), 0.02),
        "pos_gamma1": 1.0 + nrm(ks[10], (1, pos_hidden), 0.05),
        "pos_beta1": nrm(ks[11], (1, pos_hidden), 0.02),
        "pos_mean1": jnp.zeros((1, pos_hidden), jnp.float32),
        "pos_var1": jnp.ones((1, pos_hidden), jnp.float32),
        "pos_w2": nrm(ks[12], (pos_hidden, dim)),
        "pos_b2": nrm(ks[13], (1, dim), 0.02),
        "attn_w1": nrm(ks[14], (dim, attn_hidden)),
        "attn_b1": nrm(ks[15], (1, attn_hidden), 0.02),
        "attn_gamma1": 1.0 + nrm(ks[16], (1, attn_hidden), 0.05),
        "attn_beta1": nrm(ks[17], (1, attn_hidden), 0.02),
        "attn_mean1": jnp.zeros((1, attn_hidden), jnp.float32),
        "attn_var1": jnp.ones((1, attn_hidden), jnp.float32),
        "attn_w2": nrm(ks[18], (attn_hidden, dim)),
        "attn_b2": nrm(ks[19], (1, dim), 0.02),
        "w_end": nrm(ks[20], (dim, in_channel)),
        "b_end": nrm(ks[21], (1, in_channel), 0.02),
    }


if __name__ == "__main__":
    # Small shapes consistent with the module's forward.
    B, in_channel, n = 2, 16, 64
    dim, n_knn, pos_hidden, attn_mult = 64, 8, 32, 4
    attn_hidden = dim * attn_mult

    key = jax.random.PRNGKey(0)
    kp, kx, kpos = jax.random.split(key, 3)
    params = init_params(kp, in_channel, dim, pos_hidden, attn_hidden)
    x = jax.random.normal(kx, (B, in_channel, n), dtype=jnp.float32)
    pos = jax.random.normal(kpos, (B, 3, n), dtype=jnp.float32)

    vmem_limit = choose_vmem_limit_bytes(tpu_vmem_capacity_bytes())
    tile_n = choose_tile_n(B, n, n_knn, packed_channels(in_channel), in_channel,
                           dim, pos_hidden, attn_hidden, vmem_limit)

    fwd = jax.jit(functools.partial(transformer_forward, n_knn=n_knn, tile_n=tile_n,
                                    vmem_limit_bytes=vmem_limit))
    out = jax.block_until_ready(fwd(params, x, pos))

    ref = reference_forward(params, x, pos, n_knn=n_knn)
    assert out.shape == (B, in_channel, n), out.shape
    max_err = float(jnp.max(jnp.abs(out - ref)))
    # Tolerance covers bf16 feature/weight/activation quantisation on the MXU path and
    # the approx-EUP softmax reciprocal vs the full-f32 reference (residual is exact).
    assert jnp.allclose(out, ref, atol=4e-2, rtol=4e-2), max_err
    print("KERNEL_OK")
</pallas_src>

<mosaic_0001>
module attributes {stable_mosaic.version = 11 : i64} {
  func.func @_attn_kernel(%arg0: i32, %arg1: i32, %arg2: memref<1x16x64xf32, #tpu.memory_space<vmem>>, %arg3: memref<1x64x8x20xbf16, #tpu.memory_space<vmem>>, %arg4: memref<16x64xbf16, #tpu.memory_space<vmem>>, %arg5: memref<1x64xf32, #tpu.memory_space<vmem>>, %arg6: memref<16x64xbf16, #tpu.memory_space<vmem>>, %arg7: memref<1x64xf32, #tpu.memory_space<vmem>>, %arg8: memref<20x64xbf16, #tpu.memory_space<vmem>>, %arg9: memref<1x64xf32, #tpu.memory_space<vmem>>, %arg10: memref<20x32xbf16, #tpu.memory_space<vmem>>, %arg11: memref<1x32xf32, #tpu.memory_space<vmem>>, %arg12: memref<32x64xbf16, #tpu.memory_space<vmem>>, %arg13: memref<1x64xf32, #tpu.memory_space<vmem>>, %arg14: memref<64x256xbf16, #tpu.memory_space<vmem>>, %arg15: memref<1x256xf32, #tpu.memory_space<vmem>>, %arg16: memref<256x64xbf16, #tpu.memory_space<vmem>>, %arg17: memref<1x64xf32, #tpu.memory_space<vmem>>, %arg18: memref<64x16xbf16, #tpu.memory_space<vmem>>, %arg19: memref<1x16xf32, #tpu.memory_space<vmem>>, %arg20: memref<1x16x64xf32, #tpu.memory_space<vmem>>) attributes {dimension_semantics = [#tpu.dimension_semantics<parallel>, #tpu.dimension_semantics<parallel>], iteration_bounds = array<i64: 2, 1>, scalar_prefetch = 0 : i64, scratch_operands = 0 : i64, tpu.core_type = #tpu.core_type<tc>, window_params = [{transform_indices = @transform_0, window_bounds = array<i64: 1, 16, 64>}, {transform_indices = @transform_1, window_bounds = array<i64: 1, 64, 8, 20>}, {pipeline_mode = #tpu.pipeline_mode<synchronous>, transform_indices = @transform_2, window_bounds = array<i64: 16, 64>}, {pipeline_mode = #tpu.pipeline_mode<synchronous>, transform_indices = @transform_3, window_bounds = array<i64: 1, 64>}, {pipeline_mode = #tpu.pipeline_mode<synchronous>, transform_indices = @transform_4, window_bounds = array<i64: 16, 64>}, {pipeline_mode = #tpu.pipeline_mode<synchronous>, transform_indices = @transform_5, window_bounds = array<i64: 1, 64>}, {pipeline_mode = #tpu.pipeline_mode<synchronous>, transform_indices = @transform_6, window_bounds = array<i64: 20, 64>}, {pipeline_mode = #tpu.pipeline_mode<synchronous>, transform_indices = @transform_7, window_bounds = array<i64: 1, 64>}, {pipeline_mode = #tpu.pipeline_mode<synchronous>, transform_indices = @transform_8, window_bounds = array<i64: 20, 32>}, {pipeline_mode = #tpu.pipeline_mode<synchronous>, transform_indices = @transform_9, window_bounds = array<i64: 1, 32>}, {pipeline_mode = #tpu.pipeline_mode<synchronous>, transform_indices = @transform_10, window_bounds = array<i64: 32, 64>}, {pipeline_mode = #tpu.pipeline_mode<synchronous>, transform_indices = @transform_11, window_bounds = array<i64: 1, 64>}, {pipeline_mode = #tpu.pipeline_mode<synchronous>, transform_indices = @transform_12, window_bounds = array<i64: 64, 256>}, {pipeline_mode = #tpu.pipeline_mode<synchronous>, transform_indices = @transform_13, window_bounds = array<i64: 1, 256>}, {pipeline_mode = #tpu.pipeline_mode<synchronous>, transform_indices = @transform_14, window_bounds = array<i64: 256, 64>}, {pipeline_mode = #tpu.pipeline_mode<synchronous>, transform_indices = @transform_15, window_bounds = array<i64: 1, 64>}, {pipeline_mode = #tpu.pipeline_mode<synchronous>, transform_indices = @transform_16, window_bounds = array<i64: 64, 16>}, {pipeline_mode = #tpu.pipeline_mode<synchronous>, transform_indices = @transform_17, window_bounds = array<i64: 1, 16>}, {transform_indices = @transform_18, window_bounds = array<i64: 1, 16, 64>}]} {
    %c0 = arith.constant 0 : index
    %c0_0 = arith.constant 0 : index
    %c0_1 = arith.constant 0 : index
    %0 = vector.load %arg2[%c0, %c0_0, %c0_1] : memref<1x16x64xf32, #tpu.memory_space<vmem>>, vector<1x16x64xf32>
    %1 = vector.shape_cast %0 : vector<1x16x64xf32> to vector<16x64xf32>
    %c0_2 = arith.constant 0 : index
    %c0_3 = arith.constant 0 : index
    %c0_4 = arith.constant 0 : index
    %c0_5 = arith.constant 0 : index
    %2 = vector.load %arg3[%c0_2, %c0_3, %c0_4, %c0_5] : memref<1x64x8x20xbf16, #tpu.memory_space<vmem>>, vector<1x64x8x20xbf16>
    %3 = vector.shape_cast %2 : vector<1x64x8x20xbf16> to vector<64x8x20xbf16>
    %4 = tpu.transpose %1, [1, 0] : vector<16x64xf32> -> vector<64x16xf32>
    %5 = arith.truncf %4 : vector<64x16xf32> to vector<64x16xbf16>
    %c0_6 = arith.constant 0 : index
    %c0_7 = arith.constant 0 : index
    %6 = vector.load %arg4[%c0_6, %c0_7] : memref<16x64xbf16, #tpu.memory_space<vmem>>, vector<16x64xbf16>
    %cst = arith.constant dense<0.000000e+00> : vector<64x64xf32>
    %7 = tpu.matmul %5, %6, %cst {dimension_numbers = #tpu.dot_dimension_numbers<[1], [0], [0], [1], [0, 0, 1, 1], [], []>} : vector<64x16xbf16>, vector<16x64xbf16>, vector<64x64xf32> -> vector<64x64xf32>
    %c0_8 = arith.constant 0 : index
    %c0_9 = arith.constant 0 : index
    %8 = vector.load %arg5[%c0_8, %c0_9] : memref<1x64xf32, #tpu.memory_space<vmem>>, vector<1x64xf32>
    %9 = vector.broadcast %8 : vector<1x64xf32> to vector<64x64xf32>
    %10 = arith.addf %7, %9 : vector<64x64xf32>
    %c0_10 = arith.constant 0 : index
    %c0_11 = arith.constant 0 : index
    %11 = vector.load %arg6[%c0_10, %c0_11] : memref<16x64xbf16, #tpu.memory_space<vmem>>, vector<16x64xbf16>
    %cst_12 = arith.constant dense<0.000000e+00> : vector<64x64xf32>
    %12 = tpu.matmul %5, %11, %cst_12 {dimension_numbers = #tpu.dot_dimension_numbers<[1], [0], [0], [1], [0, 0, 1, 1], [], []>} : vector<64x16xbf16>, vector<16x64xbf16>, vector<64x64xf32> -> vector<64x64xf32>
    %c0_13 = arith.constant 0 : index
    %c0_14 = arith.constant 0 : index
    %13 = vector.load %arg7[%c0_13, %c0_14] : memref<1x64xf32, #tpu.memory_space<vmem>>, vector<1x64xf32>
    %14 = vector.broadcast %13 : vector<1x64xf32> to vector<64x64xf32>
    %15 = arith.addf %12, %14 : vector<64x64xf32>
    %16 = vector.shape_cast %3 : vector<64x8x20xbf16> to vector<512x20xbf16>
    %c0_15 = arith.constant 0 : index
    %c0_16 = arith.constant 0 : index
    %17 = vector.load %arg8[%c0_15, %c0_16] : memref<20x64xbf16, #tpu.memory_space<vmem>>, vector<20x64xbf16>
    %cst_17 = arith.constant dense<0.000000e+00> : vector<512x64xf32>
    %18 = tpu.matmul %16, %17, %cst_17 {dimension_numbers = #tpu.dot_dimension_numbers<[1], [0], [0], [1], [0, 0, 1, 1], [], []>} : vector<512x20xbf16>, vector<20x64xbf16>, vector<512x64xf32> -> vector<512x64xf32>
    %c0_18 = arith.constant 0 : index
    %c0_19 = arith.constant 0 : index
    %19 = vector.load %arg9[%c0_18, %c0_19] : memref<1x64xf32, #tpu.memory_space<vmem>>, vector<1x64xf32>
    %20 = vector.broadcast %19 : vector<1x64xf32> to vector<512x64xf32>
    %21 = arith.addf %18, %20 : vector<512x64xf32>
    %c0_20 = arith.constant 0 : index
    %c0_21 = arith.constant 0 : index
    %22 = vector.load %arg10[%c0_20, %c0_21] : memref<20x32xbf16, #tpu.memory_space<vmem>>, vector<20x32xbf16>
    %cst_22 = arith.constant dense<0.000000e+00> : vector<512x32xf32>
    %23 = tpu.matmul %16, %22, %cst_22 {dimension_numbers = #tpu.dot_dimension_numbers<[1], [0], [0], [1], [0, 0, 1, 1], [], []>} : vector<512x20xbf16>, vector<20x32xbf16>, vector<512x32xf32> -> vector<512x32xf32>
    %c0_23 = arith.constant 0 : index
    %c0_24 = arith.constant 0 : index
    %24 = vector.load %arg11[%c0_23, %c0_24] : memref<1x32xf32, #tpu.memory_space<vmem>>, vector<1x32xf32>
    %25 = vector.broadcast %24 : vector<1x32xf32> to vector<512x32xf32>
    %26 = arith.addf %23, %25 : vector<512x32xf32>
    %cst_25 = arith.constant 0.000000e+00 : f32
    %27 = vector.broadcast %cst_25 : f32 to vector<512x32xf32>
    %28 = arith.maximumf %26, %27 : vector<512x32xf32>
    %29 = arith.truncf %28 : vector<512x32xf32> to vector<512x32xbf16>
    %c0_26 = arith.constant 0 : index
    %c0_27 = arith.constant 0 : index
    %30 = vector.load %arg12[%c0_26, %c0_27] : memref<32x64xbf16, #tpu.memory_space<vmem>>, vector<32x64xbf16>
    %cst_28 = arith.constant dense<0.000000e+00> : vector<512x64xf32>
    %31 = tpu.matmul %29, %30, %cst_28 {dimension_numbers = #tpu.dot_dimension_numbers<[1], [0], [0], [1], [0, 0, 1, 1], [], []>} : vector<512x32xbf16>, vector<32x64xbf16>, vector<512x64xf32> -> vector<512x64xf32>
    %c0_29 = arith.constant 0 : index
    %c0_30 = arith.constant 0 : index
    %32 = vector.load %arg13[%c0_29, %c0_30] : memref<1x64xf32, #tpu.memory_space<vmem>>, vector<1x64xf32>
    %33 = vector.broadcast %32 : vector<1x64xf32> to vector<512x64xf32>
    %34 = arith.addf %31, %33 : vector<512x64xf32>
    %35 = vector.shape_cast %34 : vector<512x64xf32> to vector<64x8x64xf32>
    %36 = vector.shape_cast %10 : vector<64x64xf32> to vector<64x1x64xf32>
    %37 = vector.shape_cast %21 : vector<512x64xf32> to vector<64x8x64xf32>
    %38 = vector.broadcast %36 : vector<64x1x64xf32> to vector<64x8x64xf32>
    %39 = arith.subf %38, %37 : vector<64x8x64xf32>
    %40 = arith.addf %39, %35 : vector<64x8x64xf32>
    %41 = vector.shape_cast %40 : vector<64x8x64xf32> to vector<512x64xf32>
    %42 = arith.truncf %41 : vector<512x64xf32> to vector<512x64xbf16>
    %c0_31 = arith.constant 0 : index
    %c0_32 = arith.constant 0 : index
    %43 = vector.load %arg14[%c0_31, %c0_32] : memref<64x256xbf16, #tpu.memory_space<vmem>>, vector<64x256xbf16>
    %cst_33 = arith.constant dense<0.000000e+00> : vector<512x256xf32>
    %44 = tpu.matmul %42, %43, %cst_33 {dimension_numbers = #tpu.dot_dimension_numbers<[1], [0], [0], [1], [0, 0, 1, 1], [], []>} : vector<512x64xbf16>, vector<64x256xbf16>, vector<512x256xf32> -> vector<512x256xf32>
    %c0_34 = arith.constant 0 : index
    %c0_35 = arith.constant 0 : index
    %45 = vector.load %arg15[%c0_34, %c0_35] : memref<1x256xf32, #tpu.memory_space<vmem>>, vector<1x256xf32>
    %46 = vector.broadcast %45 : vector<1x256xf32> to vector<512x256xf32>
    %47 = arith.addf %44, %46 : vector<512x256xf32>
    %cst_36 = arith.constant 0.000000e+00 : f32
    %48 = vector.broadcast %cst_36 : f32 to vector<512x256xf32>
    %49 = arith.maximumf %47, %48 : vector<512x256xf32>
    %50 = arith.truncf %49 : vector<512x256xf32> to vector<512x256xbf16>
    %c0_37 = arith.constant 0 : index
    %c0_38 = arith.constant 0 : index
    %51 = vector.load %arg16[%c0_37, %c0_38] : memref<256x64xbf16, #tpu.memory_space<vmem>>, vector<256x64xbf16>
    %cst_39 = arith.constant dense<0.000000e+00> : vector<512x64xf32>
    %52 = tpu.matmul %50, %51, %cst_39 {dimension_numbers = #tpu.dot_dimension_numbers<[1], [0], [0], [1], [0, 0, 1, 1], [], []>} : vector<512x256xbf16>, vector<256x64xbf16>, vector<512x64xf32> -> vector<512x64xf32>
    %c0_40 = arith.constant 0 : index
    %c0_41 = arith.constant 0 : index
    %53 = vector.load %arg17[%c0_40, %c0_41] : memref<1x64xf32, #tpu.memory_space<vmem>>, vector<1x64xf32>
    %54 = vector.broadcast %53 : vector<1x64xf32> to vector<512x64xf32>
    %55 = arith.addf %52, %54 : vector<512x64xf32>
    %56 = vector.shape_cast %55 : vector<512x64xf32> to vector<64x8x64xf32>
    %cst_42 = arith.constant dense<0xFF800000> : vector<64x64xf32>
    %57 = vector.multi_reduction <maximumf>, %56, %cst_42 [1] : vector<64x8x64xf32> to vector<64x64xf32>
    %58 = vector.shape_cast %57 : vector<64x64xf32> to vector<64x1x64xf32>
    %59 = vector.broadcast %58 : vector<64x1x64xf32> to vector<64x8x64xf32>
    %60 = arith.subf %56, %59 : vector<64x8x64xf32>
    %61 = math.exp %60 : vector<64x8x64xf32>
    %cst_43 = arith.constant dense<0.000000e+00> : vector<64x64xf32>
    %62 = vector.multi_reduction <add>, %61, %cst_43 [1] : vector<64x8x64xf32> to vector<64x64xf32>
    %63 = vector.shape_cast %62 : vector<64x64xf32> to vector<64x1x64xf32>
    %64 = tpu.reciprocal %63 {approx = true} : vector<64x1x64xf32> -> vector<64x1x64xf32>
    %65 = vector.broadcast %64 : vector<64x1x64xf32> to vector<64x8x64xf32>
    %66 = arith.mulf %61, %65 : vector<64x8x64xf32>
    %67 = vector.shape_cast %15 : vector<64x64xf32> to vector<64x1x64xf32>
    %68 = vector.broadcast %67 : vector<64x1x64xf32> to vector<64x8x64xf32>
    %69 = arith.addf %68, %35 : vector<64x8x64xf32>
    %70 = arith.mulf %66, %69 : vector<64x8x64xf32>
    %cst_44 = arith.constant dense<0.000000e+00> : vector<64x64xf32>
    %71 = vector.multi_reduction <add>, %70, %cst_44 [1] : vector<64x8x64xf32> to vector<64x64xf32>
    %72 = arith.truncf %71 : vector<64x64xf32> to vector<64x64xbf16>
    %c0_45 = arith.constant 0 : index
    %c0_46 = arith.constant 0 : index
    %73 = vector.load %arg18[%c0_45, %c0_46] : memref<64x16xbf16, #tpu.memory_space<vmem>>, vector<64x16xbf16>
    %cst_47 = arith.constant dense<0.000000e+00> : vector<64x16xf32>
    %74 = tpu.matmul %72, %73, %cst_47 {dimension_numbers = #tpu.dot_dimension_numbers<[1], [0], [0], [1], [0, 0, 1, 1], [], []>} : vector<64x64xbf16>, vector<64x16xbf16>, vector<64x16xf32> -> vector<64x16xf32>
    %c0_48 = arith.constant 0 : index
    %c0_49 = arith.constant 0 : index
    %75 = vector.load %arg19[%c0_48, %c0_49] : memref<1x16xf32, #tpu.memory_space<vmem>>, vector<1x16xf32>
    %76 = vector.broadcast %75 : vector<1x16xf32> to vector<64x16xf32>
    %77 = arith.addf %74, %76 : vector<64x16xf32>
    %78 = tpu.transpose %77, [1, 0] : vector<64x16xf32> -> vector<16x64xf32>
    %79 = arith.addf %78, %1 : vector<16x64xf32>
    %c0_50 = arith.constant 0 : index
    %c0_51 = arith.constant 0 : index
    %c0_52 = arith.constant 0 : index
    %80 = vector.load %arg20[%c0_50, %c0_51, %c0_52] : memref<1x16x64xf32, #tpu.memory_space<vmem>>, vector<1x16x64xf32>
    %81 = vector.shape_cast %80 : vector<1x16x64xf32> to vector<16x64xf32>
    %82 = vector.shape_cast %79 : vector<16x64xf32> to vector<1x16x64xf32>
    tpu.vector_store %arg20[%c0_50, %c0_51, %c0_52], %82 {strides = array<i32>} : memref<1x16x64xf32, #tpu.memory_space<vmem>>, vector<1x16x64xf32>,
    return
  }
  func.func @transform_0(%arg0: i32, %arg1: i32) -> (i32, i32, i32) {
    %c0_i32 = arith.constant 0 : i32
    %c0_i32_0 = arith.constant 0 : i32
    return %arg0, %c0_i32, %arg1 : i32, i32, i32
  }
  func.func @transform_1(%arg0: i32, %arg1: i32) -> (i32, i32, i32, i32) {
    %c0_i32 = arith.constant 0 : i32
    %c0_i32_0 = arith.constant 0 : i32
    %c0_i32_1 = arith.constant 0 : i32
    return %arg0, %arg1, %c0_i32, %c0_i32_0 : i32, i32, i32, i32
  }
  func.func @transform_2(%arg0: i32, %arg1: i32) -> (i32, i32) {
    %c0_i32 = arith.constant 0 : i32
    %c0_i32_0 = arith.constant 0 : i32
    %c0_i32_1 = arith.constant 0 : i32
    return %c0_i32, %c0_i32_0 : i32, i32
  }
  func.func @transform_3(%arg0: i32, %arg1: i32) -> (i32, i32) {
    %c0_i32 = arith.constant 0 : i32
    %c0_i32_0 = arith.constant 0 : i32
    %c0_i32_1 = arith.constant 0 : i32
    return %c0_i32, %c0_i32_0 : i32, i32
  }
  func.func @transform_4(%arg0: i32, %arg1: i32) -> (i32, i32) {
    %c0_i32 = arith.constant 0 : i32
    %c0_i32_0 = arith.constant 0 : i32
    %c0_i32_1 = arith.constant 0 : i32
    return %c0_i32, %c0_i32_0 : i32, i32
  }
  func.func @transform_5(%arg0: i32, %arg1: i32) -> (i32, i32) {
    %c0_i32 = arith.constant 0 : i32
    %c0_i32_0 = arith.constant 0 : i32
    %c0_i32_1 = arith.constant 0 : i32
    return %c0_i32, %c0_i32_0 : i32, i32
  }
  func.func @transform_6(%arg0: i32, %arg1: i32) -> (i32, i32) {
    %c0_i32 = arith.constant 0 : i32
    %c0_i32_0 = arith.constant 0 : i32
    %c0_i32_1 = arith.constant 0 : i32
    return %c0_i32, %c0_i32_0 : i32, i32
  }
  func.func @transform_7(%arg0: i32, %arg1: i32) -> (i32, i32) {
    %c0_i32 = arith.constant 0 : i32
    %c0_i32_0 = arith.constant 0 : i32
    %c0_i32_1 = arith.constant 0 : i32
    return %c0_i32, %c0_i32_0 : i32, i32
  }
  func.func @transform_8(%arg0: i32, %arg1: i32) -> (i32, i32) {
    %c0_i32 = arith.constant 0 : i32
    %c0_i32_0 = arith.constant 0 : i32
    %c0_i32_1 = arith.constant 0 : i32
    return %c0_i32, %c0_i32_0 : i32, i32
  }
  func.func @transform_9(%arg0: i32, %arg1: i32) -> (i32, i32) {
    %c0_i32 = arith.constant 0 : i32
    %c0_i32_0 = arith.constant 0 : i32
    %c0_i32_1 = arith.constant 0 : i32
    return %c0_i32, %c0_i32_0 : i32, i32
  }
  func.func @transform_10(%arg0: i32, %arg1: i32) -> (i32, i32) {
    %c0_i32 = arith.constant 0 : i32
    %c0_i32_0 = arith.constant 0 : i32
    %c0_i32_1 = arith.constant 0 : i32
    return %c0_i32, %c0_i32_0 : i32, i32
  }
  func.func @transform_11(%arg0: i32, %arg1: i32) -> (i32, i32) {
    %c0_i32 = arith.constant 0 : i32
    %c0_i32_0 = arith.constant 0 : i32
    %c0_i32_1 = arith.constant 0 : i32
    return %c0_i32, %c0_i32_0 : i32, i32
  }
  func.func @transform_12(%arg0: i32, %arg1: i32) -> (i32, i32) {
    %c0_i32 = arith.constant 0 : i32
    %c0_i32_0 = arith.constant 0 : i32
    %c0_i32_1 = arith.constant 0 : i32
    return %c0_i32, %c0_i32_0 : i32, i32
  }
  func.func @transform_13(%arg0: i32, %arg1: i32) -> (i32, i32) {
    %c0_i32 = arith.constant 0 : i32
    %c0_i32_0 = arith.constant 0 : i32
    %c0_i32_1 = arith.constant 0 : i32
    return %c0_i32, %c0_i32_0 : i32, i32
  }
  func.func @transform_14(%arg0: i32, %arg1: i32) -> (i32, i32) {
    %c0_i32 = arith.constant 0 : i32
    %c0_i32_0 = arith.constant 0 : i32
    %c0_i32_1 = arith.constant 0 : i32
    return %c0_i32, %c0_i32_0 : i32, i32
  }
  func.func @transform_15(%arg0: i32, %arg1: i32) -> (i32, i32) {
    %c0_i32 = arith.constant 0 : i32
    %c0_i32_0 = arith.constant 0 : i32
    %c0_i32_1 = arith.constant 0 : i32
    return %c0_i32, %c0_i32_0 : i32, i32
  }
  func.func @transform_16(%arg0: i32, %arg1: i32) -> (i32, i32) {
    %c0_i32 = arith.constant 0 : i32
    %c0_i32_0 = arith.constant 0 : i32
    %c0_i32_1 = arith.constant 0 : i32
    return %c0_i32, %c0_i32_0 : i32, i32
  }
  func.func @transform_17(%arg0: i32, %arg1: i32) -> (i32, i32) {
    %c0_i32 = arith.constant 0 : i32
    %c0_i32_0 = arith.constant 0 : i32
    %c0_i32_1 = arith.constant 0 : i32
    return %c0_i32, %c0_i32_0 : i32, i32
  }
  func.func @transform_18(%arg0: i32, %arg1: i32) -> (i32, i32, i32) {
    %c0_i32 = arith.constant 0 : i32
    %c0_i32_0 = arith.constant 0 : i32
    return %arg0, %c0_i32, %arg1 : i32, i32, i32
  }
}

</mosaic_0001>

<bundles_post_ra>
// kernel: transformer_forward.1
= control target key start
LH: loop header
LB: loop body
LE: loop exit
PB: predicated region body
PF: predicated region fallthrough
CT: control target
= control target key end

     0   :  { %s12123_s0 = inlined_call_operand.vmem [shape: f32[2,16,64], index: 0, kind: input, shape index: {}]   ;;  %s12124_s1 = inlined_call_operand.vmem [shape: bf16[2,64,8,20], index: 1, kind: input, shape index: {}]   ;;  %s12125_s2 = inlined_call_operand.vmem [shape: bf16[16,64], index: 2, kind: input, shape index: {}]   ;;  %s12126_s3 = inlined_call_operand.vmem [shape: f32[1,64], index: 3, kind: input, shape index: {}]   ;;  %s12127_s4 = inlined_call_operand.vmem [shape: bf16[16,64], index: 4, kind: input, shape index: {}]   ;;  %s12128_s5 = inlined_call_operand.vmem [shape: f32[1,64], index: 5, kind: input, shape index: {}]   ;;  %s12129_s6 = inlined_call_operand.vmem [shape: bf16[20,64], index: 6, kind: input, shape index: {}]   ;;  %s12130_s7 = inlined_call_operand.vmem [shape: f32[1,64], index: 7, kind: input, shape index: {}]   ;;  %s12131_s8 = inlined_call_operand.vmem [shape: bf16[20,32], index: 8, kind: input, shape index: {}]   ;;  %s12132_s9 = inlined_call_operand.vmem [shape: f32[1,32], index: 9, kind: input, shape index: {}]   ;;  %s12133_s10 = inlined_call_operand.vmem [shape: bf16[32,64], index: 10, kind: input, shape index: {}]   ;;  %s12134_s11 = inlined_call_operand.vmem [shape: f32[1,64], index: 11, kind: input, shape index: {}]   ;;  %s12135_s12 = inlined_call_operand.vmem [shape: bf16[64,256], index: 12, kind: input, shape index: {}]   ;;  %s12136_s13 = inlined_call_operand.vmem [shape: f32[1,256], index: 13, kind: input, shape index: {}]   ;;  %s12137_s14 = inlined_call_operand.vmem [shape: bf16[256,64], index: 14, kind: input, shape index: {}]   ;;  %s12138_s15 = inlined_call_operand.vmem [shape: f32[1,64], index: 15, kind: input, shape index: {}]   ;;  %s12139_s16 = inlined_call_operand.vmem [shape: bf16[64,16], index: 16, kind: input, shape index: {}]   ;;  %s12140_s17 = inlined_call_operand.vmem [shape: f32[1,16], index: 17, kind: input, shape index: {}]   ;;  %s12141_s18 = inlined_call_operand.hbm [shape: f32[2,16,64], index: 18, kind: output, shape index: {}]  }
   0x1   :  { %12202 = sst [smem:[#allocation90_spill]] %s12123_s0 }
   0x2   :  { %12203 = sst [smem:[#allocation91_spill]] %s12124_s1 }
   0x3   :  { %12204 = sst [smem:[#allocation92_spill]] %s12125_s2 }
   0x4   :  { %12205 = sst [smem:[#allocation93_spill]] %s12141_s18 }
   0x5   :  { %23 = vsyncpa [#allocation3], 0 }
   0x6   :  { %25 = vsyncpa [#allocation3 + $0x1], 0  ;;  %s8512_s27 = smov 0   ;;  %s8514_s28 = smov 0  }
   0x7   :  { %s8516_s29 = smov 0   ;;  %s8518_s30 = smov 0  }
   0x8   :  { %s8520_s0 = smov 0   ;;  %s8522_s19 = smov 0  }
   0x9 LB: > { %12206 = sst [smem:[#allocation5_spill]] %s8390_s27  ;;  %s7336_s1 = sadd.s32 4294967295, %s8410_s19   ;;  %s8410_s19 = sphi %s8522_s19, %s31_s19   ;;  %s8406_s0 = sphi %s8520_s0, %s12572_s0   ;;  %s8402_s30 = sphi %s8518_s30, %s12571_s30   ;;  %s8398_s29 = sphi %s8516_s29, %s12570_s29   ;;  %s8394_s28 = sphi %s8514_s28, %s12569_s28   ;;  %s8390_s27 = sphi %s8512_s27, %s12568_s27  }
   0xa   : > { %12207 = sst [smem:[#allocation6_spill]] %s8394_s28  ;;  %s7337_s20 = sadd.s32 4294967294, %s8410_s19  }
   0xb   : > { %12208 = sst [smem:[#allocation7_spill]] %s8398_s29  ;;  %s43_s21 = sadd.s32 1, %s8406_s0 }
   0xc   : > { %12209 = sst [smem:[#allocation8_spill]] %s8406_s0  ;;  %s444_s22 = sadd.s32 1, %s8398_s29 }
   0xd   : > { %12210 = sst [smem:[#allocation9_spill]] %s8410_s19  ;;  %p45_p0 = scmp.ge.s32.totalorder %s43_s21, 2 }
   0xe   : > { %p454_p1 = scmp.ne.s32.totalorder %s8398_s29, %s8394_s28  ;;  %p455_p2 = scmp.eq.s32.totalorder %s7336_s1, 1 }
   0xf   : > { %p460_p3 = scmp.ne.s32.totalorder %s8394_s28, %s8390_s27  ;;  %s12574_s21 = smov (%p45_p0, %s43_s21), 0 }
  0x10   : > { %12211 = sst [smem:[#allocation10_spill]] %s12574_s21  ;;  %p8552_p4 = por %p455_p2, %p454_p1 }
  0x11   : > { %p461_p5 = scmp.eq.s32.totalorder %s7337_s20, 1  ;;  %s439_s23 = ssub.s32 %s8406_s0, %s12574_s21 }
  0x12   : > { %s12212_s2 = scalar_select %p8552_p4, 1, 0 }
  0x13   : > { %p7340_p6 = scmp.ge.s32.totalorder %s8410_s19, 1  ;;  %p442_p7 = scmp.eq.s32.totalorder %s439_s23, 0 }
  0x14   : > { %12213 = sst [smem:[#allocation11_spill]] %s12212_s2  ;;  %p8559_p8 = por %p461_p5, %p460_p3 }
  0x15   : > { %p551_p9 = scmp.lt.s32.totalorder %s8410_s19, 3 }
  0x16   : > { %s12214_s24 = scalar_select %p8559_p8, 1, 0 }
  0x17   : > { %s8565_s25 = scalar_select %p442_p7, %s8398_s29, %s444_s22  }
  0x18   : > { %12215 = sst [smem:[#allocation12_spill]] %s12214_s24  ;;  %p552_p10 = pnand %p7340_p6, %p551_p9 }
  0x19   : > { %12216 = sst [smem:[#allocation13_spill]] %s8565_s25 }
  0x1a   : > { %555 = sbr.rel (%p552_p10) target bundleno = 1921 (0x781), region = 92 }
  0x1f   : > { %p617_p11 = scmp.lt.s32.totalorder %s8402_s30, 1  ;;  %s12217_s21 = sld [smem:[#allocation90_spill]]  ;;  %v7997_v3 = vld [vmem:[%s12127_s4] sm:$0xff]   ;;  %v7998_v4 = vld [vmem:[%s12129_s6 + $0x8] ss:$0 sps:$4 sm:$0x33]  }
  0x20   : > { %s12218_s28 = sld [smem:[#allocation91_spill]]  ;;  %7699 = vmatprep.subr.bf16.mxu1 %v7997_v3  ;;  %vm1187_vm0 = vcmask 1041408   ;;  %vm753_vm1 = vcmask 130048   ;;  %v7999_v12 = vld [vmem:[%s12129_s6] sm:$0xff]   ;;  %vm1090_vm2 = vcmask 162816   ;;  %v8034_v54 = vld [vmem:[%s12133_s10 + $0x8] sm:$0xff]  }
  0x21   : > { %s618_s26 = scalar_select %p617_p11, %s8402_s30, 1  ;;  %7700 = vmatpush3.bf16.msra.mxu1 %v7997_v3  ;;  %v1189_v11 = vsel %vm1187_vm0, %v7998_v4, 0  ;;  %v8002_v14 = vld [vmem:[%s12131_s8 + $0x8] ss:$0 sps:$4 sm:$0x33]   ;;  %v8017_v27 = vld [vmem:[%s12131_s8] sm:$0xff]  }
  0x22   : > { %s12219_s24 = sld [smem:[#allocation92_spill]]  ;;  %7934 = vmatprep.subr.msk.bf16.mxu1 %vm1187_vm0, %v7998_v4  ;;  %v1500_v25 = vsel %vm1187_vm0, %v8002_v14, 0  ;;  %v8035_v55 = vld [vmem:[%s12133_s10] sm:$0xff]   ;;  %vm1910_vm3 = vcmask 261120   ;;  %vm3236_vm4 = vcmask 523264   ;;  %vm7021_vm5 = vcmask 1041409  }
  0x23   : > { %s7566_s1 = sshll.u32 %s618_s26, 4  ;;  %s7567_s27 = sshll.u32 %s618_s26, 8  ;;  %v7346_v56 = vld [vmem:[%s12126_s3] ss:$0 sm:$0xff]  ;;  %vm7023_vm6 = vcmask 1042434   ;;  %vm7025_vm7 = vcmask 1043459  }
  0x24   : > { %v7352_v57 = vld [vmem:[%s12128_s5] ss:$0 sm:$0xff]  ;;  %vm7027_vm8 = vcmask 1044484   ;;  %vm7029_vm9 = vcmask 1045509   ;;  %vm7031_vm10 = vcmask 1046534   ;;  %vm7033_vm11 = vcmask 1047559  }
  0x25   : > { %s8572_s0 = scalar_lea.vmem %s12217_s21, %s7566_s1  ;;  %s7568_s25 = sshll.u32 %s8402_s30, 8 }
  0x26   : > { %s8577_s22 = scalar_lea.vmem %s12218_s28, %s7567_s27  ;;  %v636_v0 = vld [vmem:[%s8572_s0] sm:$0xff]  ;;  %v637_v1 = vld [vmem:[%s8572_s0 + $0x8] sm:$0xff]  ;;  %s12562_s27 = sld [smem:[#allocation6_spill]] }
  0x27   : > { %702 = vxpose.xlu0.b32.start [1/2] (short) (narrow) %v636_v0, 64  ;;  %v8607_v19 = vld [vmem:[%s8577_s22] sm:$0xff]   ;;  %v8610_v20 = vld [vmem:[%s8577_s22 + $0x90] sm:$0xff]   ;;  %v8619_v22 = vld [vmem:[%s8577_s22 + $0x8] sm:$0xff]   ;;  %s12564_s23 = sld [smem:[#allocation93_spill]]  ;;  %s8414_s18 = smov [#allocation2]  }
  0x28   : > { %v7996_v2 = vld [vmem:[%s12219_s24] sm:$0xff]   ;;  %v8622_v23 = vld [vmem:[%s8577_s22 + $0x98] sm:$0xff]   ;;  %v8625_v24 = vld [vmem:[%s8577_s22 + $0x10] sm:$0xff]   ;;  %s8338_s21 = sshll.u32 %s8414_s18, 4  ;;  %s8339_s21 = int_to_ptr.vmem [resolvable:$false] %s8338_s21 }
  0x29   : > { %7689 = vmatprep.subr.bf16.mxu0 %v7996_v2  ;;  %v8629_v26 = vld [vmem:[%s8577_s22 + $0xa0] sm:$0xff]   ;;  %v8007_v28 = vld [vmem:[%s8577_s22 + $0x18] sm:$0xff]   ;;  %v8644_v29 = vld [vmem:[%s8577_s22 + $0xa8] sm:$0xff]  }
  0x2a   : > { %7690 = vmatpush3.bf16.msra.mxu0 %v7996_v2  ;;  %v8009_v30 = vld [vmem:[%s8577_s22 + $0x20] sm:$0xff]   ;;  %v8648_v31 = vld [vmem:[%s8577_s22 + $0xb0] sm:$0xff]   ;;  %v8011_v32 = vld [vmem:[%s8577_s22 + $0x28] sm:$0xff]  }
  0x2b   : > { %703 = vxpose.xlu0.b32.end [2/2] (short) (narrow) %v637_v1, 64  ;;  %7933 = vmatprep.subr.msk.bf16.mxu0 %vm1187_vm0, %v7998_v4  ;;  %v8658_v33 = vld [vmem:[%s8577_s22 + $0xb8] sm:$0xff]   ;;  %v8013_v34 = vld [vmem:[%s8577_s22 + $0x30] sm:$0xff]   ;;  %v8662_v35 = vld [vmem:[%s8577_s22 + $0xc0] sm:$0xff]  }
  0x2c   : > { %v8015_v36 = vld [vmem:[%s8577_s22 + $0x38] sm:$0xff]   ;;  %v8672_v37 = vld [vmem:[%s8577_s22 + $0xc8] sm:$0xff]   ;;  %v8018_v38 = vld [vmem:[%s8577_s22 + $0x40] sm:$0xff]   ;;  %s614_s28 = sand.u32 1, %s12562_s27   ;;  %s8340_s27 = scalar_lea.vmem %s8339_s21, 512 }
  0x2d   : > { %v8676_v39 = vld [vmem:[%s8577_s22 + $0xd0] sm:$0xff]   ;;  %v8020_v40 = vld [vmem:[%s8577_s22 + $0x48] sm:$0xff]   ;;  %v8021_v41 = vld [vmem:[%s8577_s22 + $0xd8] sm:$0xff]   ;;  %s7341_s29 = sshll.u32 %s614_s28, 4  ;;  %s12078_s26 = scalar_lea.sflag [#allocation3], %s614_s28 }
  0x2e   : > { %v8022_v42 = vld [vmem:[%s8577_s22 + $0x50] sm:$0xff]   ;;  %v8023_v43 = vld [vmem:[%s8577_s22 + $0xe0] sm:$0xff]   ;;  %v8024_v44 = vld [vmem:[%s8577_s22 + $0x58] sm:$0xff]   ;;  %s616_s2 = scalar_lea.vmem [#allocation2], %s7341_s29 }
  0x2f   : > { %v8025_v45 = vld [vmem:[%s8577_s22 + $0xe8] sm:$0xff]   ;;  %v8026_v46 = vld [vmem:[%s8577_s22 + $0x60] sm:$0xff]   ;;  %v8027_v47 = vld [vmem:[%s8577_s22 + $0xf0] sm:$0xff]   ;;  %s7240_s24 = sshll.u32 %s616_s2, 4  ;;  %s12069_s24 = int_to_ptr.vmem [resolvable:$true] %s7240_s24 }
  0x30   : > { %v8028_v48 = vld [vmem:[%s8577_s22 + $0x68] sm:$0xff]   ;;  %v8029_v49 = vld [vmem:[%s8577_s22 + $0xf8] sm:$0xff]   ;;  %v8030_v50 = vld [vmem:[%s8577_s22 + $0x70] sm:$0xff]   ;;  %s8334_s30 = scalar_lea.vmem %s12069_s24, 256  ;;  %p8341_p1 = scmp.lt.s32.totalorder %s12069_s24, %s8339_s21 }
  0x31   : > { %v8031_v51 = vld [vmem:[%s8577_s22 + $0x78] sm:$0xff]   ;;  %v8032_v52 = vld [vmem:[%s8577_s22 + $0x80] sm:$0xff]   ;;  %v8033_v53 = vld [vmem:[%s8577_s22 + $0x88] sm:$0xff]   ;;  %s12075_s22 = scalar_lea.hbm %s12564_s23, %s7568_s25  ;;  %p8335_p12 = scmp.ne.s32.totalorder %s12069_s24, %s8334_s30 }
  0x32   : > { %p8342_p2 = scmp.lt.s32.totalorder %s8340_s27, %s8334_s30 }
  0x33   : > { %p8336_p13 = pnand %p8335_p12, %p8552_p4 }
  0x34   : > { %p8343_p3 = por %p8342_p2, %p8341_p1 }
  0x35   : > { %p8337_p0 = pneg %p8336_p13 }
  0x37   : > { %p8344_p5 = pnand %p8343_p3, %p8337_p0 }
  0xa3   : > { %v718_v5 = vpop.trf.xlu0 }
  0xa7   : > { %v719_v6 = vpop.trf.xlu0 }
  0xa8   : > { %v734_v7 = vpack.c.bf16 %v719_v6, %v718_v5  ;;  %v8412_v6 = vmov 1966171168  }
  0xaa   : > { %7691 = vmatprep.mubr.msk.bf16.mxu0 %vm753_vm1, %v734_v7  ;;  %7701 = vmatprep.mubr.msk.bf16.mxu1 %vm753_vm1, %v734_v7  ;;  %v2306_v7 = vunpack.c.l.s4 %v8412_v6 }
  0xab   : > { %v720_v8 = vpop.trf.xlu0 }
  0xaf   : > { %v721_v9 = vpop.trf.xlu0 }
  0xb0   : > { %v735_v10 = vpack.c.bf16 %v721_v9, %v720_v8  ;;  %v2308_v8 = vlaneseq }
  0xb2   : > { %7692 = vmatmul.mubr.msk.bf16.vlgmr.msra.gmra.mxu0 %vm753_vm1, %v735_v10  ;;  %7702 = vmatmul.mubr.msk.bf16.vlgmr.msra.gmra.mxu1 %vm753_vm1, %v735_v10 }
  0xb3   : > { %v722_v13 = vpop.trf.xlu0  ;;  %7931 = vmatpush3.bf16.msra.mxu1 %v1189_v11  ;;  %7710 = vmatpush3.bf16.msra.mxu0 %v1189_v11 }
  0xb4   : > { %7930 = vmatprep.subr.bf16.mxu1 %v7999_v12  ;;  %7711 = vmatprep.subr.bf16.mxu0 %v7999_v12 }
  0xb7   : > { %v723_v15 = vpop.trf.xlu0  ;;  %7932 = vmatpush3.bf16.msra.mxu1 %v7999_v12  ;;  %7712 = vmatpush3.bf16.msra.mxu0 %v7999_v12 }
  0xb8   : > { %v736_v16 = vpack.c.bf16 %v723_v15, %v722_v13  ;;  %7935 = vmatprep.subr.msk.bf16.mxu1 %vm1187_vm0, %v8002_v14  ;;  %7845 = vmatprep.subr.bf16.mxu0 %v8034_v54  ;;  %v2307_v15 = vunpack.c.0.s8 %v2306_v7 }
  0xba   : > { %7695 = vmatprep.mubr.msk.bf16.mxu0 %vm753_vm1, %v736_v16  ;;  %7705 = vmatprep.mubr.msk.bf16.mxu1 %vm753_vm1, %v736_v16  ;;  %v8786_v16 = vshrl.u32 %v2308_v8, 7 }
  0xbb   : > { %v724_v17 = vpop.trf.xlu0 }
  0xbc   : > { %12224 = vst [vmem:[#allocation18_spill] sm:$0xff] %v8786_v16 }
  0xbf   : > { %v725_v18 = vpop.trf.xlu0 }
  0xc0   : > { %v737_v21 = vpack.c.bf16 %v725_v18, %v724_v17 }
  0xc2   : > { %7696 = vmatmul.mubr.msk.bf16.gmra.mxu0 %vm753_vm1, %v737_v21  ;;  %7706 = vmatmul.mubr.msk.bf16.gmra.mxu1 %vm753_vm1, %v737_v21 }
  0xc3   : > { %7713 = vmatprep.mubr.msk.bf16.mxu0 %vm1090_vm2, %v8607_v19  ;;  %7749 = vmatprep.mubr.msk.bf16.mxu1 %vm1090_vm2, %v8610_v20 }
  0xca   : > { %7714 = vmatmul.mubr.msk.bf16.vlgmr.msra.gmra.mxu0 %vm1090_vm2, %v8619_v22  ;;  %7750 = vmatmul.mubr.msk.bf16.vlgmr.msra.gmra.mxu1 %vm1090_vm2, %v8622_v23 }
  0xcb   : > { %7778 = vmatpush3.bf16.msra.mxu1 %v1500_v25  ;;  %7717 = vmatprep.mubr.msk.bf16.mxu0 %vm1090_vm2, %v8625_v24 }
  0xcc   : > { %7753 = vmatprep.mubr.msk.bf16.mxu1 %vm1090_vm2, %v8629_v26  ;;  %7779 = vmatprep.subr.bf16.mxu1 %v8017_v27 }
  0xcd   : > { %7846 = vmatpush3.bf16.msra.mxu0 %v8034_v54 }
  0xce   : > { %7847 = vmatprep.subr.bf16.mxu0 %v8035_v55 }
  0xcf   : > { %7780 = vmatpush3.bf16.msra.mxu1 %v8017_v27 }
  0xd1   : > { %7848 = vmatpush3.bf16.msra.mxu0 %v8035_v55 }
  0xd2   : > { %7718 = vmatmul.mubr.msk.bf16.gmra.mxu0 %vm1090_vm2, %v8007_v28  ;;  %7754 = vmatmul.mubr.msk.bf16.gmra.mxu1 %vm1090_vm2, %v8644_v29 }
  0xd3   : > { %7721 = vmatprep.mubr.msk.bf16.mxu0 %vm1090_vm2, %v8009_v30  ;;  %7757 = vmatprep.mubr.msk.bf16.mxu1 %vm1090_vm2, %v8648_v31 }
  0xda   : > { %7722 = vmatmul.mubr.msk.bf16.gmra.mxu0 %vm1090_vm2, %v8011_v32  ;;  %7758 = vmatmul.mubr.msk.bf16.gmra.mxu1 %vm1090_vm2, %v8658_v33 }
  0xdb   : > { %7725 = vmatprep.mubr.msk.bf16.mxu0 %vm1090_vm2, %v8013_v34  ;;  %7761 = vmatprep.mubr.msk.bf16.mxu1 %vm1090_vm2, %v8662_v35 }
  0xe2   : > { %7726 = vmatmul.mubr.msk.bf16.gmra.mxu0 %vm1090_vm2, %v8015_v36  ;;  %7762 = vmatmul.mubr.msk.bf16.gmra.mxu1 %vm1090_vm2, %v8672_v37 }
  0xe3   : > { %7729 = vmatprep.mubr.msk.bf16.mxu0 %vm1090_vm2, %v8018_v38  ;;  %7765 = vmatprep.mubr.msk.bf16.mxu1 %vm1090_vm2, %v8676_v39 }
  0xea   : > { %7730 = vmatmul.mubr.msk.bf16.gmra.mxu0 %vm1090_vm2, %v8020_v40  ;;  %7766 = vmatmul.mubr.msk.bf16.gmra.mxu1 %vm1090_vm2, %v8021_v41 }
  0xeb   : > { %7733 = vmatprep.mubr.msk.bf16.mxu0 %vm1090_vm2, %v8022_v42  ;;  %7769 = vmatprep.mubr.msk.bf16.mxu1 %vm1090_vm2, %v8023_v43 }
  0xf2   : > { %7734 = vmatmul.mubr.msk.bf16.gmra.mxu0 %vm1090_vm2, %v8024_v44  ;;  %7770 = vmatmul.mubr.msk.bf16.gmra.mxu1 %vm1090_vm2, %v8025_v45 }
  0xf3   : > { %7737 = vmatprep.mubr.msk.bf16.mxu0 %vm1090_vm2, %v8026_v46  ;;  %7773 = vmatprep.mubr.msk.bf16.mxu1 %vm1090_vm2, %v8027_v47 }
  0xfa   : > { %7738 = vmatmul.mubr.msk.bf16.gmra.mxu0 %vm1090_vm2, %v8028_v48  ;;  %7774 = vmatmul.mubr.msk.bf16.gmra.mxu1 %vm1090_vm2, %v8029_v49 }
  0xfb   : > { %7741 = vmatprep.mubr.msk.bf16.mxu0 %vm1090_vm2, %v8030_v50  ;;  %7781 = vmatprep.mubr.msk.bf16.mxu1 %vm1090_vm2, %v8607_v19 }
 0x102   : > { %7742 = vmatmul.mubr.msk.bf16.gmra.mxu0 %vm1090_vm2, %v8031_v51  ;;  %7782 = vmatmul.mubr.msk.bf16.vlgmr.msra.gmra.mxu1 %vm1090_vm2, %v8619_v22 }
 0x103   : > { %7745 = vmatprep.mubr.msk.bf16.mxu0 %vm1090_vm2, %v8032_v52  ;;  %7785 = vmatprep.mubr.msk.bf16.mxu1 %vm1090_vm2, %v8625_v24 }
 0x10a   : > { %7746 = vmatmul.mubr.msk.bf16.gmra.mxu0 %vm1090_vm2, %v8033_v53  ;;  %7786 = vmatmul.mubr.msk.bf16.gmra.mxu1 %vm1090_vm2, %v8007_v28 }
 0x10b   : > { %7789 = vmatprep.mubr.msk.bf16.mxu1 %vm1090_vm2, %v8009_v30 }
 0x112   : > { %7790 = vmatmul.mubr.msk.bf16.gmra.mxu1 %vm1090_vm2, %v8011_v32 }
 0x113   : > { %7793 = vmatprep.mubr.msk.bf16.mxu1 %vm1090_vm2, %v8013_v34 }
 0x11a   : > { %7794 = vmatmul.mubr.msk.bf16.gmra.mxu1 %vm1090_vm2, %v8015_v36 }
 0x11b   : > { %7797 = vmatprep.mubr.msk.bf16.mxu1 %vm1090_vm2, %v8018_v38 }
 0x122   : > { %7798 = vmatmul.mubr.msk.bf16.gmra.mxu1 %vm1090_vm2, %v8020_v40 }
 0x123   : > { %7801 = vmatprep.mubr.msk.bf16.mxu1 %vm1090_vm2, %v8022_v42 }
 0x12a   : > { %7802 = vmatmul.mubr.msk.bf16.gmra.mxu1 %vm1090_vm2, %v8024_v44 }
 0x12b   : > { %7805 = vmatprep.mubr.msk.bf16.mxu1 %vm1090_vm2, %v8026_v46 }
 0x132   : > { %7806 = vmatmul.mubr.msk.bf16.gmra.mxu1 %vm1090_vm2, %v8028_v48 }
 0x133   : > { %7809 = vmatprep.mubr.msk.bf16.mxu1 %vm1090_vm2, %v8030_v50 }
 0x13a   : > { %7810 = vmatmul.mubr.msk.bf16.gmra.mxu1 %vm1090_vm2, %v8031_v51 }
 0x13b   : > { %7813 = vmatprep.mubr.msk.bf16.mxu1 %vm1090_vm2, %v8032_v52  ;;  %v8826_v52 = vsub.s32 0, %v8786_v16 }
 0x142   : > { %7814 = vmatmul.mubr.msk.bf16.gmra.mxu1 %vm1090_vm2, %v8033_v53 }
 0x143   : > { %7817 = vmatprep.mubr.msk.bf16.mxu1 %vm1090_vm2, %v8610_v20 }
 0x14a   : > { %7818 = vmatmul.mubr.msk.bf16.gmra.mxu1 %vm1090_vm2, %v8622_v23  ;;  %v8793_v23 = vsub.s32 %v2307_v15, %v8786_v16 }
 0x14b   : > { %7821 = vmatprep.mubr.msk.bf16.mxu1 %vm1090_vm2, %v8629_v26 }
 0x152   : > { %7822 = vmatmul.mubr.msk.bf16.gmra.mxu1 %vm1090_vm2, %v8644_v29 }
 0x153   : > { %7825 = vmatprep.mubr.msk.bf16.mxu1 %vm1090_vm2, %v8648_v31 }
 0x15a   : > { %7826 = vmatmul.mubr.msk.bf16.gmra.mxu1 %vm1090_vm2, %v8658_v33 }
 0x15b   : > { %7829 = vmatprep.mubr.msk.bf16.mxu1 %vm1090_vm2, %v8662_v35 }
 0x162   : > { %7830 = vmatmul.mubr.msk.bf16.gmra.mxu1 %vm1090_vm2, %v8672_v37 }
 0x163   : > { %7833 = vmatprep.mubr.msk.bf16.mxu1 %vm1090_vm2, %v8676_v39 }
 0x16a   : > { %7834 = vmatmul.mubr.msk.bf16.gmra.mxu1 %vm1090_vm2, %v8021_v41 }
 0x16b   : > { %7837 = vmatprep.mubr.msk.bf16.mxu1 %vm1090_vm2, %v8023_v43 }
 0x172   : > { %v7693_v58 = vpop.f32.mrf.mxu0  ;;  %v7703_v59 = vpop.f32.mrf.mxu1  ;;  %7838 = vmatmul.mubr.msk.bf16.gmra.mxu1 %vm1090_vm2, %v8025_v45  ;;  %v8813_v45 = vld [vmem:[%s12130_s7] ss:$0 sm:$0xff] }
 0x173   : > { %v8766_v60 = vadd.f32 %v7693_v58, %v7346_v56  ;;  %v8768_v61 = vadd.f32 %v7703_v59, %v7352_v57  ;;  %7841 = vmatprep.mubr.msk.bf16.mxu1 %vm1090_vm2, %v8027_v47 }
 0x174   : > { %v800_v62 = vpop.f32.mrf.mxu0  ;;  %v8771_v63 = vpop.f32.mrf.mxu1 }
 0x175   : > { %12220 = vst [vmem:[#allocation14_spill] sm:$0xff] %v8768_v61  ;;  %v801_v19 = vadd.f32 %v7346_v56, %v800_v62  ;;  %v2402_v44 = vcombine.high %v8766_v60, %v8766_v60  ;;  %v8817_v47 = vrot.slane %v8766_v60, %v8793_v23 }
 0x176   : > { %v7694_v0 = vpop.f32.mrf.mxu0  ;;  %v7704_v1 = vpop.f32.mrf.mxu1 }
 0x177   : > { %v8774_v2 = vadd.f32 %v7694_v0, %v7346_v56  ;;  %v8776_v3 = vadd.f32 %v7704_v1, %v7352_v57  ;;  %v2311_v26 = vrot.slane %v801_v19, %v8793_v23  ;;  %v2304_v39 = vcombine.high %v801_v19, %v801_v19 }
 0x178   : > { %v8778_v4 = vpop.f32.mrf.mxu0  ;;  %v8780_v5 = vpop.f32.mrf.mxu1  ;;  %v8838_v58 = vrot.slane %v2402_v44, %v8793_v23  ;;  %v8856_v8 = vrot.slane %v8817_v47, %v8793_v23 }
 0x179   : > { %12221 = vst [vmem:[#allocation15_spill] sm:$0xff] %v8776_v3  ;;  %12222 = vst [vmem:[#allocation16_spill] sm:$0xff] %v8780_v5  ;;  %v2327_v35 = vrot.slane %v2311_v26, %v8793_v23  ;;  %v2319_v36 = vcombine.high %v2311_v26, %v2311_v26  ;;  %v8823_v51 = vrot.slane %v2304_v39, %v8793_v23 }
 0x17a   : > { %7842 = vmatmul.mubr.msk.bf16.gmra.mxu1 %vm1090_vm2, %v8029_v49 }
 0x17b   : > { %v2349_v46 = vcombine.high %v2327_v35, %v2327_v35  ;;  %v8820_v48 = vrot.slane %v2319_v36, %v8793_v23 }
 0x17d   : > { %v8841_v59 = vrot.slane %v2349_v46, %v8826_v52  ;;  %v2351_v1 = vcombine.high %v8820_v48, %v8820_v48 }
 0x17f   : > { %v8876_v39 = vrot.slane %v2351_v1, %v8826_v52 }
 0x182   : > { %v7697_v9 = vpop.f32.mrf.mxu0  ;;  %v7707_v10 = vpop.f32.mrf.mxu1 }
 0x183   : > { %v8782_v11 = vadd.f32 %v7697_v9, %v7346_v56  ;;  %v8784_v12 = vadd.f32 %v7707_v10, %v7352_v57  ;;  %v2334_v9 = vrot.slane %v8823_v51, %v8793_v23 }
 0x184   : > { %v816_v13 = vpop.f32.mrf.mxu0  ;;  %v896_v14 = vpop.f32.mrf.mxu1 }
 0x185   : > { %12223 = vst [vmem:[#allocation17_spill] sm:$0xff] %v8784_v12  ;;  %v8788_v20 = vadd.f32 %v7346_v56, %v816_v13  ;;  %v8796_v29 = vadd.f32 %v7352_v57, %v896_v14  ;;  %v2715_v5 = vrot.slane %v2334_v9, %v8826_v52 }
 0x186   : > { %v7698_v17 = vpop.f32.mrf.mxu0  ;;  %v7708_v18 = vpop.f32.mrf.mxu1 }
 0x187   : > { %12226 = vst [vmem:[#allocation20_spill] sm:$0xff] %v8796_v29  ;;  %v8798_v30 = vadd.f32 %v7698_v17, %v7346_v56  ;;  %v8800_v31 = vadd.f32 %v7708_v18, %v7352_v57  ;;  %v2500_v32 = vcombine.high %v8788_v20, %v8788_v20  ;;  %v2699_v18 = vrot.slane %v2327_v35, %v8826_v52 }
 0x188   : > { %v819_v21 = vpop.f32.mrf.mxu0  ;;  %v8790_v22 = vpop.f32.mrf.mxu1 }
 0x189   : > { %12225 = vst [vmem:[#allocation19_spill] sm:$0xff] %v8790_v22  ;;  %12227 = vst [vmem:[#allocation21_spill] sm:$0xff] %v8800_v31  ;;  %v2514_v40 = vrot.slane %v2500_v32, %v8793_v23  ;;  %v820_v41 = vadd.f32 %v7346_v56, %v819_v21 }
 0x18a   : > { %v7715_v24 = vpop.f32.mrf.mxu0  ;;  %v7751_v25 = vpop.f32.mrf.mxu1 }
 0x18b   : > { %v2530_v53 = vrot.slane %v2514_v40, %v8793_v23  ;;  %v2556_v54 = vrot.slane %v820_v41, %v8793_v23  ;;  %v8831_v55 = vadd.f32 %v7715_v24, %v8813_v45  ;;  %v2516_v62 = vcombine.high %v2514_v40, %v2514_v40 }
 0x18c   : > { %v1225_v27 = vpop.f32.mrf.mxu0  ;;  %v1369_v28 = vpop.f32.mrf.mxu1  ;;  %v8846_v0 = vadd.f32 %v7751_v25, %v8813_v45  ;;  %v2549_v10 = vcombine.high %v820_v41, %v820_v41 }
 0x18d   : > { %v2564_v14 = vcombine.high %v2556_v54, %v2556_v54  ;;  %v2572_v15 = vrot.slane %v2556_v54, %v8793_v23  ;;  %v2546_v17 = vcombine.high %v2530_v53, %v2530_v53  ;;  %v1226_v24 = vadd.f32 %v8813_v45, %v1225_v27 }
 0x18e   : > { %v7716_v33 = vpop.f32.mrf.mxu0  ;;  %v7752_v34 = vpop.f32.mrf.mxu1  ;;  %12228 = vst [vmem:[#allocation22_spill] sm:$0xff] %v8846_v0  ;;  %v1370_v25 = vadd.f32 %v8813_v45, %v1369_v28  ;;  %v2843_v26 = vrot.slane %v2530_v53, %v8826_v52  ;;  %v2544_v40 = vrot.slane %v2516_v62, %v8793_v23  ;;  %v2320_v28 = vcombine.high %v8823_v51, %v8823_v51 }
 0x18f   : > { %v8870_v32 = vadd.f32 %v7716_v33, %v8813_v45  ;;  %v8873_v36 = vrot.slane %v2546_v17, %v8826_v52  ;;  %v8879_v35 = vadd.f32 %v7752_v34, %v8813_v45  ;;  %v8889_v33 = vrot.slane %v2549_v10, %v8793_v23 }
 0x190   : > { %v8805_v37 = vpop.f32.mrf.mxu0  ;;  %v1372_v38 = vpop.f32.mrf.mxu1  ;;  %v8891_v44 = vsub.f32 %v2699_v18, %v1226_v24  ;;  %v8893_v46 = vsub.f32 %v2843_v26, %v1370_v25  ;;  %v2548_v54 = vcombine.high %v2544_v40, %v2544_v40  ;;  %v2586_v51 = vrot.slane %v2564_v14, %v8793_v23  ;;  %v8036_v25 = vld [vmem:[%s12135_s12 + $0x30] ss:$8 sps:$4 sm:$0xff]  }
 0x191   : > { %12229 = vst [vmem:[#allocation23_spill] sm:$0xff] %v8873_v36  ;;  %12230 = vst [vmem:[#allocation24_spill] sm:$0xff] %v8879_v35  ;;  %v1373_v62 = vadd.f32 %v8813_v45, %v1372_v38  ;;  %v2847_v10 = vrot.slane %v2544_v40, %v8826_v52  ;;  %v2350_v24 = vcombine.high %v2334_v9, %v2334_v9  ;;  %v8038_v38 = vld [vmem:[%s12135_s12 + $0x34] ss:$8 sps:$4 sm:$0xff]  }
 0x192   : > { %v7719_v42 = vpop.f32.mrf.mxu0  ;;  %v7755_v43 = vpop.f32.mrf.mxu1  ;;  %12232 = vst [vmem:[#allocation26_spill] sm:$0xff] %v8893_v46  ;;  %v8916_v26 = vrot.slane %v2548_v54, %v8826_v52  ;;  %v2594_v14 = vcombine.high %v2572_v15, %v2572_v15  ;;  %3341 = vmatprep.subr.bf16.mxu1 %v8038_v38  ;;  %v8946_v38 = vrot.slane %v2320_v28, %v8793_v23 }
 0x193   : > { %v8907_v18 = vadd.f32 %v7719_v42, %v8813_v45  ;;  %v8919_v34 = vadd.f32 %v7755_v43, %v8813_v45  ;;  %v8924_v13 = vsub.f32 %v2847_v10, %v1373_v62  ;;  %v8927_v60 = vrot.slane %v2350_v24, %v8826_v52  ;;  %3342 = vmatpush1.bf16.msra.mxu1 %v8036_v25 }
 0x194   : > { %v1241_v49 = vpop.f32.mrf.mxu0  ;;  %v1385_v50 = vpop.f32.mrf.mxu1  ;;  %12233 = vst [vmem:[#allocation27_spill] sm:$0xff] %v8916_v26  ;;  %v2579_v43 = vrot.slane %v8889_v33, %v8793_v23  ;;  %v2859_v62 = vrot.slane %v2572_v15, %v8826_v52  ;;  %v2596_v25 = vcombine.high %v2586_v51, %v2586_v51  ;;  %v2863_v9 = vrot.slane %v2586_v51, %v8826_v52 }
 0x195   : > { %12234 = vst [vmem:[#allocation28_spill] sm:$0xff] %v8919_v34  ;;  %v1242_v40 = vadd.f32 %v8813_v45, %v1241_v49  ;;  %12236 = vst [vmem:[#allocation30_spill] sm:$0xff] %v8924_v13  ;;  %v1386_v16 = vadd.f32 %v8813_v45, %v1385_v50  ;;  %v8936_v49 = vrot.slane %v2594_v14, %v8826_v52 }
 0x196   : > { %v8833_v56 = vpop.f32.mrf.mxu0  ;;  %v8835_v57 = vpop.f32.mrf.mxu1  ;;  %v2451_v14 = vcombine.high %v8774_v2, %v8774_v2  ;;  %v8974_v15 = vrot.slane %v2596_v25, %v8826_v52  ;;  %v2458_v13 = vrot.slane %v8774_v2, %v8793_v23 }
 0x197   : > { %12237 = vst [vmem:[#allocation31_spill] sm:$0xff] %v8936_v49  ;;  %v8943_v50 = vsub.f32 %v2715_v5, %v1242_v40  ;;  %v8950_v54 = vadd.f32 %v8835_v57, %v8813_v45  ;;  %v8956_v31 = vsub.f32 %v2859_v62, %v1386_v16  ;;  %v8962_v28 = vadd.f32 %v8833_v56, %v8813_v45 }
 0x198   : > { %v8850_v6 = vpop.f32.mrf.mxu0  ;;  %v8852_v7 = vpop.f32.mrf.mxu1  ;;  %v2352_v57 = vcombine.high %v8946_v38, %v8946_v38  ;;  %v2605_v62 = vrot.slane %v8782_v11, %v8793_v23  ;;  %12243 = vst [vmem:[#allocation37_spill] sm:$0xff] %v8974_v15  ;;  %v2595_v16 = vcombine.high %v2579_v43, %v2579_v43  ;;  %v8991_v25 = vrot.slane %v2451_v14, %v8793_v23 }
 0x199   : > { %12239 = vst [vmem:[#allocation33_spill] sm:$0xff] %v8943_v50  ;;  %12240 = vst [vmem:[#allocation34_spill] sm:$0xff] %v8950_v54  ;;  %v1389_v40 = vadd.f32 %v8813_v45, %v8852_v7  ;;  %v2565_v7 = vcombine.high %v8889_v33, %v8889_v33  ;;  %v2875_v14 = vrot.slane %v2579_v43, %v8826_v52 }
 0x19a   : > { %v8864_v19 = vpop.f32.mrf.mxu0  ;;  %v7759_v21 = vpop.f32.mrf.mxu1  ;;  %12241 = vst [vmem:[#allocation35_spill] sm:$0xff] %v8956_v31  ;;  %v8984_v51 = vrot.slane %v2352_v57, %v8826_v52  ;;  %v9002_v57 = vrot.slane %v2595_v16, %v8826_v52  ;;  %v2466_v0 = vcombine.high %v2458_v13, %v2458_v13 }
 0x19b   : > { %v8977_v56 = vadd.f32 %v7759_v21, %v8813_v45  ;;  %v8986_v49 = vsub.f32 %v2863_v9, %v1389_v40  ;;  %v2598_v21 = vcombine.high %v8782_v11, %v8782_v11  ;;  %v9009_v11 = vrot.slane %v8838_v58, %v8793_v23 }
 0x19c   : > { %v8882_v41 = vpop.f32.mrf.mxu0  ;;  %v8884_v27 = vpop.f32.mrf.mxu1  ;;  %12248 = vst [vmem:[#allocation42_spill] sm:$0xff] %v9002_v57  ;;  %v12249_v40 = vcombine.high %v8817_v47, %v8817_v47  ;;  %v2621_v9 = vrot.slane %v2605_v62, %v8793_v23  ;;  %v2593_v26 = vrot.slane %v2565_v7, %v8793_v23  ;;  %v2654_v57 = vrot.slane %v8798_v30, %v8793_v23 }
 0x19d   : > { %12231 = vst [vmem:[#allocation25_spill] sm:$0xff] %v8882_v41  ;;  %12244 = vst [vmem:[#allocation38_spill] sm:$0xff] %v8977_v56  ;;  %v1402_v2 = vadd.f32 %v8813_v45, %v8884_v27  ;;  %v9041_v27 = vrot.slane %v8991_v25, %v8793_v23 }
 0x19e   : > { %v8900_v1 = vpop.f32.mrf.mxu0  ;;  %v8902_v17 = vpop.f32.mrf.mxu1  ;;  %12246 = vst [vmem:[#allocation40_spill] sm:$0xff] %v8986_v49  ;;  %v9015_v46 = vrot.slane %v12249_v40, %v8793_v23  ;;  %v2613_v49 = vcombine.high %v2605_v62, %v2605_v62  ;;  %v9030_v40 = vrot.slane %v2458_v13, %v8793_v23  ;;  %v2879_v7 = vrot.slane %v2593_v26, %v8826_v52 }
 0x19f   : > { %v9020_v15 = vsub.f32 %v2875_v14, %v1402_v2  ;;  %v9024_v43 = vadd.f32 %v8902_v17, %v8813_v45  ;;  %v9034_v2 = vrot.slane %v2598_v21, %v8793_v23  ;;  %v2647_v17 = vcombine.high %v8798_v30, %v8798_v30 }
 0x1a0   : > { %v8922_v42 = vpop.f32.mrf.mxu0  ;;  %v1404_v53 = vpop.f32.mrf.mxu1  ;;  %v2597_v14 = vcombine.high %v2593_v26, %v2593_v26  ;;  %v9045_v13 = vrot.slane %v8788_v20, %v8793_v23  ;;  %v2643_v47 = vcombine.high %v2621_v9, %v2621_v9  ;;  %v2635_v56 = vrot.slane %v2613_v49, %v8793_v23 }
 0x1a1   : > { %12235 = vst [vmem:[#allocation29_spill] sm:$0xff] %v8922_v42  ;;  %12250 = vst [vmem:[#allocation43_spill] sm:$0xff] %v9020_v15  ;;  %v1405_v62 = vadd.f32 %v8813_v45, %v1404_v53  ;;  %v2891_v29 = vrot.slane %v2621_v9, %v8826_v52  ;;  %v2614_v30 = vcombine.high %v9034_v2, %v9034_v2 }
 0x1a2   : > { %v8939_v10 = vpop.f32.mrf.mxu0  ;;  %v7763_v24 = vpop.f32.mrf.mxu1  ;;  %12251 = vst [vmem:[#allocation44_spill] sm:$0xff] %v9024_v43  ;;  %v9054_v26 = vrot.slane %v2597_v14, %v8826_v52  ;;  %v9062_v20 = vrot.slane %v2643_v47, %v8826_v52  ;;  %v2628_v14 = vrot.slane %v9034_v2, %v8793_v23  ;;  %v9086_v2 = vrot.slane %v9045_v13, %v8793_v23 }
 0x1a3   : > { %12238 = vst [vmem:[#allocation32_spill] sm:$0xff] %v8939_v10  ;;  %v9048_v53 = vadd.f32 %v7763_v24, %v8813_v45  ;;  %v2645_v43 = vcombine.high %v2635_v56, %v2635_v56 }
 0x1a4   : > { %v8958_v12 = vpop.f32.mrf.mxu0  ;;  %v1417_v5 = vpop.f32.mrf.mxu1  ;;  %12253 = vst [vmem:[#allocation46_spill] sm:$0xff] %v9054_v26  ;;  %12255 = vst [vmem:[#allocation48_spill] sm:$0xff] %v9062_v20  ;;  %v2644_v26 = vcombine.high %v2628_v14, %v2628_v14 }
 0x1a5   : > { %12242 = vst [vmem:[#allocation36_spill] sm:$0xff] %v8958_v12  ;;  %12252 = vst [vmem:[#allocation45_spill] sm:$0xff] %v9048_v53  ;;  %v9056_v12 = vsub.f32 %v2879_v7, %v1405_v62  ;;  %v1418_v24 = vadd.f32 %v8813_v45, %v1417_v5  ;;  %v9071_v62 = vrot.slane %v2647_v17, %v8793_v23 }
 0x1a6   : > { %v8979_v31 = vpop.f32.mrf.mxu0  ;;  %v7764_v34 = vpop.f32.mrf.mxu1  ;;  %v2662_v17 = vcombine.high %v2654_v57, %v2654_v57  ;;  %v2895_v5 = vrot.slane %v2635_v56, %v8826_v52  ;;  %v9105_v20 = vrot.slane %v2645_v43, %v8826_v52  ;;  %v2642_v43 = vrot.slane %v2614_v30, %v8793_v23 }
 0x1a7   : > { %12245 = vst [vmem:[#allocation39_spill] sm:$0xff] %v8979_v31  ;;  %12254 = vst [vmem:[#allocation47_spill] sm:$0xff] %v9056_v12  ;;  %v9079_v9 = vsub.f32 %v2891_v29, %v1418_v24  ;;  %v9082_v7 = vadd.f32 %v7764_v34, %v8813_v45  ;;  %v2447_v34 = vcombine.high %v8856_v8, %v8856_v8 }
 0x1a8   : > { %v8997_v35 = vpop.f32.mrf.mxu0  ;;  %v1420_v33 = vpop.f32.mrf.mxu1  ;;  %12258 = vst [vmem:[#allocation51_spill] sm:$0xff] %v9105_v20  ;;  %v9117_v10 = vrot.slane %v2662_v17, %v8793_v23  ;;  %v2646_v20 = vcombine.high %v2642_v43, %v2642_v43  ;;  %v2911_v30 = vrot.slane %v2642_v43, %v8826_v52 }
 0x1a9   : > { %12247 = vst [vmem:[#allocation41_spill] sm:$0xff] %v8997_v35  ;;  %v9059_v35 = vrot.slane %v2466_v0, %v8793_v23  ;;  %12256 = vst [vmem:[#allocation49_spill] sm:$0xff] %v9079_v9  ;;  %v9089_v0 = vrot.slane %v2654_v57, %v8793_v23  ;;  %v1421_v47 = vadd.f32 %v8813_v45, %v1420_v33 }
 0x1aa   : > { %v7731_v16 = vpop.f32.mrf.mxu0  ;;  %v7767_v54 = vpop.f32.mrf.mxu1  ;;  %12257 = vst [vmem:[#allocation50_spill] sm:$0xff] %v9082_v7  ;;  %v9102_v57 = vrot.slane %v9071_v62, %v8793_v23 }
 0x1ab   : > { %v9094_v29 = vadd.f32 %v7731_v16, %v8813_v45  ;;  %v9108_v56 = vadd.f32 %v7767_v54, %v8813_v45  ;;  %v9110_v33 = vsub.f32 %v2895_v5, %v1421_v47  ;;  %v9113_v16 = vrot.slane %v2447_v34, %v8826_v52 }
 0x1ac   : > { %v1289_v36 = vpop.f32.mrf.mxu0  ;;  %v1433_v22 = vpop.f32.mrf.mxu1  ;;  %v2763_v54 = vrot.slane %v8856_v8, %v8826_v52  ;;  %v9127_v34 = vrot.slane %v2644_v26, %v8826_v52  ;;  %v2449_v8 = vcombine.high %v9015_v46, %v9015_v46 }
 0x1ad   : > { %12259 = vst [vmem:[#allocation52_spill] sm:$0xff] %v9108_v56  ;;  %12260 = vst [vmem:[#allocation53_spill] sm:$0xff] %v9110_v33  ;;  %v1290_v3 = vadd.f32 %v8813_v45, %v1289_v36  ;;  %v1434_v47 = vadd.f32 %v8813_v45, %v1433_v22  ;;  %v2907_v36 = vrot.slane %v2628_v14, %v8826_v52 }
 0x1ae   : > { %v7732_v21 = vpop.f32.mrf.mxu0  ;;  %v7768_v15 = vpop.f32.mrf.mxu1  ;;  %12261 = vst [vmem:[#allocation54_spill] sm:$0xff] %v9127_v34  ;;  %v2767_v14 = vrot.slane %v9015_v46, %v8826_v52  ;;  %v9149_v7 = vrot.slane %v2449_v8, %v8826_v52 }
 0x1af   : > { %v9131_v33 = vadd.f32 %v7732_v21, %v8813_v45  ;;  %v9133_v50 = vsub.f32 %v2763_v54, %v1290_v3  ;;  %v9138_v22 = vadd.f32 %v7768_v15, %v8813_v45  ;;  %v9143_v5 = vsub.f32 %v2907_v36, %v1434_v47 }
 0x1b0   : > { %v1292_v41 = vpop.f32.mrf.mxu0  ;;  %v1436_v49 = vpop.f32.mrf.mxu1 }
 0x1b1   : > { %12262 = vst [vmem:[#allocation55_spill] sm:$0xff] %v9133_v50  ;;  %12263 = vst [vmem:[#allocation56_spill] sm:$0xff] %v9138_v22  ;;  %v1293_v21 = vadd.f32 %v8813_v45, %v1292_v41  ;;  %v1437_v15 = vadd.f32 %v8813_v45, %v1436_v49  ;;  %v2448_v41 = vcombine.high %v9009_v11, %v9009_v11 }
 0x1b2   : > { %v7735_v12 = vpop.f32.mrf.mxu0  ;;  %v7771_v42 = vpop.f32.mrf.mxu1  ;;  %12264 = vst [vmem:[#allocation57_spill] sm:$0xff] %v9143_v5  ;;  %v9166_v49 = vrot.slane %v2646_v20, %v8826_v52 }
 0x1b3   : > { %v9153_v50 = vsub.f32 %v2767_v14, %v1293_v21  ;;  %v9156_v47 = vadd.f32 %v7735_v12, %v8813_v45  ;;  %v9161_v46 = vadd.f32 %v7771_v42, %v8813_v45  ;;  %v9168_v43 = vsub.f32 %v2911_v30, %v1437_v15 }
 0x1b4   : > { %v1305_v24 = vpop.f32.mrf.mxu0  ;;  %v1449_v9 = vpop.f32.mrf.mxu1  ;;  %12267 = vst [vmem:[#allocation60_spill] sm:$0xff] %v9166_v49  ;;  %v2692_v12 = vcombine.high %v9089_v0, %v9089_v0  ;;  %v9173_v21 = vrot.slane %v2448_v41, %v8826_v52  ;;  %v2779_v42 = vrot.slane %v9009_v11, %v8826_v52  ;;  %v2923_v30 = vrot.slane %v9089_v0, %v8826_v52  ;;  %v8039_v11 = vld [vmem:[%s12135_s12 + $0x20] ss:$8 sps:$4 sm:$0xff]  }
 0x1b5   : > { %12265 = vst [vmem:[#allocation58_spill] sm:$0xff] %v9156_v47  ;;  %12266 = vst [vmem:[#allocation59_spill] sm:$0xff] %v9161_v46  ;;  %v1306_v14 = vadd.f32 %v8813_v45, %v1305_v24  ;;  %v1450_v5 = vadd.f32 %v8813_v45, %v1449_v9  ;;  %v8041_v9 = vld [vmem:[%s12135_s12 + $0x24] ss:$8 sps:$4 sm:$0xff]   ;;  %v12271_v0 = vcombine.high %v8838_v58, %v8838_v58 }
 0x1b6   : > { %v7736_v31 = vpop.f32.mrf.mxu0  ;;  %v7772_v53 = vpop.f32.mrf.mxu1  ;;  %12268 = vst [vmem:[#allocation61_spill] sm:$0xff] %v9168_v43  ;;  %v9182_v15 = vrot.slane %v2692_v12, %v8826_v52  ;;  %v2694_v24 = vcombine.high %v9117_v10, %v9117_v10  ;;  %3343 = vmatprep.subr.bf16.mxu1 %v8041_v9 }
 0x1b7   : > { %v9187_v41 = vadd.f32 %v7736_v31, %v8813_v45  ;;  %v9197_v20 = vsub.f32 %v2779_v42, %v1306_v14  ;;  %v2446_v12 = vrot.slane %v12271_v0, %v8793_v23  ;;  %v9204_v31 = vadd.f32 %v7772_v53, %v8813_v45  ;;  %3344 = vmatpush1.bf16.msra.mxu1 %v8039_v11 }
 0x1b8   : > { %v1308_v17 = vpop.f32.mrf.mxu0  ;;  %v1452_v61 = vpop.f32.mrf.mxu1  ;;  %12269 = vst [vmem:[#allocation62_spill] sm:$0xff] %v9182_v15  ;;  %v9208_v34 = vsub.f32 %v2923_v30, %v1450_v5  ;;  %v2927_v53 = vrot.slane %v9117_v10, %v8826_v52  ;;  %v9218_v5 = vrot.slane %v2694_v24, %v8826_v52  ;;  %v2693_v11 = vcombine.high %v9102_v57, %v9102_v57 }
 0x1b9   : > { %12270 = vst [vmem:[#allocation63_spill] sm:$0xff] %v9197_v20  ;;  %12272 = vst [vmem:[#allocation64_spill] sm:$0xff] %v9204_v31  ;;  %v1309_v14 = vadd.f32 %v8813_v45, %v1308_v17  ;;  %v2450_v42 = vcombine.high %v2446_v12, %v2446_v12  ;;  %v2783_v58 = vrot.slane %v2446_v12, %v8826_v52 }
 0x1ba   : > { %v7739_v3 = vpop.f32.mrf.mxu0  ;;  %v7775_v54 = vpop.f32.mrf.mxu1  ;;  %12273 = vst [vmem:[#allocation65_spill] sm:$0xff] %v9208_v34  ;;  %v1453_v0 = vadd.f32 %v8813_v45, %v1452_v61  ;;  %12274 = vst [vmem:[#allocation66_spill] sm:$0xff] %v9218_v5  ;;  %v2496_v17 = vcombine.high %v9030_v40, %v9030_v40  ;;  %v2811_v15 = vrot.slane %v9041_v27, %v8826_v52 }
 0x1bb   : > { %v9221_v30 = vadd.f32 %v7739_v3, %v8813_v45  ;;  %v9226_v9 = vadd.f32 %v7775_v54, %v8813_v45  ;;  %v9229_v61 = vrot.slane %v2450_v42, %v8826_v52  ;;  %v9231_v12 = vsub.f32 %v2783_v58, %v1309_v14 }
 0x1bc   : > { %v1321_v36 = vpop.f32.mrf.mxu0  ;;  %v1465_v26 = vpop.f32.mrf.mxu1  ;;  %v9233_v10 = vsub.f32 %v2927_v53, %v1453_v0  ;;  %v9240_v34 = vrot.slane %v2496_v17, %v8826_v52  ;;  %v2795_v42 = vrot.slane %v9030_v40, %v8826_v52  ;;  %v9248_v58 = vrot.slane %v2693_v11, %v8826_v52 }
 0x1bd   : > { %12275 = vst [vmem:[#allocation67_spill] sm:$0xff] %v9221_v30  ;;  %12276 = vst [vmem:[#allocation68_spill] sm:$0xff] %v9226_v9  ;;  %v1322_v54 = vadd.f32 %v8813_v45, %v1321_v36  ;;  %v1466_v0 = vadd.f32 %v8813_v45, %v1465_v26  ;;  %v2939_v53 = vrot.slane %v9102_v57, %v8826_v52 }
 0x1be   : > { %v7740_v56 = vpop.f32.mrf.mxu0  ;;  %v7776_v8 = vpop.f32.mrf.mxu1  ;;  %12277 = vst [vmem:[#allocation69_spill] sm:$0xff] %v9233_v10  ;;  %12278 = vst [vmem:[#allocation70_spill] sm:$0xff] %v9248_v58  ;;  %v2498_v14 = vcombine.high %v9059_v35, %v9059_v35  ;;  %v12282_v17 = vcombine.high %v9071_v62, %v9071_v62 }
 0x1bf   : > { %v9255_v36 = vsub.f32 %v2795_v42, %v1322_v54  ;;  %v9258_v40 = vadd.f32 %v7740_v56, %v8813_v45  ;;  %v9264_v26 = vsub.f32 %v2939_v53, %v1466_v0  ;;  %v9267_v57 = vadd.f32 %v7776_v8, %v8813_v45  ;;  %v9276_v56 = vld [vmem:[%s12132_s9] ss:$0 sm:$0xff] }
 0x1c0   : > { %v1324_v43 = vpop.f32.mrf.mxu0  ;;  %v1468_v22 = vpop.f32.mrf.mxu1  ;;  %v2691_v54 = vrot.slane %v12282_v17, %v8793_v23  ;;  %v9279_v5 = vrot.slane %v2498_v14, %v8826_v52  ;;  %v2799_v8 = vrot.slane %v9059_v35, %v8826_v52 }
 0x1c1   : > { %12279 = vst [vmem:[#allocation71_spill] sm:$0xff] %v9255_v36  ;;  %12280 = vst [vmem:[#allocation72_spill] sm:$0xff] %v9264_v26  ;;  %v1325_v0 = vadd.f32 %v8813_v45, %v1324_v43  ;;  %v1469_v53 = vadd.f32 %v8813_v45, %v1468_v22  ;;  %v2497_v26 = vcombine.high %v9041_v27, %v9041_v27 }
 0x1c2   : > { %v7743_v20 = vpop.f32.mrf.mxu0  ;;  %v7783_v47 = vpop.f32.mrf.mxu1  ;;  %12281 = vst [vmem:[#allocation73_spill] sm:$0xff] %v9267_v57  ;;  %v2695_v11 = vcombine.high %v2691_v54, %v2691_v54  ;;  %v2943_v62 = vrot.slane %v2691_v54, %v8826_v52 }
 0x1c3   : > { %v9287_v17 = vadd.f32 %v7743_v20, %v8813_v45  ;;  %v9293_v43 = vsub.f32 %v2799_v8, %v1325_v0  ;;  %v1545_v35 = vadd.f32 %v7783_v47, %v9276_v56  ;;  %v9303_v20 = vrot.slane %v2497_v26, %v8826_v52 }
 0x1c4   : > { %v1337_v24 = vpop.f32.mrf.mxu0  ;;  %v1536_v49 = vpop.f32.mrf.mxu1  ;;  %v9298_v46 = vrot.slane %v2695_v11, %v8826_v52  ;;  %v9300_v54 = vsub.f32 %v2943_v62, %v1469_v53  ;;  %v12288_v47 = vcombine.high %v8991_v25, %v8991_v25  ;;  %v8042_v11 = vld [vmem:[%s12135_s12 + $0x10] ss:$8 sps:$4 sm:$0xff]  }
 0x1c5   : > { %12283 = vst [vmem:[#allocation74_spill] sm:$0xff] %v9287_v17  ;;  %12284 = vst [vmem:[#allocation75_spill] sm:$0xff] %v9293_v43  ;;  %v1338_v22 = vadd.f32 %v8813_v45, %v1337_v24  ;;  %v1537_v0 = vadd.f32 %v9276_v56, %v1536_v49  ;;  %v2827_v17 = vrot.slane %v9086_v2, %v8826_v52 }
 0x1c6   : > { %v7744_v3 = vpop.f32.mrf.mxu0  ;;  %v7784_v10 = vpop.f32.mrf.mxu1  ;;  %12285 = vst [vmem:[#allocation76_spill] sm:$0xff] %v9298_v46  ;;  %12286 = vst [vmem:[#allocation77_spill] sm:$0xff] %v9300_v54  ;;  %v2495_v24 = vrot.slane %v12288_v47, %v8793_v23 }
 0x1c7   : > { %12287 = vst [vmem:[#allocation78_spill] sm:$0xff] %v9303_v20  ;;  %v9309_v8 = vadd.f32 %v7744_v3, %v8813_v45  ;;  %v9319_v27 = vsub.f32 %v2811_v15, %v1338_v22  ;;  %v1548_v53 = vadd.f32 %v7784_v10, %v9276_v56  ;;  %v12290_v3 = vcombine.high %v9045_v13, %v9045_v13  ;;  %v8044_v15 = vld [vmem:[%s12135_s12 + $0x14] ss:$8 sps:$4 sm:$0xff]  }
 0x1c8   : > { %v1340_v42 = vpop.f32.mrf.mxu0  ;;  %v1539_v31 = vpop.f32.mrf.mxu1  ;;  %v2499_v25 = vcombine.high %v2495_v24, %v2495_v24  ;;  %v2815_v54 = vrot.slane %v2495_v24, %v8826_v52  ;;  %v1793_v10 = vmax.f32 %v1545_v35, 0.0  ;;  %v2545_v13 = vcombine.high %v9086_v2, %v9086_v2  ;;  %v8047_v24 = vld [vmem:[%s12135_s12 + $0x4] ss:$8 sps:$4 sm:$0xff]   ;;  %3345 = vmatprep.subr.bf16.mxu1 %v8044_v15 }
 0x1c9   : > { %12289 = vst [vmem:[#allocation79_spill] sm:$0xff] %v9319_v27  ;;  %v2537_v14 = vrot.slane %v12290_v3, %v8793_v23  ;;  %v1341_v47 = vadd.f32 %v8813_v45, %v1340_v42  ;;  %v1540_v22 = vadd.f32 %v9276_v56, %v1539_v31  ;;  %v1794_v57 = vmax.f32 %v1548_v53, 0.0  ;;  %3346 = vmatpush1.bf16.msra.mxu1 %v8042_v11 }
 0x1ca   : > { %v7747_v9 = vpop.f32.mrf.mxu0  ;;  %v7787_v58 = vpop.f32.mrf.mxu1  ;;  %v9344_v3 = vrot.slane %v2499_v25, %v8826_v52  ;;  %v1791_v31 = vmax.f32 %v1537_v0, 0.0  ;;  %v9350_v27 = vrot.slane %v2545_v13, %v8826_v52  ;;  %v8045_v0 = vld [vmem:[%s12135_s12] ss:$8 sps:$4 sm:$0xff]   ;;  %3347 = vmatprep.subr.bf16.mxu1 %v8047_v24 }
 0x1cb   : > { %v9336_v26 = vadd.f32 %v7747_v9, %v8813_v45  ;;  %v9346_v46 = vsub.f32 %v2815_v54, %v1341_v47  ;;  %v1792_v9 = vmax.f32 %v1540_v22, 0.0  ;;  %v1561_v54 = vadd.f32 %v7787_v58, %v9276_v56 }
 0x1cc   : > { %v1353_v36 = vpop.f32.mrf.mxu0  ;;  %v1552_v30 = vpop.f32.mrf.mxu1  ;;  %v2547_v15 = vcombine.high %v2537_v14, %v2537_v14  ;;  %v1856_v13 = vpack.c.bf16 %v1794_v57, %v1793_v10 }
 0x1cd   : > { %12291 = vst [vmem:[#allocation80_spill] sm:$0xff] %v9346_v46  ;;  %v1354_v35 = vadd.f32 %v8813_v45, %v1353_v36  ;;  %v1553_v53 = vadd.f32 %v9276_v56, %v1552_v30  ;;  %v1855_v47 = vpack.c.bf16 %v1792_v9, %v1791_v31  ;;  %v1797_v31 = vmax.f32 %v1561_v54, 0.0  ;;  %3348 = vmatpush1.bf16.msra.mxu1 %v8045_v0 }
 0x1ce   : > { %v7748_v49 = vpop.f32.mrf.mxu0  ;;  %v7788_v62 = vpop.f32.mrf.mxu1  ;;  %v9372_v46 = vrot.slane %v2547_v15, %v8826_v52 }
 0x1cf   : > { %v9359_v36 = vadd.f32 %v7748_v49, %v8813_v45  ;;  %v9366_v11 = vsub.f32 %v2827_v17, %v1354_v35  ;;  %v1564_v58 = vadd.f32 %v7788_v62, %v9276_v56  ;;  %v2831_v49 = vrot.slane %v2537_v14, %v8826_v52  ;;  %7849 = vmatprep.mubr.msk.bf16.mxu0 %vm1910_vm3, %v1855_v47 }
 0x1d0   : > { %v1555_v42 = vpop.f32.mrf.mxu1  ;;  %v1356_v20 = vpop.f32.mrf.mxu0  ;;  %v1795_v25 = vmax.f32 %v1553_v53, 0.0  ;;  %7850 = vmatmul.mubr.msk.bf16.vlgmr.msra.gmra.mxu0 %vm1910_vm3, %v1856_v13 }
 0x1d1   : > { %v1357_v30 = vadd.f32 %v8813_v45, %v1356_v20  ;;  %v1556_v24 = vadd.f32 %v9276_v56, %v1555_v42  ;;  %v1798_v9 = vmax.f32 %v1564_v58, 0.0 }
 0x1d2   : > { %v7791_v43 = vpop.f32.mrf.mxu1 }
 0x1d3   : > { %v9377_v57 = vsub.f32 %v2831_v49, %v1357_v30  ;;  %v1796_v14 = vmax.f32 %v1556_v24, 0.0  ;;  %v1858_v47 = vpack.c.bf16 %v1798_v9, %v1797_v31  ;;  %v1577_v15 = vadd.f32 %v7791_v43, %v9276_v56 }
 0x1d4   : > { %v1568_v22 = vpop.f32.mrf.mxu1 }
 0x1d5   : > { %v1569_v17 = vadd.f32 %v9276_v56, %v1568_v22  ;;  %v1857_v53 = vpack.c.bf16 %v1796_v14, %v1795_v25  ;;  %v1801_v49 = vmax.f32 %v1577_v15, 0.0 }
 0x1d6   : > { %v7792_v35 = vpop.f32.mrf.mxu1 }
 0x1d7   : > { %v1799_v62 = vmax.f32 %v1569_v17, 0.0  ;;  %v1580_v54 = vadd.f32 %v7792_v35, %v9276_v56  ;;  %7853 = vmatprep.mubr.msk.bf16.mxu0 %vm1910_vm3, %v1857_v53 }
 0x1d8   : > { %v1571_v20 = vpop.f32.mrf.mxu1  ;;  %7854 = vmatmul.mubr.msk.bf16.gmra.mxu0 %vm1910_vm3, %v1858_v47 }
 0x1d9   : > { %v1572_v10 = vadd.f32 %v9276_v56, %v1571_v20  ;;  %v1802_v24 = vmax.f32 %v1580_v54, 0.0 }
 0x1da   : > { %v7795_v42 = vpop.f32.mrf.mxu1 }
 0x1db   : > { %v1800_v22 = vmax.f32 %v1572_v10, 0.0  ;;  %v1860_v35 = vpack.c.bf16 %v1802_v24, %v1801_v49  ;;  %v1593_v9 = vadd.f32 %v7795_v42, %v9276_v56 }
 0x1dc   : > { %v1584_v13 = vpop.f32.mrf.mxu1 }
 0x1dd   : > { %v1859_v0 = vpack.c.bf16 %v1800_v22, %v1799_v62  ;;  %v1585_v58 = vadd.f32 %v9276_v56, %v1584_v13  ;;  %v1805_v54 = vmax.f32 %v1593_v9, 0.0 }
 0x1de   : > { %v7796_v30 = vpop.f32.mrf.mxu1 }
 0x1df   : > { %7857 = vmatprep.mubr.msk.bf16.mxu0 %vm1910_vm3, %v1859_v0  ;;  %v1803_v17 = vmax.f32 %v1585_v58, 0.0  ;;  %v1596_v14 = vadd.f32 %v7796_v30, %v9276_v56 }
 0x1e0   : > { %v1587_v25 = vpop.f32.mrf.mxu1  ;;  %7858 = vmatmul.mubr.msk.bf16.gmra.mxu0 %vm1910_vm3, %v1860_v35 }
 0x1e1   : > { %v1588_v43 = vadd.f32 %v9276_v56, %v1587_v25  ;;  %v1806_v47 = vmax.f32 %v1596_v14, 0.0 }
 0x1e2   : > { %v7799_v31 = vpop.f32.mrf.mxu1 }
 0x1e3   : > { %v1804_v20 = vmax.f32 %v1588_v43, 0.0  ;;  %v1862_v42 = vpack.c.bf16 %v1806_v47, %v1805_v54  ;;  %v1609_v30 = vadd.f32 %v7799_v31, %v9276_v56 }
 0x1e4   : > { %v1600_v62 = vpop.f32.mrf.mxu1 }
 0x1e5   : > { %v1861_v10 = vpack.c.bf16 %v1804_v20, %v1803_v17  ;;  %v1601_v53 = vadd.f32 %v9276_v56, %v1600_v62  ;;  %v1809_v14 = vmax.f32 %v1609_v30, 0.0 }
 0x1e6   : > { %v7800_v15 = vpop.f32.mrf.mxu1 }
 0x1e7   : > { %7861 = vmatprep.mubr.msk.bf16.mxu0 %vm1910_vm3, %v1861_v10  ;;  %v1807_v13 = vmax.f32 %v1601_v53, 0.0  ;;  %v1612_v49 = vadd.f32 %v7800_v15, %v9276_v56 }
 0x1e8   : > { %v1603_v22 = vpop.f32.mrf.mxu1  ;;  %7862 = vmatmul.mubr.msk.bf16.gmra.mxu0 %vm1910_vm3, %v1862_v42 }
 0x1e9   : > { %v1604_v0 = vadd.f32 %v9276_v56, %v1603_v22  ;;  %v1810_v35 = vmax.f32 %v1612_v49, 0.0 }
 0x1ea   : > { %v7803_v58 = vpop.f32.mrf.mxu1 }
 0x1eb   : > { %v1808_v24 = vmax.f32 %v1604_v0, 0.0  ;;  %v1864_v31 = vpack.c.bf16 %v1810_v35, %v1809_v14  ;;  %v1625_v15 = vadd.f32 %v7803_v58, %v9276_v56 }
 0x1ec   : > { %v1616_v25 = vpop.f32.mrf.mxu1 }
 0x1ed   : > { %v1863_v17 = vpack.c.bf16 %v1808_v24, %v1807_v13  ;;  %v1617_v43 = vadd.f32 %v9276_v56, %v1616_v25  ;;  %v1813_v49 = vmax.f32 %v1625_v15, 0.0 }
 0x1ee   : > { %v7804_v9 = vpop.f32.mrf.mxu1 }
 0x1ef   : > { %7865 = vmatprep.mubr.msk.bf16.mxu0 %vm1910_vm3, %v1863_v17  ;;  %v1811_v62 = vmax.f32 %v1617_v43, 0.0  ;;  %v1628_v54 = vadd.f32 %v7804_v9, %v9276_v56 }
 0x1f0   : > { %v1619_v20 = vpop.f32.mrf.mxu1  ;;  %7866 = vmatmul.mubr.msk.bf16.gmra.mxu0 %vm1910_vm3, %v1864_v31 }
 0x1f1   : > { %v1620_v10 = vadd.f32 %v9276_v56, %v1619_v20  ;;  %v1814_v42 = vmax.f32 %v1628_v54, 0.0 }
 0x1f2   : > { %v7807_v53 = vpop.f32.mrf.mxu1 }
 0x1f3   : > { %v1812_v47 = vmax.f32 %v1620_v10, 0.0  ;;  %v1866_v58 = vpack.c.bf16 %v1814_v42, %v1813_v49  ;;  %v1641_v9 = vadd.f32 %v7807_v53, %v9276_v56 }
 0x1f4   : > { %v1632_v22 = vpop.f32.mrf.mxu1 }
 0x1f5   : > { %v1865_v13 = vpack.c.bf16 %v1812_v47, %v1811_v62  ;;  %v1633_v0 = vadd.f32 %v9276_v56, %v1632_v22  ;;  %v1817_v54 = vmax.f32 %v1641_v9, 0.0 }
 0x1f6   : > { %v7808_v30 = vpop.f32.mrf.mxu1 }
 0x1f7   : > { %7869 = vmatprep.mubr.msk.bf16.mxu0 %vm1910_vm3, %v1865_v13  ;;  %v1815_v25 = vmax.f32 %v1633_v0, 0.0  ;;  %v1644_v14 = vadd.f32 %v7808_v30, %v9276_v56 }
 0x1f8   : > { %v1635_v24 = vpop.f32.mrf.mxu1  ;;  %7870 = vmatmul.mubr.msk.bf16.gmra.mxu0 %vm1910_vm3, %v1866_v58 }
 0x1f9   : > { %v1636_v17 = vadd.f32 %v9276_v56, %v1635_v24  ;;  %v1818_v31 = vmax.f32 %v1644_v14, 0.0 }
 0x1fa   : > { %v7811_v43 = vpop.f32.mrf.mxu1 }
 0x1fb   : > { %v1816_v35 = vmax.f32 %v1636_v17, 0.0  ;;  %v1868_v53 = vpack.c.bf16 %v1818_v31, %v1817_v54  ;;  %v1657_v30 = vadd.f32 %v7811_v43, %v9276_v56 }
 0x1fc   : > { %v1648_v20 = vpop.f32.mrf.mxu1 }
 0x1fd   : > { %v1867_v62 = vpack.c.bf16 %v1816_v35, %v1815_v25  ;;  %v1649_v10 = vadd.f32 %v9276_v56, %v1648_v20  ;;  %v1821_v14 = vmax.f32 %v1657_v30, 0.0 }
 0x1fe   : > { %v7812_v15 = vpop.f32.mrf.mxu1 }
 0x1ff   : > { %7873 = vmatprep.mubr.msk.bf16.mxu0 %vm1910_vm3, %v1867_v62  ;;  %v1819_v22 = vmax.f32 %v1649_v10, 0.0  ;;  %v1660_v49 = vadd.f32 %v7812_v15, %v9276_v56 }
 0x200   : > { %v1651_v47 = vpop.f32.mrf.mxu1  ;;  %7874 = vmatmul.mubr.msk.bf16.gmra.mxu0 %vm1910_vm3, %v1868_v53 }
 0x201   : > { %v1652_v13 = vadd.f32 %v9276_v56, %v1651_v47  ;;  %v1822_v58 = vmax.f32 %v1660_v49, 0.0 }
 0x202   : > { %v7815_v0 = vpop.f32.mrf.mxu1 }
 0x203   : > { %v1820_v42 = vmax.f32 %v1652_v13, 0.0  ;;  %v1870_v43 = vpack.c.bf16 %v1822_v58, %v1821_v14  ;;  %v1673_v15 = vadd.f32 %v7815_v0, %v9276_v56 }
 0x204   : > { %v1664_v24 = vpop.f32.mrf.mxu1 }
 0x205   : > { %v1869_v25 = vpack.c.bf16 %v1820_v42, %v1819_v22  ;;  %v1665_v17 = vadd.f32 %v9276_v56, %v1664_v24  ;;  %v1825_v49 = vmax.f32 %v1673_v15, 0.0 }
 0x206   : > { %v7816_v9 = vpop.f32.mrf.mxu1 }
 0x207   : > { %7877 = vmatprep.mubr.msk.bf16.mxu0 %vm1910_vm3, %v1869_v25  ;;  %v1823_v20 = vmax.f32 %v1665_v17, 0.0  ;;  %v1676_v54 = vadd.f32 %v7816_v9, %v9276_v56 }
 0x208   : > { %v1667_v35 = vpop.f32.mrf.mxu1  ;;  %7878 = vmatmul.mubr.msk.bf16.gmra.mxu0 %vm1910_vm3, %v1870_v43 }
 0x209   : > { %v1668_v62 = vadd.f32 %v9276_v56, %v1667_v35  ;;  %v1826_v53 = vmax.f32 %v1676_v54, 0.0 }
 0x20a   : > { %v7819_v10 = vpop.f32.mrf.mxu1 }
 0x20b   : > { %v1824_v31 = vmax.f32 %v1668_v62, 0.0  ;;  %v1872_v0 = vpack.c.bf16 %v1826_v53, %v1825_v49  ;;  %v1689_v9 = vadd.f32 %v7819_v10, %v9276_v56 }
 0x20c   : > { %v1680_v47 = vpop.f32.mrf.mxu1 }
 0x20d   : > { %v1871_v22 = vpack.c.bf16 %v1824_v31, %v1823_v20  ;;  %v1681_v13 = vadd.f32 %v9276_v56, %v1680_v47  ;;  %v1829_v54 = vmax.f32 %v1689_v9, 0.0 }
 0x20e   : > { %v7820_v30 = vpop.f32.mrf.mxu1 }
 0x20f   : > { %7881 = vmatprep.mubr.msk.bf16.mxu0 %vm1910_vm3, %v1871_v22  ;;  %v1827_v24 = vmax.f32 %v1681_v13, 0.0  ;;  %v1692_v14 = vadd.f32 %v7820_v30, %v9276_v56 }
 0x210   : > { %v1683_v42 = vpop.f32.mrf.mxu1  ;;  %7882 = vmatmul.mubr.msk.bf16.gmra.mxu0 %vm1910_vm3, %v1872_v0 }
 0x211   : > { %v1684_v25 = vadd.f32 %v9276_v56, %v1683_v42  ;;  %v1830_v43 = vmax.f32 %v1692_v14, 0.0 }
 0x212   : > { %v7823_v17 = vpop.f32.mrf.mxu1 }
 0x213   : > { %v1828_v58 = vmax.f32 %v1684_v25, 0.0  ;;  %v1874_v10 = vpack.c.bf16 %v1830_v43, %v1829_v54  ;;  %v1705_v30 = vadd.f32 %v7823_v17, %v9276_v56 }
 0x214   : > { %v1696_v35 = vpop.f32.mrf.mxu1 }
 0x215   : > { %v1873_v20 = vpack.c.bf16 %v1828_v58, %v1827_v24  ;;  %v1697_v62 = vadd.f32 %v9276_v56, %v1696_v35  ;;  %v1833_v14 = vmax.f32 %v1705_v30, 0.0 }
 0x216   : > { %v7824_v15 = vpop.f32.mrf.mxu1 }
 0x217   : > { %7885 = vmatprep.mubr.msk.bf16.mxu0 %vm1910_vm3, %v1873_v20  ;;  %v1831_v47 = vmax.f32 %v1697_v62, 0.0  ;;  %v1708_v49 = vadd.f32 %v7824_v15, %v9276_v56 }
 0x218   : > { %v1699_v31 = vpop.f32.mrf.mxu1  ;;  %7886 = vmatmul.mubr.msk.bf16.gmra.mxu0 %vm1910_vm3, %v1874_v10 }
 0x219   : > { %v1700_v22 = vadd.f32 %v9276_v56, %v1699_v31  ;;  %v1834_v0 = vmax.f32 %v1708_v49, 0.0 }
 0x21a   : > { %v7827_v13 = vpop.f32.mrf.mxu1 }
 0x21b   : > { %v1832_v53 = vmax.f32 %v1700_v22, 0.0  ;;  %v1876_v17 = vpack.c.bf16 %v1834_v0, %v1833_v14  ;;  %v1721_v15 = vadd.f32 %v7827_v13, %v9276_v56 }
 0x21c   : > { %v1712_v42 = vpop.f32.mrf.mxu1 }
 0x21d   : > { %v1875_v24 = vpack.c.bf16 %v1832_v53, %v1831_v47  ;;  %v1713_v25 = vadd.f32 %v9276_v56, %v1712_v42  ;;  %v1837_v49 = vmax.f32 %v1721_v15, 0.0 }
 0x21e   : > { %v7828_v9 = vpop.f32.mrf.mxu1 }
 0x21f   : > { %7889 = vmatprep.mubr.msk.bf16.mxu0 %vm1910_vm3, %v1875_v24  ;;  %v1835_v35 = vmax.f32 %v1713_v25, 0.0  ;;  %v1724_v54 = vadd.f32 %v7828_v9, %v9276_v56  ;;  %v12191_v25 = vmov 0  }
 0x220   : > { %v1715_v58 = vpop.f32.mrf.mxu1  ;;  %7890 = vmatmul.mubr.msk.bf16.gmra.mxu0 %vm1910_vm3, %v1876_v17  ;;  %3365 = vmatprep.mubr.bf16.mxu1 %v12191_v25 }
 0x221   : > { %v1716_v20 = vadd.f32 %v9276_v56, %v1715_v58  ;;  %v1838_v10 = vmax.f32 %v1724_v54, 0.0  ;;  %4013 = vmatprep.subr.bf16.mxu0 %v12191_v25 }
 0x222   : > { %v7831_v62 = vpop.f32.mrf.mxu1 }
 0x223   : > { %v1836_v43 = vmax.f32 %v1716_v20, 0.0  ;;  %v1878_v9 = vpack.c.bf16 %v1838_v10, %v1837_v49  ;;  %v1737_v14 = vadd.f32 %v7831_v62, %v9276_v56 }
 0x224   : > { %v1728_v31 = vpop.f32.mrf.mxu1 }
 0x225   : > { %v1877_v47 = vpack.c.bf16 %v1836_v43, %v1835_v35  ;;  %v1729_v22 = vadd.f32 %v9276_v56, %v1728_v31  ;;  %v1841_v54 = vmax.f32 %v1737_v14, 0.0 }
 0x226   : > { %v7832_v30 = vpop.f32.mrf.mxu1 }
 0x227   : > { %7893 = vmatprep.mubr.msk.bf16.mxu0 %vm1910_vm3, %v1877_v47  ;;  %v1839_v42 = vmax.f32 %v1729_v22, 0.0  ;;  %v1740_v0 = vadd.f32 %v7832_v30, %v9276_v56 }
 0x228   : > { %v1731_v53 = vpop.f32.mrf.mxu1  ;;  %7894 = vmatmul.mubr.msk.bf16.gmra.mxu0 %vm1910_vm3, %v1878_v9 }
 0x229   : > { %v1732_v24 = vadd.f32 %v9276_v56, %v1731_v53  ;;  %v1842_v43 = vmax.f32 %v1740_v0, 0.0 }
 0x22a   : > { %v7835_v13 = vpop.f32.mrf.mxu1 }
 0x22b   : > { %v1840_v58 = vmax.f32 %v1732_v24, 0.0  ;;  %v1880_v62 = vpack.c.bf16 %v1842_v43, %v1841_v54  ;;  %v1753_v30 = vadd.f32 %v7835_v13, %v9276_v56 }
 0x22c   : > { %v1744_v35 = vpop.f32.mrf.mxu1 }
 0x22d   : > { %v1879_v20 = vpack.c.bf16 %v1840_v58, %v1839_v42  ;;  %v1745_v17 = vadd.f32 %v9276_v56, %v1744_v35  ;;  %v1845_v58 = vmax.f32 %v1753_v30, 0.0 }
 0x22e   : > { %v7836_v15 = vpop.f32.mrf.mxu1 }
 0x22f   : > { %7897 = vmatprep.mubr.msk.bf16.mxu0 %vm1910_vm3, %v1879_v20  ;;  %v1843_v47 = vmax.f32 %v1745_v17, 0.0  ;;  %v1756_v10 = vadd.f32 %v7836_v15, %v9276_v56 }
 0x230   : > { %v1747_v31 = vpop.f32.mrf.mxu1  ;;  %7898 = vmatmul.mubr.msk.bf16.gmra.mxu0 %vm1910_vm3, %v1880_v62 }
 0x231   : > { %v1748_v22 = vadd.f32 %v9276_v56, %v1747_v31  ;;  %v1846_v9 = vmax.f32 %v1756_v10, 0.0 }
 0x232   : > { %v7839_v49 = vpop.f32.mrf.mxu1 }
 0x233   : > { %v1844_v53 = vmax.f32 %v1748_v22, 0.0  ;;  %v1882_v13 = vpack.c.bf16 %v1846_v9, %v1845_v58  ;;  %v1769_v15 = vadd.f32 %v7839_v49, %v9276_v56 }
 0x234   : > { %v1760_v42 = vpop.f32.mrf.mxu1 }
 0x235   : > { %v1881_v24 = vpack.c.bf16 %v1844_v53, %v1843_v47  ;;  %v1761_v14 = vadd.f32 %v9276_v56, %v1760_v42  ;;  %v1849_v53 = vmax.f32 %v1769_v15, 0.0  ;;  %v8048_v15 = vld [vmem:[%s12137_s14 + $0x38] sm:$0xff]  }
 0x236   : > { %v7840_v0 = vpop.f32.mrf.mxu1  ;;  %4014 = vmatpush1.bf16.msra.mxu0 %v8048_v15 }
 0x237   : > { %7901 = vmatprep.mubr.msk.bf16.mxu0 %vm1910_vm3, %v1881_v24  ;;  %v1847_v20 = vmax.f32 %v1761_v14, 0.0  ;;  %v1772_v43 = vadd.f32 %v7840_v0, %v9276_v56  ;;  %4015 = vmatprep.subr.bf16.mxu0 %v12191_v25 }
 0x238   : > { %v1763_v35 = vpop.f32.mrf.mxu1  ;;  %7902 = vmatmul.mubr.msk.bf16.gmra.mxu0 %vm1910_vm3, %v1882_v13 }
 0x239   : > { %v1764_v17 = vadd.f32 %v9276_v56, %v1763_v35  ;;  %v1850_v62 = vmax.f32 %v1772_v43, 0.0  ;;  %v9484_v43 = vld [vmem:[%s12128_s5] ss:$0 sm:$0xff] }
 0x23a   : > { %v7843_v54 = vpop.f32.mrf.mxu1 }
 0x23b   : > { %v1848_v31 = vmax.f32 %v1764_v17, 0.0  ;;  %v1884_v58 = vpack.c.bf16 %v1850_v62, %v1849_v53  ;;  %v1785_v49 = vadd.f32 %v7843_v54, %v9276_v56  ;;  %v8050_v54 = vld [vmem:[%s12137_s14 + $0x28] sm:$0xff]  }
 0x23c   : > { %v1776_v47 = vpop.f32.mrf.mxu1 }
 0x23d   : > { %v1883_v22 = vpack.c.bf16 %v1848_v31, %v1847_v20  ;;  %v1777_v30 = vadd.f32 %v9276_v56, %v1776_v47  ;;  %v1853_v20 = vmax.f32 %v1785_v49, 0.0  ;;  %v881_v31 = vadd.f32 %v9484_v43, %v8771_v63  ;;  %v8052_v63 = vld [vmem:[%s12137_s14 + $0x18] sm:$0xff]   ;;  %v9506_v49 = vld [vmem:[%s12134_s11] ss:$0 sm:$0xff] }
 0x23e   : > { %v7844_v10 = vpop.f32.mrf.mxu1 }
 0x23f   : > { %7905 = vmatprep.mubr.msk.bf16.mxu0 %vm1910_vm3, %v1883_v22  ;;  %v1851_v24 = vmax.f32 %v1777_v30, 0.0  ;;  %v1788_v0 = vadd.f32 %v7844_v10, %v9276_v56  ;;  %v5533_v47 = vrot.slane %v881_v31, %v8793_v23  ;;  %v8051_v22 = vld [vmem:[%s12137_s14 + $0x20] sm:$0xff]   ;;  %v5526_v30 = vcombine.high %v881_v31, %v881_v31 }
 0x240   : > { %v1779_v42 = vpop.f32.mrf.mxu1  ;;  %7906 = vmatmul.mubr.msk.bf16.gmra.mxu0 %vm1910_vm3, %v1884_v58 }
 0x241   : > { %v1780_v14 = vadd.f32 %v9276_v56, %v1779_v42  ;;  %v1854_v17 = vmax.f32 %v1788_v0, 0.0  ;;  %v8049_v56 = vld [vmem:[%s12137_s14 + $0x30] sm:$0xff]   ;;  %v5541_v10 = vcombine.high %v5533_v47, %v5533_v47  ;;  %v5549_v53 = vrot.slane %v5533_v47, %v8793_v23 }
 0x242   : > { %4016 = vmatpush1.bf16.msra.mxu0 %v8049_v56  ;;  %v5540_v62 = vrot.slane %v5526_v30, %v8793_v23  ;;  %v8053_v30 = vld [vmem:[%s12137_s14 + $0x10] sm:$0xff]  }
 0x243   : > { %v1852_v9 = vmax.f32 %v1780_v14, 0.0  ;;  %v1886_v13 = vpack.c.bf16 %v1854_v17, %v1853_v20  ;;  %4017 = vmatprep.subr.bf16.mxu0 %v12191_v25  ;;  %v5563_v42 = vrot.slane %v5541_v10, %v8793_v23  ;;  %v8325_v14 = vld [vmem:[%s12126_s3] ss:$0 sm:$0xff] }
 0x244   : > { %v804_v58 = vadd.f32 %v8325_v14, %v8778_v4  ;;  %v5542_v0 = vcombine.high %v5540_v62, %v5540_v62  ;;  %v9516_v4 = vld [vmem:[%s12130_s7] ss:$0 sm:$0xff] }
 0x245   : > { %v1885_v35 = vpack.c.bf16 %v1852_v9, %v1851_v24  ;;  %v5571_v24 = vcombine.high %v5549_v53, %v5549_v53  ;;  %v5556_v9 = vrot.slane %v5540_v62, %v8793_v23  ;;  %v1229_v56 = vadd.f32 %v9516_v4, %v8805_v37 }
 0x246   : > { %4018 = vmatpush1.bf16.msra.mxu0 %v8050_v54  ;;  %v2360_v15 = vrot.slane %v804_v58, %v8793_v23  ;;  %v2353_v10 = vcombine.high %v804_v58, %v804_v58  ;;  %v2703_v62 = vrot.slane %v8820_v48, %v8826_v52  ;;  %v5570_v14 = vrot.slane %v5542_v0, %v8793_v23 }
 0x247   : > { %7909 = vmatprep.mubr.msk.bf16.mxu0 %vm1910_vm3, %v1885_v35  ;;  %4019 = vmatprep.subr.bf16.mxu0 %v12191_v25  ;;  %v5929_v17 = vrot.slane %v5571_v24, %v8826_v52  ;;  %v5925_v48 = vrot.slane %v5563_v42, %v8826_v52  ;;  %v12294_v0 = vsub.f32 %v8841_v59, %v8831_v55 }
 0x248   : > { %7910 = vmatmul.mubr.msk.bf16.gmra.mxu0 %vm1910_vm3, %v1886_v13  ;;  %v5573_v13 = vcombine.high %v5563_v42, %v5563_v42  ;;  %v3017_v58 = vsub.f32 %v2703_v62, %v1229_v56  ;;  %v2367_v56 = vrot.slane %v2353_v10, %v8793_v23  ;;  %v12298_v10 = vmov 0  }
 0x24a   : > { %4020 = vmatpush1.bf16.msra.mxu0 %v8051_v22  ;;  %v5921_v22 = vrot.slane %v5549_v53, %v8826_v52  ;;  %v8054_v53 = vld [vmem:[%s12137_s14 + $0x8] sm:$0xff]  }
 0x24b   : > { %4021 = vmatprep.subr.bf16.mxu0 %v12191_v25 }
 0x24e   : > { %4022 = vmatpush1.bf16.msra.mxu0 %v8052_v63  ;;  %v5572_v63 = vcombine.high %v5556_v9, %v5556_v9 }
 0x24f   : > { %4023 = vmatprep.subr.bf16.mxu0 %v12191_v25 }
 0x252   : > { %4024 = vmatpush1.bf16.msra.mxu0 %v8053_v30 }
 0x253   : > { %4025 = vmatprep.subr.bf16.mxu0 %v12191_v25  ;;  %v5945_v25 = vrot.slane %v5572_v63, %v8826_v52 }
 0x256   : > { %4026 = vmatpush1.bf16.msra.mxu0 %v8054_v53 }
 0x257   : > { %4027 = vmatprep.subr.bf16.mxu0 %v12298_v10 }
 0x290   : > { %v7851_v35 = vpop.f32.mrf.mxu0 }
 0x291   : > { %v2050_v20 = vadd.f32 %v7851_v35, %v9506_v49 }
 0x292   : > { %v2041_v54 = vpop.f32.mrf.mxu0 }
 0x293   : > { %v9520_v31 = vadd.f32 %v5929_v17, %v2050_v20  ;;  %v2042_v47 = vadd.f32 %v9506_v49, %v2041_v54  ;;  %v5933_v17 = vrot.slane %v5573_v13, %v8826_v52  ;;  %v2368_v54 = vcombine.high %v2360_v15, %v2360_v15 }
 0x294   : > { %v7852_v24 = vpop.f32.mrf.mxu0  ;;  %v12295_v13 = vsub.f32 %v8876_v39, %v8870_v32  ;;  %v9561_v39 = vrot.slane %v2360_v15, %v8793_v23  ;;  %v2719_v15 = vrot.slane %v8946_v38, %v8826_v52 }
 0x295   : > { %12292 = vst [vmem:[#allocation81_spill] sm:$0xff] %v9520_v31  ;;  %v9530_v37 = vadd.f32 %v5921_v22, %v2042_v47  ;;  %v2053_v35 = vadd.f32 %v7852_v24, %v9506_v49  ;;  %v9542_v22 = vadd.f32 %v12294_v0, %v2050_v20  ;;  %v3080_v42 = vadd.f32 %v8891_v44, %v2042_v47 }
 0x296   : > { %v2044_v45 = vpop.f32.mrf.mxu0  ;;  %v5574_v31 = vcombine.high %v5570_v14, %v5570_v14  ;;  %v1245_v44 = vadd.f32 %v9516_v4, %v8850_v6 }
 0x297   : > { %12293 = vst [vmem:[#allocation82_spill] sm:$0xff] %v9530_v37  ;;  %v9547_v30 = vadd.f32 %v12295_v13, %v2053_v35  ;;  %v9549_v24 = vadd.f32 %v5933_v17, %v2053_v35  ;;  %v2045_v2 = vadd.f32 %v9506_v49, %v2044_v45  ;;  %v9564_v45 = vrot.slane %v2368_v54, %v8793_v23 }
 0x298   : > { %v7855_v62 = vpop.f32.mrf.mxu0  ;;  %v5937_v17 = vrot.slane %v5556_v9, %v8826_v52  ;;  %v2369_v54 = vcombine.high %v2367_v56, %v2367_v56  ;;  %v3021_v0 = vsub.f32 %v2719_v15, %v1245_v44  ;;  %v2398_v9 = vcombine.high %v9561_v39, %v9561_v39 }
 0x299   : > { %12296 = vst [vmem:[#allocation83_spill] sm:$0xff] %v9549_v24  ;;  %v3145_v55 = vpack.c.bf16 %v9547_v30, %v9542_v22  ;;  %v3081_v59 = vadd.f32 %v3017_v58, %v2045_v2  ;;  %v9557_v20 = vadd.f32 %v5925_v48, %v2045_v2  ;;  %v2066_v32 = vadd.f32 %v7855_v62, %v9506_v49 }
 0x29a   : > { %v2057_v47 = vpop.f32.mrf.mxu0  ;;  %v5949_v48 = vrot.slane %v5574_v31, %v8826_v52  ;;  %v2400_v38 = vcombine.high %v9564_v45, %v9564_v45  ;;  %v5941_v13 = vrot.slane %v5570_v14, %v8826_v52  ;;  %v12301_v31 = vsub.f32 %v8927_v60, %v8907_v18  ;;  %v12304_v60 = vld [vmem:[#allocation33_spill] sm:$0xff] }
 0x29b   : > { %12297 = vst [vmem:[#allocation84_spill] sm:$0xff] %v9557_v20  ;;  %v3144_v63 = vpack.c.bf16 %v3081_v59, %v3080_v42  ;;  %v9569_v35 = vadd.f32 %v5945_v25, %v2066_v32  ;;  %v2058_v2 = vadd.f32 %v9506_v49, %v2057_v47  ;;  %v8055_v25 = vld [vmem:[%s12137_s14] sm:$0xff]   ;;  %v12302_v42 = vsub.f32 %v8984_v51, %v8962_v28 }
 0x29c   : > { %v7856_v53 = vpop.f32.mrf.mxu0  ;;  %v9592_v30 = vadd.f32 %v12301_v31, %v2066_v32  ;;  %4028 = vmatpush1.bf16.msra.mxu0 %v8055_v25  ;;  %v1266_v14 = vadd.f32 %v9516_v4, %v8864_v19  ;;  %v1269_v47 = vadd.f32 %v9516_v4, %v8900_v1  ;;  %v2739_v15 = vrot.slane %v2398_v9, %v8826_v52 }
 0x29d   : > { %12299 = vst [vmem:[#allocation85_spill] sm:$0xff] %v9569_v35  ;;  %v9575_v58 = vadd.f32 %v5937_v17, %v2058_v2  ;;  %v2069_v6 = vadd.f32 %v7856_v53, %v9506_v49  ;;  %7503 = vmatmul.mubr.msk.bf16.vlgmr.msra.gmra.mxu1 %vm3236_vm4, %v3144_v63  ;;  %4029 = vmatprep.subr.bf16.mxu0 %v12298_v10 }
 0x29e   : > { %v2060_v22 = vpop.f32.mrf.mxu0  ;;  %3375 = vmatprep.mubr.bf16.mxu1 %v12298_v10  ;;  %v3084_v18 = vadd.f32 %v12304_v60, %v2058_v2  ;;  %v9613_v17 = vrot.slane %v2367_v56, %v8793_v23  ;;  %v2743_v1 = vrot.slane %v2400_v38, %v8826_v52  ;;  %v9620_v53 = vrot.slane %v2369_v54, %v8793_v23  ;;  %v8056_v54 = vld [vmem:[%s12137_s14 + $0x78] sm:$0xff]   ;;  %v12308_v60 = vld [vmem:[#allocation32_spill] sm:$0xff] }
 0x29f   : > { %12300 = vst [vmem:[#allocation86_spill] sm:$0xff] %v9575_v58  ;;  %v9597_v62 = vadd.f32 %v12302_v42, %v2069_v6  ;;  %v9599_v59 = vadd.f32 %v5949_v48, %v2069_v6  ;;  %v2061_v44 = vadd.f32 %v9506_v49, %v2060_v22  ;;  %v12306_v48 = vld [vmem:[#allocation14_spill] sm:$0xff]  ;;  %v3026_v22 = vsub.f32 %v2739_v15, %v1266_v14 }
 0x2a0   : > { %v7859_v63 = vpop.f32.mrf.mxu0  ;;  %v5631_v25 = vrot.slane %v12306_v48, %v8793_v23  ;;  %v3027_v56 = vsub.f32 %v2743_v1, %v1269_v47  ;;  %v2399_v38 = vcombine.high %v9613_v17, %v9613_v17  ;;  %v2401_v31 = vcombine.high %v9620_v53, %v9620_v53  ;;  %4030 = vmatpush2.bf16.msra.mxu0 %v8056_v54 }
 0x2a1   : > { %12303 = vst [vmem:[#allocation87_spill] sm:$0xff] %v9599_v59  ;;  %v3085_v51 = vadd.f32 %v3021_v0, %v2061_v44  ;;  %v9610_v32 = vadd.f32 %v5941_v13, %v2061_v44  ;;  %v9623_v2 = vadd.f32 %v7859_v63, %v9506_v49  ;;  %4031 = vmatprep.subr.bf16.mxu0 %v12298_v10 }
 0x2a2   : > { %v9616_v19 = vpop.f32.mrf.mxu0  ;;  %v5639_v14 = vcombine.high %v5631_v25, %v5631_v25  ;;  %v5647_v63 = vrot.slane %v5631_v25, %v8793_v23 }
 0x2a3   : > { %12305 = vst [vmem:[#allocation33_spill] sm:$0xff] %v9610_v32  ;;  %v3146_v6 = vpack.c.bf16 %v3085_v51, %v3084_v18  ;;  %v9640_v42 = vadd.f32 %v3026_v22, %v9623_v2  ;;  %v1282_v18 = vadd.f32 %v9516_v4, %v12308_v60  ;;  %v12309_v51 = vld [vmem:[#allocation39_spill] sm:$0xff]  ;;  %v2755_v22 = vrot.slane %v2399_v38, %v8826_v52  ;;  %v8057_v38 = vld [vmem:[%s12137_s14 + $0x70] sm:$0xff]  }
 0x2a4   : > { %v7860_v0 = vpop.f32.mrf.mxu0  ;;  %v1285_v15 = vadd.f32 %v9516_v4, %v12309_v51  ;;  %v9664_v54 = vrot.slane %v5639_v14, %v8793_v23  ;;  %v5669_v1 = vcombine.high %v5647_v63, %v5647_v63  ;;  %4032 = vmatpush2.bf16.msra.mxu0 %v8057_v38 }
 0x2a5   : > { %v9628_v13 = vadd.f32 %v7860_v0, %v9506_v49  ;;  %7504 = vmatmul.mubr.msk.bf16.gmra.mxu1 %vm3236_vm4, %v3145_v55  ;;  %v5624_v55 = vcombine.high %v12306_v48, %v12306_v48  ;;  %v2759_v48 = vrot.slane %v2401_v31, %v8826_v52  ;;  %v3030_v28 = vsub.f32 %v2755_v22, %v1282_v18  ;;  %v12312_v31 = vld [vmem:[#allocation15_spill] sm:$0xff] }
 0x2a6   : > { %v2076_v9 = vpop.f32.mrf.mxu0  ;;  %3385 = vmatprep.mubr.bf16.mxu1 %v12298_v10  ;;  %v5680_v22 = vrot.slane %v12312_v31, %v8793_v23  ;;  %4033 = vmatprep.subr.bf16.mxu0 %v12298_v10  ;;  %v5671_v38 = vcombine.high %v9664_v54, %v9664_v54 }
 0x2a7   : > { %12307 = vst [vmem:[#allocation14_spill] sm:$0xff] %v9628_v13  ;;  %v9643_v44 = vadd.f32 %v3027_v56, %v9628_v13  ;;  %v5638_v25 = vrot.slane %v5624_v55, %v8793_v23  ;;  %v3031_v51 = vsub.f32 %v2759_v48, %v1285_v15  ;;  %v12313_v48 = vld [vmem:[#allocation29_spill] sm:$0xff]  ;;  %v9704_v24 = vadd.f32 %v9506_v49, %v2076_v9 }
 0x2a8   : > { %v7863_v47 = vpop.f32.mrf.mxu0 }
 0x2a9   : > { %v9660_v56 = vadd.f32 %v7863_v47, %v9506_v49  ;;  %v5673_v47 = vcombine.high %v12312_v31, %v12312_v31  ;;  %v5654_v15 = vrot.slane %v5638_v25, %v8793_v23  ;;  %v12314_v31 = vld [vmem:[#allocation25_spill] sm:$0xff] }
 0x2aa   : > { %v9655_v0 = vpop.f32.mrf.mxu0  ;;  %v1258_v58 = vadd.f32 %v9516_v4, %v12314_v31  ;;  %v9714_v31 = vadd.f32 %v9506_v49, %v9616_v19  ;;  %v8058_v19 = vld [vmem:[%s12137_s14 + $0x68] sm:$0xff]  }
 0x2ab   : > { %12310 = vst [vmem:[#allocation32_spill] sm:$0xff] %v9660_v56  ;;  %v9679_v14 = vadd.f32 %v3030_v28, %v9660_v56  ;;  %v5688_v56 = vcombine.high %v5680_v22, %v5680_v22  ;;  %4034 = vmatpush2.bf16.msra.mxu0 %v8058_v19 }
 0x2ac   : > { %v7864_v60 = vpop.f32.mrf.mxu0  ;;  %4035 = vmatprep.subr.bf16.mxu0 %v12298_v10 }
 0x2ad   : > { %v9667_v59 = vadd.f32 %v7864_v60, %v9506_v49  ;;  %7505 = vmatmul.mubr.msk.bf16.gmra.mxu1 %vm3236_vm4, %v3146_v6  ;;  %v5640_v6 = vcombine.high %v5638_v25, %v5638_v25  ;;  %v1261_v60 = vadd.f32 %v9516_v4, %v12313_v48  ;;  %v9697_v25 = vrot.slane %v5673_v47, %v8793_v23 }
 0x2ae   : > { %v9675_v55 = vpop.f32.mrf.mxu0  ;;  %3395 = vmatprep.mubr.bf16.mxu1 %v12298_v10  ;;  %v2735_v48 = vrot.slane %v9564_v45, %v8826_v52  ;;  %v5985_v47 = vrot.slane %v5647_v63, %v8826_v52  ;;  %v5670_v45 = vcombine.high %v5654_v15, %v5654_v15  ;;  %v12316_v63 = vpack.c.bf16 %v9597_v62, %v9592_v30 }
 0x2af   : > { %12311 = vst [vmem:[#allocation39_spill] sm:$0xff] %v9667_v59  ;;  %v9682_v18 = vadd.f32 %v3031_v51, %v9667_v59  ;;  %v5993_v51 = vrot.slane %v5669_v1, %v8826_v52  ;;  %v9717_v9 = vrot.slane %v5640_v6, %v8793_v23  ;;  %v12317_v30 = vsub.f32 %v9113_v16, %v9094_v29 }
 0x2b0   : > { %v7867_v35 = vpop.f32.mrf.mxu0  ;;  %v3025_v37 = vsub.f32 %v2735_v48, %v1261_v60  ;;  %v9731_v60 = vrot.slane %v5680_v22, %v8793_v23  ;;  %v6009_v29 = vrot.slane %v5670_v45, %v8826_v52 }
 0x2b1   : > { %v2114_v32 = vadd.f32 %v7867_v35, %v9506_v49  ;;  %v2731_v35 = vrot.slane %v9561_v39, %v8826_v52  ;;  %v5672_v16 = vcombine.high %v9717_v9, %v9717_v9 }
 0x2b2   : > { %v2105_v28 = vpop.f32.mrf.mxu0 }
 0x2b3   : > { %v9708_v1 = vadd.f32 %v5993_v51, %v2114_v32  ;;  %v2106_v20 = vadd.f32 %v9506_v49, %v2105_v28  ;;  %v5997_v51 = vrot.slane %v5671_v38, %v8826_v52  ;;  %v3024_v6 = vsub.f32 %v2731_v35, %v1258_v58 }
 0x2b4   : > { %v7868_v59 = vpop.f32.mrf.mxu0  ;;  %v3089_v28 = vadd.f32 %v3025_v37, %v9704_v24  ;;  %v9740_v62 = vadd.f32 %v12317_v30, %v2114_v32  ;;  %v12318_v38 = vsub.f32 %v9149_v7, %v9131_v33  ;;  %v9773_v30 = vrot.slane %v5688_v56, %v8793_v23  ;;  %v8059_v56 = vld [vmem:[%s12137_s14 + $0x60] sm:$0xff]  }
 0x2b5   : > { %12315 = vst [vmem:[#allocation15_spill] sm:$0xff] %v9708_v1  ;;  %v9719_v13 = vadd.f32 %v5985_v47, %v2106_v20  ;;  %v2117_v39 = vadd.f32 %v7868_v59, %v9506_v49  ;;  %7506 = vmatmul.mubr.msk.bf16.gmra.mxu1 %vm3236_vm4, %v12316_v63  ;;  %v5989_v59 = vrot.slane %v9664_v54, %v8826_v52  ;;  %v12320_v54 = vld [vmem:[#allocation55_spill] sm:$0xff] }
 0x2b6   : > { %v2108_v48 = vpop.f32.mrf.mxu0  ;;  %3405 = vmatprep.mubr.bf16.mxu1 %v12298_v10  ;;  %v3088_v58 = vadd.f32 %v3024_v6, %v9714_v31  ;;  %v9752_v35 = vadd.f32 %v12320_v54, %v2106_v20  ;;  %v12323_v54 = vld [vmem:[#allocation20_spill] sm:$0xff]  ;;  %4036 = vmatpush2.bf16.msra.mxu0 %v8059_v56  ;;  %v9838_v56 = vadd.f32 %v9506_v49, %v9675_v55 }
 0x2b7   : > { %v9745_v47 = vadd.f32 %v12318_v38, %v2117_v39  ;;  %v9747_v22 = vadd.f32 %v5997_v51, %v2117_v39  ;;  %v2109_v37 = vadd.f32 %v9506_v49, %v2108_v48  ;;  %v6001_v51 = vrot.slane %v5654_v15, %v8826_v52  ;;  %4037 = vmatprep.subr.bf16.mxu0 %v12298_v10 }
 0x2b8   : > { %v7871_v63 = vpop.f32.mrf.mxu0  ;;  %v3148_v19 = vpack.c.bf16 %v3089_v28, %v3088_v58  ;;  %v5689_v38 = vcombine.high %v9697_v25, %v9697_v25  ;;  %v6013_v28 = vrot.slane %v5672_v16, %v8826_v52  ;;  %v9789_v58 = vrot.slane %v9697_v25, %v8793_v23 }
 0x2b9   : > { %12319 = vst [vmem:[#allocation29_spill] sm:$0xff] %v9747_v22  ;;  %v9761_v33 = vadd.f32 %v9153_v50, %v2109_v37  ;;  %v9763_v32 = vadd.f32 %v5989_v59, %v2109_v37  ;;  %v2130_v39 = vadd.f32 %v7871_v63, %v9506_v49  ;;  %v5718_v59 = vcombine.high %v9731_v60, %v9731_v60 }
 0x2ba   : > { %v2121_v20 = vpop.f32.mrf.mxu0  ;;  %v5722_v63 = vcombine.high %v12323_v54, %v12323_v54  ;;  %v6005_v16 = vrot.slane %v9717_v9, %v8826_v52  ;;  %v12326_v25 = vsub.f32 %v9229_v61, %v9187_v41  ;;  %v5719_v55 = vcombine.high %v9789_v58, %v9789_v58 }
 0x2bb   : > { %v9769_v6 = vadd.f32 %v6009_v29, %v2130_v39  ;;  %v2122_v48 = vadd.f32 %v9506_v49, %v2121_v20  ;;  %v9795_v29 = vrot.slane %v12323_v54, %v8793_v23 }
 0x2bc   : > { %v7872_v50 = vpop.f32.mrf.mxu0 }
 0x2bd   : > { %12321 = vst [vmem:[#allocation25_spill] sm:$0xff] %v9769_v6  ;;  %v9779_v37 = vadd.f32 %v6001_v51, %v2122_v48  ;;  %v2133_v15 = vadd.f32 %v7872_v50, %v9506_v49  ;;  %7507 = vmatmul.mubr.msk.bf16.gmra.mxu1 %vm3236_vm4, %v3148_v19  ;;  %v12324_v51 = vld [vmem:[#allocation58_spill] sm:$0xff]  ;;  %v12328_v6 = vld [vmem:[#allocation41_spill] sm:$0xff] }
 0x2be   : > { %v2124_v20 = vpop.f32.mrf.mxu0  ;;  %3415 = vmatprep.mubr.bf16.mxu1 %v12298_v10  ;;  %v12325_v19 = vsub.f32 %v9173_v21, %v12324_v51  ;;  %v1277_v9 = vadd.f32 %v9516_v4, %v12328_v6  ;;  %v6025_v21 = vrot.slane %v5718_v59, %v8826_v52  ;;  %v2747_v59 = vrot.slane %v9613_v17, %v8826_v52 }
 0x2bf   : > { %12322 = vst [vmem:[#allocation55_spill] sm:$0xff] %v9779_v37  ;;  %v9808_v7 = vadd.f32 %v12326_v25, %v2133_v15  ;;  %v9810_v45 = vadd.f32 %v6013_v28, %v2133_v15  ;;  %v2125_v54 = vadd.f32 %v9506_v49, %v2124_v20  ;;  %v12329_v37 = vld [vmem:[#allocation63_spill] sm:$0xff]  ;;  %v2751_v28 = vrot.slane %v9620_v53, %v8826_v52 }
 0x2c0   : > { %v9803_v50 = vadd.f32 %v12325_v19, %v2130_v39  ;;  %v9816_v22 = vadd.f32 %v12329_v37, %v2122_v48  ;;  %v7875_v1 = vpop.f32.mrf.mxu0  ;;  %v5720_v39 = vcombine.high %v9773_v30, %v9773_v30  ;;  %v12330_v48 = vld [vmem:[#allocation36_spill] sm:$0xff]  ;;  %v9849_v17 = vadd.f32 %v9506_v49, %v9655_v0  ;;  %v8060_v0 = vld [vmem:[%s12137_s14 + $0x58] sm:$0xff]  }
 0x2c1   : > { %12327 = vst [vmem:[#allocation20_spill] sm:$0xff] %v9810_v45  ;;  %v9825_v61 = vadd.f32 %v9231_v12, %v2125_v54  ;;  %v9827_v15 = vadd.f32 %v6005_v16, %v2125_v54  ;;  %v2146_v6 = vadd.f32 %v7875_v1, %v9506_v49  ;;  %v1274_v37 = vadd.f32 %v9516_v4, %v12330_v48 }
 0x2c2   : > { %v2137_v20 = vpop.f32.mrf.mxu0  ;;  %v6017_v4 = vrot.slane %v9731_v60, %v8826_v52  ;;  %v3029_v51 = vsub.f32 %v2751_v28, %v1277_v9  ;;  %v5717_v19 = vrot.slane %v5689_v38, %v8793_v23  ;;  %v5737_v25 = vcombine.high %v9795_v29, %v9795_v29  ;;  %4038 = vmatpush2.bf16.msra.mxu0 %v8060_v0 }
 0x2c3   : > { %v9842_v16 = vadd.f32 %v6025_v21, %v2146_v6  ;;  %v2138_v1 = vadd.f32 %v9506_v49, %v2137_v20  ;;  %v6029_v60 = vrot.slane %v5720_v39, %v8826_v52  ;;  %v12333_v9 = vpack.c.bf16 %v9643_v44, %v9640_v42  ;;  %v12334_v42 = vld [vmem:[#allocation67_spill] sm:$0xff]  ;;  %4039 = vmatprep.subr.bf16.mxu0 %v12298_v10 }
 0x2c4   : > { %v7876_v53 = vpop.f32.mrf.mxu0  ;;  %v9869_v38 = vrot.slane %v9795_v29, %v8793_v23  ;;  %v3028_v48 = vsub.f32 %v2747_v59, %v1274_v37  ;;  %v3093_v28 = vadd.f32 %v3029_v51, %v9838_v56  ;;  %v6021_v39 = vrot.slane %v9773_v30, %v8826_v52  ;;  %v12338_v30 = vld [vmem:[#allocation71_spill] sm:$0xff] }
 0x2c5   : > { %12331 = vst [vmem:[#allocation58_spill] sm:$0xff] %v9842_v16  ;;  %v9856_v54 = vadd.f32 %v6017_v4, %v2138_v1  ;;  %v2149_v21 = vadd.f32 %v7876_v53, %v9506_v49  ;;  %7508 = vmatmul.mubr.msk.bf16.gmra.mxu1 %vm3236_vm4, %v12333_v9  ;;  %v12335_v44 = vsub.f32 %v9240_v34, %v12334_v42  ;;  %v12410_v16 = vld [vmem:[#allocation49_spill] sm:$0xff] }
 0x2c6   : > { %v2140_v20 = vpop.f32.mrf.mxu0  ;;  %3425 = vmatprep.mubr.bf16.mxu1 %v12298_v10  ;;  %v12336_v53 = vsub.f32 %v9279_v5, %v9258_v40  ;;  %v3092_v59 = vadd.f32 %v3028_v48, %v9849_v17  ;;  %v9890_v51 = vadd.f32 %v12338_v30, %v2138_v1  ;;  %v6041_v34 = vrot.slane %v5719_v55, %v8826_v52  ;;  %v12339_v40 = vld [vmem:[#allocation75_spill] sm:$0xff]  ;;  %v12345_v5 = vld [vmem:[#allocation74_spill] sm:$0xff] }
 0x2c7   : > { %12332 = vst [vmem:[#allocation41_spill] sm:$0xff] %v9856_v54  ;;  %v9878_v4 = vadd.f32 %v12335_v44, %v2146_v6  ;;  %v9885_v29 = vadd.f32 %v6029_v60, %v2149_v21  ;;  %v2141_v37 = vadd.f32 %v9506_v49, %v2140_v20  ;;  %v5721_v6 = vcombine.high %v5717_v19, %v5717_v19 }
 0x2c8   : > { %v9883_v9 = vadd.f32 %v12336_v53, %v2149_v21  ;;  %v7879_v41 = vpop.f32.mrf.mxu0  ;;  %v5736_v48 = vrot.slane %v5722_v63, %v8793_v23  ;;  %v6033_v20 = vrot.slane %v9789_v58, %v8826_v52  ;;  %v3150_v55 = vpack.c.bf16 %v3093_v28, %v3092_v59  ;;  %v8061_v28 = vld [vmem:[%s12137_s14 + $0x50] sm:$0xff]  }
 0x2c9   : > { %12337 = vst [vmem:[#allocation63_spill] sm:$0xff] %v9885_v29  ;;  %v9897_v21 = vadd.f32 %v12339_v40, %v2141_v37  ;;  %v9899_v60 = vadd.f32 %v6021_v39, %v2141_v37  ;;  %v2162_v0 = vadd.f32 %v7879_v41, %v9506_v49  ;;  %v5759_v30 = vrot.slane %v5737_v25, %v8793_v23 }
 0x2ca   : > { %v2153_v1 = vpop.f32.mrf.mxu0  ;;  %v5767_v41 = vcombine.high %v9869_v38, %v9869_v38  ;;  %v6045_v58 = vrot.slane %v5721_v6, %v8826_v52  ;;  %v5738_v59 = vcombine.high %v5736_v48, %v5736_v48  ;;  %v12347_v6 = vsub.f32 %v9344_v3, %v9309_v8  ;;  %4040 = vmatpush2.bf16.msra.mxu0 %v8061_v28  ;;  %v12350_v3 = vld [vmem:[#allocation80_spill] sm:$0xff] }
 0x2cb   : > { %12340 = vst [vmem:[#allocation36_spill] sm:$0xff] %v9899_v60  ;;  %v9907_v44 = vadd.f32 %v6041_v34, %v2162_v0  ;;  %v2154_v53 = vadd.f32 %v9506_v49, %v2153_v1  ;;  %v12343_v34 = vld [vmem:[#allocation19_spill] sm:$0xff]  ;;  %v6037_v1 = vrot.slane %v5717_v19, %v8826_v52  ;;  %4041 = vmatprep.subr.bf16.mxu0 %v12298_v10 }
 0x2cc   : > { %v7880_v39 = vpop.f32.mrf.mxu0  ;;  %v900_v25 = vadd.f32 %v9484_v43, %v12343_v34  ;;  %v5752_v43 = vrot.slane %v5736_v48, %v8793_v23  ;;  %v12349_v19 = vld [vmem:[#allocation79_spill] sm:$0xff]  ;;  %v12354_v8 = vpack.c.bf16 %v9682_v18, %v9679_v14  ;;  %v12356_v14 = vsub.f32 %v9372_v46, %v9359_v36 }
 0x2cd   : > { %12341 = vst [vmem:[#allocation67_spill] sm:$0xff] %v9907_v44  ;;  %v9913_v37 = vadd.f32 %v6033_v20, %v2154_v53  ;;  %v2165_v63 = vadd.f32 %v7880_v39, %v9506_v49  ;;  %7509 = vmatmul.mubr.msk.bf16.gmra.mxu1 %vm3236_vm4, %v3150_v55  ;;  %v12344_v20 = vld [vmem:[#allocation78_spill] sm:$0xff]  ;;  %v9940_v34 = vadd.f32 %v12349_v19, %v2154_v53 }
 0x2ce   : > { %v2156_v40 = vpop.f32.mrf.mxu0  ;;  %3435 = vmatprep.mubr.bf16.mxu1 %v12298_v10  ;;  %v12346_v39 = vsub.f32 %v12344_v20, %v12345_v5  ;;  %v6057_v5 = vrot.slane %v5767_v41, %v8826_v52  ;;  %v5778_v48 = vrot.slane %v900_v25, %v8793_v23  ;;  %v5768_v19 = vcombine.high %v5752_v43, %v5752_v43 }
 0x2cf   : > { %12342 = vst [vmem:[#allocation71_spill] sm:$0xff] %v9913_v37  ;;  %v9933_v55 = vadd.f32 %v12347_v6, %v2165_v63  ;;  %v9935_v12 = vadd.f32 %v6045_v58, %v2165_v63  ;;  %v2157_v44 = vadd.f32 %v9506_v49, %v2156_v40 }
 0x2d0   : > { %v9928_v42 = vadd.f32 %v12346_v39, %v2162_v0  ;;  %v7883_v37 = vpop.f32.mrf.mxu0  ;;  %v5769_v0 = vcombine.high %v5759_v30, %v5759_v30  ;;  %v6049_v39 = vrot.slane %v9869_v38, %v8826_v52  ;;  %v5771_v38 = vcombine.high %v900_v25, %v900_v25 }
 0x2d1   : > { %12348 = vst [vmem:[#allocation75_spill] sm:$0xff] %v9935_v12  ;;  %v9947_v63 = vadd.f32 %v12350_v3, %v2157_v44  ;;  %v9949_v58 = vadd.f32 %v6037_v1, %v2157_v44  ;;  %v2178_v28 = vadd.f32 %v7883_v37, %v9506_v49  ;;  %v5766_v44 = vrot.slane %v5738_v59, %v8793_v23 }
 0x2d2   : > { %v2169_v53 = vpop.f32.mrf.mxu0  ;;  %v6061_v3 = vrot.slane %v5769_v0, %v8826_v52  ;;  %v6053_v59 = vrot.slane %v5759_v30, %v8826_v52 }
 0x2d3   : > { %12351 = vst [vmem:[#allocation19_spill] sm:$0xff] %v9949_v58  ;;  %v9955_v41 = vadd.f32 %v6057_v5, %v2178_v28  ;;  %v2170_v20 = vadd.f32 %v9506_v49, %v2169_v53  ;;  %v8062_v5 = vld [vmem:[%s12137_s14 + $0x48] sm:$0xff]   ;;  %v5786_v53 = vcombine.high %v5778_v48, %v5778_v48 }
 0x2d4   : > { %v7884_v6 = vpop.f32.mrf.mxu0  ;;  %4042 = vmatpush2.bf16.msra.mxu0 %v8062_v5 }
 0x2d5   : > { %12352 = vst [vmem:[#allocation78_spill] sm:$0xff] %v9955_v41  ;;  %v9961_v1 = vadd.f32 %v6049_v39, %v2170_v20  ;;  %v2181_v37 = vadd.f32 %v7884_v6, %v9506_v49  ;;  %7510 = vmatmul.mubr.msk.bf16.gmra.mxu1 %vm3236_vm4, %v12354_v8  ;;  %v12355_v39 = vsub.f32 %v9350_v27, %v9336_v26 }
 0x2d6   : > { %v2172_v40 = vpop.f32.mrf.mxu0  ;;  %3445 = vmatprep.mubr.bf16.mxu1 %v12298_v10  ;;  %v5794_v6 = vrot.slane %v5778_v48, %v8793_v23  ;;  %v9989_v30 = vadd.f32 %v9366_v11, %v2170_v20  ;;  %v6073_v26 = vrot.slane %v5768_v19, %v8826_v52  ;;  %v5770_v27 = vcombine.high %v5766_v44, %v5766_v44  ;;  %v12365_v20 = vld [vmem:[#allocation27_spill] sm:$0xff] }
 0x2d7   : > { %12353 = vst [vmem:[#allocation74_spill] sm:$0xff] %v9961_v1  ;;  %v9977_v0 = vadd.f32 %v12355_v39, %v2178_v28  ;;  %v9982_v18 = vadd.f32 %v12356_v14, %v2181_v37  ;;  %v9984_v8 = vadd.f32 %v6061_v3, %v2181_v37  ;;  %v2173_v25 = vadd.f32 %v9506_v49, %v2172_v40  ;;  %v12383_v1 = vld [vmem:[#allocation35_spill] sm:$0xff] }
 0x2d8   : > { %v7887_v41 = vpop.f32.mrf.mxu0  ;;  %4043 = vmatprep.subr.bf16.mxu0 %v12298_v10  ;;  %v5785_v48 = vrot.slane %v5771_v38, %v8793_v23  ;;  %v6065_v3 = vrot.slane %v5752_v43, %v8826_v52  ;;  %v5808_v5 = vrot.slane %v5786_v53, %v8793_v23  ;;  %v5816_v39 = vcombine.high %v5794_v6, %v5794_v6  ;;  %v12362_v43 = vld [vmem:[#allocation23_spill] sm:$0xff]  ;;  %v12363_v53 = vld [vmem:[#allocation22_spill] sm:$0xff] }
 0x2d9   : > { %12357 = vst [vmem:[#allocation79_spill] sm:$0xff] %v9984_v8  ;;  %v9996_v36 = vadd.f32 %v9377_v57, %v2173_v25  ;;  %v9998_v28 = vadd.f32 %v6053_v59, %v2173_v25  ;;  %v2194_v40 = vadd.f32 %v7887_v41, %v9506_v49  ;;  %v6077_v38 = vrot.slane %v5770_v27, %v8826_v52 }
 0x2da   : > { %v2185_v11 = vpop.f32.mrf.mxu0  ;;  %v12361_v14 = vpack.c.bf16 %v9761_v33, %v9752_v35  ;;  %v5787_v25 = vcombine.high %v5785_v48, %v5785_v48  ;;  %v12364_v46 = vsub.f32 %v12362_v43, %v12363_v53  ;;  %v5801_v33 = vrot.slane %v5785_v48, %v8793_v23 }
 0x2db   : > { %12358 = vst [vmem:[#allocation80_spill] sm:$0xff] %v9998_v28  ;;  %v10004_v19 = vadd.f32 %v6073_v26, %v2194_v40  ;;  %v2186_v37 = vadd.f32 %v9506_v49, %v2185_v11  ;;  %v6069_v11 = vrot.slane %v5766_v44, %v8826_v52  ;;  %v6089_v28 = vrot.slane %v5816_v39, %v8826_v52 }
 0x2dc   : > { %v7888_v57 = vpop.f32.mrf.mxu0  ;;  %v5818_v43 = vcombine.high %v5808_v5, %v5808_v5 }
 0x2dd   : > { %12359 = vst [vmem:[#allocation88_spill] sm:$0xff] %v10004_v19  ;;  %v10009_v59 = vadd.f32 %v6065_v3, %v2186_v37  ;;  %v2197_v41 = vadd.f32 %v7888_v57, %v9506_v49  ;;  %7511 = vmatmul.mubr.msk.bf16.gmra.mxu1 %vm3236_vm4, %v12361_v14  ;;  %v10022_v3 = vadd.f32 %v12364_v46, %v2194_v40  ;;  %v12366_v57 = vld [vmem:[#allocation24_spill] sm:$0xff]  ;;  %v12369_v14 = vld [vmem:[#allocation26_spill] sm:$0xff] }
 0x2de   : > { %v2188_v26 = vpop.f32.mrf.mxu0  ;;  %3455 = vmatprep.mubr.bf16.mxu1 %v12298_v10  ;;  %v12367_v19 = vsub.f32 %v12365_v20, %v12366_v57  ;;  %v10034_v44 = vadd.f32 %v12369_v14, %v2186_v37  ;;  %v12370_v40 = vld [vmem:[#allocation30_spill] sm:$0xff]  ;;  %v6081_v57 = vrot.slane %v5794_v6, %v8826_v52  ;;  %v6093_v46 = vrot.slane %v5818_v43, %v8826_v52  ;;  %v12377_v43 = vld [vmem:[#allocation28_spill] sm:$0xff] }
 0x2df   : > { %12360 = vst [vmem:[#allocation89_spill] sm:$0xff] %v10009_v59  ;;  %v10029_v59 = vadd.f32 %v6077_v38, %v2197_v41  ;;  %v2189_v35 = vadd.f32 %v9506_v49, %v2188_v26  ;;  %v12372_v38 = vld [vmem:[#allocation17_spill] sm:$0xff]  ;;  %v6085_v37 = vrot.slane %v5808_v5, %v8826_v52 }
 0x2e0   : > { %v10027_v27 = vadd.f32 %v12367_v19, %v2197_v41  ;;  %v7891_v8 = vpop.f32.mrf.mxu0  ;;  %v5827_v48 = vrot.slane %v12372_v38, %v8793_v23 }
 0x2e1   : > { %12368 = vst [vmem:[#allocation23_spill] sm:$0xff] %v10029_v59  ;;  %v10040_v20 = vadd.f32 %v12370_v40, %v2189_v35  ;;  %v10042_v19 = vadd.f32 %v6069_v11, %v2189_v35  ;;  %v2210_v41 = vadd.f32 %v7891_v8, %v9506_v49  ;;  %v5817_v40 = vcombine.high %v5801_v33, %v5801_v33 }
 0x2e2   : > { %v2201_v26 = vpop.f32.mrf.mxu0  ;;  %v5815_v11 = vrot.slane %v5787_v25, %v8793_v23  ;;  %v12375_v59 = vpack.c.bf16 %v9745_v47, %v9740_v62  ;;  %v8063_v25 = vld [vmem:[%s12137_s14 + $0x40] sm:$0xff]   ;;  %v12379_v62 = vld [vmem:[#allocation37_spill] sm:$0xff] }
 0x2e3   : > { %12371 = vst [vmem:[#allocation22_spill] sm:$0xff] %v10042_v19  ;;  %v10049_v53 = vadd.f32 %v6089_v28, %v2210_v41  ;;  %v2202_v39 = vadd.f32 %v9506_v49, %v2201_v26  ;;  %v5820_v28 = vcombine.high %v12372_v38, %v12372_v38  ;;  %v5835_v26 = vcombine.high %v5827_v48, %v5827_v48  ;;  %v12380_v47 = vld [vmem:[#allocation34_spill] sm:$0xff] }
 0x2e4   : > { %v7892_v14 = vpop.f32.mrf.mxu0  ;;  %v5843_v19 = vrot.slane %v5827_v48, %v8793_v23  ;;  %v6105_v29 = vrot.slane %v5817_v40, %v8826_v52  ;;  %4044 = vmatpush2.bf16.msra.mxu0 %v8063_v25  ;;  %v6097_v25 = vrot.slane %v5801_v33, %v8826_v52  ;;  %v12389_v33 = vld [vmem:[#allocation42_spill] sm:$0xff] }
 0x2e5   : > { %12373 = vst [vmem:[#allocation27_spill] sm:$0xff] %v10049_v53  ;;  %v10054_v35 = vadd.f32 %v6081_v57, %v2202_v39  ;;  %v2213_v8 = vadd.f32 %v7892_v14, %v9506_v49  ;;  %7512 = vmatmul.mubr.msk.bf16.gmra.mxu1 %vm3236_vm4, %v12375_v59  ;;  %v12376_v57 = vld [vmem:[#allocation31_spill] sm:$0xff]  ;;  %v12381_v59 = vsub.f32 %v12379_v62, %v12380_v47 }
 0x2e6   : > { %v2204_v6 = vpop.f32.mrf.mxu0  ;;  %3465 = vmatprep.mubr.bf16.mxu1 %v12298_v10  ;;  %v12378_v14 = vsub.f32 %v12376_v57, %v12377_v43  ;;  %v10084_v12 = vadd.f32 %v12383_v1, %v2202_v39  ;;  %v5819_v57 = vcombine.high %v5815_v11, %v5815_v11  ;;  %v12384_v43 = vld [vmem:[#allocation40_spill] sm:$0xff]  ;;  %v5834_v48 = vrot.slane %v5820_v28, %v8793_v23  ;;  %v12392_v1 = vld [vmem:[#allocation46_spill] sm:$0xff] }
 0x2e7   : > { %12374 = vst [vmem:[#allocation24_spill] sm:$0xff] %v10054_v35  ;;  %v10077_v35 = vadd.f32 %v12381_v59, %v2213_v8  ;;  %v10079_v38 = vadd.f32 %v6093_v46, %v2213_v8  ;;  %v2205_v5 = vadd.f32 %v9506_v49, %v2204_v6  ;;  %v5857_v62 = vrot.slane %v5835_v26, %v8793_v23  ;;  %v12390_v26 = vld [vmem:[#allocation38_spill] sm:$0xff] }
 0x2e8   : > { %v10072_v53 = vadd.f32 %v12378_v14, %v2210_v41  ;;  %v7895_v58 = vpop.f32.mrf.mxu0  ;;  %v5865_v59 = vcombine.high %v5843_v19, %v5843_v19  ;;  %v6109_v28 = vrot.slane %v5819_v57, %v8826_v52  ;;  %v12391_v41 = vsub.f32 %v12389_v33, %v12390_v26 }
 0x2e9   : > { %12382 = vst [vmem:[#allocation26_spill] sm:$0xff] %v10079_v38  ;;  %v10090_v14 = vadd.f32 %v12384_v43, %v2205_v5  ;;  %v10092_v46 = vadd.f32 %v6085_v37, %v2205_v5  ;;  %v2226_v8 = vadd.f32 %v7895_v58, %v9506_v49  ;;  %v12388_v5 = vpack.c.bf16 %v9825_v61, %v9816_v22 }
 0x2ea   : > { %v2217_v6 = vpop.f32.mrf.mxu0  ;;  %v5850_v61 = vrot.slane %v5834_v48, %v8793_v23  ;;  %v5867_v33 = vcombine.high %v5857_v62, %v5857_v62 }
 0x2eb   : > { %12385 = vst [vmem:[#allocation30_spill] sm:$0xff] %v10092_v46  ;;  %v10098_v39 = vadd.f32 %v6105_v29, %v2226_v8  ;;  %v2218_v40 = vadd.f32 %v9506_v49, %v2217_v6  ;;  %v5836_v29 = vcombine.high %v5834_v48, %v5834_v48  ;;  %v6101_v6 = vrot.slane %v5815_v11, %v8826_v52 }
 0x2ec   : > { %v7896_v47 = vpop.f32.mrf.mxu0  ;;  %v6121_v46 = vrot.slane %v5865_v59, %v8826_v52 }
 0x2ed   : > { %12386 = vst [vmem:[#allocation17_spill] sm:$0xff] %v10098_v39  ;;  %v10103_v37 = vadd.f32 %v6097_v25, %v2218_v40  ;;  %v2229_v58 = vadd.f32 %v7896_v47, %v9506_v49  ;;  %7513 = vmatmul.mubr.msk.bf16.gmra.mxu1 %vm3236_vm4, %v12388_v5  ;;  %v10116_v25 = vadd.f32 %v12391_v41, %v2226_v8  ;;  %v12393_v47 = vld [vmem:[#allocation44_spill] sm:$0xff]  ;;  %v12396_v5 = vld [vmem:[#allocation43_spill] sm:$0xff] }
 0x2ee   : > { %v2220_v43 = vpop.f32.mrf.mxu0  ;;  %3475 = vmatprep.mubr.bf16.mxu1 %v12298_v10  ;;  %v12394_v39 = vsub.f32 %v12392_v1, %v12393_v47  ;;  %v10128_v11 = vadd.f32 %v12396_v5, %v2218_v40  ;;  %v12397_v8 = vld [vmem:[#allocation47_spill] sm:$0xff]  ;;  %v6113_v47 = vrot.slane %v5843_v19, %v8826_v52  ;;  %v6125_v41 = vrot.slane %v5867_v33, %v8826_v52 }
 0x2ef   : > { %12387 = vst [vmem:[#allocation31_spill] sm:$0xff] %v10103_v37  ;;  %v10123_v37 = vadd.f32 %v6109_v28, %v2229_v58  ;;  %v2221_v22 = vadd.f32 %v9506_v49, %v2220_v43  ;;  %v12399_v28 = vld [vmem:[#allocation21_spill] sm:$0xff]  ;;  %v6117_v40 = vrot.slane %v5857_v62, %v8826_v52  ;;  %v12406_v33 = vld [vmem:[#allocation51_spill] sm:$0xff] }
 0x2f0   : > { %v10121_v57 = vadd.f32 %v12394_v39, %v2229_v58  ;;  %v7899_v38 = vpop.f32.mrf.mxu0  ;;  %v5876_v48 = vrot.slane %v12399_v28, %v8793_v23 }
 0x2f1   : > { %12395 = vst [vmem:[#allocation28_spill] sm:$0xff] %v10123_v37  ;;  %v10134_v1 = vadd.f32 %v12397_v8, %v2221_v22  ;;  %v10136_v39 = vadd.f32 %v6101_v6, %v2221_v22  ;;  %v2242_v58 = vadd.f32 %v7899_v38, %v9506_v49  ;;  %v5866_v8 = vcombine.high %v5850_v61, %v5850_v61 }
 0x2f2   : > { %v2233_v43 = vpop.f32.mrf.mxu0  ;;  %v5864_v6 = vrot.slane %v5836_v29, %v8793_v23  ;;  %v12402_v37 = vpack.c.bf16 %v9808_v7, %v9803_v50  ;;  %v12403_v29 = vld [vmem:[#allocation48_spill] sm:$0xff] }
 0x2f3   : > { %12398 = vst [vmem:[#allocation37_spill] sm:$0xff] %v10136_v39  ;;  %v10143_v26 = vadd.f32 %v6121_v46, %v2242_v58  ;;  %v2234_v59 = vadd.f32 %v9506_v49, %v2233_v43  ;;  %v5869_v46 = vcombine.high %v12399_v28, %v12399_v28  ;;  %v5884_v43 = vcombine.high %v5876_v48, %v5876_v48 }
 0x2f4   : > { %v7900_v5 = vpop.f32.mrf.mxu0  ;;  %v5892_v28 = vrot.slane %v5876_v48, %v8793_v23  ;;  %v6137_v54 = vrot.slane %v5866_v8, %v8826_v52 }
 0x2f5   : > { %12400 = vst [vmem:[#allocation34_spill] sm:$0xff] %v10143_v26  ;;  %v10148_v22 = vadd.f32 %v6113_v47, %v2234_v59  ;;  %v2245_v38 = vadd.f32 %v7900_v5, %v9506_v49  ;;  %7514 = vmatmul.mubr.msk.bf16.gmra.mxu1 %vm3236_vm4, %v12402_v37  ;;  %v12404_v47 = vld [vmem:[#allocation45_spill] sm:$0xff]  ;;  %v10175_v62 = vadd.f32 %v12410_v16, %v2234_v59 }
 0x2f6   : > { %v2236_v19 = vpop.f32.mrf.mxu0  ;;  %3485 = vmatprep.mubr.bf16.mxu1 %v12298_v10  ;;  %v12405_v26 = vsub.f32 %v12403_v29, %v12404_v47  ;;  %v5868_v29 = vcombine.high %v5864_v6, %v5864_v6  ;;  %v5906_v47 = vrot.slane %v5884_v43, %v8793_v23  ;;  %v12417_v43 = vld [vmem:[#allocation52_spill] sm:$0xff] }
 0x2f7   : > { %12401 = vst [vmem:[#allocation35_spill] sm:$0xff] %v10148_v22  ;;  %v12407_v22 = vld [vmem:[#allocation50_spill] sm:$0xff]  ;;  %v10170_v50 = vadd.f32 %v6125_v41, %v2245_v38  ;;  %v2237_v37 = vadd.f32 %v9506_v49, %v2236_v19  ;;  %v6129_v19 = vrot.slane %v5850_v61, %v8826_v52 }
 0x2f8   : > { %v10163_v5 = vadd.f32 %v12405_v26, %v2242_v58  ;;  %v12408_v39 = vsub.f32 %v12406_v33, %v12407_v22  ;;  %v7903_v60 = vpop.f32.mrf.mxu0  ;;  %v12411_v26 = vld [vmem:[#allocation53_spill] sm:$0xff]  ;;  %v12416_v61 = vld [vmem:[#allocation54_spill] sm:$0xff] }
 0x2f9   : > { %12409 = vst [vmem:[#allocation40_spill] sm:$0xff] %v10170_v50  ;;  %v10181_v22 = vadd.f32 %v12411_v26, %v2237_v37  ;;  %v2258_v41 = vadd.f32 %v7903_v60, %v9506_v49  ;;  %v5914_v26 = vcombine.high %v5892_v28, %v5892_v28  ;;  %v12418_v16 = vsub.f32 %v12416_v61, %v12417_v43 }
 0x2fa   : > { %v10168_v7 = vadd.f32 %v12408_v39, %v2245_v38  ;;  %v10183_v39 = vadd.f32 %v6117_v40, %v2237_v37  ;;  %v5883_v38 = vrot.slane %v5869_v46, %v8793_v23  ;;  %v2249_v48 = vpop.f32.mrf.mxu0  ;;  %v6141_v46 = vrot.slane %v5868_v29, %v8826_v52 }
 0x2fb   : > { %v10189_v59 = vadd.f32 %v6137_v54, %v2258_v41  ;;  %v2250_v8 = vadd.f32 %v9506_v49, %v2249_v48  ;;  %v12415_v37 = vpack.c.bf16 %v9897_v21, %v9890_v51  ;;  %v6133_v48 = vrot.slane %v5864_v6, %v8826_v52 }
 0x2fc   : > { %12412 = vst [vmem:[#allocation42_spill] sm:$0xff] %v10183_v39  ;;  %v7904_v33 = vpop.f32.mrf.mxu0  ;;  %v5885_v54 = vcombine.high %v5883_v38, %v5883_v38  ;;  %v5899_v21 = vrot.slane %v5883_v38, %v8793_v23  ;;  %v6153_v45 = vrot.slane %v5914_v26, %v8826_v52  ;;  %v5916_v61 = vcombine.high %v5906_v47, %v5906_v47 }
 0x2fd   : > { %12413 = vst [vmem:[#allocation38_spill] sm:$0xff] %v10189_v59  ;;  %v10194_v40 = vadd.f32 %v6129_v19, %v2250_v8  ;;  %v2261_v60 = vadd.f32 %v7904_v33, %v9506_v49  ;;  %7515 = vmatmul.mubr.msk.bf16.gmra.mxu1 %vm3236_vm4, %v12415_v37  ;;  %v10207_v19 = vadd.f32 %v12418_v16, %v2258_v41  ;;  %v12419_v59 = vld [vmem:[#allocation60_spill] sm:$0xff]  ;;  %v12423_v37 = vld [vmem:[#allocation57_spill] sm:$0xff]  ;;  %v12430_v41 = vld [vmem:[#allocation59_spill] sm:$0xff] }
 0x2fe   : > { %v2252_v58 = vpop.f32.mrf.mxu0  ;;  %3495 = vmatprep.mubr.bf16.mxu1 %v12298_v10  ;;  %v12420_v33 = vld [vmem:[#allocation56_spill] sm:$0xff]  ;;  %v10219_v6 = vadd.f32 %v12423_v37, %v2250_v8  ;;  %v12424_v16 = vld [vmem:[#allocation61_spill] sm:$0xff]  ;;  %v6145_v26 = vrot.slane %v5892_v28, %v8826_v52  ;;  %v5913_v37 = vrot.slane %v5885_v54, %v8793_v23  ;;  %v12429_v28 = vld [vmem:[#allocation62_spill] sm:$0xff] }
 0x2ff   : > { %12414 = vst [vmem:[#allocation46_spill] sm:$0xff] %v10194_v40  ;;  %v12421_v40 = vsub.f32 %v12419_v59, %v12420_v33  ;;  %v10214_v50 = vadd.f32 %v6141_v46, %v2261_v60  ;;  %v2253_v51 = vadd.f32 %v9506_v49, %v2252_v58  ;;  %v5915_v33 = vcombine.high %v5899_v21, %v5899_v21 }
 0x300   : > { %v7907_v39 = vpop.f32.mrf.mxu0  ;;  %v12431_v38 = vsub.f32 %v12429_v28, %v12430_v41  ;;  %v12445_v41 = vld [vmem:[#allocation76_spill] sm:$0xff] }
 0x301   : > { %v10212_v29 = vadd.f32 %v12421_v40, %v2261_v60  ;;  %12422 = vst [vmem:[#allocation44_spill] sm:$0xff] %v10214_v50  ;;  %v10225_v59 = vadd.f32 %v12424_v16, %v2253_v51  ;;  %v10227_v40 = vadd.f32 %v6133_v48, %v2253_v51  ;;  %v2274_v60 = vadd.f32 %v7907_v39, %v9506_v49 }
 0x302   : > { %v2265_v58 = vpop.f32.mrf.mxu0  ;;  %v6157_v39 = vrot.slane %v5916_v61, %v8826_v52  ;;  %v12428_v51 = vpack.c.bf16 %v9883_v9, %v9878_v4  ;;  %v12436_v9 = vld [vmem:[#allocation65_spill] sm:$0xff]  ;;  %v6169_v50 = vrot.slane %v5915_v33, %v8826_v52  ;;  %v6161_v33 = vrot.slane %v5899_v21, %v8826_v52  ;;  %v12442_v21 = vld [vmem:[#allocation70_spill] sm:$0xff] }
 0x303   : > { %12425 = vst [vmem:[#allocation43_spill] sm:$0xff] %v10227_v40  ;;  %v10232_v8 = vadd.f32 %v6153_v45, %v2274_v60  ;;  %v2266_v46 = vadd.f32 %v9506_v49, %v2265_v58  ;;  %v6149_v58 = vrot.slane %v5906_v47, %v8826_v52  ;;  %v10250_v54 = vadd.f32 %v12431_v38, %v2274_v60  ;;  %v12437_v60 = vld [vmem:[#allocation69_spill] sm:$0xff] }
 0x304   : > { %v7908_v43 = vpop.f32.mrf.mxu0  ;;  %v5917_v40 = vcombine.high %v5913_v37, %v5913_v37 }
 0x305   : > { %12426 = vst [vmem:[#allocation47_spill] sm:$0xff] %v10232_v8  ;;  %v10237_v16 = vadd.f32 %v6145_v26, %v2266_v46  ;;  %v2277_v48 = vadd.f32 %v7908_v43, %v9506_v49  ;;  %7516 = vmatmul.mubr.msk.bf16.gmra.mxu1 %vm3236_vm4, %v12428_v51  ;;  %v12432_v26 = vld [vmem:[#allocation66_spill] sm:$0xff]  ;;  %v12433_v8 = vld [vmem:[#allocation64_spill] sm:$0xff]  ;;  %v10261_v51 = vadd.f32 %v12436_v9, %v2266_v46 }
 0x306   : > { %v2268_v45 = vpop.f32.mrf.mxu0  ;;  %3505 = vmatprep.mubr.bf16.mxu1 %v12298_v10  ;;  %v12434_v43 = vsub.f32 %v12432_v26, %v12433_v8  ;;  %v6173_v9 = vrot.slane %v5917_v40, %v8826_v52 }
 0x307   : > { %12427 = vst [vmem:[#allocation21_spill] sm:$0xff] %v10237_v16  ;;  %v10257_v61 = vadd.f32 %v6157_v39, %v2277_v48  ;;  %v2269_v4 = vadd.f32 %v9506_v49, %v2268_v45  ;;  %v12446_v45 = vld [vmem:[#allocation73_spill] sm:$0xff] }
 0x308   : > { %v10255_v16 = vadd.f32 %v12434_v43, %v2277_v48  ;;  %v7911_v47 = vpop.f32.mrf.mxu0 }
 0x309   : > { %12435 = vst [vmem:[#allocation48_spill] sm:$0xff] %v10257_v61  ;;  %v10267_v38 = vadd.f32 %v12437_v60, %v2269_v4  ;;  %v10269_v8 = vadd.f32 %v6149_v58, %v2269_v4  ;;  %v2290_v48 = vadd.f32 %v7911_v47, %v9506_v49  ;;  %v8327_v58 = vld [vmem:[%s12134_s11] ss:$0 sm:$0xff]  ;;  %v12441_v47 = vpack.c.bf16 %v9947_v63, %v9940_v34  ;;  %v12443_v60 = vld [vmem:[#allocation68_spill] sm:$0xff] }
 0x30a   : > { %v2281_v39 = vpop.f32.mrf.mxu0  ;;  %v12449_v63 = vld [vmem:[#allocation72_spill] sm:$0xff] }
 0x30b   : > { %12438 = vst [vmem:[#allocation45_spill] sm:$0xff] %v10269_v8  ;;  %v10274_v46 = vadd.f32 %v6169_v50, %v2290_v48  ;;  %v2282_v28 = vadd.f32 %v9506_v49, %v2281_v39  ;;  %v6165_v49 = vrot.slane %v5913_v37, %v8826_v52  ;;  %v12444_v39 = vsub.f32 %v12442_v21, %v12443_v60 }
 0x30c   : > { %v7912_v26 = vpop.f32.mrf.mxu0 }
 0x30d   : > { %12439 = vst [vmem:[#allocation51_spill] sm:$0xff] %v10274_v46  ;;  %v10278_v43 = vadd.f32 %v6161_v33, %v2282_v28  ;;  %v2293_v4 = vadd.f32 %v8327_v58, %v7912_v26  ;;  %7517 = vmatmul.mubr.msk.bf16.gmra.mxu1 %vm3236_vm4, %v12441_v47  ;;  %v10293_v33 = vadd.f32 %v12444_v39, %v2290_v48 }
 0x30e   : > { %v2284_v50 = vpop.f32.mrf.mxu0  ;;  %3515 = vmatprep.mubr.bf16.mxu1 %v12298_v10  ;;  %v12447_v26 = vsub.f32 %v12445_v41, %v12446_v45  ;;  %v10303_v47 = vadd.f32 %v12449_v63, %v2282_v28  ;;  %v12452_v41 = vpack.c.bf16 %v9933_v55, %v9928_v42  ;;  %v12453_v45 = vpack.c.bf16 %v9996_v36, %v9989_v30  ;;  %v12461_v36 = vld [vmem:[#allocation18_spill] sm:$0xff] }
 0x30f   : > { %12440 = vst [vmem:[#allocation50_spill] sm:$0xff] %v10278_v43  ;;  %v10300_v40 = vadd.f32 %v6173_v9, %v2293_v4  ;;  %v2285_v34 = vadd.f32 %v8327_v58, %v2284_v50  ;;  %v12450_v43 = vld [vmem:[#allocation77_spill] sm:$0xff]  ;;  %v12454_v28 = vpack.c.bf16 %v9982_v18, %v9977_v0  ;;  %v12455_v42 = vpack.c.bf16 %v10040_v20, %v10034_v44 }
 0x310   : > { %v10298_v46 = vadd.f32 %v12447_v26, %v2293_v4  ;;  %v12456_v55 = vpack.c.bf16 %v10027_v27, %v10022_v3  ;;  %v12457_v0 = vpack.c.bf16 %v10090_v14, %v10084_v12  ;;  %v12458_v18 = vpack.c.bf16 %v10077_v35, %v10072_v53  ;;  %v3184_v27 = vld [vmem:[%s12136_s13] sm:$0x3] }
 0x311   : > { %12448 = vst [vmem:[#allocation49_spill] sm:$0xff] %v10300_v40  ;;  %v10308_v61 = vadd.f32 %v12450_v43, %v2285_v34  ;;  %v10310_v21 = vadd.f32 %v6165_v49, %v2285_v34  ;;  %v12459_v30 = vpack.c.bf16 %v10134_v1, %v10128_v11  ;;  %v12460_v12 = vpack.c.bf16 %v10121_v57, %v10116_v25 }
 0x312   : > { %v3175_v37 = vpack.c.bf16 %v10298_v46, %v10293_v33  ;;  %v3192_v3 = vsub.s32 1, %v12461_v36  ;;  %v12462_v20 = vpack.c.bf16 %v10181_v22, %v10175_v62  ;;  %v10371_v35 = vrot.slane %v3184_v27, %v8826_v52 }
 0x313   : > { %12451 = vst [vmem:[#allocation53_spill] sm:$0xff] %v10310_v21  ;;  %v3174_v48 = vpack.c.bf16 %v10308_v61, %v10303_v47  ;;  %v12463_v4 = vpack.c.bf16 %v10168_v7, %v10163_v5 }
 0x314   : > { %v10367_v53 = vrot.slane %v3184_v27, %v3192_v3 }
 0x315   : > { %7518 = vmatmul.mubr.msk.bf16.gmra.mxu1 %vm3236_vm4, %v12452_v41 }
 0x316   : > { %3525 = vmatprep.mubr.bf16.mxu1 %v12298_v10 }
 0x31d   : > { %7519 = vmatmul.mubr.msk.bf16.gmra.mxu1 %vm3236_vm4, %v12453_v45 }
 0x31e   : > { %3535 = vmatprep.mubr.bf16.mxu1 %v12298_v10 }
 0x325   : > { %7520 = vmatmul.mubr.msk.bf16.gmra.mxu1 %vm3236_vm4, %v12454_v28 }
 0x326   : > { %3545 = vmatprep.mubr.bf16.mxu1 %v12298_v10 }
 0x32d   : > { %7521 = vmatmul.mubr.msk.bf16.gmra.mxu1 %vm3236_vm4, %v12455_v42 }
 0x32e   : > { %3555 = vmatprep.mubr.bf16.mxu1 %v12298_v10 }
 0x335   : > { %7522 = vmatmul.mubr.msk.bf16.gmra.mxu1 %vm3236_vm4, %v12456_v55  ;;  %v12464_v55 = vpack.c.bf16 %v10225_v59, %v10219_v6 }
 0x336   : > { %3565 = vmatprep.mubr.bf16.mxu1 %v12298_v10 }
 0x33d   : > { %7523 = vmatmul.mubr.msk.bf16.gmra.mxu1 %vm3236_vm4, %v12457_v0 }
 0x33e   : > { %3575 = vmatprep.mubr.bf16.mxu1 %v12298_v10 }
 0x345   : > { %7524 = vmatmul.mubr.msk.bf16.gmra.mxu1 %vm3236_vm4, %v12458_v18 }
 0x346   : > { %3585 = vmatprep.mubr.bf16.mxu1 %v12298_v10 }
 0x34d   : > { %7525 = vmatmul.mubr.msk.bf16.gmra.mxu1 %vm3236_vm4, %v12459_v30 }
 0x34e   : > { %3595 = vmatprep.mubr.bf16.mxu1 %v12298_v10 }
 0x355   : > { %7526 = vmatmul.mubr.msk.bf16.gmra.mxu1 %vm3236_vm4, %v12460_v12 }
 0x356   : > { %3605 = vmatprep.mubr.bf16.mxu1 %v12298_v10 }
 0x35d   : > { %v3367_v44 = vpop.f32.mrf.mxu1  ;;  %7527 = vmatmul.mubr.msk.bf16.gmra.mxu1 %vm3236_vm4, %v12462_v20 }
 0x35e   : > { %3615 = vmatprep.mubr.bf16.mxu1 %v12298_v10  ;;  %v3368_v1 = vadd.f32 %v3367_v44, %v10371_v35 }
 0x35f   : > { %v3369_v14 = vpop.f32.mrf.mxu1 }
 0x360   : > { %v3370_v57 = vadd.f32 %v3369_v14, %v10367_v53  ;;  %v3686_v49 = vmax.f32 %v3368_v1, 0.0 }
 0x361   : > { %v3371_v25 = vpop.f32.mrf.mxu1 }
 0x362   : > { %v3372_v11 = vadd.f32 %v3371_v25, %v10371_v35  ;;  %v3687_v9 = vmax.f32 %v3370_v57, 0.0 }
 0x363   : > { %v3373_v43 = vpop.f32.mrf.mxu1 }
 0x364   : > { %v3374_v62 = vadd.f32 %v3373_v43, %v10367_v53  ;;  %v3688_v22 = vmax.f32 %v3372_v11, 0.0  ;;  %v12465_v11 = vpack.c.bf16 %v10212_v29, %v10207_v19 }
 0x365   : > { %v3377_v58 = vpop.f32.mrf.mxu1  ;;  %7528 = vmatmul.mubr.msk.bf16.gmra.mxu1 %vm3236_vm4, %v12463_v4 }
 0x366   : > { %v3689_v50 = vmax.f32 %v3374_v62, 0.0  ;;  %3625 = vmatprep.mubr.bf16.mxu1 %v12298_v10  ;;  %v3814_v26 = vpack.c.bf16 %v3688_v22, %v3686_v49  ;;  %v3378_v45 = vadd.f32 %v3377_v58, %v10371_v35 }
 0x367   : > { %v3379_v60 = vpop.f32.mrf.mxu1 }
 0x368   : > { %v3815_v39 = vpack.c.bf16 %v3689_v50, %v3687_v9  ;;  %v3380_v63 = vadd.f32 %v3379_v60, %v10367_v53  ;;  %v3690_v30 = vmax.f32 %v3378_v45, 0.0 }
 0x369   : > { %v3381_v34 = vpop.f32.mrf.mxu1 }
 0x36a   : > { %v3382_v41 = vadd.f32 %v3381_v34, %v10371_v35  ;;  %4045 = vmatprep.mubr.bf16.mxu0 %v3815_v39  ;;  %v3691_v0 = vmax.f32 %v3380_v63, 0.0  ;;  %v12466_v34 = vpack.c.bf16 %v10267_v38, %v10261_v51 }
 0x36b   : > { %v3383_v28 = vpop.f32.mrf.mxu1  ;;  %4046 = vmatmul.mubr.bf16.vlgmr.msra.gmra.mxu0 %v3814_v26 }
 0x36c   : > { %v3384_v5 = vadd.f32 %v3383_v28, %v10367_v53  ;;  %v3692_v7 = vmax.f32 %v3382_v41, 0.0 }
 0x36d   : > { %v3387_v42 = vpop.f32.mrf.mxu1  ;;  %7529 = vmatmul.mubr.msk.bf16.gmra.mxu1 %vm3236_vm4, %v12464_v55 }
 0x36e   : > { %v3693_v18 = vmax.f32 %v3384_v5, 0.0  ;;  %3635 = vmatprep.mubr.bf16.mxu1 %v12298_v10  ;;  %v3816_v3 = vpack.c.bf16 %v3692_v7, %v3690_v30  ;;  %v3388_v14 = vadd.f32 %v3387_v42, %v10371_v35 }
 0x36f   : > { %v3389_v12 = vpop.f32.mrf.mxu1 }
 0x370   : > { %v3817_v36 = vpack.c.bf16 %v3693_v18, %v3691_v0  ;;  %v3390_v44 = vadd.f32 %v3389_v12, %v10367_v53  ;;  %v3694_v62 = vmax.f32 %v3388_v14, 0.0 }
 0x371   : > { %v3391_v27 = vpop.f32.mrf.mxu1 }
 0x372   : > { %v3392_v20 = vadd.f32 %v3391_v27, %v10371_v35  ;;  %4053 = vmatprep.mubr.bf16.mxu0 %v3817_v36  ;;  %v3695_v1 = vmax.f32 %v3390_v44, 0.0  ;;  %v12467_v36 = vpack.c.bf16 %v10255_v16, %v10250_v54 }
 0x373   : > { %v3393_v25 = vpop.f32.mrf.mxu1  ;;  %4054 = vmatmul.mubr.bf16.gmra.mxu0 %v3816_v3 }
 0x374   : > { %v3394_v6 = vadd.f32 %v3393_v25, %v10367_v53  ;;  %v3696_v59 = vmax.f32 %v3392_v20, 0.0 }
 0x375   : > { %v3397_v57 = vpop.f32.mrf.mxu1  ;;  %7530 = vmatmul.mubr.msk.bf16.gmra.mxu1 %vm3236_vm4, %v12465_v11 }
 0x376   : > { %v3697_v43 = vmax.f32 %v3394_v6, 0.0  ;;  %3645 = vmatprep.mubr.bf16.mxu1 %v12298_v10  ;;  %v3818_v4 = vpack.c.bf16 %v3696_v59, %v3694_v62  ;;  %v3398_v60 = vadd.f32 %v3397_v57, %v10371_v35 }
 0x377   : > { %v3399_v22 = vpop.f32.mrf.mxu1 }
 0x378   : > { %v3819_v58 = vpack.c.bf16 %v3697_v43, %v3695_v1  ;;  %v3400_v50 = vadd.f32 %v3399_v22, %v10367_v53  ;;  %v3698_v45 = vmax.f32 %v3398_v60, 0.0 }
 0x379   : > { %v3401_v9 = vpop.f32.mrf.mxu1 }
 0x37a   : > { %v3402_v49 = vadd.f32 %v3401_v9, %v10371_v35  ;;  %4061 = vmatprep.mubr.bf16.mxu0 %v3819_v58  ;;  %v3699_v63 = vmax.f32 %v3400_v50, 0.0 }
 0x37b   : > { %v3403_v39 = vpop.f32.mrf.mxu1  ;;  %4062 = vmatmul.mubr.bf16.gmra.mxu0 %v3818_v4 }
 0x37c   : > { %v3404_v19 = vadd.f32 %v3403_v39, %v10367_v53  ;;  %v3700_v29 = vmax.f32 %v3402_v49, 0.0 }
 0x37d   : > { %v3407_v26 = vpop.f32.mrf.mxu1  ;;  %7531 = vmatmul.mubr.msk.bf16.gmra.mxu1 %vm3236_vm4, %v12466_v34 }
 0x37e   : > { %v3701_v41 = vmax.f32 %v3404_v19, 0.0  ;;  %3655 = vmatprep.mubr.bf16.mxu1 %v12298_v10  ;;  %v3820_v7 = vpack.c.bf16 %v3700_v29, %v3698_v45  ;;  %v3408_v18 = vadd.f32 %v3407_v26, %v10371_v35 }
 0x37f   : > { %v3409_v28 = vpop.f32.mrf.mxu1 }
 0x380   : > { %v3821_v5 = vpack.c.bf16 %v3701_v41, %v3699_v63  ;;  %v3410_v55 = vadd.f32 %v3409_v28, %v10367_v53  ;;  %v3702_v44 = vmax.f32 %v3408_v18, 0.0 }
 0x381   : > { %v3411_v42 = vpop.f32.mrf.mxu1 }
 0x382   : > { %v3412_v0 = vadd.f32 %v3411_v42, %v10371_v35  ;;  %4069 = vmatprep.mubr.bf16.mxu0 %v3821_v5  ;;  %v3703_v3 = vmax.f32 %v3410_v55, 0.0 }
 0x383   : > { %v3413_v30 = vpop.f32.mrf.mxu1  ;;  %4070 = vmatmul.mubr.bf16.gmra.mxu0 %v3820_v7 }
 0x384   : > { %v3414_v51 = vadd.f32 %v3413_v30, %v10367_v53  ;;  %v3704_v38 = vmax.f32 %v3412_v0, 0.0 }
 0x385   : > { %v3417_v12 = vpop.f32.mrf.mxu1  ;;  %7532 = vmatmul.mubr.msk.bf16.gmra.mxu1 %vm3236_vm4, %v12467_v36 }
 0x386   : > { %v3705_v27 = vmax.f32 %v3414_v51, 0.0  ;;  %3665 = vmatprep.mubr.bf16.mxu1 %v12298_v10  ;;  %v3822_v25 = vpack.c.bf16 %v3704_v38, %v3702_v44  ;;  %v3418_v11 = vadd.f32 %v3417_v12, %v10371_v35 }
 0x387   : > { %v3419_v20 = vpop.f32.mrf.mxu1 }
 0x388   : > { %v3823_v14 = vpack.c.bf16 %v3705_v27, %v3703_v3  ;;  %v3420_v59 = vadd.f32 %v3419_v20, %v10367_v53  ;;  %v3706_v58 = vmax.f32 %v3418_v11, 0.0 }
 0x389   : > { %v3421_v6 = vpop.f32.mrf.mxu1 }
 0x38a   : > { %v3422_v57 = vadd.f32 %v3421_v6, %v10371_v35  ;;  %4077 = vmatprep.mubr.bf16.mxu0 %v3823_v14  ;;  %v3707_v62 = vmax.f32 %v3420_v59, 0.0 }
 0x38b   : > { %v3423_v1 = vpop.f32.mrf.mxu1  ;;  %4078 = vmatmul.mubr.bf16.gmra.mxu0 %v3822_v25 }
 0x38c   : > { %v3424_v16 = vadd.f32 %v3423_v1, %v10367_v53  ;;  %v3708_v54 = vmax.f32 %v3422_v57, 0.0 }
 0x38d   : > { %v3427_v43 = vpop.f32.mrf.mxu1  ;;  %7533 = vmatmul.mubr.msk.bf16.gmra.mxu1 %vm3236_vm4, %v3174_v48 }
 0x38e   : > { %v3709_v22 = vmax.f32 %v3424_v16, 0.0  ;;  %3675 = vmatprep.mubr.bf16.mxu1 %v12298_v10  ;;  %v3824_v50 = vpack.c.bf16 %v3708_v54, %v3706_v58  ;;  %v3428_v19 = vadd.f32 %v3427_v43, %v10371_v35 }
 0x38f   : > { %v3429_v4 = vpop.f32.mrf.mxu1 }
 0x390   : > { %v3825_v9 = vpack.c.bf16 %v3709_v22, %v3707_v62  ;;  %v3430_v60 = vadd.f32 %v3429_v4, %v10367_v53  ;;  %v3710_v34 = vmax.f32 %v3428_v19, 0.0 }
 0x391   : > { %v3431_v49 = vpop.f32.mrf.mxu1 }
 0x392   : > { %v3432_v39 = vadd.f32 %v3431_v49, %v10371_v35  ;;  %4085 = vmatprep.mubr.bf16.mxu0 %v3825_v9  ;;  %v3711_v10 = vmax.f32 %v3430_v60, 0.0 }
 0x393   : > { %v3433_v29 = vpop.f32.mrf.mxu1  ;;  %4086 = vmatmul.mubr.bf16.gmra.mxu0 %v3824_v50 }
 0x394   : > { %v3434_v61 = vadd.f32 %v3433_v29, %v10367_v53  ;;  %v3712_v47 = vmax.f32 %v3432_v39, 0.0 }
 0x395   : > { %v3437_v48 = vpop.f32.mrf.mxu1  ;;  %7534 = vmatmul.mubr.msk.bf16.gmra.mxu1 %vm3236_vm4, %v3175_v37 }
 0x396   : > { %v3713_v26 = vmax.f32 %v3434_v61, 0.0  ;;  %v3826_v45 = vpack.c.bf16 %v3712_v47, %v3710_v34  ;;  %v3438_v42 = vadd.f32 %v3437_v48, %v10371_v35 }
 0x397   : > { %v3439_v63 = vpop.f32.mrf.mxu1 }
 0x398   : > { %v3827_v41 = vpack.c.bf16 %v3713_v26, %v3711_v10  ;;  %v3440_v5 = vadd.f32 %v3439_v63, %v10367_v53  ;;  %v3714_v30 = vmax.f32 %v3438_v42, 0.0 }
 0x399   : > { %v3441_v28 = vpop.f32.mrf.mxu1 }
 0x39a   : > { %v3442_v7 = vadd.f32 %v3441_v28, %v10371_v35  ;;  %4093 = vmatprep.mubr.bf16.mxu0 %v3827_v41  ;;  %v3715_v0 = vmax.f32 %v3440_v5, 0.0 }
 0x39b   : > { %v3443_v55 = vpop.f32.mrf.mxu1  ;;  %4094 = vmatmul.mubr.bf16.gmra.mxu0 %v3826_v45 }
 0x39c   : > { %v3444_v46 = vadd.f32 %v3443_v55, %v10367_v53  ;;  %v3716_v33 = vmax.f32 %v3442_v7, 0.0 }
 0x39d   : > { %v3447_v37 = vpop.f32.mrf.mxu1 }
 0x39e   : > { %v3717_v18 = vmax.f32 %v3444_v46, 0.0  ;;  %v3828_v12 = vpack.c.bf16 %v3716_v33, %v3714_v30  ;;  %v3448_v44 = vadd.f32 %v3447_v37, %v10371_v35 }
 0x39f   : > { %v3449_v51 = vpop.f32.mrf.mxu1 }
 0x3a0   : > { %v3829_v38 = vpack.c.bf16 %v3717_v18, %v3715_v0  ;;  %v3450_v3 = vadd.f32 %v3449_v51, %v10367_v53  ;;  %v3718_v11 = vmax.f32 %v3448_v44, 0.0 }
 0x3a1   : > { %v3451_v36 = vpop.f32.mrf.mxu1 }
 0x3a2   : > { %v3452_v27 = vadd.f32 %v3451_v36, %v10371_v35  ;;  %4101 = vmatprep.mubr.bf16.mxu0 %v3829_v38  ;;  %v3719_v59 = vmax.f32 %v3450_v3, 0.0 }
 0x3a3   : > { %v3453_v20 = vpop.f32.mrf.mxu1  ;;  %4102 = vmatmul.mubr.bf16.gmra.mxu0 %v3828_v12 }
 0x3a4   : > { %v3454_v14 = vadd.f32 %v3453_v20, %v10367_v53  ;;  %v3720_v25 = vmax.f32 %v3452_v27, 0.0 }
 0x3a5   : > { %v3457_v6 = vpop.f32.mrf.mxu1 }
 0x3a6   : > { %v3721_v57 = vmax.f32 %v3454_v14, 0.0  ;;  %v3830_v54 = vpack.c.bf16 %v3720_v25, %v3718_v11  ;;  %v3458_v58 = vadd.f32 %v3457_v6, %v10371_v35 }
 0x3a7   : > { %v3459_v1 = vpop.f32.mrf.mxu1 }
 0x3a8   : > { %v3831_v16 = vpack.c.bf16 %v3721_v57, %v3719_v59  ;;  %v3460_v62 = vadd.f32 %v3459_v1, %v10367_v53  ;;  %v3722_v19 = vmax.f32 %v3458_v58, 0.0 }
 0x3a9   : > { %v3461_v43 = vpop.f32.mrf.mxu1 }
 0x3aa   : > { %v3462_v22 = vadd.f32 %v3461_v43, %v10371_v35  ;;  %4109 = vmatprep.mubr.bf16.mxu0 %v3831_v16  ;;  %v3723_v60 = vmax.f32 %v3460_v62, 0.0 }
 0x3ab   : > { %v3463_v4 = vpop.f32.mrf.mxu1  ;;  %4110 = vmatmul.mubr.bf16.gmra.mxu0 %v3830_v54 }
 0x3ac   : > { %v3464_v9 = vadd.f32 %v3463_v4, %v10367_v53  ;;  %v3724_v50 = vmax.f32 %v3462_v22, 0.0 }
 0x3ad   : > { %v3467_v49 = vpop.f32.mrf.mxu1 }
 0x3ae   : > { %v3725_v39 = vmax.f32 %v3464_v9, 0.0  ;;  %v3832_v47 = vpack.c.bf16 %v3724_v50, %v3722_v19  ;;  %v3468_v34 = vadd.f32 %v3467_v49, %v10371_v35 }
 0x3af   : > { %v3469_v29 = vpop.f32.mrf.mxu1 }
 0x3b0   : > { %v3833_v61 = vpack.c.bf16 %v3725_v39, %v3723_v60  ;;  %v3470_v10 = vadd.f32 %v3469_v29, %v10367_v53  ;;  %v3726_v42 = vmax.f32 %v3468_v34, 0.0 }
 0x3b1   : > { %v3471_v48 = vpop.f32.mrf.mxu1 }
 0x3b2   : > { %v3472_v26 = vadd.f32 %v3471_v48, %v10371_v35  ;;  %4117 = vmatprep.mubr.bf16.mxu0 %v3833_v61  ;;  %v3727_v5 = vmax.f32 %v3470_v10, 0.0 }
 0x3b3   : > { %v3473_v63 = vpop.f32.mrf.mxu1  ;;  %4118 = vmatmul.mubr.bf16.gmra.mxu0 %v3832_v47 }
 0x3b4   : > { %v3474_v41 = vadd.f32 %v3473_v63, %v10367_v53  ;;  %v3728_v45 = vmax.f32 %v3472_v26, 0.0 }
 0x3b5   : > { %v3477_v28 = vpop.f32.mrf.mxu1 }
 0x3b6   : > { %v3729_v7 = vmax.f32 %v3474_v41, 0.0  ;;  %v3834_v33 = vpack.c.bf16 %v3728_v45, %v3726_v42  ;;  %v3478_v30 = vadd.f32 %v3477_v28, %v10371_v35 }
 0x3b7   : > { %v3479_v55 = vpop.f32.mrf.mxu1 }
 0x3b8   : > { %v3835_v46 = vpack.c.bf16 %v3729_v7, %v3727_v5  ;;  %v3480_v0 = vadd.f32 %v3479_v55, %v10367_v53  ;;  %v3730_v44 = vmax.f32 %v3478_v30, 0.0 }
 0x3b9   : > { %v3481_v37 = vpop.f32.mrf.mxu1 }
 0x3ba   : > { %v3482_v18 = vadd.f32 %v3481_v37, %v10371_v35  ;;  %4125 = vmatprep.mubr.bf16.mxu0 %v3835_v46  ;;  %v3731_v3 = vmax.f32 %v3480_v0, 0.0 }
 0x3bb   : > { %v3483_v51 = vpop.f32.mrf.mxu1  ;;  %4126 = vmatmul.mubr.bf16.gmra.mxu0 %v3834_v33 }
 0x3bc   : > { %v3484_v38 = vadd.f32 %v3483_v51, %v10367_v53  ;;  %v3732_v12 = vmax.f32 %v3482_v18, 0.0 }
 0x3bd   : > { %v3487_v36 = vpop.f32.mrf.mxu1 }
 0x3be   : > { %v3733_v27 = vmax.f32 %v3484_v38, 0.0  ;;  %v3836_v25 = vpack.c.bf16 %v3732_v12, %v3730_v44  ;;  %v3488_v11 = vadd.f32 %v3487_v36, %v10371_v35 }
 0x3bf   : > { %v3489_v20 = vpop.f32.mrf.mxu1 }
 0x3c0   : > { %v3837_v14 = vpack.c.bf16 %v3733_v27, %v3731_v3  ;;  %v3490_v59 = vadd.f32 %v3489_v20, %v10367_v53  ;;  %v3734_v58 = vmax.f32 %v3488_v11, 0.0 }
 0x3c1   : > { %v3491_v6 = vpop.f32.mrf.mxu1 }
 0x3c2   : > { %v3492_v57 = vadd.f32 %v3491_v6, %v10371_v35  ;;  %4133 = vmatprep.mubr.bf16.mxu0 %v3837_v14  ;;  %v3735_v62 = vmax.f32 %v3490_v59, 0.0 }
 0x3c3   : > { %v3493_v1 = vpop.f32.mrf.mxu1  ;;  %4134 = vmatmul.mubr.bf16.gmra.mxu0 %v3836_v25 }
 0x3c4   : > { %v3494_v16 = vadd.f32 %v3493_v1, %v10367_v53  ;;  %v3736_v54 = vmax.f32 %v3492_v57, 0.0 }
 0x3c5   : > { %v3497_v43 = vpop.f32.mrf.mxu1 }
 0x3c6   : > { %v3737_v22 = vmax.f32 %v3494_v16, 0.0  ;;  %v3838_v50 = vpack.c.bf16 %v3736_v54, %v3734_v58  ;;  %v3498_v19 = vadd.f32 %v3497_v43, %v10371_v35 }
 0x3c7   : > { %v3499_v4 = vpop.f32.mrf.mxu1 }
 0x3c8   : > { %v3839_v9 = vpack.c.bf16 %v3737_v22, %v3735_v62  ;;  %v3500_v60 = vadd.f32 %v3499_v4, %v10367_v53  ;;  %v3738_v34 = vmax.f32 %v3498_v19, 0.0 }
 0x3c9   : > { %v3501_v49 = vpop.f32.mrf.mxu1 }
 0x3ca   : > { %v3502_v39 = vadd.f32 %v3501_v49, %v10371_v35  ;;  %4141 = vmatprep.mubr.bf16.mxu0 %v3839_v9  ;;  %v3739_v10 = vmax.f32 %v3500_v60, 0.0 }
 0x3cb   : > { %v3503_v29 = vpop.f32.mrf.mxu1  ;;  %4142 = vmatmul.mubr.bf16.gmra.mxu0 %v3838_v50 }
 0x3cc   : > { %v3504_v61 = vadd.f32 %v3503_v29, %v10367_v53  ;;  %v3740_v47 = vmax.f32 %v3502_v39, 0.0 }
 0x3cd   : > { %v3507_v48 = vpop.f32.mrf.mxu1 }
 0x3ce   : > { %v3741_v26 = vmax.f32 %v3504_v61, 0.0  ;;  %v3840_v45 = vpack.c.bf16 %v3740_v47, %v3738_v34  ;;  %v3508_v42 = vadd.f32 %v3507_v48, %v10371_v35 }
 0x3cf   : > { %v3509_v63 = vpop.f32.mrf.mxu1 }
 0x3d0   : > { %v3841_v41 = vpack.c.bf16 %v3741_v26, %v3739_v10  ;;  %v3510_v5 = vadd.f32 %v3509_v63, %v10367_v53  ;;  %v3742_v30 = vmax.f32 %v3508_v42, 0.0 }
 0x3d1   : > { %v3511_v28 = vpop.f32.mrf.mxu1 }
 0x3d2   : > { %v3512_v7 = vadd.f32 %v3511_v28, %v10371_v35  ;;  %4149 = vmatprep.mubr.bf16.mxu0 %v3841_v41  ;;  %v3743_v0 = vmax.f32 %v3510_v5, 0.0 }
 0x3d3   : > { %v3513_v55 = vpop.f32.mrf.mxu1  ;;  %4150 = vmatmul.mubr.bf16.gmra.mxu0 %v3840_v45 }
 0x3d4   : > { %v3514_v46 = vadd.f32 %v3513_v55, %v10367_v53  ;;  %v3744_v33 = vmax.f32 %v3512_v7, 0.0 }
 0x3d5   : > { %v3517_v37 = vpop.f32.mrf.mxu1 }
 0x3d6   : > { %v3745_v18 = vmax.f32 %v3514_v46, 0.0  ;;  %v3842_v12 = vpack.c.bf16 %v3744_v33, %v3742_v30  ;;  %v3518_v44 = vadd.f32 %v3517_v37, %v10371_v35 }
 0x3d7   : > { %v3519_v51 = vpop.f32.mrf.mxu1 }
 0x3d8   : > { %v3843_v38 = vpack.c.bf16 %v3745_v18, %v3743_v0  ;;  %v3520_v3 = vadd.f32 %v3519_v51, %v10367_v53  ;;  %v3746_v11 = vmax.f32 %v3518_v44, 0.0 }
 0x3d9   : > { %v3521_v36 = vpop.f32.mrf.mxu1 }
 0x3da   : > { %v3522_v27 = vadd.f32 %v3521_v36, %v10371_v35  ;;  %4157 = vmatprep.mubr.bf16.mxu0 %v3843_v38  ;;  %v3747_v59 = vmax.f32 %v3520_v3, 0.0 }
 0x3db   : > { %v3523_v20 = vpop.f32.mrf.mxu1  ;;  %4158 = vmatmul.mubr.bf16.gmra.mxu0 %v3842_v12 }
 0x3dc   : > { %v3524_v14 = vadd.f32 %v3523_v20, %v10367_v53  ;;  %v3748_v25 = vmax.f32 %v3522_v27, 0.0 }
 0x3dd   : > { %v3527_v6 = vpop.f32.mrf.mxu1 }
 0x3de   : > { %v3749_v57 = vmax.f32 %v3524_v14, 0.0  ;;  %v3844_v54 = vpack.c.bf16 %v3748_v25, %v3746_v11  ;;  %v3528_v58 = vadd.f32 %v3527_v6, %v10371_v35 }
 0x3df   : > { %v3529_v1 = vpop.f32.mrf.mxu1 }
 0x3e0   : > { %v3845_v16 = vpack.c.bf16 %v3749_v57, %v3747_v59  ;;  %v3530_v62 = vadd.f32 %v3529_v1, %v10367_v53  ;;  %v3750_v19 = vmax.f32 %v3528_v58, 0.0 }
 0x3e1   : > { %v3531_v43 = vpop.f32.mrf.mxu1 }
 0x3e2   : > { %v3532_v22 = vadd.f32 %v3531_v43, %v10371_v35  ;;  %4165 = vmatprep.mubr.bf16.mxu0 %v3845_v16  ;;  %v3751_v60 = vmax.f32 %v3530_v62, 0.0 }
 0x3e3   : > { %v3533_v4 = vpop.f32.mrf.mxu1  ;;  %4166 = vmatmul.mubr.bf16.gmra.mxu0 %v3844_v54 }
 0x3e4   : > { %v3534_v9 = vadd.f32 %v3533_v4, %v10367_v53  ;;  %v3752_v50 = vmax.f32 %v3532_v22, 0.0 }
 0x3e5   : > { %v3537_v49 = vpop.f32.mrf.mxu1 }
 0x3e6   : > { %v3753_v39 = vmax.f32 %v3534_v9, 0.0  ;;  %v3846_v47 = vpack.c.bf16 %v3752_v50, %v3750_v19  ;;  %v3538_v34 = vadd.f32 %v3537_v49, %v10371_v35 }
 0x3e7   : > { %v3539_v29 = vpop.f32.mrf.mxu1 }
 0x3e8   : > { %v3847_v61 = vpack.c.bf16 %v3753_v39, %v3751_v60  ;;  %v3540_v10 = vadd.f32 %v3539_v29, %v10367_v53  ;;  %v3754_v42 = vmax.f32 %v3538_v34, 0.0 }
 0x3e9   : > { %v3541_v48 = vpop.f32.mrf.mxu1 }
 0x3ea   : > { %v3542_v26 = vadd.f32 %v3541_v48, %v10371_v35  ;;  %4173 = vmatprep.mubr.bf16.mxu0 %v3847_v61  ;;  %v3755_v5 = vmax.f32 %v3540_v10, 0.0 }
 0x3eb   : > { %v3543_v63 = vpop.f32.mrf.mxu1  ;;  %4174 = vmatmul.mubr.bf16.gmra.mxu0 %v3846_v47 }
 0x3ec   : > { %v3544_v41 = vadd.f32 %v3543_v63, %v10367_v53  ;;  %v3756_v45 = vmax.f32 %v3542_v26, 0.0 }
 0x3ed   : > { %v3547_v28 = vpop.f32.mrf.mxu1 }
 0x3ee   : > { %v3757_v7 = vmax.f32 %v3544_v41, 0.0  ;;  %v3848_v33 = vpack.c.bf16 %v3756_v45, %v3754_v42  ;;  %v3548_v30 = vadd.f32 %v3547_v28, %v10371_v35 }
 0x3ef   : > { %v3549_v55 = vpop.f32.mrf.mxu1 }
 0x3f0   : > { %v3849_v46 = vpack.c.bf16 %v3757_v7, %v3755_v5  ;;  %v3550_v0 = vadd.f32 %v3549_v55, %v10367_v53  ;;  %v3758_v44 = vmax.f32 %v3548_v30, 0.0 }
 0x3f1   : > { %v3551_v37 = vpop.f32.mrf.mxu1 }
 0x3f2   : > { %v3552_v18 = vadd.f32 %v3551_v37, %v10371_v35  ;;  %4181 = vmatprep.mubr.bf16.mxu0 %v3849_v46  ;;  %v3759_v3 = vmax.f32 %v3550_v0, 0.0 }
 0x3f3   : > { %v3553_v51 = vpop.f32.mrf.mxu1  ;;  %4182 = vmatmul.mubr.bf16.gmra.mxu0 %v3848_v33 }
 0x3f4   : > { %v3554_v38 = vadd.f32 %v3553_v51, %v10367_v53  ;;  %v3760_v12 = vmax.f32 %v3552_v18, 0.0 }
 0x3f5   : > { %v3557_v36 = vpop.f32.mrf.mxu1 }
 0x3f6   : > { %v3761_v27 = vmax.f32 %v3554_v38, 0.0  ;;  %v3850_v25 = vpack.c.bf16 %v3760_v12, %v3758_v44  ;;  %v3558_v11 = vadd.f32 %v3557_v36, %v10371_v35 }
 0x3f7   : > { %v3559_v20 = vpop.f32.mrf.mxu1 }
 0x3f8   : > { %v3851_v14 = vpack.c.bf16 %v3761_v27, %v3759_v3  ;;  %v3560_v59 = vadd.f32 %v3559_v20, %v10367_v53  ;;  %v3762_v58 = vmax.f32 %v3558_v11, 0.0 }
 0x3f9   : > { %v3561_v6 = vpop.f32.mrf.mxu1 }
 0x3fa   : > { %v3562_v57 = vadd.f32 %v3561_v6, %v10371_v35  ;;  %4189 = vmatprep.mubr.bf16.mxu0 %v3851_v14  ;;  %v3763_v62 = vmax.f32 %v3560_v59, 0.0 }
 0x3fb   : > { %v3563_v1 = vpop.f32.mrf.mxu1  ;;  %4190 = vmatmul.mubr.bf16.gmra.mxu0 %v3850_v25 }
 0x3fc   : > { %v3564_v16 = vadd.f32 %v3563_v1, %v10367_v53  ;;  %v3764_v54 = vmax.f32 %v3562_v57, 0.0 }
 0x3fd   : > { %v3567_v43 = vpop.f32.mrf.mxu1 }
 0x3fe   : > { %v3765_v22 = vmax.f32 %v3564_v16, 0.0  ;;  %v3852_v50 = vpack.c.bf16 %v3764_v54, %v3762_v58  ;;  %v3568_v19 = vadd.f32 %v3567_v43, %v10371_v35 }
 0x3ff   : > { %v3569_v4 = vpop.f32.mrf.mxu1 }
 0x400   : > { %v3853_v9 = vpack.c.bf16 %v3765_v22, %v3763_v62  ;;  %v3570_v60 = vadd.f32 %v3569_v4, %v10367_v53  ;;  %v3766_v34 = vmax.f32 %v3568_v19, 0.0 }
 0x401   : > { %v3571_v49 = vpop.f32.mrf.mxu1 }
 0x402   : > { %v3572_v39 = vadd.f32 %v3571_v49, %v10371_v35  ;;  %4197 = vmatprep.mubr.bf16.mxu0 %v3853_v9  ;;  %v3767_v10 = vmax.f32 %v3570_v60, 0.0  ;;  %v12468_v49 = vld [vmem:[#allocation16_spill] sm:$0xff] }
 0x403   : > { %v3573_v29 = vpop.f32.mrf.mxu1  ;;  %4198 = vmatmul.mubr.bf16.gmra.mxu0 %v3852_v50  ;;  %v8328_v50 = vld [vmem:[%s12128_s5] ss:$0 sm:$0xff] }
 0x404   : > { %v3574_v61 = vadd.f32 %v3573_v29, %v10367_v53  ;;  %v3768_v47 = vmax.f32 %v3572_v39, 0.0  ;;  %v884_v60 = vadd.f32 %v8328_v50, %v12468_v49 }
 0x405   : > { %v3577_v48 = vpop.f32.mrf.mxu1 }
 0x406   : > { %v3769_v26 = vmax.f32 %v3574_v61, 0.0  ;;  %v3854_v45 = vpack.c.bf16 %v3768_v47, %v3766_v34  ;;  %v3578_v42 = vadd.f32 %v3577_v48, %v10371_v35 }
 0x407   : > { %v3579_v63 = vpop.f32.mrf.mxu1 }
 0x408   : > { %v3855_v41 = vpack.c.bf16 %v3769_v26, %v3767_v10  ;;  %v3580_v5 = vadd.f32 %v3579_v63, %v10367_v53  ;;  %v3770_v30 = vmax.f32 %v3578_v42, 0.0  ;;  %v5575_v26 = vcombine.high %v884_v60, %v884_v60 }
 0x409   : > { %v3581_v28 = vpop.f32.mrf.mxu1 }
 0x40a   : > { %v3582_v7 = vadd.f32 %v3581_v28, %v10371_v35  ;;  %4205 = vmatprep.mubr.bf16.mxu0 %v3855_v41  ;;  %v3771_v0 = vmax.f32 %v3580_v5, 0.0  ;;  %v5582_v28 = vrot.slane %v884_v60, %v8793_v23 }
 0x40b   : > { %v3583_v55 = vpop.f32.mrf.mxu1  ;;  %4206 = vmatmul.mubr.bf16.gmra.mxu0 %v3854_v45 }
 0x40c   : > { %v3584_v46 = vadd.f32 %v3583_v55, %v10367_v53  ;;  %v3772_v33 = vmax.f32 %v3582_v7, 0.0  ;;  %v5589_v55 = vrot.slane %v5575_v26, %v8793_v23 }
 0x40d   : > { %v3587_v37 = vpop.f32.mrf.mxu1 }
 0x40e   : > { %v3773_v18 = vmax.f32 %v3584_v46, 0.0  ;;  %v3856_v12 = vpack.c.bf16 %v3772_v33, %v3770_v30  ;;  %v3588_v44 = vadd.f32 %v3587_v37, %v10371_v35  ;;  %v10514_v30 = vrot.slane %v5582_v28, %v8793_v23 }
 0x40f   : > { %v3589_v51 = vpop.f32.mrf.mxu1 }
 0x410   : > { %v3857_v38 = vpack.c.bf16 %v3773_v18, %v3771_v0  ;;  %v3590_v3 = vadd.f32 %v3589_v51, %v10367_v53  ;;  %v3774_v11 = vmax.f32 %v3588_v44, 0.0  ;;  %v5590_v18 = vcombine.high %v5582_v28, %v5582_v28  ;;  %v10519_v44 = vld [vmem:[%s12138_s15] ss:$0 sm:$0xff] }
 0x411   : > { %v3591_v36 = vpop.f32.mrf.mxu1 }
 0x412   : > { %v3592_v27 = vadd.f32 %v3591_v36, %v10371_v35  ;;  %4213 = vmatprep.mubr.bf16.mxu0 %v3857_v38  ;;  %v3775_v59 = vmax.f32 %v3590_v3, 0.0  ;;  %v5591_v36 = vcombine.high %v5589_v55, %v5589_v55 }
 0x413   : > { %v3593_v20 = vpop.f32.mrf.mxu1  ;;  %4214 = vmatmul.mubr.bf16.gmra.mxu0 %v3856_v12 }
 0x414   : > { %v3594_v14 = vadd.f32 %v3593_v20, %v10367_v53  ;;  %v3776_v25 = vmax.f32 %v3592_v27, 0.0 }
 0x415   : > { %v3597_v6 = vpop.f32.mrf.mxu1 }
 0x416   : > { %v3777_v57 = vmax.f32 %v3594_v14, 0.0  ;;  %v3858_v54 = vpack.c.bf16 %v3776_v25, %v3774_v11  ;;  %v3598_v58 = vadd.f32 %v3597_v6, %v10371_v35  ;;  %v10524_v25 = vrot.slane %v5590_v18, %v8793_v23 }
 0x417   : > { %v3599_v1 = vpop.f32.mrf.mxu1  ;;  %v5620_v6 = vcombine.high %v10514_v30, %v10514_v30 }
 0x418   : > { %v3859_v16 = vpack.c.bf16 %v3777_v57, %v3775_v59  ;;  %v3600_v62 = vadd.f32 %v3599_v1, %v10367_v53  ;;  %v3778_v47 = vmax.f32 %v3598_v58, 0.0  ;;  %v10530_v1 = vrot.slane %v5589_v55, %v8793_v23 }
 0x419   : > { %v3601_v43 = vpop.f32.mrf.mxu1  ;;  %v5961_v49 = vrot.slane %v5620_v6, %v8826_v52  ;;  %v5622_v60 = vcombine.high %v10524_v25, %v10524_v25  ;;  %v5957_v26 = vrot.slane %v10524_v25, %v8826_v52 }
 0x41a   : > { %v3602_v22 = vadd.f32 %v3601_v43, %v10371_v35  ;;  %4221 = vmatprep.mubr.bf16.mxu0 %v3859_v16  ;;  %v3779_v29 = vmax.f32 %v3600_v62, 0.0  ;;  %v10537_v43 = vrot.slane %v5591_v36, %v8793_v23  ;;  %v5953_v23 = vrot.slane %v10514_v30, %v8826_v52 }
 0x41b   : > { %v3603_v4 = vpop.f32.mrf.mxu1  ;;  %4222 = vmatmul.mubr.bf16.gmra.mxu0 %v3858_v54 }
 0x41c   : > { %v3604_v9 = vadd.f32 %v3603_v4, %v10367_v53  ;;  %v3780_v39 = vmax.f32 %v3602_v22, 0.0 }
 0x41d   : > { %v3607_v19 = vpop.f32.mrf.mxu1 }
 0x41e   : > { %v3781_v61 = vmax.f32 %v3604_v9, 0.0  ;;  %v3860_v34 = vpack.c.bf16 %v3780_v39, %v3778_v47  ;;  %v3608_v5 = vadd.f32 %v3607_v19, %v10371_v35  ;;  %v5621_v47 = vcombine.high %v10530_v1, %v10530_v1 }
 0x41f   : > { %v3609_v48 = vpop.f32.mrf.mxu1 }
 0x420   : > { %v3861_v10 = vpack.c.bf16 %v3781_v61, %v3779_v29  ;;  %v3610_v41 = vadd.f32 %v3609_v48, %v10367_v53  ;;  %v3782_v51 = vmax.f32 %v3608_v5, 0.0  ;;  %v5969_v5 = vrot.slane %v10530_v1, %v8826_v52 }
 0x421   : > { %v3611_v63 = vpop.f32.mrf.mxu1 }
 0x422   : > { %v3612_v45 = vadd.f32 %v3611_v63, %v10371_v35  ;;  %4229 = vmatprep.mubr.bf16.mxu0 %v3861_v10  ;;  %v3783_v37 = vmax.f32 %v3610_v41, 0.0 }
 0x423   : > { %v3613_v7 = vpop.f32.mrf.mxu1  ;;  %4230 = vmatmul.mubr.bf16.gmra.mxu0 %v3860_v34  ;;  %v5623_v34 = vcombine.high %v10537_v43, %v10537_v43 }
 0x424   : > { %v3614_v42 = vadd.f32 %v3613_v7, %v10367_v53  ;;  %v3784_v46 = vmax.f32 %v3612_v45, 0.0 }
 0x425   : > { %v3617_v33 = vpop.f32.mrf.mxu1 }
 0x426   : > { %v3785_v0 = vmax.f32 %v3614_v42, 0.0  ;;  %v3862_v3 = vpack.c.bf16 %v3784_v46, %v3782_v51  ;;  %v3618_v59 = vadd.f32 %v3617_v33, %v10371_v35  ;;  %v5965_v46 = vrot.slane %v5622_v60, %v8826_v52 }
 0x427   : > { %v3619_v38 = vpop.f32.mrf.mxu1  ;;  %v10564_v51 = vrot.slane %v5621_v47, %v8826_v52  ;;  %v10581_v60 = vadd.f32 %v5953_v23, %v9714_v31 }
 0x428   : > { %v3863_v12 = vpack.c.bf16 %v3785_v0, %v3783_v37  ;;  %v3620_v20 = vadd.f32 %v3619_v38, %v10367_v53  ;;  %v3786_v39 = vmax.f32 %v3618_v59, 0.0  ;;  %v5973_v38 = vrot.slane %v10537_v43, %v8826_v52 }
 0x429   : > { %v3621_v27 = vpop.f32.mrf.mxu1  ;;  %v10576_v59 = vadd.f32 %v5961_v49, %v9623_v2 }
 0x42a   : > { %v3622_v14 = vadd.f32 %v3621_v27, %v10371_v35  ;;  %4237 = vmatprep.mubr.bf16.mxu0 %v3863_v12  ;;  %v3787_v4 = vmax.f32 %v3620_v20, 0.0 }
 0x42b   : > { %v3623_v57 = vpop.f32.mrf.mxu1  ;;  %v4047_v11 = vpop.f32.mrf.mxu0  ;;  %4238 = vmatmul.mubr.bf16.gmra.mxu0 %v3862_v3  ;;  %v10573_v3 = vrot.slane %v5623_v34, %v8826_v52 }
 0x42c   : > { %v3624_v16 = vadd.f32 %v3623_v57, %v10367_v53  ;;  %v10534_v54 = vadd.f32 %v10519_v44, %v4047_v11  ;;  %v3788_v62 = vmax.f32 %v3622_v14, 0.0 }
 0x42d   : > { %v3627_v22 = vpop.f32.mrf.mxu1  ;;  %v4049_v58 = vpop.f32.mrf.mxu0 }
 0x42e   : > { %v3789_v9 = vmax.f32 %v3624_v16, 0.0  ;;  %v4302_v50 = vsel %vm3236_vm4, %v10534_v54, -inf  ;;  %v3864_v63 = vpack.c.bf16 %v3788_v62, %v3786_v39  ;;  %v3628_v37 = vadd.f32 %v3627_v22, %v10371_v35  ;;  %v12469_v39 = vld [vmem:[#allocation14_spill] sm:$0xff] }
 0x42f   : > { %v4303_v19 = vrot.slane %v4302_v50, 4  ;;  %v3629_v29 = vpop.f32.mrf.mxu1  ;;  %v4050_v61 = vpop.f32.mrf.mxu0 }
 0x430   : > { %v3865_v48 = vpack.c.bf16 %v3789_v9, %v3787_v4  ;;  %v10549_v10 = vadd.f32 %v10519_v44, %v4050_v61  ;;  %v3630_v7 = vadd.f32 %v3629_v29, %v10367_v53  ;;  %v3790_v22 = vmax.f32 %v3628_v37, 0.0 }
 0x431   : > { %v4304_v41 = vmax.f32 %v4302_v50, %v4303_v19  ;;  %v3631_v45 = vpop.f32.mrf.mxu1  ;;  %v4052_v28 = vpop.f32.mrf.mxu0  ;;  %v10584_v19 = vadd.f32 %v5965_v46, %v12469_v39  ;;  %v10596_v37 = vadd.f32 %v5957_v26, %v9704_v24 }
 0x432   : > { %v4309_v42 = vsel %vm3236_vm4, %v10549_v10, -inf  ;;  %v3632_v55 = vadd.f32 %v3631_v45, %v10371_v35  ;;  %4245 = vmatprep.mubr.bf16.mxu0 %v3865_v48  ;;  %v3791_v57 = vmax.f32 %v3630_v7, 0.0 }
 0x433   : > { %v4305_v33 = vrot.slane %v4304_v41, 2  ;;  %v4310_v0 = vrot.slane %v4309_v42, 4  ;;  %v3633_v18 = vpop.f32.mrf.mxu1  ;;  %v4055_v30 = vpop.f32.mrf.mxu0  ;;  %4246 = vmatmul.mubr.bf16.gmra.mxu0 %v3864_v63 }
 0x434   : > { %v3634_v12 = vadd.f32 %v3633_v18, %v10367_v53  ;;  %v10570_v36 = vadd.f32 %v10519_v44, %v4055_v30  ;;  %v3792_v14 = vmax.f32 %v3632_v55, 0.0 }
 0x435   : > { %v4306_v27 = vmax.f32 %v4304_v41, %v4305_v33  ;;  %v4311_v20 = vmax.f32 %v4309_v42, %v4310_v0  ;;  %v3637_v25 = vpop.f32.mrf.mxu1  ;;  %v4057_v6 = vpop.f32.mrf.mxu0 }
 0x436   : > { %v3793_v11 = vmax.f32 %v3634_v12, 0.0  ;;  %v4316_v16 = vsel %vm3236_vm4, %v10570_v36, -inf  ;;  %v3866_v47 = vpack.c.bf16 %v3792_v14, %v3790_v22  ;;  %v3638_v41 = vadd.f32 %v3637_v25, %v10371_v35 }
 0x437   : > { %v4307_v62 = vrot.slane %v4306_v27, 1  ;;  %v4312_v58 = vrot.slane %v4311_v20, 2  ;;  %v4317_v4 = vrot.slane %v4316_v16, 4  ;;  %v3639_v9 = vpop.f32.mrf.mxu1  ;;  %v4058_v50 = vpop.f32.mrf.mxu0 }
 0x438   : > { %v3867_v29 = vpack.c.bf16 %v3793_v11, %v3791_v57  ;;  %v10587_v2 = vadd.f32 %v10519_v44, %v4058_v50  ;;  %v3640_v45 = vadd.f32 %v3639_v9, %v10367_v53  ;;  %v3794_v6 = vmax.f32 %v3638_v41, 0.0 }
 0x439   : > { %v4308_v49 = vmax.f32 %v4306_v27, %v4307_v62  ;;  %v4313_v61 = vmax.f32 %v4311_v20, %v4312_v58  ;;  %v4318_v48 = vmax.f32 %v4316_v16, %v4317_v4  ;;  %v3641_v34 = vpop.f32.mrf.mxu1  ;;  %v4060_v63 = vpop.f32.mrf.mxu0 }
 0x43a   : > { %v4323_v31 = vsel %vm3236_vm4, %v10587_v2, -inf  ;;  %v3642_v23 = vadd.f32 %v3641_v34, %v10371_v35  ;;  %4253 = vmatprep.mubr.bf16.mxu0 %v3867_v29  ;;  %v3795_v57 = vmax.f32 %v3640_v45, 0.0  ;;  %v12470_v63 = vld [vmem:[#allocation32_spill] sm:$0xff] }
 0x43b   : > { %v4750_v28 = vsub.f32 %v10534_v54, %v4308_v49  ;;  %v4314_v7 = vrot.slane %v4313_v61, 1  ;;  %v4319_v42 = vrot.slane %v4318_v48, 2  ;;  %v4324_v55 = vrot.slane %v4323_v31, 4  ;;  %v3643_v46 = vpop.f32.mrf.mxu1  ;;  %v4063_v33 = vpop.f32.mrf.mxu0  ;;  %4254 = vmatmul.mubr.bf16.gmra.mxu0 %v3866_v47 }
 0x43c   : > { %v3796_v0 = vmax.f32 %v3642_v23, 0.0  ;;  %v3644_v18 = vadd.f32 %v3643_v46, %v10367_v53  ;;  %v10600_v30 = vadd.f32 %v10519_v44, %v4063_v33 }
 0x43d   : > { %v4814_v12 = vmul.f32 1.442695, %v4750_v28  ;;  %v4315_v27 = vmax.f32 %v4313_v61, %v4314_v7  ;;  %v4320_v20 = vmax.f32 %v4318_v48, %v4319_v42  ;;  %v4325_v14 = vmax.f32 %v4323_v31, %v4324_v55  ;;  %v3647_v54 = vpop.f32.mrf.mxu1  ;;  %v4065_v25 = vpop.f32.mrf.mxu0 }
 0x43e   : > { %v3797_v11 = vmax.f32 %v3644_v18, 0.0  ;;  %v4330_v16 = vsel %vm3236_vm4, %v10600_v30, -inf  ;;  %v3868_v4 = vpack.c.bf16 %v3796_v0, %v3794_v6  ;;  %v3648_v39 = vadd.f32 %v3647_v54, %v10371_v35 }
 0x43f   : > { %8068 = vpow2.f32 %v4814_v12  ;;  %v4751_v24 = vsub.f32 %v10549_v10, %v4315_v27  ;;  %v4321_v26 = vrot.slane %v4320_v20, 1  ;;  %v4326_v62 = vrot.slane %v4325_v14, 2  ;;  %v3649_v22 = vpop.f32.mrf.mxu1  ;;  %v4066_v58 = vpop.f32.mrf.mxu0 }
 0x440   : > { %v3869_v9 = vpack.c.bf16 %v3797_v11, %v3795_v57  ;;  %v4331_v50 = vrot.slane %v4330_v16, 4  ;;  %v10607_v47 = vadd.f32 %v10519_v44, %v4066_v58  ;;  %v10611_v10 = vadd.f32 %v10564_v51, %v12470_v63 }
 0x441   : > { %v4816_v29 = vmul.f32 1.442695, %v4751_v24  ;;  %v4322_v49 = vmax.f32 %v4320_v20, %v4321_v26  ;;  %v4327_v61 = vmax.f32 %v4325_v14, %v4326_v62  ;;  %v3651_v48 = vpop.f32.mrf.mxu1  ;;  %v4068_v34 = vpop.f32.mrf.mxu0  ;;  %v3650_v45 = vadd.f32 %v3649_v22, %v10367_v53 }
 0x442   : > { %v4332_v41 = vmax.f32 %v4330_v16, %v4331_v50  ;;  %v3652_v31 = vadd.f32 %v3651_v48, %v10371_v35  ;;  %4261 = vmatprep.mubr.bf16.mxu0 %v3869_v9  ;;  %v4337_v7 = vsel %vm3236_vm4, %v10607_v47, -inf  ;;  %v3798_v33 = vmax.f32 %v3648_v39, 0.0 }
 0x443   : > { %8070 = vpow2.f32 %v4816_v29  ;;  %v4752_v23 = vsub.f32 %v10570_v36, %v4322_v49  ;;  %v4328_v28 = vrot.slane %v4327_v61, 1  ;;  %v3653_v42 = vpop.f32.mrf.mxu1  ;;  %v4071_v55 = vpop.f32.mrf.mxu0  ;;  %4262 = vmatmul.mubr.bf16.gmra.mxu0 %v3868_v4  ;;  %v4338_v51 = vrot.slane %v4337_v7, 4 }
 0x444   : > { %v4333_v46 = vrot.slane %v4332_v41, 2  ;;  %v3654_v0 = vadd.f32 %v3653_v42, %v10367_v53  ;;  %v3800_v27 = vmax.f32 %v3652_v31, 0.0  ;;  %v10620_v20 = vadd.f32 %v10519_v44, %v4071_v55 }
 0x445   : > { %v4818_v18 = vmul.f32 1.442695, %v4752_v23  ;;  %v4329_v12 = vmax.f32 %v4327_v61, %v4328_v28  ;;  %v3657_v14 = vpop.f32.mrf.mxu1  ;;  %v4073_v36 = vpop.f32.mrf.mxu0  ;;  %v3799_v25 = vmax.f32 %v3650_v45, 0.0  ;;  %v4339_v6 = vmax.f32 %v4337_v7, %v4338_v51 }
 0x446   : > { %v4334_v54 = vmax.f32 %v4332_v41, %v4333_v46  ;;  %v3801_v57 = vmax.f32 %v3654_v0, 0.0  ;;  %v4344_v16 = vsel %vm3236_vm4, %v10620_v20, -inf  ;;  %v3658_v24 = vadd.f32 %v3657_v14, %v10371_v35 }
 0x447   : > { %8072 = vpow2.f32 %v4818_v18  ;;  %v4753_v11 = vsub.f32 %v10587_v2, %v4329_v12  ;;  %v3659_v26 = vpop.f32.mrf.mxu1  ;;  %v4074_v62 = vpop.f32.mrf.mxu0  ;;  %v4340_v58 = vrot.slane %v4339_v6, 2  ;;  %v4345_v9 = vrot.slane %v4344_v16, 4 }
 0x448   : > { %v4335_v22 = vrot.slane %v4334_v54, 1  ;;  %v3871_v4 = vpack.c.bf16 %v3801_v57, %v3799_v25  ;;  %v3870_v39 = vpack.c.bf16 %v3800_v27, %v3798_v33  ;;  %v3660_v29 = vadd.f32 %v3659_v26, %v10367_v53 }
 0x449   : > { %v4820_v50 = vmul.f32 1.442695, %v4753_v11  ;;  %v10628_v49 = vadd.f32 %v10519_v44, %v4074_v62  ;;  %v3661_v61 = vpop.f32.mrf.mxu1  ;;  %v4076_v2 = vpop.f32.mrf.mxu0  ;;  %v4341_v34 = vmax.f32 %v4339_v6, %v4340_v58  ;;  %v4346_v63 = vmax.f32 %v4344_v16, %v4345_v9 }
 0x44a   : > { %v4336_v48 = vmax.f32 %v4334_v54, %v4335_v22  ;;  %v3662_v41 = vadd.f32 %v3661_v61, %v10371_v35  ;;  %4269 = vmatprep.mubr.bf16.mxu0 %v3871_v4  ;;  %v3802_v45 = vmax.f32 %v3658_v24, 0.0  ;;  %v3803_v31 = vmax.f32 %v3660_v29, 0.0 }
 0x44b   : > { %8074 = vpow2.f32 %v4820_v50  ;;  %v4351_v23 = vsel %vm3236_vm4, %v10628_v49, -inf  ;;  %v3663_v28 = vpop.f32.mrf.mxu1  ;;  %v4079_v7 = vpop.f32.mrf.mxu0  ;;  %4270 = vmatmul.mubr.bf16.gmra.mxu0 %v3870_v39  ;;  %v4342_v46 = vrot.slane %v4341_v34, 1  ;;  %v4347_v33 = vrot.slane %v4346_v63, 2 }
 0x44c   : > { %v10633_v42 = vpop.eup %8068  ;;  %v4754_v55 = vsub.f32 %v10600_v30, %v4336_v48  ;;  %v4352_v51 = vrot.slane %v4351_v23, 4  ;;  %v3804_v18 = vmax.f32 %v3662_v41, 0.0  ;;  %v3664_v12 = vadd.f32 %v3663_v28, %v10367_v53 }
 0x44d   : > { %v4942_v0 = vsel %vm3236_vm4, %v10633_v42, 0.0  ;;  %v10640_v27 = vadd.f32 %v10519_v44, %v4079_v7  ;;  %v3667_v14 = vpop.f32.mrf.mxu1  ;;  %v4081_v36 = vpop.f32.mrf.mxu0  ;;  %v4343_v6 = vmax.f32 %v4341_v34, %v4342_v46  ;;  %v4348_v57 = vmax.f32 %v4346_v63, %v4347_v33 }
 0x44e   : > { %v4943_v54 = vrot.slane %v4942_v0, 4  ;;  %v4822_v25 = vmul.f32 1.442695, %v4754_v55  ;;  %v4353_v11 = vmax.f32 %v4351_v23, %v4352_v51  ;;  %v3872_v30 = vpack.c.bf16 %v3804_v18, %v3802_v45 }
 0x44f   : > { %v3805_v16 = vmax.f32 %v3664_v12, 0.0  ;;  %v4358_v24 = vsel %vm3236_vm4, %v10640_v27, -inf  ;;  %v4082_v26 = vpop.f32.mrf.mxu0  ;;  %v4755_v58 = vsub.f32 %v10607_v47, %v4343_v6  ;;  %v4349_v4 = vrot.slane %v4348_v57, 1  ;;  %v3669_v61 = vpop.f32.mrf.mxu1 }
 0x450   : > { %v10644_v62 = vpop.eup %8070  ;;  %v4944_v22 = vadd.f32 %v4943_v54, %v4942_v0  ;;  %8076 = vpow2.f32 %v4822_v25  ;;  %v4354_v50 = vrot.slane %v4353_v11, 2  ;;  %v4359_v29 = vrot.slane %v4358_v24, 4 }
 0x451   : > { %v4949_v9 = vsel %vm3236_vm4, %v10644_v62, 0.0  ;;  %v3873_v39 = vpack.c.bf16 %v3805_v16, %v3803_v31  ;;  %v4084_v2 = vpop.f32.mrf.mxu0  ;;  %v4824_v63 = vmul.f32 1.442695, %v4755_v58  ;;  %v4350_v41 = vmax.f32 %v4348_v57, %v4349_v4  ;;  %v3671_v0 = vpop.f32.mrf.mxu1 }
 0x452   : > { %v4945_v48 = vrot.slane %v4944_v22, 2  ;;  %v4950_v34 = vrot.slane %v4949_v9, 4  ;;  %v10653_v45 = vadd.f32 %v5969_v5, %v9849_v17  ;;  %v4355_v47 = vmax.f32 %v4353_v11, %v4354_v50 }
 0x453   : > { %v4360_v23 = vmax.f32 %v4358_v24, %v4359_v29  ;;  %v10656_v28 = vadd.f32 %v3667_v14, %v10371_v35  ;;  %4277 = vmatprep.mubr.bf16.mxu0 %v3873_v39  ;;  %v10658_v31 = vpop.f32.mrf.mxu0  ;;  %8078 = vpow2.f32 %v4824_v63  ;;  %v4756_v33 = vsub.f32 %v10620_v20, %v4350_v41  ;;  %v3673_v39 = vpop.f32.mrf.mxu1 }
 0x454   : > { %v10660_v7 = vpop.eup %8072  ;;  %v4946_v55 = vadd.f32 %v4945_v48, %v4944_v22  ;;  %v4951_v46 = vadd.f32 %v4950_v34, %v4949_v9  ;;  %4278 = vmatmul.mubr.bf16.gmra.mxu0 %v3872_v30  ;;  %v4356_v1 = vrot.slane %v4355_v47, 1  ;;  %v10666_v51 = vadd.f32 %v3669_v61, %v10367_v53  ;;  %v8064_v30 = vld [vmem:[%s12139_s16 + $0x18] sm:$0xff]  }
 0x455   : > { %v4956_v17 = vsel %vm3236_vm4, %v10660_v7, 0.0  ;;  %v4361_v5 = vrot.slane %v4360_v23, 2  ;;  %v4089_v18 = vpop.f32.mrf.mxu0  ;;  %v4826_v54 = vmul.f32 1.442695, %v4756_v33  ;;  %v3806_v57 = vmax.f32 %v10656_v28, 0.0  ;;  %7913 = vmatprep.subr.bf16.mxu1 %v8064_v30 }
 0x456   : > { %v4947_v12 = vrot.slane %v4946_v55, 1  ;;  %v4952_v14 = vrot.slane %v4951_v46, 2  ;;  %v4957_v36 = vrot.slane %v4956_v17, 4  ;;  %v4357_v25 = vmax.f32 %v4355_v47, %v4356_v1  ;;  %7914 = vmatpush3.bf16.msra.mxu1 %v8064_v30 }
 0x457   : > { %v4362_v6 = vmax.f32 %v4360_v23, %v4361_v5  ;;  %v10670_v20 = vadd.f32 %v10519_v44, %v4082_v26  ;;  %v10672_v11 = vpop.f32.mrf.mxu0  ;;  %8080 = vpow2.f32 %v4826_v54  ;;  %v3672_v47 = vadd.f32 %v3671_v0, %v10371_v35 }
 0x458   : > { %v10677_v16 = vpop.eup %8074  ;;  %v4948_v24 = vadd.f32 %v4947_v12, %v4946_v55  ;;  %v4953_v22 = vadd.f32 %v4952_v14, %v4951_v46  ;;  %v4958_v58 = vadd.f32 %v4957_v36, %v4956_v17  ;;  %v4757_v9 = vsub.f32 %v10628_v49, %v4357_v25 }
 0x459   : > { %v4963_v4 = vsel %vm3236_vm4, %v10677_v16, 0.0  ;;  %v4363_v50 = vrot.slane %v4362_v6, 1  ;;  %v4365_v26 = vsel %vm3236_vm4, %v10670_v20, -inf  ;;  %v4092_v29 = vpop.f32.mrf.mxu0  ;;  %v3674_v46 = vadd.f32 %v3673_v39, %v10367_v53  ;;  %v3677_v39 = vpop.f32.mrf.mxu1 }
 0x45a   : > { %8082 = vrcp.f32 %v4948_v24  ;;  %v4954_v61 = vrot.slane %v4953_v22, 1  ;;  %v4959_v2 = vrot.slane %v4958_v58, 2  ;;  %v4964_v48 = vrot.slane %v4963_v4, 4 }
 0x45b   : > { %v4828_v34 = vmul.f32 1.442695, %v4757_v9  ;;  %v4364_v63 = vmax.f32 %v4362_v6, %v4363_v50  ;;  %v4366_v41 = vrot.slane %v4365_v26, 4  ;;  %v10685_v23 = vpop.f32.mrf.mxu0  ;;  %v3808_v5 = vmax.f32 %v3672_v47, 0.0  ;;  %v12471_v47 = vld [vmem:[#allocation39_spill] sm:$0xff] }
 0x45c   : > { %v4955_v49 = vadd.f32 %v4954_v61, %v4953_v22  ;;  %v4960_v28 = vadd.f32 %v4959_v2, %v4958_v58  ;;  %v4965_v55 = vadd.f32 %v4964_v48, %v4963_v4  ;;  %v3807_v25 = vmax.f32 %v10666_v51, 0.0 }
 0x45d   : > { %v10688_v33 = vpop.eup %8076  ;;  %8084 = vpow2.f32 %v4828_v34  ;;  %v4758_v17 = vsub.f32 %v10640_v27, %v4364_v63  ;;  %v4367_v1 = vmax.f32 %v4365_v26, %v4366_v41  ;;  %v4097_v18 = vpop.f32.mrf.mxu0  ;;  %v3809_v58 = vmax.f32 %v3674_v46, 0.0 }
 0x45e   : > { %8086 = vrcp.f32 %v4955_v49  ;;  %v4961_v12 = vrot.slane %v4960_v28, 1  ;;  %v4966_v14 = vrot.slane %v4965_v55, 2  ;;  %v4970_v0 = vsel %vm3236_vm4, %v10688_v33, 0.0 }
 0x45f   : > { %v4971_v36 = vrot.slane %v4970_v0, 4  ;;  %v4830_v54 = vmul.f32 1.442695, %v4758_v17  ;;  %v4368_v6 = vrot.slane %v4367_v1, 2  ;;  %v10694_v30 = vpop.f32.mrf.mxu0  ;;  %v10698_v27 = vadd.f32 %v10519_v44, %v10658_v31 }
 0x460   : > { %v4962_v24 = vadd.f32 %v4961_v12, %v4960_v28  ;;  %v4967_v22 = vadd.f32 %v4966_v14, %v4965_v55  ;;  %v10700_v4 = vpop.eup %8078  ;;  %v3874_v26 = vpack.c.bf16 %v3808_v5, %v3806_v57  ;;  %v3875_v2 = vpack.c.bf16 %v3809_v58, %v3807_v25 }
 0x461   : > { %v4972_v9 = vadd.f32 %v4971_v36, %v4970_v0  ;;  %8088 = vpow2.f32 %v4830_v54  ;;  %v4369_v50 = vmax.f32 %v4367_v1, %v4368_v6  ;;  %v4100_v29 = vpop.f32.mrf.mxu0  ;;  %v4977_v61 = vsel %vm3236_vm4, %v10700_v4, 0.0 }
 0x462   : > { %8090 = vrcp.f32 %v4962_v24  ;;  %v4968_v51 = vrot.slane %v4967_v22, 1  ;;  %v4978_v34 = vrot.slane %v4977_v61, 4  ;;  %v4372_v31 = vsel %vm3236_vm4, %v10698_v27, -inf  ;;  %4285 = vmatprep.mubr.bf16.mxu0 %v3875_v2  ;;  %v3679_v24 = vpop.f32.mrf.mxu1 }
 0x463   : > { %v4973_v48 = vrot.slane %v4972_v9, 2  ;;  %v4370_v63 = vrot.slane %v4369_v50, 1  ;;  %v10706_v41 = vpop.f32.mrf.mxu0  ;;  %v10710_v49 = vadd.f32 %v10573_v3, %v12471_v47  ;;  %v4373_v28 = vrot.slane %v4372_v31, 4  ;;  %4286 = vmatmul.mubr.bf16.gmra.mxu0 %v3874_v26 }
 0x464   : > { %v4969_v57 = vadd.f32 %v4968_v51, %v4967_v22  ;;  %v10713_v55 = vadd.f32 %v3677_v39, %v10371_v35  ;;  %v10715_v46 = vpop.eup %8080  ;;  %v4979_v1 = vadd.f32 %v4978_v34, %v4977_v61  ;;  %v10719_v18 = vadd.f32 %v10519_v44, %v10672_v11  ;;  %v12472_v51 = vld [vmem:[#allocation82_spill] sm:$0xff] }
 0x465   : > { %v4974_v17 = vadd.f32 %v4973_v48, %v4972_v9  ;;  %v4371_v5 = vmax.f32 %v4369_v50, %v4370_v63  ;;  %v4105_v12 = vpop.f32.mrf.mxu0  ;;  %v10725_v3 = vadd.f32 %v5973_v38, %v9838_v56  ;;  %v4984_v14 = vsel %vm3236_vm4, %v10715_v46, 0.0 }
 0x466   : > { %8092 = vrcp.f32 %v4969_v57  ;;  %v4374_v0 = vmax.f32 %v4372_v31, %v4373_v28  ;;  %v4980_v25 = vrot.slane %v4979_v1, 2  ;;  %v4985_v6 = vrot.slane %v4984_v14, 4 }
 0x467   : > { %v8083_v36 = vpop.eup %8082  ;;  %v4975_v54 = vrot.slane %v4974_v17, 1  ;;  %v4759_v11 = vsub.f32 %v10670_v20, %v4371_v5  ;;  %v10730_v22 = vpop.f32.mrf.mxu0  ;;  %v3810_v52 = vmax.f32 %v10713_v55, 0.0  ;;  %v4379_v56 = vsel %vm3236_vm4, %v10719_v18, -inf }
 0x468   : > { %v5454_v58 = vmul.f32 %v8083_v36, %v10633_v42  ;;  %v4375_v9 = vrot.slane %v4374_v0, 2  ;;  %v4981_v38 = vadd.f32 %v4980_v25, %v4979_v1  ;;  %v4986_v50 = vadd.f32 %v4985_v6, %v4984_v14 }
 0x469   : > { %v4976_v43 = vadd.f32 %v4975_v54, %v4974_v17  ;;  %v4832_v26 = vmul.f32 1.442695, %v4759_v11  ;;  %v4108_v39 = vpop.f32.mrf.mxu0  ;;  %v10740_v2 = vadd.f32 %v3679_v24, %v10367_v53  ;;  %v4380_v42 = vrot.slane %v4379_v56, 4  ;;  %v12473_v54 = vld [vmem:[#allocation84_spill] sm:$0xff] }
 0x46a   : > { %v10736_v29 = vpop.eup %8084  ;;  %v6302_v20 = vmul.f32 %v12472_v51, %v5454_v58  ;;  %v4376_v61 = vmax.f32 %v4374_v0, %v4375_v9  ;;  %v4982_v34 = vrot.slane %v4981_v38, 1  ;;  %v4987_v63 = vrot.slane %v4986_v50, 2  ;;  %v3681_v58 = vpop.f32.mrf.mxu1 }
 0x46b   : > { %v8087_v48 = vpop.eup %8086  ;;  %8094 = vrcp.f32 %v4976_v43  ;;  %v4991_v31 = vsel %vm3236_vm4, %v10736_v29, 0.0  ;;  %v10744_v47 = vpop.f32.mrf.mxu0  ;;  %v3811_v11 = vmax.f32 %v10740_v2, 0.0  ;;  %v4381_v24 = vmax.f32 %v4379_v56, %v4380_v42 }
 0x46c   : > { %v6366_v57 = vsel %vm3236_vm4, %v6302_v20, 0.0  ;;  %v5455_v28 = vmul.f32 %v8087_v48, %v10644_v62  ;;  %v4992_v17 = vrot.slane %v4991_v31, 4  ;;  %8096 = vpow2.f32 %v4832_v26 }
 0x46d   : > { %v6367_v1 = vrot.slane %v6366_v57, 4  ;;  %v4983_v5 = vadd.f32 %v4982_v34, %v4981_v38  ;;  %v4988_v12 = vadd.f32 %v4987_v63, %v4986_v50  ;;  %v4377_v14 = vrot.slane %v4376_v61, 1  ;;  %v4113_v0 = vpop.f32.mrf.mxu0 }
 0x46e   : > { %v10748_v36 = vpop.eup %8088  ;;  %v6303_v25 = vmul.f32 %v12473_v54, %v5455_v28  ;;  %v4993_v6 = vadd.f32 %v4992_v17, %v4991_v31  ;;  %v3682_v56 = vadd.f32 %v3681_v58, %v10371_v35  ;;  %v12474_v31 = vld [vmem:[#allocation81_spill] sm:$0xff] }
 0x46f   : > { %v8091_v9 = vpop.eup %8090  ;;  %v6368_v43 = vadd.f32 %v6367_v1, %v6366_v57  ;;  %8098 = vrcp.f32 %v4983_v5  ;;  %v4989_v62 = vrot.slane %v4988_v12, 1  ;;  %v4998_v26 = vsel %vm3236_vm4, %v10748_v36, 0.0  ;;  %v10754_v38 = vpop.f32.mrf.mxu0 }
 0x470   : > { %v6373_v50 = vsel %vm3236_vm4, %v6303_v25, 0.0  ;;  %v5456_v39 = vmul.f32 %v8091_v9, %v10660_v7  ;;  %v4994_v51 = vrot.slane %v4993_v6, 2  ;;  %v4999_v20 = vrot.slane %v4998_v26, 4 }
 0x471   : > { %v6374_v48 = vrot.slane %v6373_v50, 4  ;;  %v4990_v34 = vadd.f32 %v4989_v62, %v4988_v12  ;;  %v4378_v63 = vmax.f32 %v4376_v61, %v4377_v14  ;;  %v4116_v42 = vpop.f32.mrf.mxu0  ;;  %v4382_v1 = vrot.slane %v4381_v24, 2 }
 0x472   : > { %v6304_v57 = vmul.f32 %v12474_v31, %v5456_v39  ;;  %v4995_v28 = vadd.f32 %v4994_v51, %v4993_v6  ;;  %v5000_v17 = vadd.f32 %v4999_v20, %v4998_v26  ;;  %v6369_v0 = vrot.slane %v6368_v43, 2  ;;  %v12475_v39 = vld [vmem:[#allocation83_spill] sm:$0xff]  ;;  %v3683_v42 = vpop.f32.mrf.mxu1 }
 0x473   : > { %v8093_v5 = vpop.eup %8092  ;;  %v6375_v54 = vadd.f32 %v6374_v48, %v6373_v50  ;;  %8100 = vrcp.f32 %v4990_v34  ;;  %v4760_v25 = vsub.f32 %v10698_v27, %v4378_v63  ;;  %v10761_v7 = vpop.f32.mrf.mxu0  ;;  %v3812_v6 = vmax.f32 %v3682_v56, 0.0 }
 0x474   : > { %v6380_v9 = vsel %vm3236_vm4, %v6304_v57, 0.0  ;;  %v5457_v61 = vmul.f32 %v8093_v5, %v10677_v16  ;;  %v4996_v12 = vrot.slane %v4995_v28, 1  ;;  %v5001_v35 = vrot.slane %v5000_v17, 2 }
 0x475   : > { %v6376_v14 = vrot.slane %v6375_v54, 2  ;;  %v6381_v58 = vrot.slane %v6380_v9, 4  ;;  %v4834_v62 = vmul.f32 1.442695, %v4760_v25  ;;  %v4121_v26 = vpop.f32.mrf.mxu0  ;;  %v4383_v48 = vmax.f32 %v4381_v24, %v4382_v1 }
 0x476   : > { %v6305_v51 = vmul.f32 %v12475_v39, %v5457_v61  ;;  %v4997_v20 = vadd.f32 %v4996_v12, %v4995_v28  ;;  %v5002_v50 = vadd.f32 %v5001_v35, %v5000_v17  ;;  %v6370_v34 = vadd.f32 %v6369_v0, %v6368_v43 }
 0x477   : > { %v6377_v27 = vadd.f32 %v6376_v14, %v6375_v54  ;;  %v6382_v63 = vadd.f32 %v6381_v58, %v6380_v9  ;;  %8102 = vpow2.f32 %v4834_v62  ;;  %v10766_v31 = vpop.f32.mrf.mxu0  ;;  %v4384_v25 = vrot.slane %v4383_v48, 1  ;;  %v12476_v14 = vld [vmem:[#allocation86_spill] sm:$0xff] }
 0x478   : > { %v8095_v16 = vpop.eup %8094  ;;  %v6387_v57 = vsel %vm3236_vm4, %v6305_v51, 0.0  ;;  %8104 = vrcp.f32 %v4997_v20  ;;  %v5003_v5 = vrot.slane %v5002_v50, 1  ;;  %v3876_v24 = vpack.c.bf16 %v3812_v6, %v3810_v52 }
 0x479   : > { %v10769_v56 = vpop.eup %8096  ;;  %v6383_v26 = vrot.slane %v6382_v63, 2  ;;  %v6388_v61 = vrot.slane %v6387_v57, 4  ;;  %v5458_v28 = vmul.f32 %v8095_v16, %v10688_v33  ;;  %v4124_v43 = vpop.f32.mrf.mxu0  ;;  %v4385_v0 = vmax.f32 %v4383_v48, %v4384_v25  ;;  %v12478_v25 = vld [vmem:[#allocation33_spill] sm:$0xff] }
 0x47a   : > { %v5004_v17 = vadd.f32 %v5003_v5, %v5002_v50  ;;  %v5005_v1 = vsel %vm3236_vm4, %v10769_v56, 0.0  ;;  %v3684_v54 = vadd.f32 %v3683_v42, %v10367_v53  ;;  %v6371_v9 = vrot.slane %v6370_v34, 1 }
 0x47b   : > { %v6378_v12 = vrot.slane %v6377_v27, 1  ;;  %v6389_v35 = vadd.f32 %v6388_v61, %v6387_v57  ;;  %v6306_v58 = vmul.f32 %v12476_v14, %v5458_v28  ;;  %v10778_v62 = vpop.f32.mrf.mxu0  ;;  %v5006_v33 = vrot.slane %v5005_v1, 4 }
 0x47c   : > { %v8099_v39 = vpop.eup %8098  ;;  %8106 = vrcp.f32 %v5004_v17  ;;  %v4761_v55 = vsub.f32 %v10719_v18, %v4385_v0  ;;  %v3813_v52 = vmax.f32 %v3684_v54, 0.0  ;;  %v10781_v6 = vadd.f32 %v6383_v26, %v6382_v63 }
 0x47d   : > { %v6390_v51 = vrot.slane %v6389_v35, 2  ;;  %v6394_v20 = vsel %vm3236_vm4, %v6306_v58, 0.0  ;;  %v5459_v53 = vmul.f32 %v8099_v39, %v10700_v4  ;;  %v4129_v50 = vpop.f32.mrf.mxu0  ;;  %v5007_v42 = vadd.f32 %v5006_v33, %v5005_v1 }
 0x47e   : > { %v6395_v48 = vrot.slane %v6394_v20, 4  ;;  %v4836_v16 = vmul.f32 1.442695, %v4761_v55  ;;  %v3877_v57 = vpack.c.bf16 %v3813_v52, %v3811_v11  ;;  %v10787_v5 = vadd.f32 %v6371_v9, %v6370_v34 }
 0x47f   : > { %v10790_v61 = vmul.f32 %v12478_v25, %v5459_v53  ;;  %v10794_v18 = vadd.f32 %v10519_v44, %v10685_v23  ;;  %v10798_v63 = vadd.f32 %v10519_v44, %v10694_v30  ;;  %v10800_v4 = vpop.f32.mrf.mxu0  ;;  %v10802_v28 = vadd.f32 %v6378_v12, %v6377_v27 }
 0x480   : > { %12477 = vst [vmem:[#allocation54_spill] sm:$0xff] %v10787_v5  ;;  %v8101_v26 = vpop.eup %8100  ;;  %v5008_v2 = vrot.slane %v5007_v42, 2  ;;  %8108 = vpow2.f32 %v4836_v16  ;;  %4293 = vmatprep.mubr.bf16.mxu0 %v3877_v57  ;;  %v10806_v11 = vadd.f32 %v10519_v44, %v10706_v41  ;;  %v10814_v17 = vadd.f32 %v6390_v51, %v6389_v35  ;;  %v12480_v41 = vld [vmem:[#allocation85_spill] sm:$0xff] }
 0x481   : > { %12479 = vst [vmem:[#allocation52_spill] sm:$0xff] %v10802_v28  ;;  %v5460_v23 = vmul.f32 %v8101_v26, %v10715_v46  ;;  %v4386_v30 = vsel %vm3236_vm4, %v10794_v18, -inf  ;;  %v4393_v43 = vsel %vm3236_vm4, %v10798_v63, -inf  ;;  %4294 = vmatmul.mubr.bf16.gmra.mxu0 %v3876_v24  ;;  %v4132_v27 = vpop.f32.mrf.mxu0  ;;  %v10816_v1 = vadd.f32 %v6395_v48, %v6394_v20 }
 0x482   : > { %v5009_v0 = vadd.f32 %v5008_v2, %v5007_v42  ;;  %v4387_v54 = vrot.slane %v4386_v30, 4  ;;  %v4394_v12 = vrot.slane %v4393_v43, 4  ;;  %v4400_v46 = vsel %vm3236_vm4, %v10806_v11, -inf }
 0x483   : > { %v10819_v9 = vmul.f32 %v12480_v41, %v5460_v23  ;;  %v10825_v14 = vadd.f32 %v10519_v44, %v10730_v22  ;;  %v10827_v58 = vpop.f32.mrf.mxu0  ;;  %v4401_v33 = vrot.slane %v4400_v46, 4  ;;  %v10833_v55 = vadd.f32 %v10519_v44, %v10744_v47 }
 0x484   : > { %v10829_v24 = vpop.eup %8102  ;;  %v5010_v35 = vrot.slane %v5009_v0, 1  ;;  %v4388_v39 = vmax.f32 %v4386_v30, %v4387_v54  ;;  %v4395_v20 = vmax.f32 %v4393_v43, %v4394_v12  ;;  %v10841_v53 = vadd.f32 %v10519_v44, %v10754_v38  ;;  %v12481_v30 = vld [vmem:[#allocation87_spill] sm:$0xff] }
 0x485   : > { %v8105_v52 = vpop.eup %8104  ;;  %v5012_v51 = vsel %vm3236_vm4, %v10829_v24, 0.0  ;;  %v4407_v22 = vsel %vm3236_vm4, %v10825_v14, -inf  ;;  %v4137_v50 = vpop.f32.mrf.mxu0  ;;  %v4402_v25 = vmax.f32 %v4400_v46, %v4401_v33  ;;  %v4414_v2 = vsel %vm3236_vm4, %v10833_v55, -inf }
 0x486   : > { %v5461_v48 = vmul.f32 %v8105_v52, %v10736_v29  ;;  %v5011_v42 = vadd.f32 %v5010_v35, %v5009_v0  ;;  %v5013_v16 = vrot.slane %v5012_v51, 4  ;;  %v4389_v57 = vrot.slane %v4388_v39, 2 }
 0x487   : > { %v4396_v47 = vrot.slane %v4395_v20, 2  ;;  %v4408_v26 = vrot.slane %v4407_v22, 4  ;;  %v10846_v23 = vpop.f32.mrf.mxu0  ;;  %v4403_v29 = vrot.slane %v4402_v25, 2  ;;  %v4415_v41 = vrot.slane %v4414_v2, 4 }
 0x488   : > { %v10849_v43 = vmul.f32 %v12481_v30, %v5461_v48  ;;  %8110 = vrcp.f32 %v5011_v42  ;;  %v5014_v44 = vadd.f32 %v5013_v16, %v5012_v51  ;;  %v4390_v38 = vmax.f32 %v4388_v39, %v4389_v57 }
 0x489   : > { %v8107_v27 = vpop.eup %8106  ;;  %v4397_v54 = vmax.f32 %v4395_v20, %v4396_v47  ;;  %v4409_v0 = vmax.f32 %v4407_v22, %v4408_v26  ;;  %v4140_v12 = vpop.f32.mrf.mxu0  ;;  %v4421_v52 = vsel %vm3236_vm4, %v10841_v53, -inf  ;;  %v4404_v34 = vmax.f32 %v4402_v25, %v4403_v29 }
 0x48a   : > { %12482 = vst [vmem:[#allocation60_spill] sm:$0xff] %v10849_v43  ;;  %v5462_v46 = vmul.f32 %v8107_v27, %v10748_v36  ;;  %v5015_v35 = vrot.slane %v5014_v44, 2  ;;  %v4391_v33 = vrot.slane %v4390_v38, 1  ;;  %v4416_v30 = vmax.f32 %v4414_v2, %v4415_v41 }
 0x48b   : > { %v4398_v50 = vrot.slane %v4397_v54, 1  ;;  %v4410_v48 = vrot.slane %v4409_v0, 2  ;;  %v10854_v42 = vpop.f32.mrf.mxu0  ;;  %v4422_v22 = vrot.slane %v4421_v52, 4  ;;  %v4405_v36 = vrot.slane %v4404_v34, 1 }
 0x48c   : > { %v6310_v39 = vmul.f32 %v10581_v60, %v5462_v46  ;;  %v5016_v51 = vadd.f32 %v5015_v35, %v5014_v44  ;;  %v4392_v20 = vmax.f32 %v4390_v38, %v4391_v33  ;;  %v4417_v26 = vrot.slane %v4416_v30, 2 }
 0x48d   : > { %v10857_v16 = vpop.eup %8108  ;;  %v4399_v57 = vmax.f32 %v4397_v54, %v4398_v50  ;;  %v4411_v47 = vmax.f32 %v4409_v0, %v4410_v48  ;;  %v4145_v27 = vpop.f32.mrf.mxu0  ;;  %v4406_v38 = vmax.f32 %v4404_v34, %v4405_v36 }
 0x48e   : > { %v6422_v12 = vsel %vm3236_vm4, %v6310_v39, 0.0  ;;  %v5017_v40 = vrot.slane %v5016_v51, 1  ;;  %v5019_v25 = vsel %vm3236_vm4, %v10857_v16, 0.0  ;;  %v4762_v2 = vsub.f32 %v10794_v18, %v4392_v20 }
 0x48f   : > { %v6423_v29 = vrot.slane %v6422_v12, 4  ;;  %v5020_v60 = vrot.slane %v5019_v25, 4  ;;  %v4763_v44 = vsub.f32 %v10798_v63, %v4399_v57  ;;  %v10864_v41 = vpop.f32.mrf.mxu0  ;;  %v4412_v0 = vrot.slane %v4411_v47, 1 }
 0x490   : > { %v5018_v54 = vadd.f32 %v5017_v40, %v5016_v51  ;;  %v4838_v46 = vmul.f32 1.442695, %v4762_v2  ;;  %v4418_v35 = vmax.f32 %v4416_v30, %v4417_v26  ;;  %v4764_v39 = vsub.f32 %v10806_v11, %v4406_v38 }
 0x491   : > { %v6424_v33 = vadd.f32 %v6423_v29, %v6422_v12  ;;  %v5021_v50 = vadd.f32 %v5020_v60, %v5019_v25  ;;  %v4840_v48 = vmul.f32 1.442695, %v4763_v44  ;;  %v4148_v27 = vpop.f32.mrf.mxu0  ;;  %v4413_v21 = vmax.f32 %v4411_v47, %v4412_v0  ;;  %v10880_v29 = vld [vmem:[%s12138_s15] ss:$0 sm:$0xff] }
 0x492   : > { %8112 = vrcp.f32 %v5018_v54  ;;  %v4419_v18 = vrot.slane %v4418_v35, 1  ;;  %v4423_v20 = vmax.f32 %v4421_v52, %v4422_v22  ;;  %v4842_v63 = vmul.f32 1.442695, %v4764_v39 }
 0x493   : > { %v6425_v8 = vrot.slane %v6424_v33, 2  ;;  %v5022_v28 = vrot.slane %v5021_v50, 2  ;;  %8114 = vpow2.f32 %v4838_v46  ;;  %v10867_v34 = vpop.f32.mrf.mxu0  ;;  %v4765_v40 = vsub.f32 %v10825_v14, %v4413_v21 }
 0x494   : > { %8116 = vpow2.f32 %v4840_v48  ;;  %v4420_v30 = vmax.f32 %v4418_v35, %v4419_v18  ;;  %v4424_v51 = vrot.slane %v4423_v20, 2  ;;  %v10872_v11 = vsel %vm3236_vm4, %v10790_v61, 0.0 }
 0x495   : > { %v8111_v57 = vpop.eup %8110  ;;  %v6426_v36 = vadd.f32 %v6425_v8, %v6424_v33  ;;  %v5023_v47 = vadd.f32 %v5022_v28, %v5021_v50  ;;  %8118 = vpow2.f32 %v4842_v63  ;;  %v4153_v52 = vpop.f32.mrf.mxu0  ;;  %v4844_v26 = vmul.f32 1.442695, %v4765_v40 }
 0x496   : > { %v5463_v22 = vmul.f32 %v8111_v57, %v10769_v56  ;;  %v4766_v12 = vsub.f32 %v10833_v55, %v4420_v30  ;;  %v4425_v25 = vmax.f32 %v4423_v20, %v4424_v51  ;;  %v10884_v8 = vadd.f32 %v10880_v29, %v10761_v7 }
 0x497   : > { %v6427_v21 = vrot.slane %v6426_v36, 1  ;;  %v5024_v14 = vrot.slane %v5023_v47, 1  ;;  %v10886_v61 = vpop.f32.mrf.mxu0  ;;  %8120 = vpow2.f32 %v4844_v26  ;;  %v10894_v54 = vadd.f32 %v10880_v29, %v10766_v31 }
 0x498   : > { %v6311_v56 = vmul.f32 %v10596_v37, %v5463_v22  ;;  %v4846_v28 = vmul.f32 1.442695, %v4766_v12  ;;  %v4426_v55 = vrot.slane %v4425_v25, 1  ;;  %v4428_v38 = vsel %vm3236_vm4, %v10884_v8, -inf }
 0x499   : > { %v5025_v44 = vadd.f32 %v5024_v14, %v5023_v47  ;;  %v4156_v46 = vpop.f32.mrf.mxu0  ;;  %v4429_v35 = vrot.slane %v4428_v38, 4  ;;  %v10897_v37 = vadd.f32 %v6427_v21, %v6426_v36  ;;  %v4435_v50 = vsel %vm3236_vm4, %v10894_v54, -inf }
 0x49a   : > { %v6429_v7 = vsel %vm3236_vm4, %v6311_v56, 0.0  ;;  %8122 = vpow2.f32 %v4846_v28  ;;  %v4427_v0 = vmax.f32 %v4425_v25, %v4426_v55  ;;  %v4436_v31 = vrot.slane %v4435_v50, 4 }
 0x49b   : > { %12483 = vst [vmem:[#allocation56_spill] sm:$0xff] %v10897_v37  ;;  %v6430_v33 = vrot.slane %v6429_v7, 4  ;;  %8124 = vrcp.f32 %v5025_v44  ;;  %v10901_v48 = vpop.f32.mrf.mxu0  ;;  %v4430_v27 = vmax.f32 %v4428_v38, %v4429_v35  ;;  %v10906_v18 = vadd.f32 %v10880_v29, %v10778_v62 }
 0x49c   : > { %v4767_v39 = vsub.f32 %v10841_v53, %v4427_v0  ;;  %v10910_v63 = vadd.f32 %v10880_v29, %v10800_v4  ;;  %v10914_v40 = vadd.f32 %v10880_v29, %v10827_v58  ;;  %v10918_v30 = vadd.f32 %v10880_v29, %v10846_v23 }
 0x49d   : > { %v6431_v20 = vadd.f32 %v6430_v33, %v6429_v7  ;;  %v4161_v53 = vpop.f32.mrf.mxu0  ;;  %v4431_v57 = vrot.slane %v4430_v27, 2  ;;  %v4437_v36 = vmax.f32 %v4435_v50, %v4436_v31  ;;  %v4442_v62 = vsel %vm3236_vm4, %v10906_v18, -inf }
 0x49e   : > { %v4848_v51 = vmul.f32 1.442695, %v4767_v39  ;;  %v4443_v22 = vrot.slane %v4442_v62, 4  ;;  %v10924_v4 = vsel %vm3236_vm4, %v10910_v63, -inf  ;;  %v10928_v58 = vsel %vm3236_vm4, %v10914_v40, -inf }
 0x49f   : > { %v8113_v47 = vpop.eup %8112  ;;  %v6432_v52 = vrot.slane %v6431_v20, 2  ;;  %v10930_v23 = vpop.f32.mrf.mxu0  ;;  %v4432_v25 = vmax.f32 %v4430_v27, %v4431_v57  ;;  %v4438_v21 = vrot.slane %v4437_v36, 2 }
 0x4a0   : > { %v10932_v26 = vpop.eup %8114  ;;  %v5464_v12 = vmul.f32 %v8113_v47, %v10829_v24  ;;  %8126 = vpow2.f32 %v4848_v51  ;;  %v10939_v55 = vmax.f32 %v4442_v62, %v4443_v22 }
 0x4a1   : > { %v10935_v14 = vpop.eup %8116  ;;  %v6433_v56 = vadd.f32 %v6432_v52, %v6431_v20  ;;  %v5026_v28 = vsel %vm3236_vm4, %v10932_v26, 0.0  ;;  %v4164_v38 = vpop.f32.mrf.mxu0  ;;  %v4433_v35 = vrot.slane %v4432_v25, 1  ;;  %v4439_v27 = vmax.f32 %v4437_v36, %v4438_v21 }
 0x4a2   : > { %v10942_v46 = vpop.eup %8118  ;;  %v6312_v7 = vmul.f32 %v10576_v59, %v5464_v12  ;;  %v5027_v0 = vrot.slane %v5026_v28, 4  ;;  %v5033_v24 = vsel %vm3236_vm4, %v10935_v14, 0.0 }
 0x4a3   : > { %v6434_v33 = vrot.slane %v6433_v56, 1  ;;  %v5034_v50 = vrot.slane %v5033_v24, 4  ;;  %v5040_v39 = vsel %vm3236_vm4, %v10942_v46, 0.0  ;;  %v10949_v31 = vpop.f32.mrf.mxu0  ;;  %v4434_v57 = vmax.f32 %v4432_v25, %v4433_v35 }
 0x4a4   : > { %v6436_v20 = vsel %vm3236_vm4, %v6312_v7, 0.0  ;;  %v5028_v53 = vadd.f32 %v5027_v0, %v5026_v28  ;;  %v5041_v51 = vrot.slane %v5040_v39, 4  ;;  %v10952_v62 = vpop.eup %8120  ;;  %v4440_v22 = vrot.slane %v4439_v27, 1 }
 0x4a5   : > { %v10954_v59 = vadd.f32 %v6434_v33, %v6433_v56  ;;  %v6437_v47 = vrot.slane %v6436_v20, 4  ;;  %v5035_v52 = vadd.f32 %v5034_v50, %v5033_v24  ;;  %v4169_v12 = vpop.f32.mrf.mxu0  ;;  %v5047_v36 = vsel %vm3236_vm4, %v10952_v62, 0.0 }
 0x4a6   : > { %v5029_v38 = vrot.slane %v5028_v53, 2  ;;  %v5042_v60 = vadd.f32 %v5041_v51, %v5040_v39  ;;  %v4768_v21 = vsub.f32 %v10884_v8, %v4434_v57  ;;  %v5048_v25 = vrot.slane %v5047_v36, 4 }
 0x4a7   : > { %12484 = vst [vmem:[#allocation57_spill] sm:$0xff] %v10954_v59  ;;  %v10959_v2 = vpop.eup %8122  ;;  %v6438_v28 = vadd.f32 %v6437_v47, %v6436_v20  ;;  %v5036_v7 = vrot.slane %v5035_v52, 2  ;;  %v4441_v0 = vmax.f32 %v4439_v27, %v4440_v22  ;;  %v10961_v35 = vpop.f32.mrf.mxu0 }
 0x4a8   : > { %v8125_v56 = vpop.eup %8124  ;;  %v5030_v33 = vadd.f32 %v5029_v38, %v5028_v53  ;;  %v5043_v24 = vrot.slane %v5042_v60, 2  ;;  %v5054_v50 = vsel %vm3236_vm4, %v10959_v2, 0.0  ;;  %v4850_v39 = vmul.f32 1.442695, %v4768_v21 }
 0x4a9   : > { %v6439_v51 = vrot.slane %v6438_v28, 2  ;;  %v5465_v12 = vmul.f32 %v8125_v56, %v10857_v16  ;;  %v5037_v44 = vadd.f32 %v5036_v7, %v5035_v52  ;;  %v5049_v8 = vadd.f32 %v5048_v25, %v5047_v36  ;;  %v4172_v57 = vpop.f32.mrf.mxu0 }
 0x4aa   : > { %v5031_v59 = vrot.slane %v5030_v33, 1  ;;  %v5044_v20 = vadd.f32 %v5043_v24, %v5042_v60  ;;  %v5055_v47 = vrot.slane %v5054_v50, 4  ;;  %8128 = vpow2.f32 %v4850_v39 }
 0x4ab   : > { %v10966_v27 = vadd.f32 %v6439_v51, %v6438_v28  ;;  %v6313_v22 = vmul.f32 %v10584_v19, %v5465_v12  ;;  %v5038_v53 = vrot.slane %v5037_v44, 1  ;;  %v5050_v38 = vrot.slane %v5049_v8, 2  ;;  %v10969_v37 = vpop.f32.mrf.mxu0 }
 0x4ac   : > { %v5032_v5 = vadd.f32 %v5031_v59, %v5030_v33  ;;  %v5045_v21 = vrot.slane %v5044_v20, 1  ;;  %v5056_v43 = vadd.f32 %v5055_v47, %v5054_v50  ;;  %v4769_v16 = vsub.f32 %v10894_v54, %v4441_v0 }
 0x4ad   : > { %v10972_v52 = vpop.eup %8126  ;;  %v6443_v60 = vsel %vm3236_vm4, %v6313_v22, 0.0  ;;  %v5039_v7 = vadd.f32 %v5038_v53, %v5037_v44  ;;  %v5051_v28 = vadd.f32 %v5050_v38, %v5049_v8  ;;  %v4177_v25 = vpop.f32.mrf.mxu0  ;;  %v4445_v44 = vrot.slane %v10939_v55, 2 }
 0x4ae   : > { %v6444_v56 = vrot.slane %v6443_v60, 4  ;;  %8130 = vrcp.f32 %v5032_v5  ;;  %v5046_v19 = vadd.f32 %v5045_v21, %v5044_v20  ;;  %v5057_v24 = vrot.slane %v5056_v43, 2 }
 0x4af   : > { %8132 = vrcp.f32 %v5039_v7  ;;  %v5052_v39 = vrot.slane %v5051_v28, 1  ;;  %v5061_v59 = vsel %vm3236_vm4, %v10972_v52, 0.0  ;;  %v4852_v33 = vmul.f32 1.442695, %v4769_v16  ;;  %v10978_v54 = vpop.f32.mrf.mxu0 }
 0x4b0   : > { %v6445_v0 = vadd.f32 %v6444_v56, %v6443_v60  ;;  %8134 = vrcp.f32 %v5046_v19  ;;  %v5058_v50 = vadd.f32 %v5057_v24, %v5056_v43  ;;  %v5062_v51 = vrot.slane %v5061_v59, 4 }
 0x4b1   : > { %v5053_v12 = vadd.f32 %v5052_v39, %v5051_v28  ;;  %8136 = vpow2.f32 %v4852_v33  ;;  %v12485_v5 = vrot.slane %v10924_v4, 4  ;;  %v4180_v57 = vpop.f32.mrf.mxu0  ;;  %v4457_v53 = vrot.slane %v10928_v58, 4 }
 0x4b2   : > { %v6446_v20 = vrot.slane %v6445_v0, 2  ;;  %v5059_v47 = vrot.slane %v5058_v50, 1  ;;  %v5063_v22 = vadd.f32 %v5062_v51, %v5061_v59  ;;  %v4446_v38 = vmax.f32 %v10939_v55, %v4445_v44 }
 0x4b3   : > { %v4451_v8 = vmax.f32 %v10924_v4, %v12485_v5  ;;  %8138 = vrcp.f32 %v5053_v12  ;;  %v4463_v43 = vsel %vm3236_vm4, %v10918_v30, -inf  ;;  %v10988_v16 = vpop.f32.mrf.mxu0  ;;  %v4458_v4 = vmax.f32 %v10928_v58, %v4457_v53 }
 0x4b4   : > { %v10990_v60 = vadd.f32 %v6446_v20, %v6445_v0  ;;  %v5060_v7 = vadd.f32 %v5059_v47, %v5058_v50  ;;  %v5064_v28 = vrot.slane %v5063_v22, 2  ;;  %v4447_v25 = vrot.slane %v4446_v38, 1 }
 0x4b5   : > { %v4452_v21 = vrot.slane %v4451_v8, 2  ;;  %v4464_v19 = vrot.slane %v4463_v43, 4  ;;  %v10995_v24 = vadd.f32 %v10880_v29, %v10854_v42  ;;  %v4185_v55 = vpop.f32.mrf.mxu0  ;;  %v4459_v59 = vrot.slane %v4458_v4, 2 }
 0x4b6   : > { %8140 = vrcp.f32 %v5060_v7  ;;  %v5065_v39 = vadd.f32 %v5064_v28, %v5063_v22  ;;  %v10999_v33 = vadd.f32 %v10880_v29, %v10864_v41  ;;  %v4448_v50 = vmax.f32 %v4446_v38, %v4447_v25 }
 0x4b7   : > { %v4453_v56 = vmax.f32 %v4451_v8, %v4452_v21  ;;  %v11001_v0 = vpop.eup %8128  ;;  %v4465_v58 = vmax.f32 %v4463_v43, %v4464_v19  ;;  %v4470_v12 = vsel %vm3236_vm4, %v10995_v24, -inf  ;;  %v11005_v44 = vpop.f32.mrf.mxu0  ;;  %v4460_v8 = vmax.f32 %v4458_v4, %v4459_v59 }
 0x4b8   : > { %v5066_v42 = vrot.slane %v5065_v39, 1  ;;  %v5068_v5 = vsel %vm3236_vm4, %v11001_v0, 0.0  ;;  %v4471_v57 = vrot.slane %v4470_v12, 4  ;;  %v4770_v41 = vsub.f32 %v10906_v18, %v4448_v50 }
 0x4b9   : > { %v4454_v51 = vrot.slane %v4453_v56, 1  ;;  %v5069_v20 = vrot.slane %v5068_v5, 4  ;;  %v4466_v22 = vrot.slane %v4465_v58, 2  ;;  %v4188_v53 = vpop.f32.mrf.mxu0  ;;  %v4461_v21 = vrot.slane %v4460_v8, 1 }
 0x4ba   : > { %v5067_v38 = vadd.f32 %v5066_v42, %v5065_v39  ;;  %v4472_v43 = vmax.f32 %v4470_v12, %v4471_v57  ;;  %v4477_v7 = vsel %vm3236_vm4, %v10999_v33, -inf  ;;  %v4854_v19 = vmul.f32 1.442695, %v4770_v41 }
 0x4bb   : > { %v4455_v47 = vmax.f32 %v4453_v56, %v4454_v51  ;;  %v8131_v28 = vpop.eup %8130  ;;  %v5070_v25 = vadd.f32 %v5069_v20, %v5068_v5  ;;  %v4467_v36 = vmax.f32 %v4465_v58, %v4466_v22  ;;  %v11013_v4 = vpop.f32.mrf.mxu0  ;;  %v4462_v56 = vmax.f32 %v4460_v8, %v4461_v21 }
 0x4bc   : > { %v8133_v59 = vpop.eup %8132  ;;  %v5466_v18 = vmul.f32 %v8131_v28, %v10932_v26  ;;  %8142 = vrcp.f32 %v5067_v38  ;;  %v4473_v50 = vrot.slane %v4472_v43, 2 }
 0x4bd   : > { %v4771_v55 = vsub.f32 %v10910_v63, %v4455_v47  ;;  %v8135_v39 = vpop.eup %8134  ;;  %v5467_v51 = vmul.f32 %v8133_v59, %v10935_v14  ;;  %v5071_v12 = vrot.slane %v5070_v25, 2  ;;  %8144 = vpow2.f32 %v4854_v19  ;;  %v4193_v57 = vpop.f32.mrf.mxu0 }
 0x4be   : > { %v11017_v5 = vpop.eup %8136  ;;  %v6314_v63 = vmul.f32 %v10653_v45, %v5466_v18  ;;  %v5468_v58 = vmul.f32 %v8135_v39, %v10942_v46  ;;  %v4772_v20 = vsub.f32 %v10914_v40, %v4462_v56  ;;  %v4468_v41 = vrot.slane %v4467_v36, 1 }
 0x4bf   : > { %v4856_v42 = vmul.f32 1.442695, %v4771_v55  ;;  %v6315_v26 = vmul.f32 %v10725_v3, %v5467_v51  ;;  %v5072_v8 = vadd.f32 %v5071_v12, %v5070_v25  ;;  %v5075_v47 = vsel %vm3236_vm4, %v11017_v5, 0.0 }
 0x4c0   : > { %v8139_v14 = vpop.eup %8138  ;;  %v6450_v22 = vsel %vm3236_vm4, %v6314_v63, 0.0  ;;  %v11027_v53 = vmul.f32 %v10611_v10, %v5468_v58  ;;  %v5076_v38 = vrot.slane %v5075_v47, 4  ;;  %v4858_v45 = vmul.f32 1.442695, %v4772_v20 }
 0x4c1   : > { %8146 = vpow2.f32 %v4856_v42  ;;  %v6451_v21 = vrot.slane %v6450_v22, 4  ;;  %v11030_v46 = vsel %vm3236_vm4, %v6315_v26, 0.0  ;;  %v5469_v40 = vmul.f32 %v8139_v14, %v10952_v62 }
 0x4c2   : > { %v5073_v3 = vrot.slane %v5072_v8, 1  ;;  %v6458_v28 = vrot.slane %v11030_v46, 4  ;;  %v5077_v25 = vadd.f32 %v5076_v38, %v5075_v47  ;;  %8148 = vpow2.f32 %v4858_v45 }
 0x4c3   : > { %v4469_v19 = vmax.f32 %v4467_v36, %v4468_v41  ;;  %v8141_v55 = vpop.eup %8140  ;;  %v11034_v59 = vadd.f32 %v6451_v21, %v6450_v22  ;;  %v11037_v10 = vmul.f32 %v10710_v49, %v5469_v40  ;;  %v4474_v56 = vmax.f32 %v4472_v43, %v4473_v50 }
 0x4c4   : > { %v5074_v18 = vadd.f32 %v5073_v3, %v5072_v8  ;;  %v5470_v39 = vmul.f32 %v8141_v55, %v10959_v2  ;;  %v5078_v51 = vrot.slane %v5077_v25, 2  ;;  %v4478_v62 = vrot.slane %v4477_v7, 4 }
 0x4c5   : > { %v4773_v12 = vsub.f32 %v10918_v30, %v4469_v19  ;;  %v6453_v42 = vrot.slane %v11034_v59, 2  ;;  %v4475_v57 = vrot.slane %v4474_v56, 1  ;;  %v11044_v36 = vadd.f32 %v10880_v29, %v10867_v34 }
 0x4c6   : > { %8150 = vrcp.f32 %v5074_v18  ;;  %v6318_v63 = vmul.f32 %v9719_v13, %v5470_v39  ;;  %v5079_v49 = vadd.f32 %v5078_v51, %v5077_v25  ;;  %v4479_v20 = vmax.f32 %v4477_v7, %v4478_v62 }
 0x4c7   : > { %v4860_v58 = vmul.f32 1.442695, %v4773_v12  ;;  %v4476_v43 = vmax.f32 %v4474_v56, %v4475_v57  ;;  %v4484_v2 = vsel %vm3236_vm4, %v11044_v36, -inf  ;;  %v11051_v30 = vadd.f32 %v10880_v29, %v10886_v61 }
 0x4c8   : > { %v11055_v50 = vadd.f32 %v10880_v29, %v10901_v48  ;;  %v6478_v34 = vsel %vm3236_vm4, %v6318_v63, 0.0  ;;  %v5080_v41 = vrot.slane %v5079_v49, 1  ;;  %v4480_v13 = vrot.slane %v4479_v20, 2 }
 0x4c9   : > { %8152 = vpow2.f32 %v4860_v58  ;;  %v8143_v26 = vpop.eup %8142  ;;  %v6479_v8 = vrot.slane %v6478_v34, 4  ;;  %v4774_v7 = vsub.f32 %v10995_v24, %v4476_v43  ;;  %v4485_v47 = vrot.slane %v4484_v2, 4 }
 0x4ca   : > { %v4491_v14 = vsel %vm3236_vm4, %v11051_v30, -inf  ;;  %v11061_v22 = vpop.eup %8144  ;;  %v5471_v61 = vmul.f32 %v8143_v26, %v10972_v52  ;;  %v5081_v38 = vadd.f32 %v5080_v41, %v5079_v49  ;;  %v4481_v48 = vmax.f32 %v4479_v20, %v4480_v13  ;;  %v8065_v52 = vld [vmem:[%s12139_s16 + $0x10] sm:$0xff]  }
 0x4cb   : > { %v4492_v45 = vrot.slane %v4491_v14, 4  ;;  %v6480_v21 = vadd.f32 %v6479_v8, %v6478_v34  ;;  %v5082_v40 = vsel %vm3236_vm4, %v11061_v22, 0.0  ;;  %v4862_v3 = vmul.f32 1.442695, %v4774_v7  ;;  %7915 = vmatprep.subr.bf16.mxu1 %v8065_v52 }
 0x4cc   : > { %v4486_v25 = vmax.f32 %v4484_v2, %v4485_v47  ;;  %v6319_v24 = vmul.f32 %v9763_v32, %v5471_v61  ;;  %8154 = vrcp.f32 %v5081_v38  ;;  %v5083_v55 = vrot.slane %v5082_v40, 4  ;;  %7916 = vmatpush3.bf16.msra.mxu1 %v8065_v52 }
 0x4cd   : > { %v4482_v18 = vrot.slane %v4481_v48, 1  ;;  %v6481_v56 = vrot.slane %v6480_v21, 2  ;;  %8156 = vpow2.f32 %v4862_v3  ;;  %v4493_v43 = vmax.f32 %v4491_v14, %v4492_v45 }
 0x4ce   : > { %v11066_v19 = vpop.eup %8146  ;;  %v4487_v51 = vrot.slane %v4486_v25, 2  ;;  %v6485_v12 = vsel %vm3236_vm4, %v6319_v24, 0.0  ;;  %v5084_v62 = vadd.f32 %v5083_v55, %v5082_v40 }
 0x4cf   : > { %v5089_v39 = vsel %vm3236_vm4, %v11066_v19, 0.0  ;;  %v4483_v63 = vmax.f32 %v4481_v48, %v4482_v18  ;;  %v11075_v32 = vpop.eup %8148  ;;  %v6482_v49 = vadd.f32 %v6481_v56, %v6480_v21  ;;  %v6486_v58 = vrot.slane %v6485_v12, 4 }
 0x4d0   : > { %v5090_v57 = vrot.slane %v5089_v39, 4  ;;  %v4488_v20 = vmax.f32 %v4486_v25, %v4487_v51  ;;  %v5085_v2 = vrot.slane %v5084_v62, 2  ;;  %v5096_v41 = vsel %vm3236_vm4, %v11075_v32, 0.0 }
 0x4d1   : > { %v4775_v13 = vsub.f32 %v10999_v33, %v4483_v63  ;;  %v6483_v26 = vrot.slane %v6482_v49, 1  ;;  %v6487_v8 = vadd.f32 %v6486_v58, %v6485_v12  ;;  %v5097_v7 = vrot.slane %v5096_v41, 4 }
 0x4d2   : > { %v5091_v34 = vadd.f32 %v5090_v57, %v5089_v39  ;;  %v4489_v47 = vrot.slane %v4488_v20, 1  ;;  %v5086_v38 = vadd.f32 %v5085_v2, %v5084_v62  ;;  %v4494_v21 = vrot.slane %v4493_v43, 2  ;;  %v12486_v39 = vld [vmem:[#allocation15_spill] sm:$0xff] }
 0x4d3   : > { %v8151_v61 = vpop.eup %8150  ;;  %v4864_v40 = vmul.f32 1.442695, %v4775_v13  ;;  %v6484_v3 = vadd.f32 %v6483_v26, %v6482_v49  ;;  %v6488_v25 = vrot.slane %v6487_v8, 2  ;;  %v5098_v45 = vadd.f32 %v5097_v7, %v5096_v41 }
 0x4d4   : > { %v5092_v48 = vrot.slane %v5091_v34, 2  ;;  %v5472_v14 = vmul.f32 %v8151_v61, %v11001_v0  ;;  %v5087_v24 = vrot.slane %v5086_v38, 1  ;;  %v4490_v18 = vmax.f32 %v4488_v20, %v4489_v47 }
 0x4d5   : > { %8158 = vpow2.f32 %v4864_v40  ;;  %v6830_v33 = vpack.c.bf16 %v6484_v3, %v6484_v3  ;;  %v6489_v56 = vadd.f32 %v6488_v25, %v6487_v8  ;;  %v5099_v12 = vrot.slane %v5098_v45, 2 }
 0x4d6   : > { %v5093_v55 = vadd.f32 %v5092_v48, %v5091_v34  ;;  %v11081_v52 = vpop.eup %8152  ;;  %v6320_v51 = vmul.f32 %v12486_v39, %v5472_v14  ;;  %v5088_v62 = vadd.f32 %v5087_v24, %v5086_v38  ;;  %v4776_v0 = vsub.f32 %v11044_v36, %v4490_v18  ;;  %v12487_v24 = vld [vmem:[#allocation29_spill] sm:$0xff] }
 0x4d7   : > { %v5103_v63 = vsel %vm3236_vm4, %v11081_v52, 0.0  ;;  %v6973_v49 = vunpack.c.l.b16 %v6830_v33  ;;  %v6490_v58 = vrot.slane %v6489_v56, 1  ;;  %v5100_v20 = vadd.f32 %v5099_v12, %v5098_v45 }
 0x4d8   : > { %v5094_v57 = vrot.slane %v5093_v55, 1  ;;  %v6492_v2 = vsel %vm3236_vm4, %v6320_v51, 0.0  ;;  %8160 = vrcp.f32 %v5088_v62  ;;  %v5104_v13 = vrot.slane %v5103_v63, 4 }
 0x4d9   : > { %v6493_v34 = vrot.slane %v6492_v2, 4  ;;  %v8155_v26 = vpop.eup %8154  ;;  %v6491_v8 = vadd.f32 %v6490_v58, %v6489_v56  ;;  %v5101_v7 = vrot.slane %v5100_v20, 1  ;;  %v4866_v47 = vmul.f32 1.442695, %v4776_v0  ;;  %v11098_v58 = vpop.f32.mrf.mxu0 }
 0x4da   : > { %v5095_v41 = vadd.f32 %v5094_v57, %v5093_v55  ;;  %v4495_v61 = vmax.f32 %v4493_v43, %v4494_v21  ;;  %v11088_v38 = vpop.eup %8156  ;;  %v5473_v40 = vmul.f32 %v8155_v26, %v11017_v5  ;;  %v5105_v36 = vadd.f32 %v5104_v13, %v5103_v63 }
 0x4db   : > { %v6494_v48 = vadd.f32 %v6493_v34, %v6492_v2  ;;  %v6831_v3 = vpack.c.bf16 %v6491_v8, %v6491_v8  ;;  %v5102_v25 = vadd.f32 %v5101_v7, %v5100_v20  ;;  %v5110_v14 = vsel %vm3236_vm4, %v11088_v38, 0.0 }
 0x4dc   : > { %8162 = vrcp.f32 %v5095_v41  ;;  %v6321_v55 = vmul.f32 %v12487_v24, %v5473_v40  ;;  %v5106_v18 = vrot.slane %v5105_v36, 2  ;;  %v5111_v33 = vrot.slane %v5110_v14, 4 }
 0x4dd   : > { %8164 = vpow2.f32 %v4866_v47  ;;  %v6495_v45 = vrot.slane %v6494_v48, 2  ;;  %v6974_v56 = vunpack.c.l.b16 %v6831_v3  ;;  %v4496_v43 = vrot.slane %v4495_v61, 1  ;;  %v4196_v47 = vpop.f32.mrf.mxu0 }
 0x4de   : > { %8166 = vrcp.f32 %v5102_v25  ;;  %v4498_v21 = vsel %vm3236_vm4, %v11055_v50, -inf  ;;  %v6499_v39 = vsel %vm3236_vm4, %v6321_v55, 0.0  ;;  %v5107_v51 = vadd.f32 %v5106_v18, %v5105_v36 }
 0x4df   : > { %v6496_v5 = vadd.f32 %v6495_v45, %v6494_v48  ;;  %v5112_v12 = vadd.f32 %v5111_v33, %v5110_v14  ;;  %v7042_v62 = vsel %vm7021_vm5, %v6974_v56, %v6973_v49  ;;  %v6500_v57 = vrot.slane %v6499_v39, 4 }
 0x4e0   : > { %v4497_v63 = vmax.f32 %v4495_v61, %v4496_v43  ;;  %v4499_v0 = vrot.slane %v4498_v21, 4  ;;  %v5108_v20 = vrot.slane %v5107_v51, 1  ;;  %v11102_v41 = vadd.f32 %v10880_v29, %v10930_v23 }
 0x4e1   : > { %v6497_v2 = vrot.slane %v6496_v5, 1  ;;  %v5113_v34 = vrot.slane %v5112_v12, 2  ;;  %v6501_v26 = vadd.f32 %v6500_v57, %v6499_v39  ;;  %v11109_v49 = vadd.f32 %v10880_v29, %v10949_v31 }
 0x4e2   : > { %v11104_v13 = vpop.eup %8158  ;;  %v4777_v8 = vsub.f32 %v11051_v30, %v4497_v63  ;;  %v4500_v7 = vmax.f32 %v4498_v21, %v4499_v0  ;;  %v5109_v48 = vadd.f32 %v5108_v20, %v5107_v51  ;;  %v4505_v30 = vsel %vm3236_vm4, %v11102_v41, -inf  ;;  %v12488_v20 = vld [vmem:[#allocation55_spill] sm:$0xff] }
 0x4e3   : > { %v6498_v61 = vadd.f32 %v6497_v2, %v6496_v5  ;;  %v5114_v40 = vadd.f32 %v5113_v34, %v5112_v12  ;;  %v5117_v36 = vsel %vm3236_vm4, %v11104_v13, 0.0  ;;  %v6502_v3 = vrot.slane %v6501_v26, 2 }
 0x4e4   : > { %v5118_v23 = vrot.slane %v5117_v36, 4  ;;  %v4868_v25 = vmul.f32 1.442695, %v4777_v8  ;;  %v4501_v14 = vrot.slane %v4500_v7, 2  ;;  %8168 = vrcp.f32 %v5109_v48 }
 0x4e5   : > { %v6832_v45 = vpack.c.bf16 %v6498_v61, %v6498_v61  ;;  %v5115_v24 = vrot.slane %v5114_v40, 1  ;;  %v8161_v55 = vpop.eup %8160  ;;  %v6503_v31 = vadd.f32 %v6502_v3, %v6501_v26  ;;  %v4506_v5 = vrot.slane %v4505_v30, 4 }
 0x4e6   : > { %v5119_v18 = vadd.f32 %v5118_v23, %v5117_v36  ;;  %8170 = vpow2.f32 %v4868_v25  ;;  %v4502_v33 = vmax.f32 %v4500_v7, %v4501_v14  ;;  %v5474_v43 = vmul.f32 %v8161_v55, %v11061_v22 }
 0x4e7   : > { %v6975_v56 = vunpack.c.l.b16 %v6832_v45  ;;  %v5116_v21 = vadd.f32 %v5115_v24, %v5114_v40  ;;  %v6504_v51 = vrot.slane %v6503_v31, 1  ;;  %v4512_v63 = vsel %vm3236_vm4, %v11109_v49, -inf }
 0x4e8   : > { %v5120_v12 = vrot.slane %v5119_v18, 2  ;;  %v4503_v57 = vrot.slane %v4502_v33, 1  ;;  %v6322_v34 = vmul.f32 %v12488_v20, %v5474_v43  ;;  %v4507_v3 = vmax.f32 %v4505_v30, %v4506_v5 }
 0x4e9   : > { %v8163_v39 = vpop.eup %8162  ;;  %v7043_v2 = vsel %vm7023_vm6, %v6975_v56, %v7042_v62  ;;  %8172 = vrcp.f32 %v5116_v21  ;;  %v6505_v8 = vadd.f32 %v6504_v51, %v6503_v31  ;;  %v12489_v56 = vld [vmem:[#allocation25_spill] sm:$0xff] }
 0x4ea   : > { %v11118_v0 = vpop.eup %8164  ;;  %v5475_v26 = vmul.f32 %v8163_v39, %v11066_v19  ;;  %v5121_v22 = vadd.f32 %v5120_v12, %v5119_v18  ;;  %v4504_v47 = vmax.f32 %v4502_v33, %v4503_v57  ;;  %v6506_v48 = vsel %vm3236_vm4, %v6322_v34, 0.0 }
 0x4eb   : > { %v5124_v7 = vsel %vm3236_vm4, %v11118_v0, 0.0  ;;  %v8167_v61 = vpop.eup %8166  ;;  %v6833_v23 = vpack.c.bf16 %v6505_v8, %v6505_v8  ;;  %v6507_v62 = vrot.slane %v6506_v48, 4  ;;  %v4508_v55 = vrot.slane %v4507_v3, 2 }
 0x4ec   : > { %v6323_v40 = vmul.f32 %v9827_v15, %v5475_v26  ;;  %v5125_v36 = vrot.slane %v5124_v7, 4  ;;  %v5476_v25 = vmul.f32 %v8167_v61, %v11075_v32  ;;  %v5122_v14 = vrot.slane %v5121_v22, 1 }
 0x4ed   : > { %v4778_v24 = vsub.f32 %v11055_v50, %v4504_v47  ;;  %v6976_v31 = vunpack.c.l.b16 %v6833_v23  ;;  %v6508_v18 = vadd.f32 %v6507_v62, %v6506_v48  ;;  %v4509_v30 = vmax.f32 %v4507_v3, %v4508_v55 }
 0x4ee   : > { %v6513_v19 = vsel %vm3236_vm4, %v6323_v40, 0.0  ;;  %v5126_v45 = vadd.f32 %v5125_v36, %v5124_v7  ;;  %v6324_v43 = vmul.f32 %v12489_v56, %v5476_v25  ;;  %v5123_v21 = vadd.f32 %v5122_v14, %v5121_v22  ;;  %v12490_v25 = vld [vmem:[#allocation20_spill] sm:$0xff] }
 0x4ef   : > { %v6514_v33 = vrot.slane %v6513_v19, 4  ;;  %v4870_v39 = vmul.f32 1.442695, %v4778_v24  ;;  %v11132_v5 = vsel %vm7025_vm7, %v6976_v31, %v7043_v2  ;;  %v6509_v32 = vrot.slane %v6508_v18, 2 }
 0x4f0   : > { %v5127_v15 = vrot.slane %v5126_v45, 2  ;;  %v6520_v12 = vsel %vm3236_vm4, %v6324_v43, 0.0  ;;  %8174 = vrcp.f32 %v5123_v21  ;;  %v4510_v20 = vrot.slane %v4509_v30, 1 }
 0x4f1   : > { %v6515_v51 = vadd.f32 %v6514_v33, %v6513_v19  ;;  %v6521_v57 = vrot.slane %v6520_v12, 4  ;;  %v8169_v34 = vpop.eup %8168  ;;  %v6510_v26 = vadd.f32 %v6509_v32, %v6508_v18  ;;  %8176 = vpow2.f32 %v4870_v39  ;;  %v12491_v32 = vld [vmem:[#allocation41_spill] sm:$0xff] }
 0x4f2   : > { %v5128_v50 = vadd.f32 %v5127_v15, %v5126_v45  ;;  %v4513_v7 = vrot.slane %v4512_v63, 4  ;;  %v5477_v61 = vmul.f32 %v8169_v34, %v11081_v52  ;;  %v4511_v48 = vmax.f32 %v4509_v30, %v4510_v20 }
 0x4f3   : > { %v6516_v8 = vrot.slane %v6515_v51, 2  ;;  %v11135_v22 = vpop.eup %8170  ;;  %v6522_v47 = vadd.f32 %v6521_v57, %v6520_v12  ;;  %v6511_v40 = vrot.slane %v6510_v26, 1 }
 0x4f4   : > { %v5129_v2 = vrot.slane %v5128_v50, 1  ;;  %v5131_v3 = vsel %vm3236_vm4, %v11135_v22, 0.0  ;;  %v4514_v23 = vmax.f32 %v4512_v63, %v4513_v7  ;;  %v6325_v14 = vmul.f32 %v12490_v25, %v5477_v61 }
 0x4f5   : > { %v6517_v36 = vadd.f32 %v6516_v8, %v6515_v51  ;;  %v6523_v62 = vrot.slane %v6522_v47, 2  ;;  %v5132_v45 = vrot.slane %v5131_v3, 4  ;;  %v6512_v55 = vadd.f32 %v6511_v40, %v6510_v26 }
 0x4f6   : > { %v5130_v19 = vadd.f32 %v5129_v2, %v5128_v50  ;;  %v8173_v24 = vpop.eup %8172  ;;  %v4779_v18 = vsub.f32 %v11102_v41, %v4511_v48  ;;  %v4515_v33 = vrot.slane %v4514_v23, 2  ;;  %v6527_v56 = vsel %vm3236_vm4, %v6325_v14, 0.0 }
 0x4f7   : > { %v6518_v31 = vrot.slane %v6517_v36, 1  ;;  %v6524_v52 = vadd.f32 %v6523_v62, %v6522_v47  ;;  %v5478_v43 = vmul.f32 %v8173_v24, %v11088_v38  ;;  %v6834_v21 = vpack.c.bf16 %v6512_v55, %v6512_v55 }
 0x4f8   : > { %8178 = vrcp.f32 %v5130_v19  ;;  %v6528_v63 = vrot.slane %v6527_v56, 4  ;;  %v5133_v39 = vadd.f32 %v5132_v45, %v5131_v3  ;;  %v4872_v12 = vmul.f32 1.442695, %v4779_v18 }
 0x4f9   : > { %v6519_v15 = vadd.f32 %v6518_v31, %v6517_v36  ;;  %v6525_v30 = vrot.slane %v6524_v52, 1  ;;  %v6326_v51 = vmul.f32 %v12491_v32, %v5478_v43  ;;  %v4516_v57 = vmax.f32 %v4514_v23, %v4515_v33 }
 0x4fa   : > { %v11145_v50 = vunpack.c.l.b16 %v6834_v21  ;;  %v6529_v41 = vadd.f32 %v6528_v63, %v6527_v56  ;;  %v5134_v34 = vrot.slane %v5133_v39, 2  ;;  %8180 = vpow2.f32 %v4872_v12  ;;  %v12492_v56 = vld [vmem:[#allocation36_spill] sm:$0xff] }
 0x4fb   : > { %v6835_v20 = vpack.c.bf16 %v6519_v15, %v6519_v15  ;;  %v6526_v26 = vadd.f32 %v6525_v30, %v6524_v52  ;;  %v6534_v8 = vsel %vm3236_vm4, %v6326_v51, 0.0  ;;  %v4517_v38 = vrot.slane %v4516_v57, 1 }
 0x4fc   : > { %v6530_v47 = vrot.slane %v6529_v41, 2  ;;  %v6535_v61 = vrot.slane %v6534_v8, 4  ;;  %v5135_v2 = vadd.f32 %v5134_v34, %v5133_v39  ;;  %v11152_v36 = vadd.f32 %v10880_v29, %v10961_v35 }
 0x4fd   : > { %v11148_v7 = vunpack.c.l.b16 %v6835_v20  ;;  %v6836_v48 = vpack.c.bf16 %v6526_v26, %v6526_v26  ;;  %v4518_v40 = vmax.f32 %v4516_v57, %v4517_v38  ;;  %v11156_v3 = vadd.f32 %v10880_v29, %v10969_v37  ;;  %v8175_v23 = vpop.eup %8174 }
 0x4fe   : > { %v6531_v62 = vadd.f32 %v6530_v47, %v6529_v41  ;;  %v6536_v25 = vadd.f32 %v6535_v61, %v6534_v8  ;;  %v5136_v14 = vrot.slane %v5135_v2, 1  ;;  %v11160_v19 = vadd.f32 %v10880_v29, %v10978_v54  ;;  %v11162_v45 = vpop.eup %8176 }
 0x4ff   : > { %v11164_v24 = vunpack.c.l.b16 %v6836_v48  ;;  %v5479_v55 = vmul.f32 %v8175_v23, %v11104_v13  ;;  %v4780_v35 = vsub.f32 %v11109_v49, %v4518_v40  ;;  %v4519_v37 = vsel %vm3236_vm4, %v11152_v36, -inf  ;;  %v12493_v40 = vld [vmem:[#allocation58_spill] sm:$0xff] }
 0x500   : > { %v6532_v31 = vrot.slane %v6531_v62, 1  ;;  %v6537_v18 = vrot.slane %v6536_v25, 2  ;;  %v5137_v33 = vadd.f32 %v5136_v14, %v5135_v2  ;;  %v5138_v52 = vsel %vm3236_vm4, %v11162_v45, 0.0 }
 0x501   : > { %v6327_v54 = vmul.f32 %v12492_v56, %v5479_v55  ;;  %v5139_v43 = vrot.slane %v5138_v52, 4  ;;  %v4874_v21 = vmul.f32 1.442695, %v4780_v35  ;;  %v4520_v15 = vrot.slane %v4519_v37, 4 }
 0x502   : > { %v6533_v63 = vadd.f32 %v6532_v31, %v6531_v62  ;;  %v6538_v39 = vadd.f32 %v6537_v18, %v6536_v25  ;;  %8182 = vrcp.f32 %v5137_v33  ;;  %v4526_v13 = vsel %vm3236_vm4, %v11156_v3, -inf }
 0x503   : > { %v6541_v49 = vsel %vm3236_vm4, %v6327_v54, 0.0  ;;  %v5140_v30 = vadd.f32 %v5139_v43, %v5138_v52  ;;  %8184 = vpow2.f32 %v4874_v21  ;;  %v4521_v32 = vmax.f32 %v4519_v37, %v4520_v15 }
 0x504   : > { %v6837_v12 = vpack.c.bf16 %v6533_v63, %v6533_v63  ;;  %v6539_v57 = vrot.slane %v6538_v39, 1  ;;  %v6542_v20 = vrot.slane %v6541_v49, 4  ;;  %v4527_v41 = vrot.slane %v4526_v13, 4 }
 0x505   : > { %v8179_v51 = vpop.eup %8178  ;;  %v5141_v26 = vrot.slane %v5140_v30, 2  ;;  %v4522_v8 = vrot.slane %v4521_v32, 2  ;;  %v4533_v38 = vsel %vm3236_vm4, %v11160_v19, -inf  ;;  %v11186_v31 = vadd.f32 %v10880_v29, %v10988_v16 }
 0x506   : > { %v5480_v34 = vmul.f32 %v8179_v51, %v11118_v0  ;;  %v11179_v47 = vunpack.c.l.b16 %v6837_v12  ;;  %v6540_v61 = vadd.f32 %v6539_v57, %v6538_v39  ;;  %v6543_v2 = vadd.f32 %v6542_v20, %v6541_v49 }
 0x507   : > { %v4528_v48 = vmax.f32 %v4526_v13, %v4527_v41  ;;  %v5142_v62 = vadd.f32 %v5141_v26, %v5140_v30  ;;  %v4523_v25 = vmax.f32 %v4521_v32, %v4522_v8  ;;  %v4534_v14 = vrot.slane %v4533_v38, 4  ;;  %v11182_v55 = vpop.eup %8180 }
 0x508   : > { %v6328_v23 = vmul.f32 %v12493_v40, %v5480_v34  ;;  %v6838_v35 = vpack.c.bf16 %v6540_v61, %v6540_v61  ;;  %v6544_v37 = vrot.slane %v6543_v2, 2  ;;  %v5145_v52 = vsel %vm3236_vm4, %v11182_v55, 0.0 }
 0x509   : > { %v4529_v0 = vrot.slane %v4528_v48, 2  ;;  %v5143_v33 = vrot.slane %v5142_v62, 1  ;;  %v4524_v56 = vrot.slane %v4523_v25, 1  ;;  %v5146_v15 = vrot.slane %v5145_v52, 4 }
 0x50a   : > { %v6548_v18 = vsel %vm3236_vm4, %v6328_v23, 0.0  ;;  %v6981_v54 = vunpack.c.l.b16 %v6838_v35  ;;  %v6545_v43 = vadd.f32 %v6544_v37, %v6543_v2  ;;  %v4535_v49 = vmax.f32 %v4533_v38, %v4534_v14  ;;  %v11197_v38 = vld [vmem:[%s12138_s15] ss:$0 sm:$0xff] }
 0x50b   : > { %v6549_v21 = vrot.slane %v6548_v18, 4  ;;  %v5144_v63 = vadd.f32 %v5143_v33, %v5142_v62  ;;  %v4525_v39 = vmax.f32 %v4523_v25, %v4524_v56  ;;  %v4530_v13 = vmax.f32 %v4528_v48, %v4529_v0 }
 0x50c   : > { %v6546_v30 = vrot.slane %v6545_v43, 1  ;;  %v5147_v51 = vadd.f32 %v5146_v15, %v5145_v52  ;;  %v4540_v29 = vsel %vm3236_vm4, %v11186_v31, -inf  ;;  %v4536_v57 = vrot.slane %v4535_v49, 2  ;;  %v12494_v52 = vld [vmem:[#allocation63_spill] sm:$0xff] }
 0x50d   : > { %v6550_v32 = vadd.f32 %v6549_v21, %v6548_v18  ;;  %8186 = vrcp.f32 %v5144_v63  ;;  %v4781_v16 = vsub.f32 %v11152_v36, %v4525_v39  ;;  %v4531_v12 = vrot.slane %v4530_v13, 1 }
 0x50e   : > { %v6547_v20 = vadd.f32 %v6546_v30, %v6545_v43  ;;  %v5148_v34 = vrot.slane %v5147_v51, 2  ;;  %v4541_v26 = vrot.slane %v4540_v29, 4  ;;  %v4537_v48 = vmax.f32 %v4535_v49, %v4536_v57 }
 0x50f   : > { %v6551_v41 = vrot.slane %v6550_v32, 2  ;;  %v8183_v8 = vpop.eup %8182  ;;  %v4876_v61 = vmul.f32 1.442695, %v4781_v16  ;;  %v4532_v2 = vmax.f32 %v4530_v13, %v4531_v12  ;;  %v11201_v40 = vadd.f32 %v11197_v38, %v11005_v44 }
 0x510   : > { %v11203_v36 = vpop.eup %8184  ;;  %v6839_v23 = vpack.c.bf16 %v6547_v20, %v6547_v20  ;;  %v5481_v25 = vmul.f32 %v8183_v8, %v11135_v22  ;;  %v5149_v14 = vadd.f32 %v5148_v34, %v5147_v51  ;;  %v4538_v0 = vrot.slane %v4537_v48, 1  ;;  %v11213_v51 = vpop.f32.mrf.mxu0 }
 0x511   : > { %v6552_v62 = vadd.f32 %v6551_v41, %v6550_v32  ;;  %v5152_v35 = vsel %vm3236_vm4, %v11203_v36, 0.0  ;;  %8188 = vpow2.f32 %v4876_v61  ;;  %v4782_v37 = vsub.f32 %v11156_v3, %v4532_v2 }
 0x512   : > { %v6982_v18 = vunpack.c.l.b16 %v6839_v23  ;;  %v6329_v56 = vmul.f32 %v12494_v52, %v5481_v25  ;;  %v5150_v44 = vrot.slane %v5149_v14, 1  ;;  %v5153_v43 = vrot.slane %v5152_v35, 4  ;;  %v4201_v34 = vpop.f32.mrf.mxu0 }
 0x513   : > { %v6553_v33 = vrot.slane %v6552_v62, 1  ;;  %v4878_v21 = vmul.f32 1.442695, %v4782_v37  ;;  %v4539_v15 = vmax.f32 %v4537_v48, %v4538_v0  ;;  %v4542_v63 = vmax.f32 %v4540_v29, %v4541_v26 }
 0x514   : > { %v7049_v39 = vsel %vm7021_vm5, %v6982_v18, %v6981_v54  ;;  %v6555_v13 = vsel %vm3236_vm4, %v6329_v56, 0.0  ;;  %v5151_v49 = vadd.f32 %v5150_v44, %v5149_v14  ;;  %v5154_v32 = vadd.f32 %v5153_v43, %v5152_v35  ;;  %v11226_v25 = vpop.f32.mrf.mxu0 }
 0x515   : > { %v6554_v22 = vadd.f32 %v6553_v33, %v6552_v62  ;;  %v6556_v30 = vrot.slane %v6555_v13, 4  ;;  %8190 = vpow2.f32 %v4878_v21  ;;  %v4783_v3 = vsub.f32 %v11160_v19, %v4539_v15 }
 0x516   : > { %8192 = vrcp.f32 %v5151_v49  ;;  %v4543_v12 = vrot.slane %v4542_v63, 2  ;;  %v4547_v57 = vsel %vm3236_vm4, %v11201_v40, -inf  ;;  %v5155_v20 = vrot.slane %v5154_v32, 2  ;;  %v4204_v56 = vpop.f32.mrf.mxu0 }
 0x517   : > { %v6840_v16 = vpack.c.bf16 %v6554_v22, %v6554_v22  ;;  %v6557_v29 = vadd.f32 %v6556_v30, %v6555_v13  ;;  %v4880_v54 = vmul.f32 1.442695, %v4783_v3  ;;  %v4548_v41 = vrot.slane %v4547_v57, 4  ;;  %v12497_v22 = vld [vmem:[#allocation71_spill] sm:$0xff] }
 0x518   : > { %v4544_v8 = vmax.f32 %v4542_v63, %v4543_v12  ;;  %v11219_v61 = vadd.f32 %v11197_v38, %v11013_v4  ;;  %v12495_v19 = vrot.slane %v10781_v6, 1  ;;  %v5156_v23 = vadd.f32 %v5155_v20, %v5154_v32  ;;  %v11240_v32 = vpop.f32.mrf.mxu0 }
 0x519   : > { %v6983_v26 = vunpack.c.l.b16 %v6840_v16  ;;  %v6558_v48 = vrot.slane %v6557_v29, 2  ;;  %8194 = vpow2.f32 %v4880_v54  ;;  %v4549_v62 = vmax.f32 %v4547_v57, %v4548_v41 }
 0x51a   : > { %v11224_v2 = vadd.f32 %v12495_v19, %v10781_v6  ;;  %v8187_v14 = vpop.eup %8186  ;;  %v4545_v37 = vrot.slane %v4544_v8, 1  ;;  %v4554_v0 = vsel %vm3236_vm4, %v11219_v61, -inf  ;;  %v6392_v4 = vrot.slane %v10814_v17, 1  ;;  %v4209_v54 = vpop.f32.mrf.mxu0 }
 0x51b   : > { %v7050_v35 = vsel %vm7023_vm6, %v6983_v26, %v7049_v39  ;;  %v6559_v18 = vadd.f32 %v6558_v48, %v6557_v29  ;;  %v5482_v33 = vmul.f32 %v8187_v14, %v11162_v45  ;;  %v5157_v6 = vrot.slane %v5156_v23, 1 }
 0x51c   : > { %v4550_v52 = vrot.slane %v4549_v62, 2  ;;  %v4546_v44 = vmax.f32 %v4544_v8, %v4545_v37  ;;  %v4555_v43 = vrot.slane %v4554_v0, 4  ;;  %v11234_v21 = vadd.f32 %v6392_v4, %v10814_v17 }
 0x51d   : > { %v12496_v15 = vrot.slane %v10816_v1, 2  ;;  %v6560_v39 = vrot.slane %v6559_v18, 1  ;;  %v6330_v13 = vmul.f32 %v12497_v22, %v5482_v33  ;;  %v5158_v49 = vadd.f32 %v5157_v6, %v5156_v23 }
 0x51e   : > { %v4551_v30 = vmax.f32 %v4549_v62, %v4550_v52  ;;  %v11242_v45 = vpop.eup %8188  ;;  %v4784_v3 = vsub.f32 %v11186_v31, %v4546_v44  ;;  %v4556_v16 = vmax.f32 %v4554_v0, %v4555_v43  ;;  %v12498_v17 = vrot.slane %v10872_v11, 4  ;;  %v11253_v62 = vpop.f32.mrf.mxu0 }
 0x51f   : > { %v6398_v63 = vadd.f32 %v12496_v15, %v10816_v1  ;;  %v6561_v29 = vadd.f32 %v6560_v39, %v6559_v18  ;;  %v6562_v1 = vsel %vm3236_vm4, %v6330_v13, 0.0  ;;  %8196 = vrcp.f32 %v5158_v49 }
 0x520   : > { %v6403_v57 = vadd.f32 %v12498_v17, %v10872_v11  ;;  %v5159_v20 = vsel %vm3236_vm4, %v11242_v45, 0.0  ;;  %v6563_v41 = vrot.slane %v6562_v1, 4  ;;  %v4882_v26 = vmul.f32 1.442695, %v4784_v3  ;;  %v4212_v56 = vpop.f32.mrf.mxu0 }
 0x521   : > { %v6399_v12 = vrot.slane %v6398_v63, 1  ;;  %v5160_v34 = vrot.slane %v5159_v20, 4  ;;  %v4552_v8 = vrot.slane %v4551_v30, 1  ;;  %v6841_v19 = vpack.c.bf16 %v6561_v29, %v6561_v29 }
 0x522   : > { %v4557_v31 = vrot.slane %v4556_v16, 2  ;;  %v6404_v23 = vrot.slane %v6403_v57, 2  ;;  %v11255_v11 = vpop.eup %8190  ;;  %v6564_v14 = vadd.f32 %v6563_v41, %v6562_v1  ;;  %8198 = vpow2.f32 %v4882_v26 }
 0x523   : > { %v11251_v48 = vadd.f32 %v6399_v12, %v6398_v63  ;;  %v5161_v37 = vadd.f32 %v5160_v34, %v5159_v20  ;;  %v4553_v0 = vmax.f32 %v4551_v30, %v4552_v8  ;;  %v8193_v4 = vpop.eup %8192  ;;  %v6984_v18 = vunpack.c.l.b16 %v6841_v19  ;;  %v11264_v30 = vpop.f32.mrf.mxu0 }
 0x524   : > { %v5166_v33 = vsel %vm3236_vm4, %v11255_v11, 0.0  ;;  %v4558_v6 = vmax.f32 %v4556_v16, %v4557_v31  ;;  %v6405_v52 = vadd.f32 %v6404_v23, %v6403_v57  ;;  %v6565_v44 = vrot.slane %v6564_v14, 2  ;;  %v12499_v16 = vld [vmem:[#allocation19_spill] sm:$0xff] }
 0x525   : > { %v5483_v43 = vmul.f32 %v8193_v4, %v11182_v55  ;;  %v5162_v15 = vrot.slane %v5161_v37, 2  ;;  %v5167_v63 = vrot.slane %v5166_v33, 4  ;;  %v11261_v39 = vsel %vm7025_vm7, %v6984_v18, %v7050_v35  ;;  %v4217_v54 = vpop.f32.mrf.mxu0 }
 0x526   : > { %v4785_v22 = vsub.f32 %v11201_v40, %v4553_v0  ;;  %v4559_v13 = vrot.slane %v4558_v6, 1  ;;  %v6406_v49 = vrot.slane %v6405_v52, 1  ;;  %v11266_v3 = vpop.eup %8194  ;;  %v6566_v12 = vadd.f32 %v6565_v44, %v6564_v14 }
 0x527   : > { %v6331_v17 = vmul.f32 %v12499_v16, %v5483_v43  ;;  %v5163_v57 = vadd.f32 %v5162_v15, %v5161_v37  ;;  %v5168_v29 = vadd.f32 %v5167_v63, %v5166_v33  ;;  %v5173_v55 = vsel %vm3236_vm4, %v11266_v3, 0.0  ;;  %v11275_v23 = vpop.f32.mrf.mxu0  ;;  %v12500_v63 = vld [vmem:[#allocation60_spill] sm:$0xff] }
 0x528   : > { %v4884_v1 = vmul.f32 1.442695, %v4785_v22  ;;  %v4560_v20 = vmax.f32 %v4558_v6, %v4559_v13  ;;  %v11271_v35 = vadd.f32 %v6406_v49, %v6405_v52  ;;  %v6567_v40 = vrot.slane %v6566_v12, 1 }
 0x529   : > { %v6569_v41 = vsel %vm3236_vm4, %v6331_v17, 0.0  ;;  %v5164_v34 = vrot.slane %v5163_v57, 1  ;;  %v5169_v26 = vrot.slane %v5168_v29, 2  ;;  %v5174_v19 = vrot.slane %v5173_v55, 4  ;;  %v4220_v56 = vpop.f32.mrf.mxu0 }
 0x52a   : > { %v6570_v8 = vrot.slane %v6569_v41, 4  ;;  %8200 = vpow2.f32 %v4884_v1  ;;  %v4786_v31 = vsub.f32 %v11219_v61, %v4560_v20  ;;  %v6568_v14 = vadd.f32 %v6567_v40, %v6566_v12  ;;  %v12501_v1 = vld [vmem:[#allocation67_spill] sm:$0xff] }
 0x52b   : > { %v5165_v37 = vadd.f32 %v5164_v34, %v5163_v57  ;;  %v5170_v0 = vadd.f32 %v5169_v26, %v5168_v29  ;;  %v6408_v4 = vsel %vm3236_vm4, %v10819_v9, 0.0  ;;  %v5175_v33 = vadd.f32 %v5174_v19, %v5173_v55  ;;  %v11282_v12 = vpop.f32.mrf.mxu0 }
 0x52c   : > { %v6571_v18 = vadd.f32 %v6570_v8, %v6569_v41  ;;  %v4886_v6 = vmul.f32 1.442695, %v4786_v31  ;;  %v6409_v52 = vrot.slane %v6408_v4, 4  ;;  %v8197_v44 = vpop.eup %8196  ;;  %v6842_v43 = vpack.c.bf16 %v6568_v14, %v6568_v14 }
 0x52d   : > { %8202 = vrcp.f32 %v5165_v37  ;;  %v5171_v15 = vrot.slane %v5170_v0, 1  ;;  %v6415_v61 = vsel %vm3236_vm4, %v12500_v63, 0.0  ;;  %v5484_v13 = vmul.f32 %v8197_v44, %v11203_v36  ;;  %v4225_v36 = vpop.f32.mrf.mxu0 }
 0x52e   : > { %v6572_v22 = vrot.slane %v6571_v18, 2  ;;  %v5176_v49 = vrot.slane %v5175_v33, 2  ;;  %8204 = vpow2.f32 %v4886_v6  ;;  %v11284_v9 = vunpack.c.l.b16 %v6842_v43 }
 0x52f   : > { %v5172_v16 = vadd.f32 %v5171_v15, %v5170_v0  ;;  %v6410_v17 = vadd.f32 %v6409_v52, %v6408_v4  ;;  %v6416_v57 = vrot.slane %v6415_v61, 4  ;;  %v11286_v29 = vpop.eup %8198  ;;  %v6332_v20 = vmul.f32 %v12501_v1, %v5484_v13  ;;  %v11297_v0 = vpop.f32.mrf.mxu0 }
 0x530   : > { %v6573_v55 = vadd.f32 %v6572_v22, %v6571_v18  ;;  %v5177_v54 = vadd.f32 %v5176_v49, %v5175_v33  ;;  %v12502_v40 = vrot.slane %v10966_v27, 1  ;;  %v5180_v34 = vsel %vm3236_vm4, %v11286_v29, 0.0 }
 0x531   : > { %8206 = vrcp.f32 %v5172_v16  ;;  %v6411_v26 = vrot.slane %v6410_v17, 2  ;;  %v6417_v8 = vadd.f32 %v6416_v57, %v6415_v61  ;;  %v6576_v31 = vsel %vm3236_vm4, %v6332_v20, 0.0  ;;  %v4228_v43 = vpop.f32.mrf.mxu0 }
 0x532   : > { %v11292_v41 = vadd.f32 %v12502_v40, %v10966_v27  ;;  %v6574_v19 = vrot.slane %v6573_v55, 1  ;;  %v5178_v14 = vrot.slane %v5177_v54, 1  ;;  %v5181_v37 = vrot.slane %v5180_v34, 4 }
 0x533   : > { %v6577_v4 = vrot.slane %v6576_v31, 4  ;;  %v6412_v18 = vadd.f32 %v6411_v26, %v6410_v17  ;;  %v6418_v33 = vrot.slane %v6417_v8, 2  ;;  %v6448_v27 = vrot.slane %v10990_v60, 1  ;;  %v11306_v17 = vpop.f32.mrf.mxu0 }
 0x534   : > { %v6575_v6 = vadd.f32 %v6574_v19, %v6573_v55  ;;  %v5179_v52 = vadd.f32 %v5178_v14, %v5177_v54  ;;  %v5182_v56 = vadd.f32 %v5181_v37, %v5180_v34  ;;  %v6454_v44 = vadd.f32 %v6453_v42, %v11034_v59 }
 0x535   : > { %v6578_v15 = vadd.f32 %v6577_v4, %v6576_v31  ;;  %v6413_v63 = vrot.slane %v6412_v18, 1  ;;  %v6419_v61 = vadd.f32 %v6418_v33, %v6417_v8  ;;  %v11304_v22 = vadd.f32 %v6448_v27, %v10990_v60  ;;  %v4233_v36 = vpop.f32.mrf.mxu0 }
 0x536   : > { %v6843_v13 = vpack.c.bf16 %v6575_v6, %v6575_v6  ;;  %8208 = vrcp.f32 %v5179_v52  ;;  %v5183_v49 = vrot.slane %v5182_v56, 2  ;;  %v6455_v16 = vrot.slane %v6454_v44, 1 }
 0x537   : > { %v11308_v57 = vpop.eup %8200  ;;  %v6579_v55 = vrot.slane %v6578_v15, 2  ;;  %v11310_v1 = vadd.f32 %v6413_v63, %v6412_v18  ;;  %v6420_v20 = vrot.slane %v6419_v61, 1  ;;  %v6459_v59 = vadd.f32 %v6458_v28, %v11030_v46  ;;  %v12504_v28 = vld [vmem:[#allocation54_spill] sm:$0xff]  ;;  %v11329_v18 = vpop.f32.mrf.mxu0 }
 0x538   : > { %v11315_v42 = vunpack.c.l.b16 %v6843_v13  ;;  %v5184_v60 = vadd.f32 %v5183_v49, %v5182_v56  ;;  %v5187_v54 = vsel %vm3236_vm4, %v11308_v57, 0.0  ;;  %v11319_v40 = vadd.f32 %v6455_v16, %v6454_v44 }
 0x539   : > { %v6580_v34 = vadd.f32 %v6579_v55, %v6578_v15  ;;  %v5188_v26 = vrot.slane %v5187_v54, 4  ;;  %v11321_v8 = vadd.f32 %v6420_v20, %v6419_v61  ;;  %v6460_v19 = vrot.slane %v6459_v59, 2  ;;  %v4236_v63 = vpop.f32.mrf.mxu0  ;;  %v12505_v61 = vld [vmem:[#allocation75_spill] sm:$0xff] }
 0x53a   : > { %12503 = vst [vmem:[#allocation61_spill] sm:$0xff] %v11315_v42  ;;  %v8203_v31 = vpop.eup %8202  ;;  %v5185_v14 = vrot.slane %v5184_v60, 1  ;;  %v6464_v37 = vsel %vm3236_vm4, %v11027_v53, 0.0  ;;  %v6471_v46 = vsel %vm3236_vm4, %v11037_v10, 0.0 }
 0x53b   : > { %v11331_v33 = vpop.eup %8204  ;;  %v6581_v27 = vrot.slane %v6580_v34, 1  ;;  %v5485_v6 = vmul.f32 %v8203_v31, %v11242_v45  ;;  %v5189_v52 = vadd.f32 %v5188_v26, %v5187_v54  ;;  %v6461_v56 = vadd.f32 %v6460_v19, %v6459_v59  ;;  %v11337_v45 = vpop.f32.mrf.mxu0 }
 0x53c   : > { %v5186_v44 = vadd.f32 %v5185_v14, %v5184_v60  ;;  %v5194_v43 = vsel %vm3236_vm4, %v11331_v33, 0.0  ;;  %v6465_v53 = vrot.slane %v6464_v37, 4  ;;  %v6472_v15 = vrot.slane %v6471_v46, 4 }
 0x53d   : > { %v6582_v10 = vadd.f32 %v6581_v27, %v6580_v34  ;;  %v6333_v13 = vmul.f32 %v12505_v61, %v5485_v6  ;;  %v5190_v49 = vrot.slane %v5189_v52, 2  ;;  %v5195_v16 = vrot.slane %v5194_v43, 4  ;;  %v4241_v27 = vpop.f32.mrf.mxu0  ;;  %v12508_v61 = vld [vmem:[#allocation52_spill] sm:$0xff] }
 0x53e   : > { %v8207_v55 = vpop.eup %8206  ;;  %8210 = vrcp.f32 %v5186_v44  ;;  %v6462_v20 = vrot.slane %v6461_v56, 1  ;;  %v6466_v36 = vadd.f32 %v6465_v53, %v6464_v37  ;;  %v6473_v4 = vadd.f32 %v6472_v15, %v6471_v46  ;;  %v12507_v44 = vld [vmem:[#allocation74_spill] sm:$0xff] }
 0x53f   : > { %v6844_v59 = vpack.c.bf16 %v6582_v10, %v6582_v10  ;;  %v6583_v60 = vsel %vm3236_vm4, %v6333_v13, 0.0  ;;  %v5486_v54 = vmul.f32 %v8207_v55, %v11255_v11  ;;  %v5191_v26 = vadd.f32 %v5190_v49, %v5189_v52  ;;  %v11348_v11 = vpop.f32.mrf.mxu0 }
 0x540   : > { %v6584_v19 = vrot.slane %v6583_v60, 4  ;;  %v5196_v31 = vadd.f32 %v5195_v16, %v5194_v43  ;;  %v11341_v34 = vadd.f32 %v6462_v20, %v6461_v56  ;;  %v6467_v14 = vrot.slane %v6466_v36, 2 }
 0x541   : > { %v11343_v6 = vunpack.c.l.b16 %v6844_v59  ;;  %v6334_v63 = vmul.f32 %v12507_v44, %v5486_v54  ;;  %v5192_v37 = vrot.slane %v5191_v26, 1  ;;  %v6474_v46 = vrot.slane %v6473_v4, 2  ;;  %v4244_v54 = vpop.f32.mrf.mxu0  ;;  %v12509_v44 = vld [vmem:[#allocation80_spill] sm:$0xff] }
 0x542   : > { %v6585_v53 = vadd.f32 %v6584_v19, %v6583_v60  ;;  %v5197_v15 = vrot.slane %v5196_v31, 2  ;;  %v6468_v10 = vadd.f32 %v6467_v14, %v6466_v36  ;;  %v6815_v13 = vpack.c.bf16 %v12508_v61, %v12508_v61 }
 0x543   : > { %12506 = vst [vmem:[#allocation62_spill] sm:$0xff] %v11343_v6  ;;  %v8209_v52 = vpop.eup %8208  ;;  %v6590_v56 = vsel %vm3236_vm4, %v6334_v63, 0.0  ;;  %v5193_v43 = vadd.f32 %v5192_v37, %v5191_v26  ;;  %v6475_v49 = vadd.f32 %v6474_v46, %v6473_v4  ;;  %v6816_v16 = vpack.c.bf16 %v11224_v2, %v11224_v2  ;;  %v8066_v26 = vld [vmem:[%s12139_s16 + $0x8] sm:$0xff]   ;;  %v11360_v37 = vpop.f32.mrf.mxu0 }
 0x544   : > { %v6586_v55 = vrot.slane %v6585_v53, 2  ;;  %v6591_v20 = vrot.slane %v6590_v56, 4  ;;  %v5487_v59 = vmul.f32 %v8209_v52, %v11266_v3  ;;  %v5198_v60 = vadd.f32 %v5197_v15, %v5196_v31  ;;  %7917 = vmatprep.subr.bf16.mxu1 %v8066_v26 }
 0x545   : > { %8212 = vrcp.f32 %v5193_v43  ;;  %v6469_v36 = vrot.slane %v6468_v10, 1  ;;  %v6476_v19 = vrot.slane %v6475_v49, 1  ;;  %v6817_v14 = vpack.c.bf16 %v11234_v21, %v11234_v21  ;;  %7918 = vmatpush3.bf16.msra.mxu1 %v8066_v26 }
 0x546   : > { %v6587_v4 = vadd.f32 %v6586_v55, %v6585_v53  ;;  %v6592_v27 = vadd.f32 %v6591_v20, %v6590_v56  ;;  %v6335_v2 = vmul.f32 %v12509_v44, %v5487_v59  ;;  %v5199_v63 = vrot.slane %v5198_v60, 1  ;;  %v4249_v56 = vpop.f32.mrf.mxu0  ;;  %v12510_v55 = vld [vmem:[#allocation56_spill] sm:$0xff] }
 0x547   : > { %v11362_v3 = vadd.f32 %v6469_v36, %v6468_v10  ;;  %v11364_v31 = vadd.f32 %v6476_v19, %v6475_v49  ;;  %v6818_v46 = vpack.c.bf16 %v11251_v48, %v11251_v48  ;;  %v6819_v21 = vpack.c.bf16 %v11271_v35, %v11271_v35  ;;  %v8067_v35 = vld [vmem:[%s12139_s16] sm:$0xff]  }
 0x548   : > { %v6588_v15 = vrot.slane %v6587_v4, 1  ;;  %v6593_v61 = vrot.slane %v6592_v27, 2  ;;  %v6597_v53 = vsel %vm3236_vm4, %v6335_v2, 0.0  ;;  %v5200_v52 = vadd.f32 %v5199_v63, %v5198_v60  ;;  %v12511_v60 = vld [vmem:[#allocation57_spill] sm:$0xff]  ;;  %v11382_v36 = vpop.f32.mrf.mxu0  ;;  %7919 = vmatprep.subr.bf16.mxu1 %v8067_v35 }
 0x549   : > { %v6598_v43 = vrot.slane %v6597_v53, 4  ;;  %v6820_v10 = vpack.c.bf16 %v11310_v1, %v11310_v1  ;;  %v6821_v49 = vpack.c.bf16 %v11321_v8, %v11321_v8  ;;  %v6822_v48 = vpack.c.bf16 %v12510_v55, %v12510_v55  ;;  %7920 = vmatpush3.bf16.msra.mxu1 %v8067_v35 }
 0x54a   : > { %v6589_v20 = vadd.f32 %v6588_v15, %v6587_v4  ;;  %v6594_v59 = vadd.f32 %v6593_v61, %v6592_v27  ;;  %8214 = vrcp.f32 %v5200_v52  ;;  %v6823_v54 = vpack.c.bf16 %v12511_v60, %v12511_v60  ;;  %v4252_v15 = vpop.f32.mrf.mxu0 }
 0x54b   : > { %v8211_v19 = vpop.eup %8210  ;;  %v6599_v1 = vadd.f32 %v6598_v43, %v6597_v53  ;;  %v6824_v8 = vpack.c.bf16 %v11292_v41, %v11292_v41  ;;  %v6825_v26 = vpack.c.bf16 %v11304_v22, %v11304_v22  ;;  %v6826_v44 = vpack.c.bf16 %v11319_v40, %v11319_v40 }
 0x54c   : > { %v6845_v4 = vpack.c.bf16 %v6589_v20, %v6589_v20  ;;  %v6595_v27 = vrot.slane %v6594_v59, 1  ;;  %v5488_v2 = vmul.f32 %v8211_v19, %v11286_v29  ;;  %v6827_v63 = vpack.c.bf16 %v11341_v34, %v11341_v34  ;;  %v12515_v29 = vld [vmem:[#allocation78_spill] sm:$0xff]  ;;  %v11405_v55 = vpop.f32.mrf.mxu0 }
 0x54d   : > { %v6600_v61 = vrot.slane %v6599_v1, 2  ;;  %v6828_v41 = vpack.c.bf16 %v11362_v3, %v11362_v3  ;;  %v6829_v22 = vpack.c.bf16 %v11364_v31, %v11364_v31  ;;  %v12512_v40 = vpack.c.bf16 %v12504_v28, %v12504_v28 }
 0x54e   : > { %v11400_v52 = vunpack.c.l.b16 %v6845_v4  ;;  %v11402_v56 = vadd.f32 %v6595_v27, %v6594_v59  ;;  %v6336_v43 = vmul.f32 %v12515_v29, %v5488_v2  ;;  %v6958_v34 = vunpack.c.l.b16 %v6815_v13  ;;  %v4257_v28 = vpop.f32.mrf.mxu0 }
 0x54f   : > { %v6957_v53 = vunpack.c.l.b16 %v12512_v40  ;;  %v6601_v35 = vadd.f32 %v6600_v61, %v6599_v1  ;;  %v6959_v20 = vunpack.c.l.b16 %v6816_v16  ;;  %v6960_v60 = vunpack.c.l.b16 %v6817_v14  ;;  %v12519_v28 = vld [vmem:[#allocation89_spill] sm:$0xff] }
 0x550   : > { %12513 = vst [vmem:[#allocation59_spill] sm:$0xff] %v11400_v52  ;;  %12514 = vst [vmem:[#allocation66_spill] sm:$0xff] %v11402_v56  ;;  %v6961_v3 = vunpack.c.l.b16 %v6818_v46  ;;  %v6604_v19 = vsel %vm3236_vm4, %v6336_v43, 0.0  ;;  %v6962_v31 = vunpack.c.l.b16 %v6819_v21  ;;  %v6963_v15 = vunpack.c.l.b16 %v6820_v10 }
 0x551   : > { %v6964_v6 = vunpack.c.l.b16 %v6821_v49  ;;  %v6602_v40 = vrot.slane %v6601_v35, 1  ;;  %v6605_v4 = vrot.slane %v6604_v19, 4  ;;  %v6965_v52 = vunpack.c.l.b16 %v6822_v48  ;;  %v12517_v49 = vld [vmem:[#allocation79_spill] sm:$0xff] }
 0x552   : > { %v6966_v59 = vunpack.c.l.b16 %v6823_v54  ;;  %v8213_v27 = vpop.eup %8212  ;;  %v6967_v56 = vunpack.c.l.b16 %v6824_v8  ;;  %v6968_v2 = vunpack.c.l.b16 %v6825_v26  ;;  %v6969_v13 = vunpack.c.l.b16 %v6826_v44 }
 0x553   : > { %v6970_v29 = vunpack.c.l.b16 %v6827_v63  ;;  %v11408_v42 = vadd.f32 %v6602_v40, %v6601_v35  ;;  %v6606_v16 = vadd.f32 %v6605_v4, %v6604_v19  ;;  %v5489_v14 = vmul.f32 %v8213_v27, %v11308_v57 }
 0x554   : > { %v6971_v46 = vunpack.c.l.b16 %v6828_v41  ;;  %v6972_v1 = vunpack.c.l.b16 %v6829_v22  ;;  %v7022_v21 = vsel %vm7021_vm5, %v6958_v34, %v6957_v53  ;;  %v7035_v26 = vsel %vm7021_vm5, %v6966_v59, %v6965_v52  ;;  %v11425_v53 = vpop.f32.mrf.mxu0 }
 0x555   : > { %12516 = vst [vmem:[#allocation64_spill] sm:$0xff] %v11408_v42  ;;  %v6607_v10 = vrot.slane %v6606_v16, 2  ;;  %v6337_v48 = vmul.f32 %v12517_v49, %v5489_v14  ;;  %v7024_v54 = vsel %vm7023_vm6, %v6959_v20, %v7022_v21  ;;  %v11418_v57 = vadd.f32 %v11197_v38, %v11098_v58 }
 0x556   : > { %v7026_v8 = vsel %vm7025_vm7, %v6960_v60, %v7024_v54  ;;  %v7036_v22 = vsel %vm7023_vm6, %v6967_v56, %v7035_v26  ;;  %v4260_v19 = vpop.f32.mrf.mxu0  ;;  %v11441_v27 = vadd.f32 %v11197_v38, %v11213_v51 }
 0x557   : > { %v8215_v44 = vpop.eup %8214  ;;  %v11420_v63 = vadd.f32 %v6607_v10, %v6606_v16  ;;  %v6611_v61 = vsel %vm3236_vm4, %v6337_v48, 0.0  ;;  %v7028_v41 = vsel %vm7027_vm8, %v6961_v3, %v7026_v8  ;;  %v7037_v35 = vsel %vm7025_vm7, %v6968_v2, %v7036_v22 }
 0x558   : > { %v6612_v43 = vrot.slane %v6611_v61, 4  ;;  %v5490_v34 = vmul.f32 %v8215_v44, %v11331_v33  ;;  %v7030_v52 = vsel %vm7029_vm9, %v6962_v31, %v7028_v41  ;;  %v7038_v60 = vsel %vm7027_vm8, %v6969_v13, %v7037_v35  ;;  %v11447_v2 = vpop.f32.mrf.mxu0 }
 0x559   : > { %12518 = vst [vmem:[#allocation65_spill] sm:$0xff] %v11420_v63  ;;  %v7032_v20 = vsel %vm7031_vm10, %v6963_v15, %v7030_v52  ;;  %v4561_v3 = vsel %vm3236_vm4, %v11418_v57, -inf  ;;  %v7039_v33 = vsel %vm7029_vm9, %v6970_v29, %v7038_v60  ;;  %v11445_v15 = vadd.f32 %v11197_v38, %v11226_v25 }
 0x55a   : > { %v6613_v56 = vadd.f32 %v6612_v43, %v6611_v61  ;;  %v6338_v40 = vmul.f32 %v12519_v28, %v5490_v34  ;;  %v7034_v4 = vsel %vm7033_vm11, %v6964_v6, %v7032_v20  ;;  %v7040_v31 = vsel %vm7031_vm10, %v6971_v46, %v7039_v33  ;;  %v4265_v10 = vpop.f32.mrf.mxu0 }
 0x55b   : > { %v4562_v59 = vrot.slane %v4561_v3, 4  ;;  %v7041_v6 = vsel %vm7033_vm11, %v6972_v1, %v7040_v31  ;;  %v11453_v29 = vadd.f32 %v11197_v38, %v11240_v32  ;;  %v4568_v51 = vsel %vm3236_vm4, %v11441_v27, -inf }
 0x55c   : > { %v6614_v13 = vrot.slane %v6613_v56, 2  ;;  %v6618_v16 = vsel %vm3236_vm4, %v6338_v40, 0.0  ;;  %v7084_v46 = vpack.c.b16 %v7041_v6, %v7034_v4  ;;  %v4569_v49 = vrot.slane %v4568_v51, 4  ;;  %v11466_v44 = vpop.f32.mrf.mxu0 }
 0x55d   : > { %v6619_v14 = vrot.slane %v6618_v16, 4  ;;  %v4563_v21 = vmax.f32 %v4561_v3, %v4562_v59  ;;  %v4575_v48 = vsel %vm3236_vm4, %v11445_v15, -inf  ;;  %v4582_v1 = vsel %vm3236_vm4, %v11453_v29, -inf }
 0x55e   : > { %v11457_v25 = vadd.f32 %v6614_v13, %v6613_v56  ;;  %7921 = vmatprep.mubr.msk.bf16.mxu1 %vm3236_vm4, %v7084_v46  ;;  %v4576_v8 = vrot.slane %v4575_v48, 4  ;;  %v4583_v26 = vrot.slane %v4582_v1, 4  ;;  %v4570_v61 = vmax.f32 %v4568_v51, %v4569_v49  ;;  %v4268_v60 = vpop.f32.mrf.mxu0 }
 0x55f   : > { %v11463_v54 = vadd.f32 %v6619_v14, %v6618_v16  ;;  %v4564_v32 = vrot.slane %v4563_v21, 2  ;;  %v11470_v41 = vadd.f32 %v11197_v38, %v11253_v62  ;;  %v11474_v22 = vadd.f32 %v11197_v38, %v11264_v30 }
 0x560   : > { %12520 = vst [vmem:[#allocation69_spill] sm:$0xff] %v11457_v25  ;;  %v11478_v43 = vadd.f32 %v11197_v38, %v11275_v23  ;;  %v4577_v35 = vmax.f32 %v4575_v48, %v4576_v8  ;;  %v4584_v20 = vmax.f32 %v4582_v1, %v4583_v26  ;;  %v4571_v3 = vrot.slane %v4570_v61, 2  ;;  %v11487_v4 = vpop.f32.mrf.mxu0 }
 0x561   : > { %12521 = vst [vmem:[#allocation70_spill] sm:$0xff] %v11463_v54  ;;  %v4565_v52 = vmax.f32 %v4563_v21, %v4564_v32  ;;  %v4589_v19 = vsel %vm3236_vm4, %v11470_v41, -inf  ;;  %v4596_v62 = vsel %vm3236_vm4, %v11474_v22, -inf  ;;  %v11491_v13 = vadd.f32 %v11197_v38, %v11282_v12 }
 0x562   : > { %v4603_v30 = vsel %vm3236_vm4, %v11478_v43, -inf  ;;  %v4578_v28 = vrot.slane %v4577_v35, 2  ;;  %v4585_v23 = vrot.slane %v4584_v20, 2  ;;  %v4590_v40 = vrot.slane %v4589_v19, 4  ;;  %v4273_v21 = vpop.f32.mrf.mxu0 }
 0x563   : > { %v4566_v56 = vrot.slane %v4565_v52, 1  ;;  %v4572_v33 = vmax.f32 %v4570_v61, %v4571_v3  ;;  %v4597_v31 = vrot.slane %v4596_v62, 4  ;;  %v4604_v59 = vrot.slane %v4603_v30, 4 }
 0x564   : > { %v4579_v6 = vmax.f32 %v4577_v35, %v4578_v28  ;;  %v4586_v14 = vmax.f32 %v4584_v20, %v4585_v23  ;;  %v4591_v46 = vmax.f32 %v4589_v19, %v4590_v40  ;;  %v4610_v48 = vsel %vm3236_vm4, %v11491_v13, -inf  ;;  %v11496_v61 = vpop.f32.mrf.mxu0 }
 0x565   : > { %v4567_v16 = vmax.f32 %v4565_v52, %v4566_v56  ;;  %v4573_v51 = vrot.slane %v4572_v33, 1  ;;  %v4598_v10 = vmax.f32 %v4596_v62, %v4597_v31  ;;  %v4605_v49 = vmax.f32 %v4603_v30, %v4604_v59 }
 0x566   : > { %v4580_v32 = vrot.slane %v4579_v6, 1  ;;  %v4587_v8 = vrot.slane %v4586_v14, 1  ;;  %v4592_v26 = vrot.slane %v4591_v46, 2  ;;  %v4611_v35 = vrot.slane %v4610_v48, 4  ;;  %v4276_v62 = vpop.f32.mrf.mxu0 }
 0x567   : > { %v4787_v1 = vsub.f32 %v11418_v57, %v4567_v16  ;;  %v4574_v12 = vmax.f32 %v4572_v33, %v4573_v51  ;;  %v4599_v60 = vrot.slane %v4598_v10, 2  ;;  %v4606_v52 = vrot.slane %v4605_v49, 2 }
 0x568   : > { %v4581_v3 = vmax.f32 %v4579_v6, %v4580_v32  ;;  %v4588_v19 = vmax.f32 %v4586_v14, %v4587_v8  ;;  %v4593_v56 = vmax.f32 %v4591_v46, %v4592_v26  ;;  %v4612_v40 = vmax.f32 %v4610_v48, %v4611_v35  ;;  %v11501_v33 = vpop.f32.mrf.mxu0 }
 0x569   : > { %v4888_v20 = vmul.f32 1.442695, %v4787_v1  ;;  %v4788_v30 = vsub.f32 %v11441_v27, %v4574_v12  ;;  %v4600_v28 = vmax.f32 %v4598_v10, %v4599_v60  ;;  %v4607_v23 = vmax.f32 %v4605_v49, %v4606_v52 }
 0x56a   : > { %v4789_v57 = vsub.f32 %v11445_v15, %v4581_v3  ;;  %v4790_v31 = vsub.f32 %v11453_v29, %v4588_v19  ;;  %v4594_v59 = vrot.slane %v4593_v56, 1  ;;  %v4613_v6 = vrot.slane %v4612_v40, 2  ;;  %v4281_v10 = vpop.f32.mrf.mxu0 }
 0x56b   : > { %8216 = vpow2.f32 %v4888_v20  ;;  %v4890_v16 = vmul.f32 1.442695, %v4788_v30  ;;  %v4601_v21 = vrot.slane %v4600_v28, 1  ;;  %v4608_v51 = vrot.slane %v4607_v23, 1 }
 0x56c   : > { %v4892_v14 = vmul.f32 1.442695, %v4789_v57  ;;  %v4894_v46 = vmul.f32 1.442695, %v4790_v31  ;;  %v4595_v1 = vmax.f32 %v4593_v56, %v4594_v59  ;;  %v11505_v27 = vadd.f32 %v11197_v38, %v11297_v0  ;;  %v11514_v26 = vpop.f32.mrf.mxu0 }
 0x56d   : > { %8218 = vpow2.f32 %v4890_v16  ;;  %v4602_v49 = vmax.f32 %v4600_v28, %v4601_v21  ;;  %v4609_v15 = vmax.f32 %v4607_v23, %v4608_v51  ;;  %v4614_v48 = vmax.f32 %v4612_v40, %v4613_v6 }
 0x56e   : > { %8220 = vpow2.f32 %v4892_v14  ;;  %v4791_v29 = vsub.f32 %v11470_v41, %v4595_v1  ;;  %v4617_v32 = vsel %vm3236_vm4, %v11505_v27, -inf  ;;  %v11512_v8 = vadd.f32 %v11197_v38, %v11306_v17  ;;  %v4284_v3 = vpop.f32.mrf.mxu0 }
 0x56f   : > { %8222 = vpow2.f32 %v4894_v46  ;;  %v4792_v0 = vsub.f32 %v11474_v22, %v4602_v49  ;;  %v4793_v12 = vsub.f32 %v11478_v43, %v4609_v15  ;;  %v4615_v60 = vrot.slane %v4614_v48, 1 }
 0x570   : > { %v4896_v52 = vmul.f32 1.442695, %v4791_v29  ;;  %v4618_v35 = vrot.slane %v4617_v32, 4  ;;  %v4624_v41 = vsel %vm3236_vm4, %v11512_v8, -inf  ;;  %v11522_v20 = vadd.f32 %v11197_v38, %v11329_v18  ;;  %v11530_v28 = vpop.f32.mrf.mxu0 }
 0x571   : > { %v4898_v17 = vmul.f32 1.442695, %v4792_v0  ;;  %v4900_v19 = vmul.f32 1.442695, %v4793_v12  ;;  %v4616_v56 = vmax.f32 %v4614_v48, %v4615_v60  ;;  %v4625_v62 = vrot.slane %v4624_v41, 4 }
 0x572   : > { %8224 = vpow2.f32 %v4896_v52  ;;  %v4619_v30 = vmax.f32 %v4617_v32, %v4618_v35  ;;  %v4631_v22 = vsel %vm3236_vm4, %v11522_v20, -inf  ;;  %v11528_v43 = vadd.f32 %v11197_v38, %v11337_v45  ;;  %v4289_v16 = vpop.f32.mrf.mxu0 }
 0x573   : > { %8226 = vpow2.f32 %v4898_v17  ;;  %v4794_v18 = vsub.f32 %v11491_v13, %v4616_v56  ;;  %v4626_v23 = vmax.f32 %v4624_v41, %v4625_v62  ;;  %v4632_v40 = vrot.slane %v4631_v22, 4 }
 0x574   : > { %8228 = vpow2.f32 %v4900_v19  ;;  %v4620_v57 = vrot.slane %v4619_v30, 2  ;;  %v4638_v31 = vsel %vm3236_vm4, %v11528_v43, -inf  ;;  %v11537_v59 = vadd.f32 %v11197_v38, %v11348_v11  ;;  %v11549_v10 = vpop.f32.mrf.mxu0 }
 0x575   : > { %v4902_v21 = vmul.f32 1.442695, %v4794_v18  ;;  %v4627_v45 = vrot.slane %v4626_v23, 2  ;;  %v4633_v51 = vmax.f32 %v4631_v22, %v4632_v40  ;;  %v4639_v6 = vrot.slane %v4638_v31, 4 }
 0x576   : > { %v4621_v14 = vmax.f32 %v4619_v30, %v4620_v57  ;;  %v4645_v13 = vsel %vm3236_vm4, %v11537_v59, -inf  ;;  %v11543_v46 = vadd.f32 %v11197_v38, %v11360_v37  ;;  %v11547_v1 = vadd.f32 %v11197_v38, %v11382_v36  ;;  %v4292_v12 = vpop.f32.mrf.mxu0 }
 0x577   : > { %8230 = vpow2.f32 %v4902_v21  ;;  %v4628_v49 = vmax.f32 %v4626_v23, %v4627_v45  ;;  %v4634_v15 = vrot.slane %v4633_v51, 2  ;;  %v4640_v48 = vmax.f32 %v4638_v31, %v4639_v6 }
 0x578   : > { %v11551_v11 = vpop.eup %8216  ;;  %v4622_v32 = vrot.slane %v4621_v14, 1  ;;  %v4646_v0 = vrot.slane %v4645_v13, 4  ;;  %v11557_v37 = vsel %vm3236_vm4, %v11543_v46, -inf  ;;  %v11566_v19 = vsel %vm3236_vm4, %v11547_v1, -inf  ;;  %v11568_v56 = vpop.f32.mrf.mxu0 }
 0x579   : > { %v5201_v29 = vsel %vm3236_vm4, %v11551_v11, 0.0  ;;  %v4629_v36 = vrot.slane %v4628_v49, 1  ;;  %v4635_v60 = vmax.f32 %v4633_v51, %v4634_v15  ;;  %v4641_v52 = vrot.slane %v4640_v48, 2 }
 0x57a   : > { %v5202_v38 = vrot.slane %v5201_v29, 4  ;;  %v11559_v35 = vpop.eup %8218  ;;  %v4623_v41 = vmax.f32 %v4621_v14, %v4622_v32  ;;  %v11561_v3 = vmax.f32 %v4645_v13, %v4646_v0  ;;  %v4297_v45 = vpop.f32.mrf.mxu0 }
 0x57b   : > { %v11570_v62 = vpop.eup %8220  ;;  %v5208_v22 = vsel %vm3236_vm4, %v11559_v35, 0.0  ;;  %v4630_v18 = vmax.f32 %v4628_v49, %v4629_v36  ;;  %v4636_v23 = vrot.slane %v4635_v60, 1  ;;  %v11579_v21 = vmax.f32 %v4640_v48, %v4641_v52 }
 0x57c   : > { %v5203_v30 = vadd.f32 %v5202_v38, %v5201_v29  ;;  %v11574_v40 = vpop.eup %8222  ;;  %v5209_v57 = vrot.slane %v5208_v22, 4  ;;  %v5215_v31 = vsel %vm3236_vm4, %v11570_v62, 0.0  ;;  %v4795_v16 = vsub.f32 %v11505_v27, %v4623_v41  ;;  %v11584_v0 = vpop.f32.mrf.mxu0 }
 0x57d   : > { %v5216_v6 = vrot.slane %v5215_v31, 4  ;;  %v5222_v14 = vsel %vm3236_vm4, %v11574_v40, 0.0  ;;  %v4796_v13 = vsub.f32 %v11512_v8, %v4630_v18  ;;  %v4637_v32 = vmax.f32 %v4635_v60, %v4636_v23  ;;  %12522 = vst [vmem:[#allocation68_spill] sm:$0xff] %v11584_v0 }
 0x57e   : > { %v5204_v51 = vrot.slane %v5203_v30, 2  ;;  %v5210_v49 = vadd.f32 %v5209_v57, %v5208_v22  ;;  %v5223_v15 = vrot.slane %v5222_v14, 4  ;;  %v4904_v29 = vmul.f32 1.442695, %v4795_v16  ;;  %v4300_v22 = vpop.f32.mrf.mxu0 }
 0x57f   : > { %v11586_v12 = vpop.eup %8224  ;;  %v5217_v27 = vadd.f32 %v5216_v6, %v5215_v31  ;;  %v4906_v48 = vmul.f32 1.442695, %v4796_v13  ;;  %v4643_v36 = vrot.slane %v11579_v21, 1 }
 0x580   : > { %v5205_v38 = vadd.f32 %v5204_v51, %v5203_v30  ;;  %v11589_v52 = vpop.eup %8226  ;;  %v5211_v41 = vrot.slane %v5210_v49, 2  ;;  %v5224_v45 = vadd.f32 %v5223_v15, %v5222_v14  ;;  %v5229_v8 = vsel %vm3236_vm4, %v11586_v12, 0.0 }
 0x581   : > { %8232 = vpow2.f32 %v4904_v29  ;;  %v11593_v18 = vpop.eup %8228  ;;  %v5218_v23 = vrot.slane %v5217_v27, 2  ;;  %v5230_v57 = vrot.slane %v5229_v8, 4  ;;  %v5236_v30 = vsel %vm3236_vm4, %v11589_v52, 0.0 }
 0x582   : > { %v5206_v60 = vrot.slane %v5205_v38, 1  ;;  %v5212_v31 = vadd.f32 %v5211_v41, %v5210_v49  ;;  %v5225_v16 = vrot.slane %v5224_v45, 2  ;;  %v5237_v51 = vrot.slane %v5236_v30, 4 }
 0x583   : > { %v5243_v6 = vsel %vm3236_vm4, %v11593_v18, 0.0  ;;  %v5219_v13 = vadd.f32 %v5218_v23, %v5217_v27  ;;  %v5231_v15 = vadd.f32 %v5230_v57, %v5229_v8  ;;  %8234 = vpow2.f32 %v4906_v48 }
 0x584   : > { %v5207_v14 = vadd.f32 %v5206_v60, %v5205_v38  ;;  %v5244_v34 = vrot.slane %v5243_v6, 4  ;;  %v11599_v29 = vpop.eup %8230  ;;  %v5213_v22 = vrot.slane %v5212_v31, 1  ;;  %v5226_v58 = vadd.f32 %v5225_v16, %v5224_v45 }
 0x585   : > { %v5238_v17 = vadd.f32 %v5237_v51, %v5236_v30  ;;  %v5220_v42 = vrot.slane %v5219_v13, 1  ;;  %v5232_v54 = vrot.slane %v5231_v15, 2  ;;  %v5250_v0 = vsel %vm3236_vm4, %v11599_v29, 0.0 }
 0x586   : > { %8236 = vrcp.f32 %v5207_v14  ;;  %v5245_v25 = vadd.f32 %v5244_v34, %v5243_v6  ;;  %v5214_v49 = vadd.f32 %v5213_v22, %v5212_v31  ;;  %v5227_v41 = vrot.slane %v5226_v58, 1 }
 0x587   : > { %v5239_v63 = vrot.slane %v5238_v17, 2  ;;  %v5221_v38 = vadd.f32 %v5220_v42, %v5219_v13  ;;  %v5233_v27 = vadd.f32 %v5232_v54, %v5231_v15  ;;  %v5251_v60 = vrot.slane %v5250_v0, 4 }
 0x588   : > { %v5246_v8 = vrot.slane %v5245_v25, 2  ;;  %8238 = vrcp.f32 %v5214_v49  ;;  %v5228_v23 = vadd.f32 %v5227_v41, %v5226_v58  ;;  %v4797_v45 = vsub.f32 %v11522_v20, %v4637_v32 }
 0x589   : > { %v5240_v57 = vadd.f32 %v5239_v63, %v5238_v17  ;;  %8240 = vrcp.f32 %v5221_v38  ;;  %v5234_v48 = vrot.slane %v5233_v27, 1  ;;  %v5252_v16 = vadd.f32 %v5251_v60, %v5250_v0  ;;  %v11619_v38 = vld [vmem:[%s12138_s15] ss:$0 sm:$0xff] }
 0x58a   : > { %v5247_v30 = vadd.f32 %v5246_v8, %v5245_v25  ;;  %8242 = vrcp.f32 %v5228_v23  ;;  %v4908_v31 = vmul.f32 1.442695, %v4797_v45  ;;  %v4644_v51 = vmax.f32 %v11579_v21, %v4643_v36 }
 0x58b   : > { %v5241_v34 = vrot.slane %v5240_v57, 1  ;;  %v5235_v6 = vadd.f32 %v5234_v48, %v5233_v27  ;;  %v5253_v42 = vrot.slane %v5252_v16, 2  ;;  %v4648_v54 = vrot.slane %v11561_v3, 2 }
 0x58c   : > { %v5248_v14 = vrot.slane %v5247_v30, 1  ;;  %8244 = vpow2.f32 %v4908_v31  ;;  %v4798_v63 = vsub.f32 %v11528_v43, %v4644_v51  ;;  %v12523_v58 = vrot.slane %v11557_v37, 4 }
 0x58d   : > { %v5242_v13 = vadd.f32 %v5241_v34, %v5240_v57  ;;  %8246 = vrcp.f32 %v5235_v6  ;;  %v5254_v32 = vadd.f32 %v5253_v42, %v5252_v16  ;;  %v4649_v21 = vmax.f32 %v11561_v3, %v4648_v54  ;;  %v12524_v54 = vld [vmem:[#allocation22_spill] sm:$0xff] }
 0x58e   : > { %v4654_v20 = vmax.f32 %v11557_v37, %v12523_v58  ;;  %v11610_v25 = vpop.eup %8232  ;;  %v5249_v17 = vadd.f32 %v5248_v14, %v5247_v30  ;;  %v4910_v36 = vmul.f32 1.442695, %v4798_v63  ;;  %v4660_v37 = vrot.slane %v11566_v19, 4 }
 0x58f   : > { %8248 = vrcp.f32 %v5242_v13  ;;  %v5257_v0 = vsel %vm3236_vm4, %v11610_v25, 0.0  ;;  %v5255_v22 = vrot.slane %v5254_v32, 1  ;;  %v4650_v49 = vrot.slane %v4649_v21, 1 }
 0x590   : > { %v4655_v15 = vrot.slane %v4654_v20, 2  ;;  %8250 = vrcp.f32 %v5249_v17  ;;  %v5258_v43 = vrot.slane %v5257_v0, 4  ;;  %v11623_v3 = vadd.f32 %v11619_v38, %v11405_v55  ;;  %v11625_v27 = vpop.eup %8234 }
 0x591   : > { %8252 = vpow2.f32 %v4910_v36  ;;  %v5256_v8 = vadd.f32 %v5255_v22, %v5254_v32  ;;  %v4651_v23 = vmax.f32 %v4649_v21, %v4650_v49  ;;  %v7045_v57 = vsel %vm7027_vm8, %v11145_v50, %v11132_v5  ;;  %v12525_v49 = vld [vmem:[#allocation88_spill] sm:$0xff] }
 0x592   : > { %v4656_v41 = vmax.f32 %v4654_v20, %v4655_v15  ;;  %v5259_v60 = vadd.f32 %v5258_v43, %v5257_v0  ;;  %v5264_v48 = vsel %vm3236_vm4, %v11625_v27, 0.0  ;;  %v4661_v16 = vmax.f32 %v11566_v19, %v4660_v37 }
 0x593   : > { %v8237_v45 = vpop.eup %8236  ;;  %v4666_v55 = vsel %vm3236_vm4, %v11623_v3, -inf  ;;  %8254 = vrcp.f32 %v5256_v8  ;;  %v5265_v51 = vrot.slane %v5264_v48, 4  ;;  %v4799_v6 = vsub.f32 %v11537_v59, %v4651_v23 }
 0x594   : > { %v4657_v30 = vrot.slane %v4656_v41, 1  ;;  %v5491_v34 = vmul.f32 %v8237_v45, %v11551_v11  ;;  %v5260_v31 = vrot.slane %v5259_v60, 2  ;;  %v4662_v42 = vrot.slane %v4661_v16, 2 }
 0x595   : > { %v4667_v5 = vrot.slane %v4666_v55, 4  ;;  %v8239_v50 = vpop.eup %8238  ;;  %v5266_v58 = vadd.f32 %v5265_v51, %v5264_v48  ;;  %v11640_v19 = vsel %vm7029_vm9, %v11148_v7, %v7045_v57  ;;  %v4912_v17 = vmul.f32 1.442695, %v4799_v6 }
 0x596   : > { %v4658_v14 = vmax.f32 %v4656_v41, %v4657_v30  ;;  %v6339_v13 = vmul.f32 %v12524_v54, %v5491_v34  ;;  %v5261_v63 = vadd.f32 %v5260_v31, %v5259_v60  ;;  %v8241_v20 = vpop.eup %8240  ;;  %v5492_v11 = vmul.f32 %v8239_v50, %v11559_v35 }
 0x597   : > { %v4663_v21 = vmax.f32 %v4661_v16, %v4662_v42  ;;  %v8243_v59 = vpop.eup %8242  ;;  %v5493_v36 = vmul.f32 %v8241_v20, %v11570_v62  ;;  %v5267_v22 = vrot.slane %v5266_v58, 2  ;;  %8256 = vpow2.f32 %v4912_v17  ;;  %v12527_v62 = vld [vmem:[#allocation24_spill] sm:$0xff]  ;;  %v12529_v20 = vld [vmem:[#allocation27_spill] sm:$0xff] }
 0x598   : > { %v4800_v32 = vsub.f32 %v11543_v46, %v4658_v14  ;;  %v11645_v0 = vsel %vm3236_vm4, %v6339_v13, 0.0  ;;  %v5262_v15 = vrot.slane %v5261_v63, 1  ;;  %v11650_v7 = vmul.f32 %v12525_v49, %v5492_v11  ;;  %v12526_v46 = vld [vmem:[#allocation23_spill] sm:$0xff] }
 0x599   : > { %v6626_v43 = vrot.slane %v11645_v0, 4  ;;  %v5494_v41 = vmul.f32 %v8243_v59, %v11574_v40  ;;  %v11653_v35 = vpop.eup %8244  ;;  %v11656_v37 = vmul.f32 %v12526_v46, %v5493_v36  ;;  %v5268_v60 = vadd.f32 %v5267_v22, %v5266_v58 }
 0x59a   : > { %v5263_v8 = vadd.f32 %v5262_v15, %v5261_v63  ;;  %v4914_v23 = vmul.f32 1.442695, %v4800_v32  ;;  %v8247_v57 = vpop.eup %8246  ;;  %v5271_v48 = vsel %vm3236_vm4, %v11653_v35, 0.0  ;;  %v4664_v30 = vrot.slane %v4663_v21, 1  ;;  %v12528_v63 = vld [vmem:[#allocation30_spill] sm:$0xff] }
 0x59b   : > { %v6342_v45 = vmul.f32 %v12527_v62, %v5494_v41  ;;  %v11661_v16 = vmax.f32 %v4666_v55, %v4667_v5  ;;  %v5495_v40 = vmul.f32 %v8247_v57, %v11586_v12  ;;  %v5269_v31 = vrot.slane %v5268_v60, 1 }
 0x59c   : > { %v8249_v34 = vpop.eup %8248  ;;  %8258 = vrcp.f32 %v5263_v8  ;;  %v5272_v51 = vrot.slane %v5271_v48, 4  ;;  %v4665_v50 = vmax.f32 %v4663_v21, %v4664_v30  ;;  %v12530_v21 = vld [vmem:[#allocation26_spill] sm:$0xff] }
 0x59d   : > { %v8251_v6 = vpop.eup %8250  ;;  %v6646_v14 = vsel %vm3236_vm4, %v6342_v45, 0.0  ;;  %v5496_v42 = vmul.f32 %v8249_v34, %v11589_v52  ;;  %8260 = vpow2.f32 %v4914_v23  ;;  %v6343_v58 = vmul.f32 %v12528_v63, %v5495_v40  ;;  %v12531_v34 = vld [vmem:[#allocation31_spill] sm:$0xff] }
 0x59e   : > { %v11666_v54 = vpop.eup %8252  ;;  %v6647_v13 = vrot.slane %v6646_v14, 4  ;;  %v5497_v55 = vmul.f32 %v8251_v6, %v11593_v18  ;;  %v5270_v5 = vadd.f32 %v5269_v31, %v5268_v60  ;;  %v5273_v11 = vadd.f32 %v5272_v51, %v5271_v48 }
 0x59f   : > { %v6344_v12 = vmul.f32 %v12529_v20, %v5496_v42  ;;  %v5278_v17 = vsel %vm3236_vm4, %v11666_v54, 0.0  ;;  %v4801_v32 = vsub.f32 %v11547_v1, %v4665_v50  ;;  %v6653_v52 = vsel %vm3236_vm4, %v6343_v58, 0.0 }
 0x5a0   : > { %v6648_v59 = vadd.f32 %v6647_v13, %v6646_v14  ;;  %v6345_v36 = vmul.f32 %v12530_v21, %v5497_v55  ;;  %8262 = vrcp.f32 %v5270_v5  ;;  %v8255_v15 = vpop.eup %8254  ;;  %v6654_v22 = vrot.slane %v6653_v52, 4 }
 0x5a1   : > { %v6660_v49 = vsel %vm3236_vm4, %v6344_v12, 0.0  ;;  %v5274_v18 = vrot.slane %v5273_v11, 2  ;;  %v5279_v41 = vrot.slane %v5278_v17, 4  ;;  %v5498_v23 = vmul.f32 %v8255_v15, %v11599_v29 }
 0x5a2   : > { %v6649_v46 = vrot.slane %v6648_v59, 2  ;;  %v6661_v8 = vrot.slane %v6660_v49, 4  ;;  %v6667_v60 = vsel %vm3236_vm4, %v6345_v36, 0.0  ;;  %v6655_v57 = vadd.f32 %v6654_v22, %v6653_v52 }
 0x5a3   : > { %v6668_v1 = vrot.slane %v6667_v60, 4  ;;  %v5275_v62 = vadd.f32 %v5274_v18, %v5273_v11  ;;  %v5280_v45 = vadd.f32 %v5279_v41, %v5278_v17  ;;  %v6346_v40 = vmul.f32 %v12531_v34, %v5498_v23 }
 0x5a4   : > { %v6650_v48 = vadd.f32 %v6649_v46, %v6648_v59  ;;  %v6662_v30 = vadd.f32 %v6661_v8, %v6660_v49  ;;  %v4916_v31 = vmul.f32 1.442695, %v4801_v32  ;;  %v6656_v51 = vrot.slane %v6655_v57, 2  ;;  %v11680_v50 = vpop.eup %8256 }
 0x5a5   : > { %v6669_v6 = vadd.f32 %v6668_v1, %v6667_v60  ;;  %v5276_v14 = vrot.slane %v5275_v62, 1  ;;  %v5281_v42 = vrot.slane %v5280_v45, 2  ;;  %v6674_v58 = vsel %vm3236_vm4, %v6346_v40, 0.0 }
 0x5a6   : > { %v6651_v13 = vrot.slane %v6650_v48, 1  ;;  %v6663_v63 = vrot.slane %v6662_v30, 2  ;;  %8264 = vpow2.f32 %v4916_v31  ;;  %v6657_v29 = vadd.f32 %v6656_v51, %v6655_v57  ;;  %v12532_v57 = vld [vmem:[#allocation37_spill] sm:$0xff] }
 0x5a7   : > { %v6670_v55 = vrot.slane %v6669_v6, 2  ;;  %v6675_v5 = vrot.slane %v6674_v58, 4  ;;  %v5277_v20 = vadd.f32 %v5276_v14, %v5275_v62  ;;  %v5282_v17 = vadd.f32 %v5281_v42, %v5280_v45 }
 0x5a8   : > { %v11683_v12 = vadd.f32 %v6651_v13, %v6650_v48  ;;  %v11685_v11 = vadd.f32 %v6663_v63, %v6662_v30  ;;  %v5285_v32 = vsel %vm3236_vm4, %v11680_v50, 0.0  ;;  %v6658_v52 = vrot.slane %v6657_v29, 1 }
 0x5a9   : > { %v8259_v59 = vpop.eup %8258  ;;  %v11689_v21 = vadd.f32 %v6670_v55, %v6669_v6  ;;  %v11691_v36 = vadd.f32 %v6675_v5, %v6674_v58  ;;  %8266 = vrcp.f32 %v5277_v20  ;;  %v5283_v18 = vrot.slane %v5282_v17, 1  ;;  %v12535_v55 = vld [vmem:[#allocation62_spill] sm:$0xff] }
 0x5aa   : > { %v11693_v15 = vpop.eup %8260  ;;  %v6665_v22 = vrot.slane %v11685_v11, 1  ;;  %v5499_v49 = vmul.f32 %v8259_v59, %v11610_v25  ;;  %v5286_v41 = vrot.slane %v5285_v32, 4  ;;  %v11697_v46 = vadd.f32 %v6658_v52, %v6657_v29 }
 0x5ab   : > { %v6677_v8 = vrot.slane %v11691_v36, 2  ;;  %v5292_v60 = vsel %vm3236_vm4, %v11693_v15, 0.0  ;;  %v4669_v23 = vrot.slane %v11661_v16, 2  ;;  %v5284_v62 = vadd.f32 %v5283_v18, %v5282_v17 }
 0x5ac   : > { %v6347_v1 = vmul.f32 %v12532_v57, %v5499_v49  ;;  %v5287_v45 = vadd.f32 %v5286_v41, %v5285_v32  ;;  %v5293_v48 = vrot.slane %v5292_v60, 4  ;;  %v7047_v25 = vsel %vm7031_vm10, %v11164_v24, %v11640_v19  ;;  %v12533_v19 = vld [vmem:[#allocation17_spill] sm:$0xff]  ;;  %v12536_v32 = vld [vmem:[#allocation59_spill] sm:$0xff] }
 0x5ad   : > { %v8263_v30 = vpop.eup %8262  ;;  %v4670_v34 = vmax.f32 %v11661_v16, %v4669_v23  ;;  %v7052_v40 = vsel %vm7027_vm8, %v11284_v9, %v11261_v39  ;;  %v11713_v31 = vadd.f32 %v11619_v38, %v11425_v53  ;;  %8268 = vrcp.f32 %v5284_v62  ;;  %v12534_v53 = vld [vmem:[#allocation61_spill] sm:$0xff] }
 0x5ae   : > { %v11716_v51 = vsel %vm3236_vm4, %v6347_v1, 0.0  ;;  %v5500_v6 = vmul.f32 %v8263_v30, %v11625_v27  ;;  %v5288_v14 = vrot.slane %v5287_v45, 2  ;;  %v5294_v42 = vadd.f32 %v5293_v48, %v5292_v60 }
 0x5af   : > { %v6682_v16 = vrot.slane %v11716_v51, 4  ;;  %v4671_v13 = vrot.slane %v4670_v34, 1  ;;  %v7048_v24 = vsel %vm7033_vm11, %v11179_v47, %v7047_v25  ;;  %v7053_v63 = vsel %vm7029_vm9, %v12534_v53, %v7052_v40  ;;  %v12537_v53 = vld [vmem:[#allocation28_spill] sm:$0xff] }
 0x5b0   : > { %v11723_v39 = vmul.f32 %v12533_v19, %v5500_v6  ;;  %v5289_v9 = vadd.f32 %v5288_v14, %v5287_v45  ;;  %v4673_v58 = vsel %vm3236_vm4, %v11713_v31, -inf  ;;  %v5295_v27 = vrot.slane %v5294_v42, 2 }
 0x5b1   : > { %v4672_v29 = vmax.f32 %v4670_v34, %v4671_v13  ;;  %v7054_v5 = vsel %vm7031_vm10, %v12535_v55, %v7053_v63  ;;  %v4674_v20 = vrot.slane %v4673_v58, 4  ;;  %v11735_v59 = vadd.f32 %v11619_v38, %v11447_v2 }
 0x5b2   : > { %v5290_v17 = vrot.slane %v5289_v9, 1  ;;  %v7055_v47 = vsel %vm7033_vm11, %v12536_v32, %v7054_v5  ;;  %v11739_v52 = vadd.f32 %v11619_v38, %v11466_v44  ;;  %v5296_v18 = vadd.f32 %v5295_v27, %v5294_v42 }
 0x5b3   : > { %v11741_v49 = vpop.eup %8264  ;;  %v4802_v41 = vsub.f32 %v11623_v3, %v4672_v29  ;;  %v7085_v60 = vpack.c.b16 %v7055_v47, %v7048_v24  ;;  %v4675_v23 = vmax.f32 %v4673_v58, %v4674_v20  ;;  %v4680_v62 = vsel %vm3236_vm4, %v11735_v59, -inf }
 0x5b4   : > { %v5291_v57 = vadd.f32 %v5290_v17, %v5289_v9  ;;  %v5299_v1 = vsel %vm3236_vm4, %v11741_v49, 0.0  ;;  %v4687_v2 = vsel %vm3236_vm4, %v11739_v52, -inf  ;;  %v5297_v45 = vrot.slane %v5296_v18, 1 }
 0x5b5   : > { %v5300_v44 = vrot.slane %v5299_v1, 4  ;;  %v4918_v48 = vmul.f32 1.442695, %v4802_v41  ;;  %7922 = vmatmul.mubr.msk.bf16.vlgmr.msra.gmra.mxu1 %vm3236_vm4, %v7085_v60  ;;  %v4676_v30 = vrot.slane %v4675_v23, 2  ;;  %v4681_v3 = vrot.slane %v4680_v62, 4 }
 0x5b6   : > { %v8267_v34 = vpop.eup %8266  ;;  %8270 = vrcp.f32 %v5291_v57  ;;  %v4688_v25 = vrot.slane %v4687_v2, 4  ;;  %v11753_v40 = vadd.f32 %v11619_v38, %v11487_v4  ;;  %v5298_v14 = vadd.f32 %v5297_v45, %v5296_v18 }
 0x5b7   : > { %v5501_v6 = vmul.f32 %v8267_v34, %v11653_v35  ;;  %v5301_v42 = vadd.f32 %v5300_v44, %v5299_v1  ;;  %8272 = vpow2.f32 %v4918_v48  ;;  %v4677_v13 = vmax.f32 %v4675_v23, %v4676_v30 }
 0x5b8   : > { %v4682_v24 = vmax.f32 %v4680_v62, %v4681_v3  ;;  %v4689_v19 = vmax.f32 %v4687_v2, %v4688_v25  ;;  %v4694_v9 = vsel %vm3236_vm4, %v11753_v40, -inf  ;;  %8274 = vrcp.f32 %v5298_v14  ;;  %v12538_v2 = vld [vmem:[#allocation35_spill] sm:$0xff] }
 0x5b9   : > { %v11759_v63 = vmul.f32 %v12537_v53, %v5501_v6  ;;  %v5302_v58 = vrot.slane %v5301_v42, 2  ;;  %v4695_v27 = vrot.slane %v4694_v9, 4  ;;  %v4678_v29 = vrot.slane %v4677_v13, 1 }
 0x5ba   : > { %v4683_v4 = vrot.slane %v4682_v24, 2  ;;  %v4690_v55 = vrot.slane %v4689_v19, 2  ;;  %v11763_v35 = vadd.f32 %v11619_v38, %v11496_v61  ;;  %v8269_v5 = vpop.eup %8268  ;;  %v11767_v32 = vadd.f32 %v11619_v38, %v11501_v33 }
 0x5bb   : > { %v5303_v20 = vadd.f32 %v5302_v58, %v5301_v42  ;;  %v4696_v17 = vmax.f32 %v4694_v9, %v4695_v27  ;;  %v11771_v47 = vadd.f32 %v11619_v38, %v11514_v26  ;;  %v5502_v18 = vmul.f32 %v8269_v5, %v11666_v54 }
 0x5bc   : > { %v4679_v41 = vmax.f32 %v4677_v13, %v4678_v29  ;;  %v4684_v60 = vmax.f32 %v4682_v24, %v4683_v4  ;;  %v4691_v23 = vmax.f32 %v4689_v19, %v4690_v55  ;;  %v4701_v61 = vsel %vm3236_vm4, %v11763_v35, -inf }
 0x5bd   : > { %v5304_v57 = vrot.slane %v5303_v20, 1  ;;  %v4697_v1 = vrot.slane %v4696_v17, 2  ;;  %v4708_v62 = vsel %vm3236_vm4, %v11767_v32, -inf  ;;  %v6350_v33 = vmul.f32 %v12538_v2, %v5502_v18 }
 0x5be   : > { %v4803_v45 = vsub.f32 %v11713_v31, %v4679_v41  ;;  %v4685_v44 = vrot.slane %v4684_v60, 1  ;;  %v4692_v26 = vrot.slane %v4691_v23, 1  ;;  %v4702_v54 = vrot.slane %v4701_v61, 4 }
 0x5bf   : > { %v5305_v48 = vadd.f32 %v5304_v57, %v5303_v20  ;;  %v4698_v30 = vmax.f32 %v4696_v17, %v4697_v1  ;;  %v4709_v34 = vrot.slane %v4708_v62, 4  ;;  %v6702_v3 = vsel %vm3236_vm4, %v6350_v33, 0.0  ;;  %v12539_v57 = vld [vmem:[#allocation42_spill] sm:$0xff] }
 0x5c0   : > { %v4920_v25 = vmul.f32 1.442695, %v4803_v45  ;;  %v4686_v6 = vmax.f32 %v4684_v60, %v4685_v44  ;;  %v4693_v14 = vmax.f32 %v4691_v23, %v4692_v26  ;;  %v6703_v42 = vrot.slane %v6702_v3, 4 }
 0x5c1   : > { %8276 = vrcp.f32 %v5305_v48  ;;  %v4699_v13 = vrot.slane %v4698_v30, 1  ;;  %v4703_v24 = vmax.f32 %v4701_v61, %v4702_v54  ;;  %v4710_v9 = vmax.f32 %v4708_v62, %v4709_v34 }
 0x5c2   : > { %8278 = vpow2.f32 %v4920_v25  ;;  %v4804_v19 = vsub.f32 %v11735_v59, %v4686_v6  ;;  %v4805_v31 = vsub.f32 %v11739_v52, %v4693_v14  ;;  %v6704_v58 = vadd.f32 %v6703_v42, %v6702_v3 }
 0x5c3   : > { %v8271_v53 = vpop.eup %8270  ;;  %v4700_v27 = vmax.f32 %v4698_v30, %v4699_v13  ;;  %v4704_v29 = vrot.slane %v4703_v24, 2  ;;  %v4715_v4 = vsel %vm3236_vm4, %v11771_v47, -inf  ;;  %v4711_v18 = vrot.slane %v4710_v9, 2 }
 0x5c4   : > { %v11785_v55 = vpop.eup %8272  ;;  %v5503_v5 = vmul.f32 %v8271_v53, %v11680_v50  ;;  %v4922_v20 = vmul.f32 1.442695, %v4804_v19  ;;  %v4924_v17 = vmul.f32 1.442695, %v4805_v31  ;;  %v6705_v41 = vrot.slane %v6704_v58, 2 }
 0x5c5   : > { %v5306_v59 = vsel %vm3236_vm4, %v11785_v55, 0.0  ;;  %v4806_v52 = vsub.f32 %v11753_v40, %v4700_v27  ;;  %v4705_v60 = vmax.f32 %v4703_v24, %v4704_v29  ;;  %v8275_v23 = vpop.eup %8274  ;;  %v4712_v62 = vmax.f32 %v4710_v9, %v4711_v18  ;;  %v12540_v40 = vld [vmem:[#allocation34_spill] sm:$0xff] }
 0x5c6   : > { %v6351_v1 = vmul.f32 %v12539_v57, %v5503_v5  ;;  %v5307_v61 = vrot.slane %v5306_v59, 4  ;;  %8280 = vpow2.f32 %v4922_v20  ;;  %v6706_v2 = vadd.f32 %v6705_v41, %v6704_v58 }
 0x5c7   : > { %v5504_v33 = vmul.f32 %v8275_v23, %v11693_v15  ;;  %8282 = vpow2.f32 %v4924_v17  ;;  %v4926_v50 = vmul.f32 1.442695, %v4806_v52  ;;  %v4706_v26 = vrot.slane %v4705_v60, 1 }
 0x5c8   : > { %v6709_v45 = vsel %vm3236_vm4, %v6351_v1, 0.0  ;;  %v5308_v44 = vadd.f32 %v5307_v61, %v5306_v59  ;;  %v4713_v48 = vrot.slane %v4712_v62, 1  ;;  %v6707_v30 = vrot.slane %v6706_v2, 1  ;;  %v12541_v61 = vld [vmem:[#allocation40_spill] sm:$0xff] }
 0x5c9   : > { %v6710_v54 = vrot.slane %v6709_v45, 4  ;;  %v6352_v34 = vmul.f32 %v12540_v40, %v5504_v33  ;;  %8284 = vpow2.f32 %v4926_v50  ;;  %v4707_v25 = vmax.f32 %v4705_v60, %v4706_v26 }
 0x5ca   : > { %v5309_v3 = vrot.slane %v5308_v44, 2  ;;  %v4714_v6 = vmax.f32 %v4712_v62, %v4713_v48  ;;  %v4716_v14 = vrot.slane %v4715_v4, 4  ;;  %v6708_v42 = vadd.f32 %v6707_v30, %v6706_v2 }
 0x5cb   : > { %v6711_v13 = vadd.f32 %v6710_v54, %v6709_v45  ;;  %v6716_v15 = vsel %vm3236_vm4, %v6352_v34, 0.0  ;;  %v11798_v24 = vadd.f32 %v11619_v38, %v11530_v28  ;;  %v4807_v9 = vsub.f32 %v11763_v35, %v4707_v25 }
 0x5cc   : > { %v6717_v19 = vrot.slane %v6716_v15, 4  ;;  %v5310_v31 = vadd.f32 %v5309_v3, %v5308_v44  ;;  %v4808_v53 = vsub.f32 %v11767_v32, %v4714_v6  ;;  %v6862_v58 = vpack.c.bf16 %v6708_v42, %v6708_v42 }
 0x5cd   : > { %v6712_v27 = vrot.slane %v6711_v13, 2  ;;  %v4717_v29 = vmax.f32 %v4715_v4, %v4716_v14  ;;  %v4722_v5 = vsel %vm3236_vm4, %v11798_v24, -inf  ;;  %v4928_v41 = vmul.f32 1.442695, %v4807_v9 }
 0x5ce   : > { %v8277_v20 = vpop.eup %8276  ;;  %v6718_v17 = vadd.f32 %v6717_v19, %v6716_v15  ;;  %v5311_v18 = vrot.slane %v5310_v31, 1  ;;  %v4930_v59 = vmul.f32 1.442695, %v4808_v53  ;;  %v11806_v28 = vunpack.c.l.b16 %v6862_v58 }
 0x5cf   : > { %v11804_v52 = vpop.eup %8278  ;;  %v6713_v60 = vadd.f32 %v6712_v27, %v6711_v13  ;;  %v5505_v35 = vmul.f32 %v8277_v20, %v11741_v49  ;;  %v4718_v23 = vrot.slane %v4717_v29, 2  ;;  %8286 = vpow2.f32 %v4928_v41 }
 0x5d0   : > { %v6719_v32 = vrot.slane %v6718_v17, 2  ;;  %v5312_v57 = vadd.f32 %v5311_v18, %v5310_v31  ;;  %v5313_v4 = vsel %vm3236_vm4, %v11804_v52, 0.0  ;;  %8288 = vpow2.f32 %v4930_v59 }
 0x5d1   : > { %v6714_v1 = vrot.slane %v6713_v60, 1  ;;  %v6353_v62 = vmul.f32 %v12541_v61, %v5505_v35  ;;  %v5314_v2 = vrot.slane %v5313_v4, 4  ;;  %v4719_v50 = vmax.f32 %v4717_v29, %v4718_v23 }
 0x5d2   : > { %v6720_v33 = vadd.f32 %v6719_v32, %v6718_v17  ;;  %8290 = vrcp.f32 %v5312_v57  ;;  %v4723_v45 = vrot.slane %v4722_v5, 4  ;;  %v11817_v30 = vadd.f32 %v11619_v38, %v11549_v10 }
 0x5d3   : > { %v11812_v44 = vpop.eup %8280  ;;  %v6715_v26 = vadd.f32 %v6714_v1, %v6713_v60  ;;  %v6723_v49 = vsel %vm3236_vm4, %v6353_v62, 0.0  ;;  %v5315_v48 = vadd.f32 %v5314_v2, %v5313_v4  ;;  %v4720_v25 = vrot.slane %v4719_v50, 1 }
 0x5d4   : > { %v11819_v54 = vpop.eup %8282  ;;  %v6721_v40 = vrot.slane %v6720_v33, 1  ;;  %v6724_v34 = vrot.slane %v6723_v49, 4  ;;  %v5320_v3 = vsel %vm3236_vm4, %v11812_v44, 0.0  ;;  %v4724_v23 = vmax.f32 %v4722_v5, %v4723_v45 }
 0x5d5   : > { %v6863_v6 = vpack.c.bf16 %v6715_v26, %v6715_v26  ;;  %v5316_v14 = vrot.slane %v5315_v48, 2  ;;  %v5321_v42 = vrot.slane %v5320_v3, 4  ;;  %v5327_v13 = vsel %vm3236_vm4, %v11819_v54, 0.0 }
 0x5d6   : > { %v11825_v15 = vpop.eup %8284  ;;  %v6722_v19 = vadd.f32 %v6721_v40, %v6720_v33  ;;  %v6725_v31 = vadd.f32 %v6724_v34, %v6723_v49  ;;  %v5328_v10 = vrot.slane %v5327_v13, 4  ;;  %v4721_v9 = vmax.f32 %v4719_v50, %v4720_v25 }
 0x5d7   : > { %v11827_v53 = vunpack.c.l.b16 %v6863_v6  ;;  %v5317_v58 = vadd.f32 %v5316_v14, %v5315_v48  ;;  %v5322_v27 = vadd.f32 %v5321_v42, %v5320_v3  ;;  %v5334_v29 = vsel %vm3236_vm4, %v11825_v15, 0.0 }
 0x5d8   : > { %v6864_v20 = vpack.c.bf16 %v6722_v19, %v6722_v19  ;;  %v6726_v17 = vrot.slane %v6725_v31, 2  ;;  %v5329_v18 = vadd.f32 %v5328_v10, %v5327_v13  ;;  %v5335_v41 = vrot.slane %v5334_v29, 4 }
 0x5d9   : > { %v5318_v59 = vrot.slane %v5317_v58, 1  ;;  %v5323_v60 = vrot.slane %v5322_v27, 2  ;;  %v4809_v35 = vsub.f32 %v11771_v47, %v4721_v9  ;;  %v4725_v33 = vrot.slane %v4724_v23, 2 }
 0x5da   : > { %v11832_v32 = vunpack.c.l.b16 %v6864_v20  ;;  %v6727_v57 = vadd.f32 %v6726_v17, %v6725_v31  ;;  %v5330_v4 = vrot.slane %v5329_v18, 2  ;;  %v5336_v1 = vadd.f32 %v5335_v41, %v5334_v29 }
 0x5db   : > { %v5319_v61 = vadd.f32 %v5318_v59, %v5317_v58  ;;  %v5324_v62 = vadd.f32 %v5323_v60, %v5322_v27  ;;  %v4932_v2 = vmul.f32 1.442695, %v4809_v35  ;;  %v4729_v48 = vsel %vm3236_vm4, %v11817_v30, -inf }
 0x5dc   : > { %v6728_v50 = vrot.slane %v6727_v57, 1  ;;  %v5331_v26 = vadd.f32 %v5330_v4, %v5329_v18  ;;  %v5337_v49 = vrot.slane %v5336_v1, 2  ;;  %v11836_v40 = vpop.eup %8286  ;;  %v4726_v5 = vmax.f32 %v4724_v23, %v4725_v33  ;;  %v12542_v18 = vld [vmem:[#allocation46_spill] sm:$0xff] }
 0x5dd   : > { %8292 = vrcp.f32 %v5319_v61  ;;  %v5325_v47 = vrot.slane %v5324_v62, 1  ;;  %v4730_v45 = vrot.slane %v4729_v48, 4  ;;  %v11838_v34 = vpop.eup %8288  ;;  %v5341_v14 = vsel %vm3236_vm4, %v11836_v40, 0.0  ;;  %v12543_v61 = vld [vmem:[#allocation68_spill] sm:$0xff] }
 0x5de   : > { %v11840_v3 = vadd.f32 %v6728_v50, %v6727_v57  ;;  %v5332_v25 = vrot.slane %v5331_v26, 1  ;;  %v5338_v6 = vadd.f32 %v5337_v49, %v5336_v1  ;;  %v5342_v19 = vrot.slane %v5341_v14, 4 }
 0x5df   : > { %v8291_v42 = vpop.eup %8290  ;;  %v5326_v13 = vadd.f32 %v5325_v47, %v5324_v62  ;;  %v5348_v31 = vsel %vm3236_vm4, %v11838_v34, 0.0  ;;  %8294 = vpow2.f32 %v4932_v2  ;;  %v4727_v20 = vrot.slane %v4726_v5, 1  ;;  %v12544_v47 = vld [vmem:[#allocation65_spill] sm:$0xff] }
 0x5e0   : > { %v5506_v10 = vmul.f32 %v8291_v42, %v11785_v55  ;;  %v5333_v9 = vadd.f32 %v5332_v25, %v5331_v26  ;;  %v5339_v58 = vrot.slane %v5338_v6, 1  ;;  %v5349_v27 = vrot.slane %v5348_v31, 4 }
 0x5e1   : > { %8296 = vrcp.f32 %v5326_v13  ;;  %v5343_v29 = vadd.f32 %v5342_v19, %v5341_v14  ;;  %v4731_v17 = vmax.f32 %v4729_v48, %v4730_v45  ;;  %v4728_v23 = vmax.f32 %v4726_v5, %v4727_v20  ;;  %v12546_v19 = vld [vmem:[#allocation69_spill] sm:$0xff] }
 0x5e2   : > { %v6354_v41 = vmul.f32 %v12542_v18, %v5506_v10  ;;  %8298 = vrcp.f32 %v5333_v9  ;;  %v5340_v59 = vadd.f32 %v5339_v58, %v5338_v6  ;;  %v5350_v60 = vadd.f32 %v5349_v27, %v5348_v31 }
 0x5e3   : > { %v5344_v35 = vrot.slane %v5343_v29, 2  ;;  %v4732_v57 = vrot.slane %v4731_v17, 2  ;;  %v11850_v4 = vadd.f32 %v11619_v38, %v11568_v56  ;;  %v11855_v62 = vadd.f32 %v11619_v38, %v12543_v61 }
 0x5e4   : > { %v6730_v55 = vsel %vm3236_vm4, %v6354_v41, 0.0  ;;  %8300 = vrcp.f32 %v5340_v59  ;;  %v5351_v1 = vrot.slane %v5350_v60, 2  ;;  %v4810_v50 = vsub.f32 %v11798_v24, %v4728_v23 }
 0x5e5   : > { %v6731_v2 = vrot.slane %v6730_v55, 4  ;;  %v5345_v33 = vadd.f32 %v5344_v35, %v5343_v29  ;;  %v4733_v26 = vmax.f32 %v4731_v17, %v4732_v57  ;;  %v4736_v48 = vsel %vm3236_vm4, %v11850_v4, -inf }
 0x5e6   : > { %v5352_v49 = vadd.f32 %v5351_v1, %v5350_v60  ;;  %v4743_v56 = vsel %vm3236_vm4, %v11855_v62, -inf  ;;  %v12545_v5 = vrot.slane %v12544_v47, 1  ;;  %v4934_v6 = vmul.f32 1.442695, %v4810_v50 }
 0x5e7   : > { %v6732_v25 = vadd.f32 %v6731_v2, %v6730_v55  ;;  %v5346_v38 = vrot.slane %v5345_v33, 1  ;;  %v4734_v14 = vrot.slane %v4733_v26, 1  ;;  %v4737_v13 = vrot.slane %v4736_v48, 4  ;;  %v12547_v55 = vld [vmem:[#allocation70_spill] sm:$0xff] }
 0x5e8   : > { %v11865_v45 = vadd.f32 %v12545_v5, %v12544_v47  ;;  %v5353_v42 = vrot.slane %v5352_v49, 1  ;;  %v4744_v24 = vrot.slane %v4743_v56, 4  ;;  %v6616_v31 = vrot.slane %v12546_v19, 1 }
 0x5e9   : > { %v6733_v10 = vrot.slane %v6732_v25, 2  ;;  %v5347_v9 = vadd.f32 %v5346_v38, %v5345_v33  ;;  %8302 = vpow2.f32 %v4934_v6  ;;  %v4735_v58 = vmax.f32 %v4733_v26, %v4734_v14  ;;  %v12549_v33 = vld [vmem:[#allocation43_spill] sm:$0xff] }
 0x5ea   : > { %v8293_v27 = vpop.eup %8292  ;;  %v5354_v29 = vadd.f32 %v5353_v42, %v5352_v49  ;;  %v4738_v20 = vmax.f32 %v4736_v48, %v4737_v13  ;;  %v4745_v17 = vmax.f32 %v4743_v56, %v4744_v24  ;;  %v11869_v18 = vadd.f32 %v6616_v31, %v12546_v19  ;;  %v12550_v31 = vld [vmem:[#allocation38_spill] sm:$0xff] }
 0x5eb   : > { %v11871_v41 = vadd.f32 %v6733_v10, %v6732_v25  ;;  %v5507_v59 = vmul.f32 %v8293_v27, %v11804_v52  ;;  %8304 = vrcp.f32 %v5347_v9  ;;  %v4811_v60 = vsub.f32 %v11817_v30, %v4735_v58 }
 0x5ec   : > { %v11875_v35 = vpop.eup %8294  ;;  %8306 = vrcp.f32 %v5354_v29  ;;  %v4739_v23 = vrot.slane %v4738_v20, 2  ;;  %v4746_v57 = vrot.slane %v4745_v17, 2  ;;  %v12548_v1 = vrot.slane %v12547_v55, 2 }
 0x5ed   : > { %v6735_v2 = vrot.slane %v11871_v41, 1  ;;  %v6355_v50 = vmul.f32 %v12549_v33, %v5507_v59  ;;  %v5355_v26 = vsel %vm3236_vm4, %v11875_v35, 0.0  ;;  %v4936_v52 = vmul.f32 1.442695, %v4811_v60 }
 0x5ee   : > { %v6622_v61 = vadd.f32 %v12548_v1, %v12547_v55  ;;  %v8297_v49 = vpop.eup %8296  ;;  %v5356_v48 = vrot.slane %v5355_v26, 4  ;;  %v4740_v30 = vmax.f32 %v4738_v20, %v4739_v23  ;;  %v4747_v56 = vmax.f32 %v4745_v17, %v4746_v57  ;;  %v12551_v20 = vld [vmem:[#allocation44_spill] sm:$0xff]  ;;  %v12552_v1 = vld [vmem:[#allocation21_spill] sm:$0xff] }
 0x5ef   : > { %v8299_v5 = vpop.eup %8298  ;;  %v6737_v25 = vsel %vm3236_vm4, %v6355_v50, 0.0  ;;  %v5508_v38 = vmul.f32 %v8297_v49, %v11812_v44  ;;  %8308 = vpow2.f32 %v4936_v52  ;;  %v6627_v6 = vadd.f32 %v6626_v43, %v11645_v0 }
 0x5f0   : > { %v6623_v47 = vrot.slane %v6622_v61, 1  ;;  %v6738_v14 = vrot.slane %v6737_v25, 4  ;;  %v5509_v42 = vmul.f32 %v8299_v5, %v11819_v54  ;;  %v5357_v13 = vadd.f32 %v5356_v48, %v5355_v26 }
 0x5f1   : > { %v4741_v24 = vrot.slane %v4740_v30, 1  ;;  %v8301_v19 = vpop.eup %8300  ;;  %v6356_v10 = vmul.f32 %v12550_v31, %v5508_v38  ;;  %v4748_v9 = vrot.slane %v4747_v56, 1  ;;  %v6628_v27 = vrot.slane %v6627_v6, 2 }
 0x5f2   : > { %v11891_v58 = vadd.f32 %v6623_v47, %v6622_v61  ;;  %v6739_v29 = vadd.f32 %v6738_v14, %v6737_v25  ;;  %v6357_v44 = vmul.f32 %v12551_v20, %v5509_v42  ;;  %v5510_v17 = vmul.f32 %v8301_v19, %v11825_v15  ;;  %v12553_v20 = vld [vmem:[#allocation45_spill] sm:$0xff] }
 0x5f3   : > { %v5358_v59 = vrot.slane %v5357_v13, 2  ;;  %v6744_v0 = vsel %vm3236_vm4, %v6356_v10, 0.0  ;;  %v4742_v43 = vmax.f32 %v4740_v30, %v4741_v24  ;;  %v4749_v60 = vmax.f32 %v4747_v56, %v4748_v9 }
 0x5f4   : > { %v6629_v54 = vadd.f32 %v6628_v27, %v6627_v6  ;;  %v6740_v23 = vrot.slane %v6739_v29, 2  ;;  %v6745_v57 = vrot.slane %v6744_v0, 4  ;;  %v11897_v55 = vsel %vm3236_vm4, %v6357_v44, 0.0 }
 0x5f5   : > { %v6358_v61 = vmul.f32 %v12552_v1, %v5510_v17  ;;  %v6752_v33 = vrot.slane %v11897_v55, 4  ;;  %v5359_v50 = vadd.f32 %v5358_v59, %v5357_v13  ;;  %v4812_v26 = vsub.f32 %v11850_v4, %v4742_v43 }
 0x5f6   : > { %v4813_v15 = vsub.f32 %v11855_v62, %v4749_v60  ;;  %v11903_v52 = vpop.eup %8302  ;;  %v11905_v49 = vadd.f32 %v6740_v23, %v6739_v29  ;;  %v11907_v48 = vadd.f32 %v6745_v57, %v6744_v0  ;;  %v6630_v56 = vrot.slane %v6629_v54, 1  ;;  %v12554_v0 = vld [vmem:[#allocation47_spill] sm:$0xff] }
 0x5f7   : > { %v6758_v30 = vsel %vm3236_vm4, %v6358_v61, 0.0  ;;  %v5360_v5 = vrot.slane %v5359_v50, 1  ;;  %v5362_v25 = vsel %vm3236_vm4, %v11903_v52, 0.0  ;;  %v4938_v38 = vmul.f32 1.442695, %v4812_v26 }
 0x5f8   : > { %v6759_v47 = vrot.slane %v6758_v30, 4  ;;  %v8305_v6 = vpop.eup %8304  ;;  %v6747_v4 = vrot.slane %v11907_v48, 2  ;;  %v5363_v14 = vrot.slane %v5362_v25, 4  ;;  %v4940_v62 = vmul.f32 1.442695, %v4813_v15 }
 0x5f9   : > { %v11913_v42 = vadd.f32 %v6630_v56, %v6629_v54  ;;  %v8307_v13 = vpop.eup %8306  ;;  %v5511_v19 = vmul.f32 %v8305_v6, %v11836_v40  ;;  %v5361_v31 = vadd.f32 %v5360_v5, %v5359_v50  ;;  %8310 = vpow2.f32 %v4938_v38 }
 0x5fa   : > { %v6760_v24 = vadd.f32 %v6759_v47, %v6758_v30  ;;  %v5512_v10 = vmul.f32 %v8307_v13, %v11838_v34  ;;  %v5364_v9 = vadd.f32 %v5363_v14, %v5362_v25  ;;  %8312 = vpow2.f32 %v4940_v62 }
 0x5fb   : > { %v6632_v27 = vsel %vm3236_vm4, %v11650_v7, 0.0  ;;  %v6359_v44 = vmul.f32 %v12553_v20, %v5511_v19  ;;  %8314 = vrcp.f32 %v5361_v31  ;;  %v6639_v40 = vsel %vm3236_vm4, %v11656_v37, 0.0 }
 0x5fc   : > { %v6761_v29 = vrot.slane %v6760_v24, 2  ;;  %v6633_v17 = vrot.slane %v6632_v27, 4  ;;  %v11920_v59 = vpop.eup %8308  ;;  %v6360_v43 = vmul.f32 %v12554_v0, %v5512_v10  ;;  %v5365_v60 = vrot.slane %v5364_v9, 2 }
 0x5fd   : > { %v11928_v34 = vadd.f32 %v6665_v22, %v11685_v11  ;;  %v6765_v7 = vsel %vm3236_vm4, %v6359_v44, 0.0  ;;  %v5369_v23 = vsel %vm3236_vm4, %v11920_v59, 0.0  ;;  %v6640_v56 = vrot.slane %v6639_v40, 4 }
 0x5fe   : > { %v6762_v54 = vadd.f32 %v6761_v29, %v6760_v24  ;;  %v6634_v57 = vadd.f32 %v6633_v17, %v6632_v27  ;;  %v6766_v1 = vrot.slane %v6765_v7, 4  ;;  %v6772_v61 = vsel %vm3236_vm4, %v6360_v43, 0.0 }
 0x5ff   : > { %v5366_v50 = vadd.f32 %v5365_v60, %v5364_v9  ;;  %v5370_v26 = vrot.slane %v5369_v23, 4  ;;  %v6773_v30 = vrot.slane %v6772_v61, 4  ;;  %v6672_v22 = vrot.slane %v11689_v21, 1 }
 0x600   : > { %v6763_v15 = vrot.slane %v6762_v54, 1  ;;  %v6635_v37 = vrot.slane %v6634_v57, 2  ;;  %v6767_v47 = vadd.f32 %v6766_v1, %v6765_v7  ;;  %v6641_v14 = vadd.f32 %v6640_v56, %v6639_v40 }
 0x601   : > { %v5367_v5 = vrot.slane %v5366_v50, 1  ;;  %v5371_v11 = vadd.f32 %v5370_v26, %v5369_v23  ;;  %v6774_v38 = vadd.f32 %v6773_v30, %v6772_v61  ;;  %v11936_v19 = vadd.f32 %v6672_v22, %v11689_v21 }
 0x602   : > { %v6764_v25 = vadd.f32 %v6763_v15, %v6762_v54  ;;  %v6636_v6 = vadd.f32 %v6635_v37, %v6634_v57  ;;  %v6768_v62 = vrot.slane %v6767_v47, 2  ;;  %v6642_v27 = vrot.slane %v6641_v14, 2 }
 0x603   : > { %v5368_v13 = vadd.f32 %v5367_v5, %v5366_v50  ;;  %v5372_v24 = vrot.slane %v5371_v11, 2  ;;  %v6775_v10 = vrot.slane %v6774_v38, 2  ;;  %v6678_v44 = vadd.f32 %v6677_v8, %v11691_v36 }
 0x604   : > { %v6870_v31 = vpack.c.bf16 %v6764_v25, %v6764_v25  ;;  %v6637_v9 = vrot.slane %v6636_v6, 1  ;;  %v6769_v29 = vadd.f32 %v6768_v62, %v6767_v47  ;;  %v6643_v60 = vadd.f32 %v6642_v27, %v6641_v14 }
 0x605   : > { %8316 = vrcp.f32 %v5368_v13  ;;  %v5373_v20 = vadd.f32 %v5372_v24, %v5371_v11  ;;  %v6776_v0 = vadd.f32 %v6775_v10, %v6774_v38  ;;  %v6679_v7 = vrot.slane %v6678_v44, 1 }
 0x606   : > { %v11941_v17 = vunpack.c.l.b16 %v6870_v31  ;;  %v11943_v43 = vadd.f32 %v6637_v9, %v6636_v6  ;;  %v11945_v40 = vpop.eup %8310  ;;  %v6770_v21 = vrot.slane %v6769_v29, 1  ;;  %v6683_v23 = vadd.f32 %v6682_v16, %v11716_v51 }
 0x607   : > { %v5374_v54 = vrot.slane %v5373_v20, 1  ;;  %v11950_v57 = vpop.eup %8312  ;;  %v6777_v1 = vrot.slane %v6776_v0, 1  ;;  %v5376_v36 = vsel %vm3236_vm4, %v11945_v40, 0.0  ;;  %v6644_v8 = vrot.slane %v6643_v60, 1 }
 0x608   : > { %v6688_v61 = vsel %vm3236_vm4, %v11723_v39, 0.0  ;;  %v8315_v50 = vpop.eup %8314  ;;  %v6771_v26 = vadd.f32 %v6770_v21, %v6769_v29  ;;  %v5377_v30 = vrot.slane %v5376_v36, 4  ;;  %v5383_v37 = vsel %vm3236_vm4, %v11950_v57, 0.0  ;;  %v12555_v39 = vld [vmem:[#allocation48_spill] sm:$0xff] }
 0x609   : > { %v5375_v15 = vadd.f32 %v5374_v54, %v5373_v20  ;;  %v6778_v56 = vadd.f32 %v6777_v1, %v6776_v0  ;;  %v5513_v51 = vmul.f32 %v8315_v50, %v11875_v35  ;;  %v5384_v16 = vrot.slane %v5383_v37, 4  ;;  %v12556_v54 = vld [vmem:[#allocation66_spill] sm:$0xff]  ;;  %v12557_v1 = vld [vmem:[#allocation64_spill] sm:$0xff] }
 0x60a   : > { %v11959_v47 = vadd.f32 %v6644_v8, %v6643_v60  ;;  %v6871_v5 = vpack.c.bf16 %v6771_v26, %v6771_v26  ;;  %v5378_v11 = vadd.f32 %v5377_v30, %v5376_v36  ;;  %v11961_v22 = vadd.f32 %v6679_v7, %v6678_v44 }
 0x60b   : > { %8318 = vrcp.f32 %v5375_v15  ;;  %v6872_v25 = vpack.c.bf16 %v6778_v56, %v6778_v56  ;;  %v6361_v38 = vmul.f32 %v12555_v39, %v5513_v51  ;;  %v5385_v6 = vadd.f32 %v5384_v16, %v5383_v37 }
 0x60c   : > { %v6684_v14 = vrot.slane %v6683_v23, 2  ;;  %v11964_v62 = vunpack.c.l.b16 %v6871_v5  ;;  %v5379_v13 = vrot.slane %v5378_v11, 2  ;;  %v6689_v24 = vrot.slane %v6688_v61, 4 }
 0x60d   : > { %v6695_v35 = vsel %vm3236_vm4, %v11759_v63, 0.0  ;;  %v11968_v31 = vunpack.c.l.b16 %v6872_v25  ;;  %v6779_v10 = vsel %vm3236_vm4, %v6361_v38, 0.0  ;;  %v5386_v9 = vrot.slane %v5385_v6, 2 }
 0x60e   : > { %v6685_v27 = vadd.f32 %v6684_v14, %v6683_v23  ;;  %v6780_v29 = vrot.slane %v6779_v10, 4  ;;  %v5380_v20 = vadd.f32 %v5379_v13, %v5378_v11  ;;  %v6690_v44 = vadd.f32 %v6689_v24, %v6688_v61  ;;  %v12558_v14 = vld [vmem:[#allocation50_spill] sm:$0xff] }
 0x60f   : > { %v6696_v0 = vrot.slane %v6695_v35, 4  ;;  %v5387_v60 = vadd.f32 %v5386_v9, %v5385_v6  ;;  %v6846_v7 = vpack.c.bf16 %v12556_v54, %v12556_v54  ;;  %v6847_v36 = vpack.c.bf16 %v12557_v1, %v12557_v1 }
 0x610   : > { %v6686_v21 = vrot.slane %v6685_v27, 1  ;;  %v6781_v8 = vadd.f32 %v6780_v29, %v6779_v10  ;;  %v5381_v63 = vrot.slane %v5380_v20, 1  ;;  %v6691_v50 = vrot.slane %v6690_v44, 2 }
 0x611   : > { %v6697_v26 = vadd.f32 %v6696_v0, %v6695_v35  ;;  %v5388_v30 = vrot.slane %v5387_v60, 1  ;;  %v6848_v23 = vpack.c.bf16 %v11865_v45, %v11865_v45  ;;  %v6849_v61 = vpack.c.bf16 %v11869_v18, %v11869_v18 }
 0x612   : > { %v8317_v15 = vpop.eup %8316  ;;  %v6687_v37 = vadd.f32 %v6686_v21, %v6685_v27  ;;  %v6782_v56 = vrot.slane %v6781_v8, 2  ;;  %v5382_v16 = vadd.f32 %v5381_v63, %v5380_v20  ;;  %v6692_v5 = vadd.f32 %v6691_v50, %v6690_v44 }
 0x613   : > { %v5514_v51 = vmul.f32 %v8317_v15, %v11903_v52  ;;  %v5389_v11 = vadd.f32 %v5388_v30, %v5387_v60  ;;  %v6698_v25 = vrot.slane %v6697_v26, 2  ;;  %v6850_v39 = vpack.c.bf16 %v11891_v58, %v11891_v58 }
 0x614   : > { %v6851_v38 = vpack.c.bf16 %v11913_v42, %v11913_v42  ;;  %v6783_v6 = vadd.f32 %v6782_v56, %v6781_v8  ;;  %8320 = vrcp.f32 %v5382_v16  ;;  %v6693_v45 = vrot.slane %v6692_v5, 1  ;;  %v12559_v8 = vld [vmem:[#allocation53_spill] sm:$0xff] }
 0x615   : > { %v6362_v13 = vmul.f32 %v12558_v14, %v5514_v51  ;;  %8322 = vrcp.f32 %v5389_v11  ;;  %v6699_v18 = vadd.f32 %v6698_v25, %v6697_v26  ;;  %v6852_v52 = vpack.c.bf16 %v11943_v43, %v11943_v43 }
 0x616   : > { %v6853_v24 = vpack.c.bf16 %v11959_v47, %v11959_v47  ;;  %v6784_v35 = vrot.slane %v6783_v6, 1  ;;  %v6694_v58 = vadd.f32 %v6693_v45, %v6692_v5  ;;  %v6854_v42 = vpack.c.bf16 %v11683_v12, %v11683_v12 }
 0x617   : > { %v6786_v10 = vsel %vm3236_vm4, %v6362_v13, 0.0  ;;  %v6700_v29 = vrot.slane %v6699_v18, 1  ;;  %v6855_v20 = vpack.c.bf16 %v11697_v46, %v11697_v46  ;;  %v6856_v44 = vpack.c.bf16 %v11928_v34, %v11928_v34 }
 0x618   : > { %v8319_v9 = vpop.eup %8318  ;;  %v6787_v27 = vrot.slane %v6786_v10, 4  ;;  %v11996_v43 = vadd.f32 %v6784_v35, %v6783_v6  ;;  %v6857_v0 = vpack.c.bf16 %v11936_v19, %v11936_v19  ;;  %v6858_v60 = vpack.c.bf16 %v11961_v22, %v11961_v22 }
 0x619   : > { %v5515_v47 = vmul.f32 %v8319_v9, %v11920_v59  ;;  %v6701_v21 = vadd.f32 %v6700_v29, %v6699_v18  ;;  %v6859_v54 = vpack.c.bf16 %v6687_v37, %v6687_v37  ;;  %v6860_v1 = vpack.c.bf16 %v6694_v58, %v6694_v58 }
 0x61a   : > { %v6788_v12 = vadd.f32 %v6787_v27, %v6786_v10  ;;  %v6989_v46 = vunpack.c.l.b16 %v6846_v7  ;;  %v6990_v50 = vunpack.c.l.b16 %v6847_v36  ;;  %v6991_v26 = vunpack.c.l.b16 %v6848_v23 }
 0x61b   : > { %v6363_v63 = vmul.f32 %v12559_v8, %v5515_v47  ;;  %v6861_v15 = vpack.c.bf16 %v6701_v21, %v6701_v21  ;;  %v6992_v30 = vunpack.c.l.b16 %v6849_v61  ;;  %v6993_v56 = vunpack.c.l.b16 %v6850_v39 }
 0x61c   : > { %v6789_v34 = vrot.slane %v6788_v12, 2  ;;  %v6994_v51 = vunpack.c.l.b16 %v6851_v38  ;;  %v6995_v19 = vunpack.c.l.b16 %v6852_v52  ;;  %v6996_v16 = vunpack.c.l.b16 %v6853_v24 }
 0x61d   : > { %v6793_v59 = vsel %vm3236_vm4, %v6363_v63, 0.0  ;;  %v6997_v11 = vunpack.c.l.b16 %v6854_v42  ;;  %v6998_v25 = vunpack.c.l.b16 %v6855_v20  ;;  %v6999_v37 = vunpack.c.l.b16 %v6856_v44 }
 0x61e   : > { %v6790_v5 = vadd.f32 %v6789_v34, %v6788_v12  ;;  %v6794_v22 = vrot.slane %v6793_v59, 4  ;;  %v7000_v6 = vunpack.c.l.b16 %v6857_v0  ;;  %v7001_v14 = vunpack.c.l.b16 %v6858_v60  ;;  %v12560_v0 = vld [vmem:[#allocation51_spill] sm:$0xff]  ;;  %v12561_v12 = vld [vmem:[#allocation49_spill] sm:$0xff] }
 0x61f   : > { %v7002_v13 = vunpack.c.l.b16 %v6859_v54  ;;  %v7003_v23 = vunpack.c.l.b16 %v6860_v1  ;;  %v7004_v45 = vunpack.c.l.b16 %v6861_v15  ;;  %v7056_v61 = vsel %vm7021_vm5, %v6990_v50, %v6989_v46 }
 0x620   : > { %v6791_v7 = vrot.slane %v6790_v5, 1  ;;  %v6795_v36 = vadd.f32 %v6794_v22, %v6793_v59  ;;  %v7063_v39 = vsel %vm7021_vm5, %v6998_v25, %v6997_v11  ;;  %v6736_v38 = vadd.f32 %v6735_v2, %v11871_v41 }
 0x621   : > { %v6742_v18 = vrot.slane %v11905_v49, 1  ;;  %v8321_v52 = vpop.eup %8320  ;;  %v7057_v35 = vsel %vm7023_vm6, %v6991_v26, %v7056_v61  ;;  %v7064_v10 = vsel %vm7023_vm6, %v6999_v37, %v7063_v39  ;;  %v6748_v58 = vadd.f32 %v6747_v4, %v11907_v48 }
 0x622   : > { %v6796_v24 = vrot.slane %v6795_v36, 2  ;;  %v8323_v42 = vpop.eup %8322  ;;  %v5516_v9 = vmul.f32 %v8321_v52, %v11945_v40  ;;  %v7058_v27 = vsel %vm7025_vm7, %v6992_v30, %v7057_v35  ;;  %v7065_v29 = vsel %vm7025_vm7, %v7000_v6, %v7064_v10 }
 0x623   : > { %v6743_v41 = vadd.f32 %v6742_v18, %v11905_v49  ;;  %v5517_v20 = vmul.f32 %v8323_v42, %v11950_v57  ;;  %v7059_v44 = vsel %vm7027_vm8, %v6993_v56, %v7058_v27  ;;  %v7066_v47 = vsel %vm7027_vm8, %v7001_v14, %v7065_v29 }
 0x624   : > { %v6797_v2 = vadd.f32 %v6796_v24, %v6795_v36  ;;  %v6364_v60 = vmul.f32 %v12560_v0, %v5516_v9  ;;  %v7060_v48 = vsel %vm7029_vm9, %v6994_v51, %v7059_v44  ;;  %v7067_v4 = vsel %vm7029_vm9, %v7002_v13, %v7066_v47 }
 0x625   : > { %v6749_v40 = vrot.slane %v6748_v58, 1  ;;  %v6365_v21 = vmul.f32 %v12561_v12, %v5517_v20  ;;  %v7061_v54 = vsel %vm7031_vm10, %v6995_v19, %v7060_v48  ;;  %v7068_v49 = vsel %vm7031_vm10, %v7003_v23, %v7067_v4 }
 0x626   : > { %v6753_v57 = vadd.f32 %v6752_v33, %v11897_v55  ;;  %v6800_v1 = vsel %vm3236_vm4, %v6364_v60, 0.0  ;;  %v7062_v8 = vsel %vm7033_vm11, %v6996_v16, %v7061_v54  ;;  %v7069_v63 = vsel %vm7033_vm11, %v7004_v45, %v7068_v49  ;;  %v7552_v54 = vld [vmem:[%s12140_s17] ss:$0 sm:$0xff] }
 0x627   : > { %v6750_v46 = vadd.f32 %v6749_v40, %v6748_v58  ;;  %v6801_v50 = vrot.slane %v6800_v1, 4  ;;  %v6807_v26 = vsel %vm3236_vm4, %v6365_v21, 0.0  ;;  %v7086_v34 = vpack.c.b16 %v7069_v63, %v7062_v8 }
 0x628   : > { %v6754_v15 = vrot.slane %v6753_v57, 2  ;;  %v6808_v30 = vrot.slane %v6807_v26, 4  ;;  %v6792_v56 = vadd.f32 %v6791_v7, %v6790_v5  ;;  %v6798_v59 = vrot.slane %v6797_v2, 1 }
 0x629   : > { %v6865_v51 = vpack.c.bf16 %v11840_v3, %v11840_v3  ;;  %v6802_v19 = vadd.f32 %v6801_v50, %v6800_v1  ;;  %7925 = vmatprep.mubr.msk.bf16.mxu1 %vm3236_vm4, %v7086_v34  ;;  %v6866_v33 = vpack.c.bf16 %v6736_v38, %v6736_v38  ;;  %v6867_v16 = vpack.c.bf16 %v6743_v41, %v6743_v41 }
 0x62a   : > { %v6755_v55 = vadd.f32 %v6754_v15, %v6753_v57  ;;  %v6799_v22 = vadd.f32 %v6798_v59, %v6797_v2  ;;  %v6809_v11 = vadd.f32 %v6808_v30, %v6807_v26  ;;  %v6868_v25 = vpack.c.bf16 %v6750_v46, %v6750_v46 }
 0x62b   : > { %v6873_v37 = vpack.c.bf16 %v11996_v43, %v11996_v43  ;;  %v6803_v6 = vrot.slane %v6802_v19, 2  ;;  %v6874_v13 = vpack.c.bf16 %v6792_v56, %v6792_v56  ;;  %v7008_v5 = vunpack.c.l.b16 %v6865_v51 }
 0x62c   : > { %v6756_v14 = vrot.slane %v6755_v55, 1  ;;  %v6810_v7 = vrot.slane %v6809_v11, 2  ;;  %v6875_v36 = vpack.c.bf16 %v6799_v22, %v6799_v22  ;;  %v7009_v23 = vunpack.c.l.b16 %v6866_v33  ;;  %v8332_v33 = vld [vmem:[%s8572_s0] sm:$0xff] }
 0x62d   : > { %v7010_v3 = vunpack.c.l.b16 %v6867_v16  ;;  %v6804_v61 = vadd.f32 %v6803_v6, %v6802_v19  ;;  %v7011_v39 = vunpack.c.l.b16 %v6868_v25  ;;  %v7016_v18 = vunpack.c.l.b16 %v6873_v37 }
 0x62e   : > { %v6757_v45 = vadd.f32 %v6756_v14, %v6755_v55  ;;  %v6811_v38 = vadd.f32 %v6810_v7, %v6809_v11  ;;  %v7017_v52 = vunpack.c.l.b16 %v6874_v13  ;;  %v7018_v24 = vunpack.c.l.b16 %v6875_v36  ;;  %v8333_v11 = vld [vmem:[%s8572_s0 + $0x8] sm:$0xff] }
 0x62f   : > { %v7070_v35 = vsel %vm7021_vm5, %v11827_v53, %v11806_v28  ;;  %v6805_v43 = vrot.slane %v6804_v61, 1  ;;  %v7077_v42 = vsel %vm7021_vm5, %v11964_v62, %v11941_v17 }
 0x630   : > { %v6869_v10 = vpack.c.bf16 %v6757_v45, %v6757_v45  ;;  %v7071_v58 = vsel %vm7023_vm6, %v11832_v32, %v7070_v35  ;;  %v6812_v9 = vrot.slane %v6811_v38, 1  ;;  %v7078_v29 = vsel %vm7023_vm6, %v11968_v31, %v7077_v42 }
 0x631   : > { %v7072_v27 = vsel %vm7025_vm7, %v7008_v5, %v7071_v58  ;;  %v6806_v41 = vadd.f32 %v6805_v43, %v6804_v61  ;;  %v7079_v28 = vsel %vm7025_vm7, %v7016_v18, %v7078_v29 }
 0x632   : > { %v7012_v2 = vunpack.c.l.b16 %v6869_v10  ;;  %v7073_v20 = vsel %vm7027_vm8, %v7009_v23, %v7072_v27  ;;  %v6813_v53 = vadd.f32 %v6812_v9, %v6811_v38  ;;  %v7080_v32 = vsel %vm7027_vm8, %v7017_v52, %v7079_v28 }
 0x633   : > { %v7074_v44 = vsel %vm7029_vm9, %v7010_v3, %v7073_v20  ;;  %v6876_v47 = vpack.c.bf16 %v6806_v41, %v6806_v41  ;;  %v7081_v62 = vsel %vm7029_vm9, %v7018_v24, %v7080_v32 }
 0x634   : > { %v7075_v17 = vsel %vm7031_vm10, %v7011_v39, %v7074_v44  ;;  %v6877_v0 = vpack.c.bf16 %v6813_v53, %v6813_v53 }
 0x635   : > { %v7076_v60 = vsel %vm7033_vm11, %v7012_v2, %v7075_v17  ;;  %v7019_v31 = vunpack.c.l.b16 %v6876_v47 }
 0x636   : > { %v7020_v48 = vunpack.c.l.b16 %v6877_v0 }
 0x637   : > { %v7082_v4 = vsel %vm7031_vm10, %v7019_v31, %v7081_v62 }
 0x638   : > { %v7083_v40 = vsel %vm7033_vm11, %v7020_v48, %v7082_v4 }
 0x639   : > { %v7087_v12 = vpack.c.b16 %v7083_v40, %v7076_v60 }
 0x63b   : > { %7926 = vmatmul.mubr.msk.bf16.gmra.mxu1 %vm3236_vm4, %v7087_v12 }
 0x675   : > { %v7923_v21 = vpop.f32.mrf.mxu1 }
 0x676   : > { %v7167_v46 = vadd.f32 %v7923_v21, %v7552_v54 }
 0x677   : > { %v7158_v49 = vpop.f32.mrf.mxu1 }
 0x678   : > { %v7159_v57 = vadd.f32 %v7552_v54, %v7158_v49 }
 0x679   : > { %v7924_v1 = vpop.f32.mrf.mxu1 }
 0x67a   : > { %7189 = vxpose.xlu1.b32.start [1/8] (short) (narrow) %v7159_v57, 16  ;;  %v7170_v50 = vadd.f32 %v7924_v1, %v7552_v54 }
 0x67b   : > { %v7161_v8 = vpop.f32.mrf.mxu1 }
 0x67c   : > { %v7162_v63 = vadd.f32 %v7552_v54, %v7161_v8 }
 0x67e   : > { %7190 = vxpose.xlu1.b32.cont [2/8] (short) (narrow) %v7162_v63, 16 }
 0x682   : > { %7191 = vxpose.xlu1.b32.cont [3/8] (short) (narrow) %v7167_v46, 16 }
 0x686   : > { %7192 = vxpose.xlu1.b32.cont [4/8] (short) (narrow) %v7170_v50, 16 }
 0x6fb   : > { %v7927_v26 = vpop.f32.mrf.mxu1 }
 0x6fc   : > { %v7183_v51 = vadd.f32 %v7927_v26, %v7552_v54 }
 0x6fd   : > { %v7174_v34 = vpop.f32.mrf.mxu1 }
 0x6fe   : > { %v7175_v15 = vadd.f32 %v7552_v54, %v7174_v34 }
 0x6ff   : > { %v7928_v30 = vpop.f32.mrf.mxu1 }
 0x700   : > { %7193 = vxpose.xlu1.b32.cont [5/8] (short) (narrow) %v7175_v15, 16  ;;  %v7186_v19 = vadd.f32 %v7928_v30, %v7552_v54 }
 0x701   : > { %v7177_v56 = vpop.f32.mrf.mxu1 }
 0x702   : > { %v7178_v59 = vadd.f32 %v7552_v54, %v7177_v56 }
 0x704   : > { %7194 = vxpose.xlu1.b32.cont [6/8] (short) (narrow) %v7178_v59, 16 }
 0x708   : > { %7195 = vxpose.xlu1.b32.cont [7/8] (short) (narrow) %v7183_v51, 16 }
 0x70c   : > { %7196 = vxpose.xlu1.b32.end [8/8] (short) (narrow) %v7186_v19, 16 }
 0x76c   : > { %v7205_v55 = vpop.trf.xlu1 }
 0x76d   : > { %v7221_v16 = vadd.f32 %v8332_v33, %v7205_v55 }
 0x76f   : > { %7223 = vst.msk [vmem:[%s616_s2] sm:$0xff] %vm3236_vm4, %v7221_v16 }
 0x770   : > { %v7206_v22 = vpop.trf.xlu1 }
 0x771   : > { %v7222_v25 = vadd.f32 %v8333_v11, %v7206_v22 }
 0x773   : > { %7224 = vst.msk [vmem:[%s616_s2 + $0x8] sm:$0xff] %vm3236_vm4, %v7222_v25 }
 0x774   : > { %8347 = shalt.err (!%p8344_p5)
}
 0x775   : > { %s8348_s0 = scalar_lea.hbm %s12075_s22, 256  ;;  %s8352_s2 = scalar_lea.hbm %s12564_s23, 512 }
 0x776   : > { %p8349_p6 = scmp.ne.s32.totalorder %s12075_s22, %s8348_s0  ;;  %p8353_p10 = scmp.lt.s32.totalorder %s12075_s22, %s12564_s23 }
 0x777   : > { %p8354_p11 = scmp.lt.s32.totalorder %s8352_s2, %s8348_s0 }
 0x778   : > { %p8350_p7 = pnand %p8349_p6, %p8552_p4 }
 0x779   : > { %p8355_p12 = por %p8354_p11, %p8353_p10 }
 0x77a   : > { %p8351_p9 = pneg %p8350_p7 }
 0x77c   : > { %p8356_p13 = pnand %p8355_p12, %p8351_p9 }
 0x77e   : > { %8359 = shalt.err (!%p8356_p13)
}
 0x77f   : > { %s8415_s20 = smov 128   ;;  %s8416_s30 = smov 8  }
 0x780   : > { %7936 = dma.vmem_to_hbm [thread:$0]  (%p8552_p4), %s12069_s24, 256, %s12075_s22, %s12078_s26, %s8415_s20, %s8415_s20, %s8416_s30  }
 0x781 PF: > { %s12565_s18 = sld [smem:[#allocation9_spill]] }
 0x782   : > { %s12566_s21 = sld [smem:[#allocation5_spill]] }
 0x787   : > { %p7942_p0 = scmp.ge.s32.totalorder %s12565_s18, 2 }
 0x788   : > { %s7255_s28 = sand.u32 1, %s12566_s21  }
 0x789   : > { %p7939_p1 = pnand %p7942_p0, %p8559_p8  ;;  %s7256_s0 = scalar_lea.sflag [#allocation3], %s7255_s28 }
 0x78b   : > { %p7940_p2 = pneg %p7939_p1 }
 0x78d   : > { %8385 = dma.done.wait (%p7940_p2), %s7256_s0, 256  }
 0x78e   : > { %8387 = vsyncadd (%p7940_p2), %s7256_s0, 4294967040  ;;  %s31_s19 = sadd.s32 1, %s12565_s18   ;;  %s12568_s27 = sld [smem:[#allocation6_spill]] }
 0x78f   : > { %p28_p3 = scmp.ge.s32.totalorder %s31_s19, 4   ;;  %s12569_s28 = sld [smem:[#allocation7_spill]] }
 0x790   : > { %s12570_s29 = sld [smem:[#allocation13_spill]] }
 0x791   : > { %s12571_s30 = sld [smem:[#allocation8_spill]]  ;;  %30 = sbr.rel (!%p28_p3) target bundleno = 9 (0x9), region = 130 }
 0x792   : > { %s12572_s0 = sld [smem:[#allocation10_spill]] }
 0x796   :  { %7261 = vsyncpa [#allocation3], 1 }
 0x797   :  { %7263 = vsyncpa [#allocation3 + $0x1], 1 }

</bundles_post_ra>
